<compile_context>
chip_gen: v7x
topology: tpu7x:2x2x1
jax: 0.10.0
libtpu: 0.0.40
codegen_flags: <defaults>
</compile_context>

<pallas_src>
import functools
import math

import jax
import jax.numpy as jnp
from jax import lax
from jax.experimental import pallas as pl
from jax.experimental.pallas import tpu as pltpu

HIDDEN_DIM = 32
N_HEADS = 8
HEAD_DIM = HIDDEN_DIM // N_HEADS
N_BLOCKS = 6
INP_DIM = 7            # forward() hardcodes condition[:, :7] -> inp_dim == out_dim == 7
OUT_PAD = 8            # out_dim padded 7 -> 8 lanes (zero column), sliced off outside
COND_DIM = 15
SEQ_LEN = 8
BATCH = 2
LN_EPS = 1e-5
GELU_TANH_APPROX = True   # False -> exact erf-GELU (A&S polynomial) inside the kernel
BF16_MATMULS = True       # bf16 MXU operands (f32 accumulation); elementwise stays f32


def _vmem_spec():
    return pl.BlockSpec(memory_space=pltpu.MemorySpace.VMEM)


def _erf_approx(x):
    # Abramowitz & Stegun 7.1.26 (max abs err ~1.5e-7): exact-GELU fallback path.
    a1, a2, a3, a4, a5 = 0.254829592, -0.284496736, 1.421413741, -1.453152027, 1.061405429
    p = 0.3275911
    s = jnp.where(x >= 0.0, 1.0, -1.0)
    ax = jnp.abs(x)
    t = 1.0 / (1.0 + p * ax)
    poly = ((((a5 * t + a4) * t + a3) * t + a2) * t + a1) * t
    return s * (1.0 - poly * jnp.exp(-ax * ax))


def _gelu(y):
    if GELU_TANH_APPROX:
        c = 0.7978845608028654      # sqrt(2/pi); tanh goes to the EUP slot
        return 0.5 * y * (1.0 + jnp.tanh(c * (y + 0.044715 * y * y * y)))
    return 0.5 * y * (1.0 + _erf_approx(y * (1.0 / math.sqrt(2.0))))


def _layer_norm(z, g, b):
    # var = E[z^2] - E[z]^2: the two cross-lane reductions are independent (no serial
    # XLU -> VALU -> XLU chain).  Cancellation is negligible at these magnitudes.
    mean = jnp.mean(z, axis=-1, keepdims=True)
    meansq = jnp.mean(z * z, axis=-1, keepdims=True)
    var = meansq - mean * mean
    return (z - mean) * lax.rsqrt(var + LN_EPS) * g + b


# ----------------------------- fused whole-forward kernel ---------------------------

def _fused_encoder_kernel(
    # inputs
    x_ref, t_ref, cond_ref, pos_sc_ref, sobs_ref, semb_ref, stb_ref, sx_ref,
    pool_bd_ref, poolt_bd_ref,
    wcond_ref, bcond_ref, wproj_ref, bproj_ref,
    wt1_ref, bt1_ref, wt2_ref, bt2_ref,
    wqkv_ref, bqkv_ref, wo_ref, bo_ref,
    w1_ref, b1_ref, w2_ref, b2_ref,
    g1_ref, be1_ref, g2_ref, be2_ref,
    winv_ref, binv_ref,
    # output
    out_ref,
    *, batch, s_pad,
):
    f32 = jnp.float32
    h = wproj_ref.shape[1]
    n_heads = poolt_bd_ref.shape[0] // batch
    n_blocks = wqkv_ref.shape[0]
    cdt = wqkv_ref.dtype           # MXU operand dtype (bf16 or f32); accumulation is f32

    def dot32(a, b):
        return jnp.dot(a, b, preferred_element_type=f32)

    # ---------------- embedding stage (one-time, MXU, f32) ----------------
    # obs + emb projections fused into one block-diagonal matmul (K padded 15 -> 16).
    oe = dot32(cond_ref[...], wcond_ref[...]) + bcond_ref[...]            # [B, 2h]
    obs, emb = oe[:, :h], oe[:, h:]
    xp = dot32(x_ref[...], wproj_ref[...]) + bproj_ref[...]               # [B*N, h]

    # time_embedding: Linear(1,h)+ReLU is a broadcast multiply; second layer -> MXU
    tb = jnp.maximum(t_ref[...] * wt1_ref[...] + bt1_ref[...], 0.0)       # [B, h]
    tb = jnp.maximum(dot32(tb.astype(cdt), wt2_ref[...]) + bt2_ref[...], 0.0)

    # ---------------- assemble row-padded token sequence in vregs ----------------
    # Per batch block of s_pad rows: [obs, emb, time, zero pad, x_0 .. x_{N-1}] with the
    # x tokens sublane-aligned at rows s_pad-N..s_pad-1.  Constant row-scatter matmuls
    # on the (idle) MXU place every token row; pad rows are exact zeros; positional
    # encodings arrive pre-scattered.  No scratch, no masked single-row stores.
    # Padding slots never mix with real slots in attention (mixing is per-slot).
    seq = (dot32(sobs_ref[...], obs) + dot32(semb_ref[...], emb)
           + dot32(stb_ref[...], tb) + dot32(sx_ref[...], xp)
           + pos_sc_ref[...])                                             # [rows, h]

    # ---------------- encoder blocks (fully unrolled; static weight slices) -----------
    for i in range(n_blocks):
        # One fused lane-dense QKV matmul; q/k/v are static 32-lane slices.
        qkv = dot32(seq.astype(cdt), wqkv_ref[i]) + bqkv_ref[i]           # [rows, 4h]
        q, k, v = qkv[:, :h], qkv[:, h:2 * h], qkv[:, 2 * h:3 * h]

        # nn.MultiheadAttention default batch_first=False on a [B, S, h] tensor:
        # attention mixes the *batch* axis for each sequence slot.  Source batch
        # (b + c) % B is a sublane rotation by c*s_pad rows (XLU vrot; for B=2 the
        # rotation direction is symmetric).
        lhs, vs = [q * k], [v]
        for c in range(1, batch):
            shift = (batch - c) * s_pad
            lhs.append(q * pltpu.roll(k, shift=shift, axis=0))
            vs.append(pltpu.roll(v, shift=shift, axis=0))

        # All per-source head-score reductions in ONE matmul against a block-diagonal
        # pooling matrix (softmax scale pre-folded into pool_bd).
        sc = dot32(jnp.concatenate(lhs, axis=1), pool_bd_ref[...])        # [rows, B*nh]

        s_list = [sc[:, c * n_heads:(c + 1) * n_heads] for c in range(batch)]
        m = s_list[0]
        for s_c in s_list[1:]:
            m = jnp.maximum(m, s_c)
        e_list = [jnp.exp(s_c - m) for s_c in s_list]
        denom = e_list[0]
        for e_c in e_list[1:]:
            denom = denom + e_c
        inv = pl.reciprocal(denom, approx=True)                           # EUP slot

        # All per-source prob -> lane expansions in ONE matmul (block-diag pool^T).
        probs = jnp.concatenate([e_c * inv for e_c in e_list], axis=1)    # [rows, B*nh]
        lane_p = dot32(probs, poolt_bd_ref[...])                          # [rows, B*h]
        attn = lane_p[:, :h] * vs[0]
        for c in range(1, batch):
            attn = attn + lane_p[:, c * h:(c + 1) * h] * vs[c]

        mh = dot32(attn.astype(cdt), wo_ref[i]) + bo_ref[i]               # out_proj
        z = _layer_norm(seq + mh, g1_ref[i], be1_ref[i])                  # ln1(x + mha)
        ffh = _gelu(dot32(z.astype(cdt), w1_ref[i]) + b1_ref[i])          # [rows, 4h]
        ffo = dot32(ffh.astype(cdt), w2_ref[i]) + b2_ref[i]               # linear2
        seq = _layer_norm(z + ffo, g2_ref[i], be2_ref[i])                 # ln2(x + ff)

    # ---------------- inverse projection (all rows; real rows sliced outside) ---------
    out_ref[...] = dot32(seq.astype(cdt), winv_ref[...]) + binv_ref[...]


# ----------------------------- parameters & positional encodings --------------------

def pos_encs(timesteps, dim, max_period=10000.0):
    half = dim // 2
    freqs = jnp.exp(-math.log(max_period) * jnp.arange(half, dtype=jnp.float32) / half)
    args = timesteps[:, None] * freqs[None]
    emb = jnp.concatenate([jnp.cos(args), jnp.sin(args)], axis=-1)
    if dim % 2:
        emb = jnp.concatenate([emb, jnp.zeros_like(emb[:, :1])], axis=-1)
    return emb


def init_params(key, hidden_dim, cond_dim, inp_dim, n_blocks):
    h = hidden_dim
    keys = iter(jax.random.split(key, 64))

    def lin(in_d, out_d, scale=0.08):
        kw, kb = jax.random.split(next(keys))
        w = jax.random.normal(kw, (in_d, out_d), jnp.float32) * scale   # stored [in, out]
        b = jax.random.normal(kb, (out_d,), jnp.float32) * scale
        return w, b

    params = {
        "proj_obs": lin(inp_dim, h),
        "proj_emb": lin(cond_dim - inp_dim, h),
        "proj_layer": lin(inp_dim, h),
        "time1": lin(1, h),
        "time2": lin(h, h),
        "inv_proj": lin(h, inp_dim),
        "blocks": [],
    }
    for _ in range(n_blocks):
        wqkv, bqkv = lin(h, 3 * h)
        wo, bo = lin(h, h)
        w1, b1 = lin(h, 4 * h)
        w2, b2 = lin(4 * h, h)
        params["blocks"].append({
            "wqkv": wqkv, "bqkv": bqkv, "wo": wo, "bo": bo,
            "w1": w1, "b1": b1, "w2": w2, "b2": b2,
            "ln1_g": jnp.ones((h,), jnp.float32), "ln1_b": jnp.zeros((h,), jnp.float32),
            "ln2_g": jnp.ones((h,), jnp.float32), "ln2_b": jnp.zeros((h,), jnp.float32),
        })
    return params


def pack_params(params):
    """One-time packing: stack per-block weights with a leading N_BLOCKS dim, keep the
    qkv weight fused and lane-pad it to 4h (so one matmul yields a lane-dense result),
    fuse obs/emb projections into a block-diagonal cond matmul, pad tiny contraction
    dims to MXU-friendly sizes, pad the inverse projection to 8 output lanes, build the
    constant head-pooling matrix and (optionally) cast matmul weights to bf16."""
    h = HIDDEN_DIM
    f32 = jnp.float32
    wdt = jnp.bfloat16 if BF16_MATMULS else jnp.float32
    blocks = params["blocks"]

    def stk(name):
        return jnp.stack([blk[name] for blk in blocks])

    # Fused QKV weight lane-padded [n_blocks, h, 4h]; 4th 32-lane group is zero.
    wqkv = jnp.pad(stk("wqkv"), ((0, 0), (0, 0), (0, h)))
    bqkv = jnp.pad(stk("bqkv"), ((0, 0), (0, h)))[:, None, :]

    # Constant head-pooling matrix: pool[d, j] = 1 iff lane d belongs to head j.
    pool = (jnp.arange(h)[:, None] // HEAD_DIM
            == jnp.arange(N_HEADS)[None, :]).astype(f32)

    # obs/emb projections fused into one block-diagonal matmul (K padded 15 -> 16).
    wobs, bobs = params["proj_obs"]
    wemb, bemb = params["proj_emb"]
    wcond = jnp.zeros((COND_DIM + 1, 2 * h), f32)
    wcond = wcond.at[:INP_DIM, :h].set(wobs)
    wcond = wcond.at[INP_DIM:COND_DIM, h:].set(wemb)
    bcond = jnp.concatenate([bobs, bemb]).reshape(1, 2 * h)

    packed = {
        "wcond": wcond, "bcond": bcond,
        "wproj": jnp.pad(params["proj_layer"][0], ((0, 1), (0, 0))),    # K 7 -> 8
        "bproj": params["proj_layer"][1].reshape(1, h),
        "wt1": params["time1"][0].reshape(1, h), "bt1": params["time1"][1].reshape(1, h),
        "wt2": params["time2"][0].astype(wdt), "bt2": params["time2"][1].reshape(1, h),
        "wqkv": wqkv.astype(wdt), "bqkv": bqkv,
        "wo": stk("wo").astype(wdt), "bo": stk("bo")[:, None, :],
        "w1": stk("w1").astype(wdt), "b1": stk("b1")[:, None, :],
        "w2": stk("w2").astype(wdt), "b2": stk("b2")[:, None, :],
        "g1": stk("ln1_g")[:, None, :], "be1": stk("ln1_b")[:, None, :],
        "g2": stk("ln2_g")[:, None, :], "be2": stk("ln2_b")[:, None, :],
        "winv": jnp.pad(params["inv_proj"][0],
                        ((0, 0), (0, OUT_PAD - INP_DIM))).astype(wdt),
        "binv": jnp.pad(params["inv_proj"][1], (0, OUT_PAD - INP_DIM)).reshape(1, OUT_PAD),
        "pool": pool,
    }
    return packed


# ----------------------------- full forward pass (single pallas_call) ---------------

def transformer_encoder_forward(packed, x, t, condition):
    B, N, inp_dim = x.shape
    h = HIDDEN_DIM
    f32 = jnp.float32
    s_pad = ((N + 3 + 7) // 8) * 8            # pad per-batch token count to 8 sublanes
    rows = B * s_pad
    out_pad = packed["winv"].shape[1]

    pos = pos_encs(jnp.arange(1, N + 1, dtype=f32), h)                  # [N, h]

    # Constant row-scatter matrices: token layout per s_pad-row batch block is
    # rows 0..2 = obs/emb/time, rows 3..s_pad-N-1 = zero pad, rows s_pad-N.. = x tokens.
    row = jnp.arange(rows)
    blk = row // s_pad
    slot = row % s_pad

    def scatter(n_cols, hit, col_idx):
        onehot = jnp.arange(n_cols)[None, :] == col_idx[:, None]
        return (hit[:, None] & onehot).astype(f32)

    sobs = scatter(B, slot == 0, blk)                                   # [rows, B]
    semb = scatter(B, slot == 1, blk)
    stb = scatter(B, slot == 2, blk)
    sx = scatter(B * N, slot >= s_pad - N, blk * N + (slot - (s_pad - N)))   # [rows, B*N]
    pos_sc = sx @ jnp.tile(pos, (B, 1))                                 # pos at x rows

    # Block-diagonal per-source pooling constants; softmax scale folded into pool_bd.
    pool = packed["pool"]
    eye_b = jnp.eye(B, dtype=f32)
    pool_bd = jnp.kron(eye_b, pool) * (1.0 / math.sqrt(HEAD_DIM))       # [B*h, B*nh]
    poolt_bd = jnp.kron(eye_b, pool.T)                                  # [B*nh, B*h]

    x_pad = jnp.pad(x.reshape(B * N, inp_dim).astype(f32), ((0, 0), (0, 1)))   # K 7 -> 8
    cond_pad = jnp.pad(condition.astype(f32), ((0, 0), (0, 1)))                # 15 -> 16

    args = (
        x_pad, t.astype(f32), cond_pad, pos_sc, sobs, semb, stb, sx,
        pool_bd, poolt_bd,
        packed["wcond"], packed["bcond"], packed["wproj"], packed["bproj"],
        packed["wt1"], packed["bt1"], packed["wt2"], packed["bt2"],
        packed["wqkv"], packed["bqkv"], packed["wo"], packed["bo"],
        packed["w1"], packed["b1"], packed["w2"], packed["b2"],
        packed["g1"], packed["be1"], packed["g2"], packed["be2"],
        packed["winv"], packed["binv"],
    )

    kernel = functools.partial(_fused_encoder_kernel, batch=B, s_pad=s_pad)

    # Advisory cost hint so XLA schedules the single fused call sensibly.
    flops_block = (2 * rows * h * 4 * h                      # fused qkv
                   + 2 * rows * (B * h) * (B * N_HEADS)      # fused scores
                   + 2 * rows * (B * N_HEADS) * (B * h)      # fused prob->lane expand
                   + 2 * rows * h * h                        # out proj
                   + 2 * rows * h * 4 * h                    # ff linear1
                   + 2 * rows * 4 * h * h)                   # ff linear2
    flops = (N_BLOCKS * flops_block + 2 * rows * h * out_pad
             + 2 * rows * (3 * B + B * N) * h + 2 * B * N * 8 * h
             + 2 * B * (COND_DIM + 1) * 2 * h + 2 * B * h * h)
    transcendentals = N_BLOCKS * (rows * B * N_HEADS + rows * 4 * h
                                  + rows * N_HEADS + 2 * rows)
    bytes_accessed = (sum(int(a.size) * a.dtype.itemsize for a in args)
                      + rows * out_pad * 4)

    full = pl.pallas_call(
        kernel,
        out_shape=jax.ShapeDtypeStruct((rows, out_pad), jnp.float32),
        in_specs=[_vmem_spec() for _ in args],
        out_specs=_vmem_spec(),
        cost_estimate=pl.CostEstimate(
            flops=int(flops),
            transcendentals=int(transcendentals),
            bytes_accessed=int(bytes_accessed)),
    )(*args)

    # x tokens are the last N (sublane-aligned) rows of every s_pad-row batch block;
    # drop conditioning tokens, row padding and the padded output lane.
    return full.reshape(B, s_pad, out_pad)[:, s_pad - N:, :inp_dim]


# ----------------------------- pure-JAX reference (for verification) ----------------

def reference_forward(params, x, t, condition, gelu_mode="tanh", bf16_dots=False):
    h = HIDDEN_DIM
    B, N, _ = x.shape
    HP = jax.lax.Precision.HIGHEST

    def act_gelu(y):
        if gelu_mode == "tanh":
            c = 0.7978845608028654
            return 0.5 * y * (1.0 + jnp.tanh(c * (y + 0.044715 * y * y * y)))
        return 0.5 * y * (1.0 + lax.erf(y / math.sqrt(2.0)))

    def lin(z, wb, act=None, cast=False):
        w, b = wb
        if cast and bf16_dots:
            y = jnp.dot(z.astype(jnp.bfloat16), w.astype(jnp.bfloat16),
                        preferred_element_type=jnp.float32) + b
        else:
            y = jnp.dot(z, w, precision=HP) + b
        if act == "relu":
            y = jnp.maximum(y, 0.0)
        elif act == "gelu":
            y = act_gelu(y)
        return y

    obs = lin(condition[:, :INP_DIM], params["proj_obs"])[:, None, :]
    emb = lin(condition[:, INP_DIM:], params["proj_emb"])[:, None, :]
    xp = lin(x, params["proj_layer"]) + pos_encs(
        jnp.arange(1, N + 1, dtype=jnp.float32), h)[None]
    tb = lin(lin(t, params["time1"], "relu"),
             params["time2"], "relu", cast=True)[:, None, :]
    seq = jnp.concatenate([obs, emb, tb, xp], axis=1)

    for blk in params["blocks"]:
        Bq, S, _ = seq.shape
        qkv = lin(seq, (blk["wqkv"], blk["bqkv"]), cast=True)
        q, k, v = jnp.split(qkv, 3, axis=-1)
        hd = h // N_HEADS

        def heads(a):
            return a.reshape(Bq, S, N_HEADS, hd).transpose(2, 0, 1, 3)

        qh, kh, vh = heads(q), heads(k), heads(v)
        scores = jnp.einsum("nbsd,ncsd->nsbc", qh, kh, precision=HP) / math.sqrt(hd)
        p = jax.nn.softmax(scores, axis=-1)
        attn = jnp.einsum("nsbc,ncsd->bsnd", p, vh, precision=HP).reshape(Bq, S, h)
        mh = lin(attn, (blk["wo"], blk["bo"]), cast=True)
        z = seq + mh
        z = (z - z.mean(-1, keepdims=True)) / jnp.sqrt(z.var(-1, keepdims=True) + LN_EPS)
        z = z * blk["ln1_g"] + blk["ln1_b"]
        ff = lin(lin(z, (blk["w1"], blk["b1"]), "gelu", cast=True),
                 (blk["w2"], blk["b2"]), cast=True)
        z2 = z + ff
        z2 = (z2 - z2.mean(-1, keepdims=True)) / jnp.sqrt(z2.var(-1, keepdims=True) + LN_EPS)
        seq = z2 * blk["ln2_g"] + blk["ln2_b"]

    chop = seq[:, 3:, :]
    return lin(chop, params["inv_proj"], cast=True)


if __name__ == "__main__":
    key = jax.random.PRNGKey(0)
    kp, kx, kt, kc = jax.random.split(key, 4)
    params = init_params(kp, HIDDEN_DIM, COND_DIM, INP_DIM, N_BLOCKS)
    packed = pack_params(params)

    x = jax.random.normal(kx, (BATCH, SEQ_LEN, INP_DIM), jnp.float32)
    t = jax.random.uniform(kt, (BATCH, 1), jnp.float32)
    condition = jax.random.normal(kc, (BATCH, COND_DIM), jnp.float32)

    fwd = jax.jit(transformer_encoder_forward)
    out = jax.block_until_ready(fwd(packed, x, t, condition))
    assert out.shape == (BATCH, SEQ_LEN, INP_DIM)

    # (1) Check vs a reference with MATCHED numerics (same GELU variant, same bf16-at-dot
    #     policy): isolates kernel correctness from the intentional quantization /
    #     activation-approximation choices.  Margin covers MXU pass-count differences,
    #     bf16 rounding-boundary flips and the approximate softmax reciprocal.
    ref_matched = reference_forward(
        params, x, t, condition,
        gelu_mode="tanh" if GELU_TANH_APPROX else "erf", bf16_dots=BF16_MATMULS)
    err_matched = float(jnp.max(jnp.abs(out - ref_matched)))
    assert err_matched < 1e-2, f"kernel vs matched reference mismatch: {err_matched}"

    # (2) Semantic check vs exact f32 erf-GELU (PyTorch nn.GELU default); tolerance is
    #     self-calibrated by the pure-XLA drift of the matched (bf16/tanh) configuration.
    ref_exact = reference_forward(params, x, t, condition, gelu_mode="erf",
                                  bf16_dots=False)
    drift = float(jnp.max(jnp.abs(ref_matched - ref_exact)))
    err_exact = float(jnp.max(jnp.abs(out - ref_exact)))
    assert err_exact < drift + 1e-2, (
        f"kernel vs exact reference mismatch: {err_exact} (config drift {drift})")

    print("KERNEL_OK")
</pallas_src>

<mosaic_0001>
module attributes {stable_mosaic.version = 11 : i64} {
  func.func @_fused_encoder_kernel(%arg0: memref<16x8xf32, #tpu.memory_space<vmem>>, %arg1: memref<2x1xf32, #tpu.memory_space<vmem>>, %arg2: memref<2x16xf32, #tpu.memory_space<vmem>>, %arg3: memref<32x32xf32, #tpu.memory_space<vmem>>, %arg4: memref<32x2xf32, #tpu.memory_space<vmem>>, %arg5: memref<32x2xf32, #tpu.memory_space<vmem>>, %arg6: memref<32x2xf32, #tpu.memory_space<vmem>>, %arg7: memref<32x16xf32, #tpu.memory_space<vmem>>, %arg8: memref<64x16xf32, #tpu.memory_space<vmem>>, %arg9: memref<16x64xf32, #tpu.memory_space<vmem>>, %arg10: memref<16x64xf32, #tpu.memory_space<vmem>>, %arg11: memref<1x64xf32, #tpu.memory_space<vmem>>, %arg12: memref<8x32xf32, #tpu.memory_space<vmem>>, %arg13: memref<1x32xf32, #tpu.memory_space<vmem>>, %arg14: memref<1x32xf32, #tpu.memory_space<vmem>>, %arg15: memref<1x32xf32, #tpu.memory_space<vmem>>, %arg16: memref<32x32xbf16, #tpu.memory_space<vmem>>, %arg17: memref<1x32xf32, #tpu.memory_space<vmem>>, %arg18: memref<6x32x128xbf16, #tpu.memory_space<vmem>>, %arg19: memref<6x1x128xf32, #tpu.memory_space<vmem>>, %arg20: memref<6x32x32xbf16, #tpu.memory_space<vmem>>, %arg21: memref<6x1x32xf32, #tpu.memory_space<vmem>>, %arg22: memref<6x32x128xbf16, #tpu.memory_space<vmem>>, %arg23: memref<6x1x128xf32, #tpu.memory_space<vmem>>, %arg24: memref<6x128x32xbf16, #tpu.memory_space<vmem>>, %arg25: memref<6x1x32xf32, #tpu.memory_space<vmem>>, %arg26: memref<6x1x32xf32, #tpu.memory_space<vmem>>, %arg27: memref<6x1x32xf32, #tpu.memory_space<vmem>>, %arg28: memref<6x1x32xf32, #tpu.memory_space<vmem>>, %arg29: memref<6x1x32xf32, #tpu.memory_space<vmem>>, %arg30: memref<32x8xbf16, #tpu.memory_space<vmem>>, %arg31: memref<1x8xf32, #tpu.memory_space<vmem>>, %arg32: memref<32x8xf32, #tpu.memory_space<vmem>>) attributes {dimension_semantics = [], scalar_prefetch = 0 : i64, scratch_operands = 0 : i64, tpu.core_type = #tpu.core_type<tc>} {
    %c0 = arith.constant 0 : index
    %c0_0 = arith.constant 0 : index
    %0 = vector.load %arg2[%c0, %c0_0] : memref<2x16xf32, #tpu.memory_space<vmem>>, vector<2x16xf32>
    %c0_1 = arith.constant 0 : index
    %c0_2 = arith.constant 0 : index
    %1 = vector.load %arg10[%c0_1, %c0_2] : memref<16x64xf32, #tpu.memory_space<vmem>>, vector<16x64xf32>
    %cst = arith.constant dense<0.000000e+00> : vector<2x64xf32>
    %2 = tpu.matmul %0, %1, %cst {dimension_numbers = #tpu.dot_dimension_numbers<[1], [0], [0], [1], [0, 0, 1, 1], [], []>} : vector<2x16xf32>, vector<16x64xf32>, vector<2x64xf32> -> vector<2x64xf32>
    %c0_3 = arith.constant 0 : index
    %c0_4 = arith.constant 0 : index
    %3 = vector.load %arg11[%c0_3, %c0_4] : memref<1x64xf32, #tpu.memory_space<vmem>>, vector<1x64xf32>
    %4 = vector.broadcast %3 : vector<1x64xf32> to vector<2x64xf32>
    %5 = arith.addf %2, %4 : vector<2x64xf32>
    %6 = vector.extract_strided_slice %5 {offsets = [0, 0], sizes = [2, 32], strides = [1, 1]} : vector<2x64xf32> to vector<2x32xf32>
    %7 = vector.extract_strided_slice %5 {offsets = [0, 32], sizes = [2, 32], strides = [1, 1]} : vector<2x64xf32> to vector<2x32xf32>
    %c0_5 = arith.constant 0 : index
    %c0_6 = arith.constant 0 : index
    %8 = vector.load %arg0[%c0_5, %c0_6] : memref<16x8xf32, #tpu.memory_space<vmem>>, vector<16x8xf32>
    %c0_7 = arith.constant 0 : index
    %c0_8 = arith.constant 0 : index
    %9 = vector.load %arg12[%c0_7, %c0_8] : memref<8x32xf32, #tpu.memory_space<vmem>>, vector<8x32xf32>
    %cst_9 = arith.constant dense<0.000000e+00> : vector<16x32xf32>
    %10 = tpu.matmul %8, %9, %cst_9 {dimension_numbers = #tpu.dot_dimension_numbers<[1], [0], [0], [1], [0, 0, 1, 1], [], []>} : vector<16x8xf32>, vector<8x32xf32>, vector<16x32xf32> -> vector<16x32xf32>
    %c0_10 = arith.constant 0 : index
    %c0_11 = arith.constant 0 : index
    %11 = vector.load %arg13[%c0_10, %c0_11] : memref<1x32xf32, #tpu.memory_space<vmem>>, vector<1x32xf32>
    %12 = vector.broadcast %11 : vector<1x32xf32> to vector<16x32xf32>
    %13 = arith.addf %10, %12 : vector<16x32xf32>
    %c0_12 = arith.constant 0 : index
    %c0_13 = arith.constant 0 : index
    %14 = vector.load %arg1[%c0_12, %c0_13] : memref<2x1xf32, #tpu.memory_space<vmem>>, vector<2x1xf32>
    %c0_14 = arith.constant 0 : index
    %c0_15 = arith.constant 0 : index
    %15 = vector.load %arg14[%c0_14, %c0_15] : memref<1x32xf32, #tpu.memory_space<vmem>>, vector<1x32xf32>
    %16 = vector.broadcast %14 : vector<2x1xf32> to vector<2x32xf32>
    %17 = vector.broadcast %15 : vector<1x32xf32> to vector<2x32xf32>
    %18 = arith.mulf %16, %17 : vector<2x32xf32>
    %c0_16 = arith.constant 0 : index
    %c0_17 = arith.constant 0 : index
    %19 = vector.load %arg15[%c0_16, %c0_17] : memref<1x32xf32, #tpu.memory_space<vmem>>, vector<1x32xf32>
    %20 = vector.broadcast %19 : vector<1x32xf32> to vector<2x32xf32>
    %21 = arith.addf %18, %20 : vector<2x32xf32>
    %cst_18 = arith.constant 0.000000e+00 : f32
    %22 = vector.broadcast %cst_18 : f32 to vector<2x32xf32>
    %23 = arith.maximumf %21, %22 : vector<2x32xf32>
    %24 = arith.truncf %23 : vector<2x32xf32> to vector<2x32xbf16>
    %c0_19 = arith.constant 0 : index
    %c0_20 = arith.constant 0 : index
    %25 = vector.load %arg16[%c0_19, %c0_20] : memref<32x32xbf16, #tpu.memory_space<vmem>>, vector<32x32xbf16>
    %cst_21 = arith.constant dense<0.000000e+00> : vector<2x32xf32>
    %26 = tpu.matmul %24, %25, %cst_21 {dimension_numbers = #tpu.dot_dimension_numbers<[1], [0], [0], [1], [0, 0, 1, 1], [], []>} : vector<2x32xbf16>, vector<32x32xbf16>, vector<2x32xf32> -> vector<2x32xf32>
    %c0_22 = arith.constant 0 : index
    %c0_23 = arith.constant 0 : index
    %27 = vector.load %arg17[%c0_22, %c0_23] : memref<1x32xf32, #tpu.memory_space<vmem>>, vector<1x32xf32>
    %28 = vector.broadcast %27 : vector<1x32xf32> to vector<2x32xf32>
    %29 = arith.addf %26, %28 : vector<2x32xf32>
    %cst_24 = arith.constant 0.000000e+00 : f32
    %30 = vector.broadcast %cst_24 : f32 to vector<2x32xf32>
    %31 = arith.maximumf %29, %30 : vector<2x32xf32>
    %c0_25 = arith.constant 0 : index
    %c0_26 = arith.constant 0 : index
    %32 = vector.load %arg4[%c0_25, %c0_26] : memref<32x2xf32, #tpu.memory_space<vmem>>, vector<32x2xf32>
    %cst_27 = arith.constant dense<0.000000e+00> : vector<32x32xf32>
    %33 = tpu.matmul %32, %6, %cst_27 {dimension_numbers = #tpu.dot_dimension_numbers<[1], [0], [0], [1], [0, 0, 1, 1], [], []>} : vector<32x2xf32>, vector<2x32xf32>, vector<32x32xf32> -> vector<32x32xf32>
    %c0_28 = arith.constant 0 : index
    %c0_29 = arith.constant 0 : index
    %34 = vector.load %arg5[%c0_28, %c0_29] : memref<32x2xf32, #tpu.memory_space<vmem>>, vector<32x2xf32>
    %cst_30 = arith.constant dense<0.000000e+00> : vector<32x32xf32>
    %35 = tpu.matmul %34, %7, %cst_30 {dimension_numbers = #tpu.dot_dimension_numbers<[1], [0], [0], [1], [0, 0, 1, 1], [], []>} : vector<32x2xf32>, vector<2x32xf32>, vector<32x32xf32> -> vector<32x32xf32>
    %36 = arith.addf %33, %35 : vector<32x32xf32>
    %c0_31 = arith.constant 0 : index
    %c0_32 = arith.constant 0 : index
    %37 = vector.load %arg6[%c0_31, %c0_32] : memref<32x2xf32, #tpu.memory_space<vmem>>, vector<32x2xf32>
    %cst_33 = arith.constant dense<0.000000e+00> : vector<32x32xf32>
    %38 = tpu.matmul %37, %31, %cst_33 {dimension_numbers = #tpu.dot_dimension_numbers<[1], [0], [0], [1], [0, 0, 1, 1], [], []>} : vector<32x2xf32>, vector<2x32xf32>, vector<32x32xf32> -> vector<32x32xf32>
    %39 = arith.addf %36, %38 : vector<32x32xf32>
    %c0_34 = arith.constant 0 : index
    %c0_35 = arith.constant 0 : index
    %40 = vector.load %arg7[%c0_34, %c0_35] : memref<32x16xf32, #tpu.memory_space<vmem>>, vector<32x16xf32>
    %cst_36 = arith.constant dense<0.000000e+00> : vector<32x32xf32>
    %41 = tpu.matmul %40, %13, %cst_36 {dimension_numbers = #tpu.dot_dimension_numbers<[1], [0], [0], [1], [0, 0, 1, 1], [], []>} : vector<32x16xf32>, vector<16x32xf32>, vector<32x32xf32> -> vector<32x32xf32>
    %42 = arith.addf %39, %41 : vector<32x32xf32>
    %c0_37 = arith.constant 0 : index
    %c0_38 = arith.constant 0 : index
    %43 = vector.load %arg3[%c0_37, %c0_38] : memref<32x32xf32, #tpu.memory_space<vmem>>, vector<32x32xf32>
    %44 = arith.addf %42, %43 : vector<32x32xf32>
    %45 = arith.truncf %44 : vector<32x32xf32> to vector<32x32xbf16>
    %c0_39 = arith.constant 0 : index
    %c0_40 = arith.constant 0 : index
    %c0_41 = arith.constant 0 : index
    %46 = vector.load %arg18[%c0_39, %c0_40, %c0_41] : memref<6x32x128xbf16, #tpu.memory_space<vmem>>, vector<1x32x128xbf16>
    %47 = vector.shape_cast %46 : vector<1x32x128xbf16> to vector<32x128xbf16>
    %cst_42 = arith.constant dense<0.000000e+00> : vector<32x128xf32>
    %48 = tpu.matmul %45, %47, %cst_42 {dimension_numbers = #tpu.dot_dimension_numbers<[1], [0], [0], [1], [0, 0, 1, 1], [], []>} : vector<32x32xbf16>, vector<32x128xbf16>, vector<32x128xf32> -> vector<32x128xf32>
    %c0_43 = arith.constant 0 : index
    %c0_44 = arith.constant 0 : index
    %c0_45 = arith.constant 0 : index
    %49 = vector.load %arg19[%c0_43, %c0_44, %c0_45] : memref<6x1x128xf32, #tpu.memory_space<vmem>>, vector<1x1x128xf32>
    %50 = vector.shape_cast %49 : vector<1x1x128xf32> to vector<1x128xf32>
    %51 = vector.broadcast %50 : vector<1x128xf32> to vector<32x128xf32>
    %52 = arith.addf %48, %51 : vector<32x128xf32>
    %53 = vector.extract_strided_slice %52 {offsets = [0, 0], sizes = [32, 32], strides = [1, 1]} : vector<32x128xf32> to vector<32x32xf32>
    %54 = vector.extract_strided_slice %52 {offsets = [0, 32], sizes = [32, 32], strides = [1, 1]} : vector<32x128xf32> to vector<32x32xf32>
    %55 = vector.extract_strided_slice %52 {offsets = [0, 64], sizes = [32, 32], strides = [1, 1]} : vector<32x128xf32> to vector<32x32xf32>
    %56 = arith.mulf %53, %54 : vector<32x32xf32>
    %c16_i32 = arith.constant 16 : i32
    %57 = tpu.dynamic_rotate %54 by %c16_i32 dim 0 : vector<32x32xf32>, i32 -> vector<32x32xf32>
    %58 = arith.mulf %53, %57 : vector<32x32xf32>
    %c16_i32_46 = arith.constant 16 : i32
    %59 = tpu.dynamic_rotate %55 by %c16_i32_46 dim 0 : vector<32x32xf32>, i32 -> vector<32x32xf32>
    %60 = tpu.concatenate %56, %58 in 1 : vector<32x32xf32>, vector<32x32xf32> -> vector<32x64xf32>
    %c0_47 = arith.constant 0 : index
    %c0_48 = arith.constant 0 : index
    %61 = vector.load %arg8[%c0_47, %c0_48] : memref<64x16xf32, #tpu.memory_space<vmem>>, vector<64x16xf32>
    %cst_49 = arith.constant dense<0.000000e+00> : vector<32x16xf32>
    %62 = tpu.matmul %60, %61, %cst_49 {dimension_numbers = #tpu.dot_dimension_numbers<[1], [0], [0], [1], [0, 0, 1, 1], [], []>} : vector<32x64xf32>, vector<64x16xf32>, vector<32x16xf32> -> vector<32x16xf32>
    %63 = vector.extract_strided_slice %62 {offsets = [0, 0], sizes = [32, 8], strides = [1, 1]} : vector<32x16xf32> to vector<32x8xf32>
    %64 = vector.extract_strided_slice %62 {offsets = [0, 8], sizes = [32, 8], strides = [1, 1]} : vector<32x16xf32> to vector<32x8xf32>
    %65 = arith.maximumf %63, %64 : vector<32x8xf32>
    %66 = arith.subf %63, %65 : vector<32x8xf32>
    %67 = math.exp %66 : vector<32x8xf32>
    %68 = arith.subf %64, %65 : vector<32x8xf32>
    %69 = math.exp %68 : vector<32x8xf32>
    %70 = arith.addf %67, %69 : vector<32x8xf32>
    %71 = tpu.reciprocal %70 {approx = true} : vector<32x8xf32> -> vector<32x8xf32>
    %72 = arith.mulf %67, %71 : vector<32x8xf32>
    %73 = arith.mulf %69, %71 : vector<32x8xf32>
    %74 = tpu.concatenate %72, %73 in 1 : vector<32x8xf32>, vector<32x8xf32> -> vector<32x16xf32>
    %c0_50 = arith.constant 0 : index
    %c0_51 = arith.constant 0 : index
    %75 = vector.load %arg9[%c0_50, %c0_51] : memref<16x64xf32, #tpu.memory_space<vmem>>, vector<16x64xf32>
    %cst_52 = arith.constant dense<0.000000e+00> : vector<32x64xf32>
    %76 = tpu.matmul %74, %75, %cst_52 {dimension_numbers = #tpu.dot_dimension_numbers<[1], [0], [0], [1], [0, 0, 1, 1], [], []>} : vector<32x16xf32>, vector<16x64xf32>, vector<32x64xf32> -> vector<32x64xf32>
    %77 = vector.extract_strided_slice %76 {offsets = [0, 0], sizes = [32, 32], strides = [1, 1]} : vector<32x64xf32> to vector<32x32xf32>
    %78 = arith.mulf %77, %55 : vector<32x32xf32>
    %79 = vector.extract_strided_slice %76 {offsets = [0, 32], sizes = [32, 32], strides = [1, 1]} : vector<32x64xf32> to vector<32x32xf32>
    %80 = arith.mulf %79, %59 : vector<32x32xf32>
    %81 = arith.addf %78, %80 : vector<32x32xf32>
    %82 = arith.truncf %81 : vector<32x32xf32> to vector<32x32xbf16>
    %c0_53 = arith.constant 0 : index
    %c0_54 = arith.constant 0 : index
    %c0_55 = arith.constant 0 : index
    %83 = vector.load %arg20[%c0_53, %c0_54, %c0_55] : memref<6x32x32xbf16, #tpu.memory_space<vmem>>, vector<1x32x32xbf16>
    %84 = vector.shape_cast %83 : vector<1x32x32xbf16> to vector<32x32xbf16>
    %cst_56 = arith.constant dense<0.000000e+00> : vector<32x32xf32>
    %85 = tpu.matmul %82, %84, %cst_56 {dimension_numbers = #tpu.dot_dimension_numbers<[1], [0], [0], [1], [0, 0, 1, 1], [], []>} : vector<32x32xbf16>, vector<32x32xbf16>, vector<32x32xf32> -> vector<32x32xf32>
    %c0_57 = arith.constant 0 : index
    %c0_58 = arith.constant 0 : index
    %c0_59 = arith.constant 0 : index
    %86 = vector.load %arg21[%c0_57, %c0_58, %c0_59] : memref<6x1x32xf32, #tpu.memory_space<vmem>>, vector<1x1x32xf32>
    %87 = vector.shape_cast %86 : vector<1x1x32xf32> to vector<1x32xf32>
    %88 = vector.broadcast %87 : vector<1x32xf32> to vector<32x32xf32>
    %89 = arith.addf %85, %88 : vector<32x32xf32>
    %90 = arith.addf %44, %89 : vector<32x32xf32>
    %c0_60 = arith.constant 0 : index
    %c0_61 = arith.constant 0 : index
    %c0_62 = arith.constant 0 : index
    %91 = vector.load %arg26[%c0_60, %c0_61, %c0_62] : memref<6x1x32xf32, #tpu.memory_space<vmem>>, vector<1x1x32xf32>
    %92 = vector.shape_cast %91 : vector<1x1x32xf32> to vector<1x32xf32>
    %c0_63 = arith.constant 0 : index
    %c0_64 = arith.constant 0 : index
    %c0_65 = arith.constant 0 : index
    %93 = vector.load %arg27[%c0_63, %c0_64, %c0_65] : memref<6x1x32xf32, #tpu.memory_space<vmem>>, vector<1x1x32xf32>
    %94 = vector.shape_cast %93 : vector<1x1x32xf32> to vector<1x32xf32>
    %cst_66 = arith.constant dense<0.000000e+00> : vector<32xf32>
    %95 = vector.multi_reduction <add>, %90, %cst_66 [1] : vector<32x32xf32> to vector<32xf32>
    %96 = vector.shape_cast %95 : vector<32xf32> to vector<32x1xf32>
    %cst_67 = arith.constant 3.200000e+01 : f32
    %97 = vector.broadcast %cst_67 : f32 to vector<32x1xf32>
    %98 = arith.divf %96, %97 : vector<32x1xf32>
    %99 = arith.mulf %90, %90 : vector<32x32xf32>
    %cst_68 = arith.constant dense<0.000000e+00> : vector<32xf32>
    %100 = vector.multi_reduction <add>, %99, %cst_68 [1] : vector<32x32xf32> to vector<32xf32>
    %101 = vector.shape_cast %100 : vector<32xf32> to vector<32x1xf32>
    %cst_69 = arith.constant 3.200000e+01 : f32
    %102 = vector.broadcast %cst_69 : f32 to vector<32x1xf32>
    %103 = arith.divf %101, %102 : vector<32x1xf32>
    %104 = arith.mulf %98, %98 : vector<32x1xf32>
    %105 = arith.subf %103, %104 : vector<32x1xf32>
    %106 = vector.broadcast %98 : vector<32x1xf32> to vector<32x32xf32>
    %107 = arith.subf %90, %106 : vector<32x32xf32>
    %cst_70 = arith.constant 9.99999974E-6 : f32
    %108 = vector.broadcast %cst_70 : f32 to vector<32x1xf32>
    %109 = arith.addf %105, %108 : vector<32x1xf32>
    %110 = math.rsqrt %109 : vector<32x1xf32>
    %111 = vector.broadcast %110 : vector<32x1xf32> to vector<32x32xf32>
    %112 = arith.mulf %107, %111 : vector<32x32xf32>
    %113 = vector.broadcast %92 : vector<1x32xf32> to vector<32x32xf32>
    %114 = arith.mulf %112, %113 : vector<32x32xf32>
    %115 = vector.broadcast %94 : vector<1x32xf32> to vector<32x32xf32>
    %116 = arith.addf %114, %115 : vector<32x32xf32>
    %117 = arith.truncf %116 : vector<32x32xf32> to vector<32x32xbf16>
    %c0_71 = arith.constant 0 : index
    %c0_72 = arith.constant 0 : index
    %c0_73 = arith.constant 0 : index
    %118 = vector.load %arg22[%c0_71, %c0_72, %c0_73] : memref<6x32x128xbf16, #tpu.memory_space<vmem>>, vector<1x32x128xbf16>
    %119 = vector.shape_cast %118 : vector<1x32x128xbf16> to vector<32x128xbf16>
    %cst_74 = arith.constant dense<0.000000e+00> : vector<32x128xf32>
    %120 = tpu.matmul %117, %119, %cst_74 {dimension_numbers = #tpu.dot_dimension_numbers<[1], [0], [0], [1], [0, 0, 1, 1], [], []>} : vector<32x32xbf16>, vector<32x128xbf16>, vector<32x128xf32> -> vector<32x128xf32>
    %c0_75 = arith.constant 0 : index
    %c0_76 = arith.constant 0 : index
    %c0_77 = arith.constant 0 : index
    %121 = vector.load %arg23[%c0_75, %c0_76, %c0_77] : memref<6x1x128xf32, #tpu.memory_space<vmem>>, vector<1x1x128xf32>
    %122 = vector.shape_cast %121 : vector<1x1x128xf32> to vector<1x128xf32>
    %123 = vector.broadcast %122 : vector<1x128xf32> to vector<32x128xf32>
    %124 = arith.addf %120, %123 : vector<32x128xf32>
    %cst_78 = arith.constant 5.000000e-01 : f32
    %125 = vector.broadcast %cst_78 : f32 to vector<32x128xf32>
    %126 = arith.mulf %125, %124 : vector<32x128xf32>
    %cst_79 = arith.constant 4.471500e-02 : f32
    %127 = vector.broadcast %cst_79 : f32 to vector<32x128xf32>
    %128 = arith.mulf %127, %124 : vector<32x128xf32>
    %129 = arith.mulf %128, %124 : vector<32x128xf32>
    %130 = arith.mulf %129, %124 : vector<32x128xf32>
    %131 = arith.addf %124, %130 : vector<32x128xf32>
    %cst_80 = arith.constant 0.797884583 : f32
    %132 = vector.broadcast %cst_80 : f32 to vector<32x128xf32>
    %133 = arith.mulf %132, %131 : vector<32x128xf32>
    %134 = math.tanh %133 : vector<32x128xf32>
    %cst_81 = arith.constant 1.000000e+00 : f32
    %135 = vector.broadcast %cst_81 : f32 to vector<32x128xf32>
    %136 = arith.addf %135, %134 : vector<32x128xf32>
    %137 = arith.mulf %126, %136 : vector<32x128xf32>
    %138 = arith.truncf %137 : vector<32x128xf32> to vector<32x128xbf16>
    %c0_82 = arith.constant 0 : index
    %c0_83 = arith.constant 0 : index
    %c0_84 = arith.constant 0 : index
    %139 = vector.load %arg24[%c0_82, %c0_83, %c0_84] : memref<6x128x32xbf16, #tpu.memory_space<vmem>>, vector<1x128x32xbf16>
    %140 = vector.shape_cast %139 : vector<1x128x32xbf16> to vector<128x32xbf16>
    %cst_85 = arith.constant dense<0.000000e+00> : vector<32x32xf32>
    %141 = tpu.matmul %138, %140, %cst_85 {dimension_numbers = #tpu.dot_dimension_numbers<[1], [0], [0], [1], [0, 0, 1, 1], [], []>} : vector<32x128xbf16>, vector<128x32xbf16>, vector<32x32xf32> -> vector<32x32xf32>
    %c0_86 = arith.constant 0 : index
    %c0_87 = arith.constant 0 : index
    %c0_88 = arith.constant 0 : index
    %142 = vector.load %arg25[%c0_86, %c0_87, %c0_88] : memref<6x1x32xf32, #tpu.memory_space<vmem>>, vector<1x1x32xf32>
    %143 = vector.shape_cast %142 : vector<1x1x32xf32> to vector<1x32xf32>
    %144 = vector.broadcast %143 : vector<1x32xf32> to vector<32x32xf32>
    %145 = arith.addf %141, %144 : vector<32x32xf32>
    %146 = arith.addf %116, %145 : vector<32x32xf32>
    %c0_89 = arith.constant 0 : index
    %c0_90 = arith.constant 0 : index
    %c0_91 = arith.constant 0 : index
    %147 = vector.load %arg28[%c0_89, %c0_90, %c0_91] : memref<6x1x32xf32, #tpu.memory_space<vmem>>, vector<1x1x32xf32>
    %148 = vector.shape_cast %147 : vector<1x1x32xf32> to vector<1x32xf32>
    %c0_92 = arith.constant 0 : index
    %c0_93 = arith.constant 0 : index
    %c0_94 = arith.constant 0 : index
    %149 = vector.load %arg29[%c0_92, %c0_93, %c0_94] : memref<6x1x32xf32, #tpu.memory_space<vmem>>, vector<1x1x32xf32>
    %150 = vector.shape_cast %149 : vector<1x1x32xf32> to vector<1x32xf32>
    %cst_95 = arith.constant dense<0.000000e+00> : vector<32xf32>
    %151 = vector.multi_reduction <add>, %146, %cst_95 [1] : vector<32x32xf32> to vector<32xf32>
    %152 = vector.shape_cast %151 : vector<32xf32> to vector<32x1xf32>
    %cst_96 = arith.constant 3.200000e+01 : f32
    %153 = vector.broadcast %cst_96 : f32 to vector<32x1xf32>
    %154 = arith.divf %152, %153 : vector<32x1xf32>
    %155 = arith.mulf %146, %146 : vector<32x32xf32>
    %cst_97 = arith.constant dense<0.000000e+00> : vector<32xf32>
    %156 = vector.multi_reduction <add>, %155, %cst_97 [1] : vector<32x32xf32> to vector<32xf32>
    %157 = vector.shape_cast %156 : vector<32xf32> to vector<32x1xf32>
    %cst_98 = arith.constant 3.200000e+01 : f32
    %158 = vector.broadcast %cst_98 : f32 to vector<32x1xf32>
    %159 = arith.divf %157, %158 : vector<32x1xf32>
    %160 = arith.mulf %154, %154 : vector<32x1xf32>
    %161 = arith.subf %159, %160 : vector<32x1xf32>
    %162 = vector.broadcast %154 : vector<32x1xf32> to vector<32x32xf32>
    %163 = arith.subf %146, %162 : vector<32x32xf32>
    %cst_99 = arith.constant 9.99999974E-6 : f32
    %164 = vector.broadcast %cst_99 : f32 to vector<32x1xf32>
    %165 = arith.addf %161, %164 : vector<32x1xf32>
    %166 = math.rsqrt %165 : vector<32x1xf32>
    %167 = vector.broadcast %166 : vector<32x1xf32> to vector<32x32xf32>
    %168 = arith.mulf %163, %167 : vector<32x32xf32>
    %169 = vector.broadcast %148 : vector<1x32xf32> to vector<32x32xf32>
    %170 = arith.mulf %168, %169 : vector<32x32xf32>
    %171 = vector.broadcast %150 : vector<1x32xf32> to vector<32x32xf32>
    %172 = arith.addf %170, %171 : vector<32x32xf32>
    %173 = arith.truncf %172 : vector<32x32xf32> to vector<32x32xbf16>
    %c1 = arith.constant 1 : index
    %c0_100 = arith.constant 0 : index
    %c0_101 = arith.constant 0 : index
    %174 = vector.load %arg18[%c1, %c0_100, %c0_101] : memref<6x32x128xbf16, #tpu.memory_space<vmem>>, vector<1x32x128xbf16>
    %175 = vector.shape_cast %174 : vector<1x32x128xbf16> to vector<32x128xbf16>
    %cst_102 = arith.constant dense<0.000000e+00> : vector<32x128xf32>
    %176 = tpu.matmul %173, %175, %cst_102 {dimension_numbers = #tpu.dot_dimension_numbers<[1], [0], [0], [1], [0, 0, 1, 1], [], []>} : vector<32x32xbf16>, vector<32x128xbf16>, vector<32x128xf32> -> vector<32x128xf32>
    %c1_103 = arith.constant 1 : index
    %c0_104 = arith.constant 0 : index
    %c0_105 = arith.constant 0 : index
    %177 = vector.load %arg19[%c1_103, %c0_104, %c0_105] : memref<6x1x128xf32, #tpu.memory_space<vmem>>, vector<1x1x128xf32>
    %178 = vector.shape_cast %177 : vector<1x1x128xf32> to vector<1x128xf32>
    %179 = vector.broadcast %178 : vector<1x128xf32> to vector<32x128xf32>
    %180 = arith.addf %176, %179 : vector<32x128xf32>
    %181 = vector.extract_strided_slice %180 {offsets = [0, 0], sizes = [32, 32], strides = [1, 1]} : vector<32x128xf32> to vector<32x32xf32>
    %182 = vector.extract_strided_slice %180 {offsets = [0, 32], sizes = [32, 32], strides = [1, 1]} : vector<32x128xf32> to vector<32x32xf32>
    %183 = vector.extract_strided_slice %180 {offsets = [0, 64], sizes = [32, 32], strides = [1, 1]} : vector<32x128xf32> to vector<32x32xf32>
    %184 = arith.mulf %181, %182 : vector<32x32xf32>
    %c16_i32_106 = arith.constant 16 : i32
    %185 = tpu.dynamic_rotate %182 by %c16_i32_106 dim 0 : vector<32x32xf32>, i32 -> vector<32x32xf32>
    %186 = arith.mulf %181, %185 : vector<32x32xf32>
    %c16_i32_107 = arith.constant 16 : i32
    %187 = tpu.dynamic_rotate %183 by %c16_i32_107 dim 0 : vector<32x32xf32>, i32 -> vector<32x32xf32>
    %188 = tpu.concatenate %184, %186 in 1 : vector<32x32xf32>, vector<32x32xf32> -> vector<32x64xf32>
    %c0_108 = arith.constant 0 : index
    %c0_109 = arith.constant 0 : index
    %189 = vector.load %arg8[%c0_108, %c0_109] : memref<64x16xf32, #tpu.memory_space<vmem>>, vector<64x16xf32>
    %cst_110 = arith.constant dense<0.000000e+00> : vector<32x16xf32>
    %190 = tpu.matmul %188, %189, %cst_110 {dimension_numbers = #tpu.dot_dimension_numbers<[1], [0], [0], [1], [0, 0, 1, 1], [], []>} : vector<32x64xf32>, vector<64x16xf32>, vector<32x16xf32> -> vector<32x16xf32>
    %191 = vector.extract_strided_slice %190 {offsets = [0, 0], sizes = [32, 8], strides = [1, 1]} : vector<32x16xf32> to vector<32x8xf32>
    %192 = vector.extract_strided_slice %190 {offsets = [0, 8], sizes = [32, 8], strides = [1, 1]} : vector<32x16xf32> to vector<32x8xf32>
    %193 = arith.maximumf %191, %192 : vector<32x8xf32>
    %194 = arith.subf %191, %193 : vector<32x8xf32>
    %195 = math.exp %194 : vector<32x8xf32>
    %196 = arith.subf %192, %193 : vector<32x8xf32>
    %197 = math.exp %196 : vector<32x8xf32>
    %198 = arith.addf %195, %197 : vector<32x8xf32>
    %199 = tpu.reciprocal %198 {approx = true} : vector<32x8xf32> -> vector<32x8xf32>
    %200 = arith.mulf %195, %199 : vector<32x8xf32>
    %201 = arith.mulf %197, %199 : vector<32x8xf32>
    %202 = tpu.concatenate %200, %201 in 1 : vector<32x8xf32>, vector<32x8xf32> -> vector<32x16xf32>
    %c0_111 = arith.constant 0 : index
    %c0_112 = arith.constant 0 : index
    %203 = vector.load %arg9[%c0_111, %c0_112] : memref<16x64xf32, #tpu.memory_space<vmem>>, vector<16x64xf32>
    %cst_113 = arith.constant dense<0.000000e+00> : vector<32x64xf32>
    %204 = tpu.matmul %202, %203, %cst_113 {dimension_numbers = #tpu.dot_dimension_numbers<[1], [0], [0], [1], [0, 0, 1, 1], [], []>} : vector<32x16xf32>, vector<16x64xf32>, vector<32x64xf32> -> vector<32x64xf32>
    %205 = vector.extract_strided_slice %204 {offsets = [0, 0], sizes = [32, 32], strides = [1, 1]} : vector<32x64xf32> to vector<32x32xf32>
    %206 = arith.mulf %205, %183 : vector<32x32xf32>
    %207 = vector.extract_strided_slice %204 {offsets = [0, 32], sizes = [32, 32], strides = [1, 1]} : vector<32x64xf32> to vector<32x32xf32>
    %208 = arith.mulf %207, %187 : vector<32x32xf32>
    %209 = arith.addf %206, %208 : vector<32x32xf32>
    %210 = arith.truncf %209 : vector<32x32xf32> to vector<32x32xbf16>
    %c1_114 = arith.constant 1 : index
    %c0_115 = arith.constant 0 : index
    %c0_116 = arith.constant 0 : index
    %211 = vector.load %arg20[%c1_114, %c0_115, %c0_116] : memref<6x32x32xbf16, #tpu.memory_space<vmem>>, vector<1x32x32xbf16>
    %212 = vector.shape_cast %211 : vector<1x32x32xbf16> to vector<32x32xbf16>
    %cst_117 = arith.constant dense<0.000000e+00> : vector<32x32xf32>
    %213 = tpu.matmul %210, %212, %cst_117 {dimension_numbers = #tpu.dot_dimension_numbers<[1], [0], [0], [1], [0, 0, 1, 1], [], []>} : vector<32x32xbf16>, vector<32x32xbf16>, vector<32x32xf32> -> vector<32x32xf32>
    %c1_118 = arith.constant 1 : index
    %c0_119 = arith.constant 0 : index
    %c0_120 = arith.constant 0 : index
    %214 = vector.load %arg21[%c1_118, %c0_119, %c0_120] : memref<6x1x32xf32, #tpu.memory_space<vmem>>, vector<1x1x32xf32>
    %215 = vector.shape_cast %214 : vector<1x1x32xf32> to vector<1x32xf32>
    %216 = vector.broadcast %215 : vector<1x32xf32> to vector<32x32xf32>
    %217 = arith.addf %213, %216 : vector<32x32xf32>
    %218 = arith.addf %172, %217 : vector<32x32xf32>
    %c1_121 = arith.constant 1 : index
    %c0_122 = arith.constant 0 : index
    %c0_123 = arith.constant 0 : index
    %219 = vector.load %arg26[%c1_121, %c0_122, %c0_123] : memref<6x1x32xf32, #tpu.memory_space<vmem>>, vector<1x1x32xf32>
    %220 = vector.shape_cast %219 : vector<1x1x32xf32> to vector<1x32xf32>
    %c1_124 = arith.constant 1 : index
    %c0_125 = arith.constant 0 : index
    %c0_126 = arith.constant 0 : index
    %221 = vector.load %arg27[%c1_124, %c0_125, %c0_126] : memref<6x1x32xf32, #tpu.memory_space<vmem>>, vector<1x1x32xf32>
    %222 = vector.shape_cast %221 : vector<1x1x32xf32> to vector<1x32xf32>
    %cst_127 = arith.constant dense<0.000000e+00> : vector<32xf32>
    %223 = vector.multi_reduction <add>, %218, %cst_127 [1] : vector<32x32xf32> to vector<32xf32>
    %224 = vector.shape_cast %223 : vector<32xf32> to vector<32x1xf32>
    %cst_128 = arith.constant 3.200000e+01 : f32
    %225 = vector.broadcast %cst_128 : f32 to vector<32x1xf32>
    %226 = arith.divf %224, %225 : vector<32x1xf32>
    %227 = arith.mulf %218, %218 : vector<32x32xf32>
    %cst_129 = arith.constant dense<0.000000e+00> : vector<32xf32>
    %228 = vector.multi_reduction <add>, %227, %cst_129 [1] : vector<32x32xf32> to vector<32xf32>
    %229 = vector.shape_cast %228 : vector<32xf32> to vector<32x1xf32>
    %cst_130 = arith.constant 3.200000e+01 : f32
    %230 = vector.broadcast %cst_130 : f32 to vector<32x1xf32>
    %231 = arith.divf %229, %230 : vector<32x1xf32>
    %232 = arith.mulf %226, %226 : vector<32x1xf32>
    %233 = arith.subf %231, %232 : vector<32x1xf32>
    %234 = vector.broadcast %226 : vector<32x1xf32> to vector<32x32xf32>
    %235 = arith.subf %218, %234 : vector<32x32xf32>
    %cst_131 = arith.constant 9.99999974E-6 : f32
    %236 = vector.broadcast %cst_131 : f32 to vector<32x1xf32>
    %237 = arith.addf %233, %236 : vector<32x1xf32>
    %238 = math.rsqrt %237 : vector<32x1xf32>
    %239 = vector.broadcast %238 : vector<32x1xf32> to vector<32x32xf32>
    %240 = arith.mulf %235, %239 : vector<32x32xf32>
    %241 = vector.broadcast %220 : vector<1x32xf32> to vector<32x32xf32>
    %242 = arith.mulf %240, %241 : vector<32x32xf32>
    %243 = vector.broadcast %222 : vector<1x32xf32> to vector<32x32xf32>
    %244 = arith.addf %242, %243 : vector<32x32xf32>
    %245 = arith.truncf %244 : vector<32x32xf32> to vector<32x32xbf16>
    %c1_132 = arith.constant 1 : index
    %c0_133 = arith.constant 0 : index
    %c0_134 = arith.constant 0 : index
    %246 = vector.load %arg22[%c1_132, %c0_133, %c0_134] : memref<6x32x128xbf16, #tpu.memory_space<vmem>>, vector<1x32x128xbf16>
    %247 = vector.shape_cast %246 : vector<1x32x128xbf16> to vector<32x128xbf16>
    %cst_135 = arith.constant dense<0.000000e+00> : vector<32x128xf32>
    %248 = tpu.matmul %245, %247, %cst_135 {dimension_numbers = #tpu.dot_dimension_numbers<[1], [0], [0], [1], [0, 0, 1, 1], [], []>} : vector<32x32xbf16>, vector<32x128xbf16>, vector<32x128xf32> -> vector<32x128xf32>
    %c1_136 = arith.constant 1 : index
    %c0_137 = arith.constant 0 : index
    %c0_138 = arith.constant 0 : index
    %249 = vector.load %arg23[%c1_136, %c0_137, %c0_138] : memref<6x1x128xf32, #tpu.memory_space<vmem>>, vector<1x1x128xf32>
    %250 = vector.shape_cast %249 : vector<1x1x128xf32> to vector<1x128xf32>
    %251 = vector.broadcast %250 : vector<1x128xf32> to vector<32x128xf32>
    %252 = arith.addf %248, %251 : vector<32x128xf32>
    %cst_139 = arith.constant 5.000000e-01 : f32
    %253 = vector.broadcast %cst_139 : f32 to vector<32x128xf32>
    %254 = arith.mulf %253, %252 : vector<32x128xf32>
    %cst_140 = arith.constant 4.471500e-02 : f32
    %255 = vector.broadcast %cst_140 : f32 to vector<32x128xf32>
    %256 = arith.mulf %255, %252 : vector<32x128xf32>
    %257 = arith.mulf %256, %252 : vector<32x128xf32>
    %258 = arith.mulf %257, %252 : vector<32x128xf32>
    %259 = arith.addf %252, %258 : vector<32x128xf32>
    %cst_141 = arith.constant 0.797884583 : f32
    %260 = vector.broadcast %cst_141 : f32 to vector<32x128xf32>
    %261 = arith.mulf %260, %259 : vector<32x128xf32>
    %262 = math.tanh %261 : vector<32x128xf32>
    %cst_142 = arith.constant 1.000000e+00 : f32
    %263 = vector.broadcast %cst_142 : f32 to vector<32x128xf32>
    %264 = arith.addf %263, %262 : vector<32x128xf32>
    %265 = arith.mulf %254, %264 : vector<32x128xf32>
    %266 = arith.truncf %265 : vector<32x128xf32> to vector<32x128xbf16>
    %c1_143 = arith.constant 1 : index
    %c0_144 = arith.constant 0 : index
    %c0_145 = arith.constant 0 : index
    %267 = vector.load %arg24[%c1_143, %c0_144, %c0_145] : memref<6x128x32xbf16, #tpu.memory_space<vmem>>, vector<1x128x32xbf16>
    %268 = vector.shape_cast %267 : vector<1x128x32xbf16> to vector<128x32xbf16>
    %cst_146 = arith.constant dense<0.000000e+00> : vector<32x32xf32>
    %269 = tpu.matmul %266, %268, %cst_146 {dimension_numbers = #tpu.dot_dimension_numbers<[1], [0], [0], [1], [0, 0, 1, 1], [], []>} : vector<32x128xbf16>, vector<128x32xbf16>, vector<32x32xf32> -> vector<32x32xf32>
    %c1_147 = arith.constant 1 : index
    %c0_148 = arith.constant 0 : index
    %c0_149 = arith.constant 0 : index
    %270 = vector.load %arg25[%c1_147, %c0_148, %c0_149] : memref<6x1x32xf32, #tpu.memory_space<vmem>>, vector<1x1x32xf32>
    %271 = vector.shape_cast %270 : vector<1x1x32xf32> to vector<1x32xf32>
    %272 = vector.broadcast %271 : vector<1x32xf32> to vector<32x32xf32>
    %273 = arith.addf %269, %272 : vector<32x32xf32>
    %274 = arith.addf %244, %273 : vector<32x32xf32>
    %c1_150 = arith.constant 1 : index
    %c0_151 = arith.constant 0 : index
    %c0_152 = arith.constant 0 : index
    %275 = vector.load %arg28[%c1_150, %c0_151, %c0_152] : memref<6x1x32xf32, #tpu.memory_space<vmem>>, vector<1x1x32xf32>
    %276 = vector.shape_cast %275 : vector<1x1x32xf32> to vector<1x32xf32>
    %c1_153 = arith.constant 1 : index
    %c0_154 = arith.constant 0 : index
    %c0_155 = arith.constant 0 : index
    %277 = vector.load %arg29[%c1_153, %c0_154, %c0_155] : memref<6x1x32xf32, #tpu.memory_space<vmem>>, vector<1x1x32xf32>
    %278 = vector.shape_cast %277 : vector<1x1x32xf32> to vector<1x32xf32>
    %cst_156 = arith.constant dense<0.000000e+00> : vector<32xf32>
    %279 = vector.multi_reduction <add>, %274, %cst_156 [1] : vector<32x32xf32> to vector<32xf32>
    %280 = vector.shape_cast %279 : vector<32xf32> to vector<32x1xf32>
    %cst_157 = arith.constant 3.200000e+01 : f32
    %281 = vector.broadcast %cst_157 : f32 to vector<32x1xf32>
    %282 = arith.divf %280, %281 : vector<32x1xf32>
    %283 = arith.mulf %274, %274 : vector<32x32xf32>
    %cst_158 = arith.constant dense<0.000000e+00> : vector<32xf32>
    %284 = vector.multi_reduction <add>, %283, %cst_158 [1] : vector<32x32xf32> to vector<32xf32>
    %285 = vector.shape_cast %284 : vector<32xf32> to vector<32x1xf32>
    %cst_159 = arith.constant 3.200000e+01 : f32
    %286 = vector.broadcast %cst_159 : f32 to vector<32x1xf32>
    %287 = arith.divf %285, %286 : vector<32x1xf32>
    %288 = arith.mulf %282, %282 : vector<32x1xf32>
    %289 = arith.subf %287, %288 : vector<32x1xf32>
    %290 = vector.broadcast %282 : vector<32x1xf32> to vector<32x32xf32>
    %291 = arith.subf %274, %290 : vector<32x32xf32>
    %cst_160 = arith.constant 9.99999974E-6 : f32
    %292 = vector.broadcast %cst_160 : f32 to vector<32x1xf32>
    %293 = arith.addf %289, %292 : vector<32x1xf32>
    %294 = math.rsqrt %293 : vector<32x1xf32>
    %295 = vector.broadcast %294 : vector<32x1xf32> to vector<32x32xf32>
    %296 = arith.mulf %291, %295 : vector<32x32xf32>
    %297 = vector.broadcast %276 : vector<1x32xf32> to vector<32x32xf32>
    %298 = arith.mulf %296, %297 : vector<32x32xf32>
    %299 = vector.broadcast %278 : vector<1x32xf32> to vector<32x32xf32>
    %300 = arith.addf %298, %299 : vector<32x32xf32>
    %301 = arith.truncf %300 : vector<32x32xf32> to vector<32x32xbf16>
    %c2 = arith.constant 2 : index
    %c0_161 = arith.constant 0 : index
    %c0_162 = arith.constant 0 : index
    %302 = vector.load %arg18[%c2, %c0_161, %c0_162] : memref<6x32x128xbf16, #tpu.memory_space<vmem>>, vector<1x32x128xbf16>
    %303 = vector.shape_cast %302 : vector<1x32x128xbf16> to vector<32x128xbf16>
    %cst_163 = arith.constant dense<0.000000e+00> : vector<32x128xf32>
    %304 = tpu.matmul %301, %303, %cst_163 {dimension_numbers = #tpu.dot_dimension_numbers<[1], [0], [0], [1], [0, 0, 1, 1], [], []>} : vector<32x32xbf16>, vector<32x128xbf16>, vector<32x128xf32> -> vector<32x128xf32>
    %c2_164 = arith.constant 2 : index
    %c0_165 = arith.constant 0 : index
    %c0_166 = arith.constant 0 : index
    %305 = vector.load %arg19[%c2_164, %c0_165, %c0_166] : memref<6x1x128xf32, #tpu.memory_space<vmem>>, vector<1x1x128xf32>
    %306 = vector.shape_cast %305 : vector<1x1x128xf32> to vector<1x128xf32>
    %307 = vector.broadcast %306 : vector<1x128xf32> to vector<32x128xf32>
    %308 = arith.addf %304, %307 : vector<32x128xf32>
    %309 = vector.extract_strided_slice %308 {offsets = [0, 0], sizes = [32, 32], strides = [1, 1]} : vector<32x128xf32> to vector<32x32xf32>
    %310 = vector.extract_strided_slice %308 {offsets = [0, 32], sizes = [32, 32], strides = [1, 1]} : vector<32x128xf32> to vector<32x32xf32>
    %311 = vector.extract_strided_slice %308 {offsets = [0, 64], sizes = [32, 32], strides = [1, 1]} : vector<32x128xf32> to vector<32x32xf32>
    %312 = arith.mulf %309, %310 : vector<32x32xf32>
    %c16_i32_167 = arith.constant 16 : i32
    %313 = tpu.dynamic_rotate %310 by %c16_i32_167 dim 0 : vector<32x32xf32>, i32 -> vector<32x32xf32>
    %314 = arith.mulf %309, %313 : vector<32x32xf32>
    %c16_i32_168 = arith.constant 16 : i32
    %315 = tpu.dynamic_rotate %311 by %c16_i32_168 dim 0 : vector<32x32xf32>, i32 -> vector<32x32xf32>
    %316 = tpu.concatenate %312, %314 in 1 : vector<32x32xf32>, vector<32x32xf32> -> vector<32x64xf32>
    %c0_169 = arith.constant 0 : index
    %c0_170 = arith.constant 0 : index
    %317 = vector.load %arg8[%c0_169, %c0_170] : memref<64x16xf32, #tpu.memory_space<vmem>>, vector<64x16xf32>
    %cst_171 = arith.constant dense<0.000000e+00> : vector<32x16xf32>
    %318 = tpu.matmul %316, %317, %cst_171 {dimension_numbers = #tpu.dot_dimension_numbers<[1], [0], [0], [1], [0, 0, 1, 1], [], []>} : vector<32x64xf32>, vector<64x16xf32>, vector<32x16xf32> -> vector<32x16xf32>
    %319 = vector.extract_strided_slice %318 {offsets = [0, 0], sizes = [32, 8], strides = [1, 1]} : vector<32x16xf32> to vector<32x8xf32>
    %320 = vector.extract_strided_slice %318 {offsets = [0, 8], sizes = [32, 8], strides = [1, 1]} : vector<32x16xf32> to vector<32x8xf32>
    %321 = arith.maximumf %319, %320 : vector<32x8xf32>
    %322 = arith.subf %319, %321 : vector<32x8xf32>
    %323 = math.exp %322 : vector<32x8xf32>
    %324 = arith.subf %320, %321 : vector<32x8xf32>
    %325 = math.exp %324 : vector<32x8xf32>
    %326 = arith.addf %323, %325 : vector<32x8xf32>
    %327 = tpu.reciprocal %326 {approx = true} : vector<32x8xf32> -> vector<32x8xf32>
    %328 = arith.mulf %323, %327 : vector<32x8xf32>
    %329 = arith.mulf %325, %327 : vector<32x8xf32>
    %330 = tpu.concatenate %328, %329 in 1 : vector<32x8xf32>, vector<32x8xf32> -> vector<32x16xf32>
    %c0_172 = arith.constant 0 : index
    %c0_173 = arith.constant 0 : index
    %331 = vector.load %arg9[%c0_172, %c0_173] : memref<16x64xf32, #tpu.memory_space<vmem>>, vector<16x64xf32>
    %cst_174 = arith.constant dense<0.000000e+00> : vector<32x64xf32>
    %332 = tpu.matmul %330, %331, %cst_174 {dimension_numbers = #tpu.dot_dimension_numbers<[1], [0], [0], [1], [0, 0, 1, 1], [], []>} : vector<32x16xf32>, vector<16x64xf32>, vector<32x64xf32> -> vector<32x64xf32>
    %333 = vector.extract_strided_slice %332 {offsets = [0, 0], sizes = [32, 32], strides = [1, 1]} : vector<32x64xf32> to vector<32x32xf32>
    %334 = arith.mulf %333, %311 : vector<32x32xf32>
    %335 = vector.extract_strided_slice %332 {offsets = [0, 32], sizes = [32, 32], strides = [1, 1]} : vector<32x64xf32> to vector<32x32xf32>
    %336 = arith.mulf %335, %315 : vector<32x32xf32>
    %337 = arith.addf %334, %336 : vector<32x32xf32>
    %338 = arith.truncf %337 : vector<32x32xf32> to vector<32x32xbf16>
    %c2_175 = arith.constant 2 : index
    %c0_176 = arith.constant 0 : index
    %c0_177 = arith.constant 0 : index
    %339 = vector.load %arg20[%c2_175, %c0_176, %c0_177] : memref<6x32x32xbf16, #tpu.memory_space<vmem>>, vector<1x32x32xbf16>
    %340 = vector.shape_cast %339 : vector<1x32x32xbf16> to vector<32x32xbf16>
    %cst_178 = arith.constant dense<0.000000e+00> : vector<32x32xf32>
    %341 = tpu.matmul %338, %340, %cst_178 {dimension_numbers = #tpu.dot_dimension_numbers<[1], [0], [0], [1], [0, 0, 1, 1], [], []>} : vector<32x32xbf16>, vector<32x32xbf16>, vector<32x32xf32> -> vector<32x32xf32>
    %c2_179 = arith.constant 2 : index
    %c0_180 = arith.constant 0 : index
    %c0_181 = arith.constant 0 : index
    %342 = vector.load %arg21[%c2_179, %c0_180, %c0_181] : memref<6x1x32xf32, #tpu.memory_space<vmem>>, vector<1x1x32xf32>
    %343 = vector.shape_cast %342 : vector<1x1x32xf32> to vector<1x32xf32>
    %344 = vector.broadcast %343 : vector<1x32xf32> to vector<32x32xf32>
    %345 = arith.addf %341, %344 : vector<32x32xf32>
    %346 = arith.addf %300, %345 : vector<32x32xf32>
    %c2_182 = arith.constant 2 : index
    %c0_183 = arith.constant 0 : index
    %c0_184 = arith.constant 0 : index
    %347 = vector.load %arg26[%c2_182, %c0_183, %c0_184] : memref<6x1x32xf32, #tpu.memory_space<vmem>>, vector<1x1x32xf32>
    %348 = vector.shape_cast %347 : vector<1x1x32xf32> to vector<1x32xf32>
    %c2_185 = arith.constant 2 : index
    %c0_186 = arith.constant 0 : index
    %c0_187 = arith.constant 0 : index
    %349 = vector.load %arg27[%c2_185, %c0_186, %c0_187] : memref<6x1x32xf32, #tpu.memory_space<vmem>>, vector<1x1x32xf32>
    %350 = vector.shape_cast %349 : vector<1x1x32xf32> to vector<1x32xf32>
    %cst_188 = arith.constant dense<0.000000e+00> : vector<32xf32>
    %351 = vector.multi_reduction <add>, %346, %cst_188 [1] : vector<32x32xf32> to vector<32xf32>
    %352 = vector.shape_cast %351 : vector<32xf32> to vector<32x1xf32>
    %cst_189 = arith.constant 3.200000e+01 : f32
    %353 = vector.broadcast %cst_189 : f32 to vector<32x1xf32>
    %354 = arith.divf %352, %353 : vector<32x1xf32>
    %355 = arith.mulf %346, %346 : vector<32x32xf32>
    %cst_190 = arith.constant dense<0.000000e+00> : vector<32xf32>
    %356 = vector.multi_reduction <add>, %355, %cst_190 [1] : vector<32x32xf32> to vector<32xf32>
    %357 = vector.shape_cast %356 : vector<32xf32> to vector<32x1xf32>
    %cst_191 = arith.constant 3.200000e+01 : f32
    %358 = vector.broadcast %cst_191 : f32 to vector<32x1xf32>
    %359 = arith.divf %357, %358 : vector<32x1xf32>
    %360 = arith.mulf %354, %354 : vector<32x1xf32>
    %361 = arith.subf %359, %360 : vector<32x1xf32>
    %362 = vector.broadcast %354 : vector<32x1xf32> to vector<32x32xf32>
    %363 = arith.subf %346, %362 : vector<32x32xf32>
    %cst_192 = arith.constant 9.99999974E-6 : f32
    %364 = vector.broadcast %cst_192 : f32 to vector<32x1xf32>
    %365 = arith.addf %361, %364 : vector<32x1xf32>
    %366 = math.rsqrt %365 : vector<32x1xf32>
    %367 = vector.broadcast %366 : vector<32x1xf32> to vector<32x32xf32>
    %368 = arith.mulf %363, %367 : vector<32x32xf32>
    %369 = vector.broadcast %348 : vector<1x32xf32> to vector<32x32xf32>
    %370 = arith.mulf %368, %369 : vector<32x32xf32>
    %371 = vector.broadcast %350 : vector<1x32xf32> to vector<32x32xf32>
    %372 = arith.addf %370, %371 : vector<32x32xf32>
    %373 = arith.truncf %372 : vector<32x32xf32> to vector<32x32xbf16>
    %c2_193 = arith.constant 2 : index
    %c0_194 = arith.constant 0 : index
    %c0_195 = arith.constant 0 : index
    %374 = vector.load %arg22[%c2_193, %c0_194, %c0_195] : memref<6x32x128xbf16, #tpu.memory_space<vmem>>, vector<1x32x128xbf16>
    %375 = vector.shape_cast %374 : vector<1x32x128xbf16> to vector<32x128xbf16>
    %cst_196 = arith.constant dense<0.000000e+00> : vector<32x128xf32>
    %376 = tpu.matmul %373, %375, %cst_196 {dimension_numbers = #tpu.dot_dimension_numbers<[1], [0], [0], [1], [0, 0, 1, 1], [], []>} : vector<32x32xbf16>, vector<32x128xbf16>, vector<32x128xf32> -> vector<32x128xf32>
    %c2_197 = arith.constant 2 : index
    %c0_198 = arith.constant 0 : index
    %c0_199 = arith.constant 0 : index
    %377 = vector.load %arg23[%c2_197, %c0_198, %c0_199] : memref<6x1x128xf32, #tpu.memory_space<vmem>>, vector<1x1x128xf32>
    %378 = vector.shape_cast %377 : vector<1x1x128xf32> to vector<1x128xf32>
    %379 = vector.broadcast %378 : vector<1x128xf32> to vector<32x128xf32>
    %380 = arith.addf %376, %379 : vector<32x128xf32>
    %cst_200 = arith.constant 5.000000e-01 : f32
    %381 = vector.broadcast %cst_200 : f32 to vector<32x128xf32>
    %382 = arith.mulf %381, %380 : vector<32x128xf32>
    %cst_201 = arith.constant 4.471500e-02 : f32
    %383 = vector.broadcast %cst_201 : f32 to vector<32x128xf32>
    %384 = arith.mulf %383, %380 : vector<32x128xf32>
    %385 = arith.mulf %384, %380 : vector<32x128xf32>
    %386 = arith.mulf %385, %380 : vector<32x128xf32>
    %387 = arith.addf %380, %386 : vector<32x128xf32>
    %cst_202 = arith.constant 0.797884583 : f32
    %388 = vector.broadcast %cst_202 : f32 to vector<32x128xf32>
    %389 = arith.mulf %388, %387 : vector<32x128xf32>
    %390 = math.tanh %389 : vector<32x128xf32>
    %cst_203 = arith.constant 1.000000e+00 : f32
    %391 = vector.broadcast %cst_203 : f32 to vector<32x128xf32>
    %392 = arith.addf %391, %390 : vector<32x128xf32>
    %393 = arith.mulf %382, %392 : vector<32x128xf32>
    %394 = arith.truncf %393 : vector<32x128xf32> to vector<32x128xbf16>
    %c2_204 = arith.constant 2 : index
    %c0_205 = arith.constant 0 : index
    %c0_206 = arith.constant 0 : index
    %395 = vector.load %arg24[%c2_204, %c0_205, %c0_206] : memref<6x128x32xbf16, #tpu.memory_space<vmem>>, vector<1x128x32xbf16>
    %396 = vector.shape_cast %395 : vector<1x128x32xbf16> to vector<128x32xbf16>
    %cst_207 = arith.constant dense<0.000000e+00> : vector<32x32xf32>
    %397 = tpu.matmul %394, %396, %cst_207 {dimension_numbers = #tpu.dot_dimension_numbers<[1], [0], [0], [1], [0, 0, 1, 1], [], []>} : vector<32x128xbf16>, vector<128x32xbf16>, vector<32x32xf32> -> vector<32x32xf32>
    %c2_208 = arith.constant 2 : index
    %c0_209 = arith.constant 0 : index
    %c0_210 = arith.constant 0 : index
    %398 = vector.load %arg25[%c2_208, %c0_209, %c0_210] : memref<6x1x32xf32, #tpu.memory_space<vmem>>, vector<1x1x32xf32>
    %399 = vector.shape_cast %398 : vector<1x1x32xf32> to vector<1x32xf32>
    %400 = vector.broadcast %399 : vector<1x32xf32> to vector<32x32xf32>
    %401 = arith.addf %397, %400 : vector<32x32xf32>
    %402 = arith.addf %372, %401 : vector<32x32xf32>
    %c2_211 = arith.constant 2 : index
    %c0_212 = arith.constant 0 : index
    %c0_213 = arith.constant 0 : index
    %403 = vector.load %arg28[%c2_211, %c0_212, %c0_213] : memref<6x1x32xf32, #tpu.memory_space<vmem>>, vector<1x1x32xf32>
    %404 = vector.shape_cast %403 : vector<1x1x32xf32> to vector<1x32xf32>
    %c2_214 = arith.constant 2 : index
    %c0_215 = arith.constant 0 : index
    %c0_216 = arith.constant 0 : index
    %405 = vector.load %arg29[%c2_214, %c0_215, %c0_216] : memref<6x1x32xf32, #tpu.memory_space<vmem>>, vector<1x1x32xf32>
    %406 = vector.shape_cast %405 : vector<1x1x32xf32> to vector<1x32xf32>
    %cst_217 = arith.constant dense<0.000000e+00> : vector<32xf32>
    %407 = vector.multi_reduction <add>, %402, %cst_217 [1] : vector<32x32xf32> to vector<32xf32>
    %408 = vector.shape_cast %407 : vector<32xf32> to vector<32x1xf32>
    %cst_218 = arith.constant 3.200000e+01 : f32
    %409 = vector.broadcast %cst_218 : f32 to vector<32x1xf32>
    %410 = arith.divf %408, %409 : vector<32x1xf32>
    %411 = arith.mulf %402, %402 : vector<32x32xf32>
    %cst_219 = arith.constant dense<0.000000e+00> : vector<32xf32>
    %412 = vector.multi_reduction <add>, %411, %cst_219 [1] : vector<32x32xf32> to vector<32xf32>
    %413 = vector.shape_cast %412 : vector<32xf32> to vector<32x1xf32>
    %cst_220 = arith.constant 3.200000e+01 : f32
    %414 = vector.broadcast %cst_220 : f32 to vector<32x1xf32>
    %415 = arith.divf %413, %414 : vector<32x1xf32>
    %416 = arith.mulf %410, %410 : vector<32x1xf32>
    %417 = arith.subf %415, %416 : vector<32x1xf32>
    %418 = vector.broadcast %410 : vector<32x1xf32> to vector<32x32xf32>
    %419 = arith.subf %402, %418 : vector<32x32xf32>
    %cst_221 = arith.constant 9.99999974E-6 : f32
    %420 = vector.broadcast %cst_221 : f32 to vector<32x1xf32>
    %421 = arith.addf %417, %420 : vector<32x1xf32>
    %422 = math.rsqrt %421 : vector<32x1xf32>
    %423 = vector.broadcast %422 : vector<32x1xf32> to vector<32x32xf32>
    %424 = arith.mulf %419, %423 : vector<32x32xf32>
    %425 = vector.broadcast %404 : vector<1x32xf32> to vector<32x32xf32>
    %426 = arith.mulf %424, %425 : vector<32x32xf32>
    %427 = vector.broadcast %406 : vector<1x32xf32> to vector<32x32xf32>
    %428 = arith.addf %426, %427 : vector<32x32xf32>
    %429 = arith.truncf %428 : vector<32x32xf32> to vector<32x32xbf16>
    %c3 = arith.constant 3 : index
    %c0_222 = arith.constant 0 : index
    %c0_223 = arith.constant 0 : index
    %430 = vector.load %arg18[%c3, %c0_222, %c0_223] : memref<6x32x128xbf16, #tpu.memory_space<vmem>>, vector<1x32x128xbf16>
    %431 = vector.shape_cast %430 : vector<1x32x128xbf16> to vector<32x128xbf16>
    %cst_224 = arith.constant dense<0.000000e+00> : vector<32x128xf32>
    %432 = tpu.matmul %429, %431, %cst_224 {dimension_numbers = #tpu.dot_dimension_numbers<[1], [0], [0], [1], [0, 0, 1, 1], [], []>} : vector<32x32xbf16>, vector<32x128xbf16>, vector<32x128xf32> -> vector<32x128xf32>
    %c3_225 = arith.constant 3 : index
    %c0_226 = arith.constant 0 : index
    %c0_227 = arith.constant 0 : index
    %433 = vector.load %arg19[%c3_225, %c0_226, %c0_227] : memref<6x1x128xf32, #tpu.memory_space<vmem>>, vector<1x1x128xf32>
    %434 = vector.shape_cast %433 : vector<1x1x128xf32> to vector<1x128xf32>
    %435 = vector.broadcast %434 : vector<1x128xf32> to vector<32x128xf32>
    %436 = arith.addf %432, %435 : vector<32x128xf32>
    %437 = vector.extract_strided_slice %436 {offsets = [0, 0], sizes = [32, 32], strides = [1, 1]} : vector<32x128xf32> to vector<32x32xf32>
    %438 = vector.extract_strided_slice %436 {offsets = [0, 32], sizes = [32, 32], strides = [1, 1]} : vector<32x128xf32> to vector<32x32xf32>
    %439 = vector.extract_strided_slice %436 {offsets = [0, 64], sizes = [32, 32], strides = [1, 1]} : vector<32x128xf32> to vector<32x32xf32>
    %440 = arith.mulf %437, %438 : vector<32x32xf32>
    %c16_i32_228 = arith.constant 16 : i32
    %441 = tpu.dynamic_rotate %438 by %c16_i32_228 dim 0 : vector<32x32xf32>, i32 -> vector<32x32xf32>
    %442 = arith.mulf %437, %441 : vector<32x32xf32>
    %c16_i32_229 = arith.constant 16 : i32
    %443 = tpu.dynamic_rotate %439 by %c16_i32_229 dim 0 : vector<32x32xf32>, i32 -> vector<32x32xf32>
    %444 = tpu.concatenate %440, %442 in 1 : vector<32x32xf32>, vector<32x32xf32> -> vector<32x64xf32>
    %c0_230 = arith.constant 0 : index
    %c0_231 = arith.constant 0 : index
    %445 = vector.load %arg8[%c0_230, %c0_231] : memref<64x16xf32, #tpu.memory_space<vmem>>, vector<64x16xf32>
    %cst_232 = arith.constant dense<0.000000e+00> : vector<32x16xf32>
    %446 = tpu.matmul %444, %445, %cst_232 {dimension_numbers = #tpu.dot_dimension_numbers<[1], [0], [0], [1], [0, 0, 1, 1], [], []>} : vector<32x64xf32>, vector<64x16xf32>, vector<32x16xf32> -> vector<32x16xf32>
    %447 = vector.extract_strided_slice %446 {offsets = [0, 0], sizes = [32, 8], strides = [1, 1]} : vector<32x16xf32> to vector<32x8xf32>
    %448 = vector.extract_strided_slice %446 {offsets = [0, 8], sizes = [32, 8], strides = [1, 1]} : vector<32x16xf32> to vector<32x8xf32>
    %449 = arith.maximumf %447, %448 : vector<32x8xf32>
    %450 = arith.subf %447, %449 : vector<32x8xf32>
    %451 = math.exp %450 : vector<32x8xf32>
    %452 = arith.subf %448, %449 : vector<32x8xf32>
    %453 = math.exp %452 : vector<32x8xf32>
    %454 = arith.addf %451, %453 : vector<32x8xf32>
    %455 = tpu.reciprocal %454 {approx = true} : vector<32x8xf32> -> vector<32x8xf32>
    %456 = arith.mulf %451, %455 : vector<32x8xf32>
    %457 = arith.mulf %453, %455 : vector<32x8xf32>
    %458 = tpu.concatenate %456, %457 in 1 : vector<32x8xf32>, vector<32x8xf32> -> vector<32x16xf32>
    %c0_233 = arith.constant 0 : index
    %c0_234 = arith.constant 0 : index
    %459 = vector.load %arg9[%c0_233, %c0_234] : memref<16x64xf32, #tpu.memory_space<vmem>>, vector<16x64xf32>
    %cst_235 = arith.constant dense<0.000000e+00> : vector<32x64xf32>
    %460 = tpu.matmul %458, %459, %cst_235 {dimension_numbers = #tpu.dot_dimension_numbers<[1], [0], [0], [1], [0, 0, 1, 1], [], []>} : vector<32x16xf32>, vector<16x64xf32>, vector<32x64xf32> -> vector<32x64xf32>
    %461 = vector.extract_strided_slice %460 {offsets = [0, 0], sizes = [32, 32], strides = [1, 1]} : vector<32x64xf32> to vector<32x32xf32>
    %462 = arith.mulf %461, %439 : vector<32x32xf32>
    %463 = vector.extract_strided_slice %460 {offsets = [0, 32], sizes = [32, 32], strides = [1, 1]} : vector<32x64xf32> to vector<32x32xf32>
    %464 = arith.mulf %463, %443 : vector<32x32xf32>
    %465 = arith.addf %462, %464 : vector<32x32xf32>
    %466 = arith.truncf %465 : vector<32x32xf32> to vector<32x32xbf16>
    %c3_236 = arith.constant 3 : index
    %c0_237 = arith.constant 0 : index
    %c0_238 = arith.constant 0 : index
    %467 = vector.load %arg20[%c3_236, %c0_237, %c0_238] : memref<6x32x32xbf16, #tpu.memory_space<vmem>>, vector<1x32x32xbf16>
    %468 = vector.shape_cast %467 : vector<1x32x32xbf16> to vector<32x32xbf16>
    %cst_239 = arith.constant dense<0.000000e+00> : vector<32x32xf32>
    %469 = tpu.matmul %466, %468, %cst_239 {dimension_numbers = #tpu.dot_dimension_numbers<[1], [0], [0], [1], [0, 0, 1, 1], [], []>} : vector<32x32xbf16>, vector<32x32xbf16>, vector<32x32xf32> -> vector<32x32xf32>
    %c3_240 = arith.constant 3 : index
    %c0_241 = arith.constant 0 : index
    %c0_242 = arith.constant 0 : index
    %470 = vector.load %arg21[%c3_240, %c0_241, %c0_242] : memref<6x1x32xf32, #tpu.memory_space<vmem>>, vector<1x1x32xf32>
    %471 = vector.shape_cast %470 : vector<1x1x32xf32> to vector<1x32xf32>
    %472 = vector.broadcast %471 : vector<1x32xf32> to vector<32x32xf32>
    %473 = arith.addf %469, %472 : vector<32x32xf32>
    %474 = arith.addf %428, %473 : vector<32x32xf32>
    %c3_243 = arith.constant 3 : index
    %c0_244 = arith.constant 0 : index
    %c0_245 = arith.constant 0 : index
    %475 = vector.load %arg26[%c3_243, %c0_244, %c0_245] : memref<6x1x32xf32, #tpu.memory_space<vmem>>, vector<1x1x32xf32>
    %476 = vector.shape_cast %475 : vector<1x1x32xf32> to vector<1x32xf32>
    %c3_246 = arith.constant 3 : index
    %c0_247 = arith.constant 0 : index
    %c0_248 = arith.constant 0 : index
    %477 = vector.load %arg27[%c3_246, %c0_247, %c0_248] : memref<6x1x32xf32, #tpu.memory_space<vmem>>, vector<1x1x32xf32>
    %478 = vector.shape_cast %477 : vector<1x1x32xf32> to vector<1x32xf32>
    %cst_249 = arith.constant dense<0.000000e+00> : vector<32xf32>
    %479 = vector.multi_reduction <add>, %474, %cst_249 [1] : vector<32x32xf32> to vector<32xf32>
    %480 = vector.shape_cast %479 : vector<32xf32> to vector<32x1xf32>
    %cst_250 = arith.constant 3.200000e+01 : f32
    %481 = vector.broadcast %cst_250 : f32 to vector<32x1xf32>
    %482 = arith.divf %480, %481 : vector<32x1xf32>
    %483 = arith.mulf %474, %474 : vector<32x32xf32>
    %cst_251 = arith.constant dense<0.000000e+00> : vector<32xf32>
    %484 = vector.multi_reduction <add>, %483, %cst_251 [1] : vector<32x32xf32> to vector<32xf32>
    %485 = vector.shape_cast %484 : vector<32xf32> to vector<32x1xf32>
    %cst_252 = arith.constant 3.200000e+01 : f32
    %486 = vector.broadcast %cst_252 : f32 to vector<32x1xf32>
    %487 = arith.divf %485, %486 : vector<32x1xf32>
    %488 = arith.mulf %482, %482 : vector<32x1xf32>
    %489 = arith.subf %487, %488 : vector<32x1xf32>
    %490 = vector.broadcast %482 : vector<32x1xf32> to vector<32x32xf32>
    %491 = arith.subf %474, %490 : vector<32x32xf32>
    %cst_253 = arith.constant 9.99999974E-6 : f32
    %492 = vector.broadcast %cst_253 : f32 to vector<32x1xf32>
    %493 = arith.addf %489, %492 : vector<32x1xf32>
    %494 = math.rsqrt %493 : vector<32x1xf32>
    %495 = vector.broadcast %494 : vector<32x1xf32> to vector<32x32xf32>
    %496 = arith.mulf %491, %495 : vector<32x32xf32>
    %497 = vector.broadcast %476 : vector<1x32xf32> to vector<32x32xf32>
    %498 = arith.mulf %496, %497 : vector<32x32xf32>
    %499 = vector.broadcast %478 : vector<1x32xf32> to vector<32x32xf32>
    %500 = arith.addf %498, %499 : vector<32x32xf32>
    %501 = arith.truncf %500 : vector<32x32xf32> to vector<32x32xbf16>
    %c3_254 = arith.constant 3 : index
    %c0_255 = arith.constant 0 : index
    %c0_256 = arith.constant 0 : index
    %502 = vector.load %arg22[%c3_254, %c0_255, %c0_256] : memref<6x32x128xbf16, #tpu.memory_space<vmem>>, vector<1x32x128xbf16>
    %503 = vector.shape_cast %502 : vector<1x32x128xbf16> to vector<32x128xbf16>
    %cst_257 = arith.constant dense<0.000000e+00> : vector<32x128xf32>
    %504 = tpu.matmul %501, %503, %cst_257 {dimension_numbers = #tpu.dot_dimension_numbers<[1], [0], [0], [1], [0, 0, 1, 1], [], []>} : vector<32x32xbf16>, vector<32x128xbf16>, vector<32x128xf32> -> vector<32x128xf32>
    %c3_258 = arith.constant 3 : index
    %c0_259 = arith.constant 0 : index
    %c0_260 = arith.constant 0 : index
    %505 = vector.load %arg23[%c3_258, %c0_259, %c0_260] : memref<6x1x128xf32, #tpu.memory_space<vmem>>, vector<1x1x128xf32>
    %506 = vector.shape_cast %505 : vector<1x1x128xf32> to vector<1x128xf32>
    %507 = vector.broadcast %506 : vector<1x128xf32> to vector<32x128xf32>
    %508 = arith.addf %504, %507 : vector<32x128xf32>
    %cst_261 = arith.constant 5.000000e-01 : f32
    %509 = vector.broadcast %cst_261 : f32 to vector<32x128xf32>
    %510 = arith.mulf %509, %508 : vector<32x128xf32>
    %cst_262 = arith.constant 4.471500e-02 : f32
    %511 = vector.broadcast %cst_262 : f32 to vector<32x128xf32>
    %512 = arith.mulf %511, %508 : vector<32x128xf32>
    %513 = arith.mulf %512, %508 : vector<32x128xf32>
    %514 = arith.mulf %513, %508 : vector<32x128xf32>
    %515 = arith.addf %508, %514 : vector<32x128xf32>
    %cst_263 = arith.constant 0.797884583 : f32
    %516 = vector.broadcast %cst_263 : f32 to vector<32x128xf32>
    %517 = arith.mulf %516, %515 : vector<32x128xf32>
    %518 = math.tanh %517 : vector<32x128xf32>
    %cst_264 = arith.constant 1.000000e+00 : f32
    %519 = vector.broadcast %cst_264 : f32 to vector<32x128xf32>
    %520 = arith.addf %519, %518 : vector<32x128xf32>
    %521 = arith.mulf %510, %520 : vector<32x128xf32>
    %522 = arith.truncf %521 : vector<32x128xf32> to vector<32x128xbf16>
    %c3_265 = arith.constant 3 : index
    %c0_266 = arith.constant 0 : index
    %c0_267 = arith.constant 0 : index
    %523 = vector.load %arg24[%c3_265, %c0_266, %c0_267] : memref<6x128x32xbf16, #tpu.memory_space<vmem>>, vector<1x128x32xbf16>
    %524 = vector.shape_cast %523 : vector<1x128x32xbf16> to vector<128x32xbf16>
    %cst_268 = arith.constant dense<0.000000e+00> : vector<32x32xf32>
    %525 = tpu.matmul %522, %524, %cst_268 {dimension_numbers = #tpu.dot_dimension_numbers<[1], [0], [0], [1], [0, 0, 1, 1], [], []>} : vector<32x128xbf16>, vector<128x32xbf16>, vector<32x32xf32> -> vector<32x32xf32>
    %c3_269 = arith.constant 3 : index
    %c0_270 = arith.constant 0 : index
    %c0_271 = arith.constant 0 : index
    %526 = vector.load %arg25[%c3_269, %c0_270, %c0_271] : memref<6x1x32xf32, #tpu.memory_space<vmem>>, vector<1x1x32xf32>
    %527 = vector.shape_cast %526 : vector<1x1x32xf32> to vector<1x32xf32>
    %528 = vector.broadcast %527 : vector<1x32xf32> to vector<32x32xf32>
    %529 = arith.addf %525, %528 : vector<32x32xf32>
    %530 = arith.addf %500, %529 : vector<32x32xf32>
    %c3_272 = arith.constant 3 : index
    %c0_273 = arith.constant 0 : index
    %c0_274 = arith.constant 0 : index
    %531 = vector.load %arg28[%c3_272, %c0_273, %c0_274] : memref<6x1x32xf32, #tpu.memory_space<vmem>>, vector<1x1x32xf32>
    %532 = vector.shape_cast %531 : vector<1x1x32xf32> to vector<1x32xf32>
    %c3_275 = arith.constant 3 : index
    %c0_276 = arith.constant 0 : index
    %c0_277 = arith.constant 0 : index
    %533 = vector.load %arg29[%c3_275, %c0_276, %c0_277] : memref<6x1x32xf32, #tpu.memory_space<vmem>>, vector<1x1x32xf32>
    %534 = vector.shape_cast %533 : vector<1x1x32xf32> to vector<1x32xf32>
    %cst_278 = arith.constant dense<0.000000e+00> : vector<32xf32>
    %535 = vector.multi_reduction <add>, %530, %cst_278 [1] : vector<32x32xf32> to vector<32xf32>
    %536 = vector.shape_cast %535 : vector<32xf32> to vector<32x1xf32>
    %cst_279 = arith.constant 3.200000e+01 : f32
    %537 = vector.broadcast %cst_279 : f32 to vector<32x1xf32>
    %538 = arith.divf %536, %537 : vector<32x1xf32>
    %539 = arith.mulf %530, %530 : vector<32x32xf32>
    %cst_280 = arith.constant dense<0.000000e+00> : vector<32xf32>
    %540 = vector.multi_reduction <add>, %539, %cst_280 [1] : vector<32x32xf32> to vector<32xf32>
    %541 = vector.shape_cast %540 : vector<32xf32> to vector<32x1xf32>
    %cst_281 = arith.constant 3.200000e+01 : f32
    %542 = vector.broadcast %cst_281 : f32 to vector<32x1xf32>
    %543 = arith.divf %541, %542 : vector<32x1xf32>
    %544 = arith.mulf %538, %538 : vector<32x1xf32>
    %545 = arith.subf %543, %544 : vector<32x1xf32>
    %546 = vector.broadcast %538 : vector<32x1xf32> to vector<32x32xf32>
    %547 = arith.subf %530, %546 : vector<32x32xf32>
    %cst_282 = arith.constant 9.99999974E-6 : f32
    %548 = vector.broadcast %cst_282 : f32 to vector<32x1xf32>
    %549 = arith.addf %545, %548 : vector<32x1xf32>
    %550 = math.rsqrt %549 : vector<32x1xf32>
    %551 = vector.broadcast %550 : vector<32x1xf32> to vector<32x32xf32>
    %552 = arith.mulf %547, %551 : vector<32x32xf32>
    %553 = vector.broadcast %532 : vector<1x32xf32> to vector<32x32xf32>
    %554 = arith.mulf %552, %553 : vector<32x32xf32>
    %555 = vector.broadcast %534 : vector<1x32xf32> to vector<32x32xf32>
    %556 = arith.addf %554, %555 : vector<32x32xf32>
    %557 = arith.truncf %556 : vector<32x32xf32> to vector<32x32xbf16>
    %c4 = arith.constant 4 : index
    %c0_283 = arith.constant 0 : index
    %c0_284 = arith.constant 0 : index
    %558 = vector.load %arg18[%c4, %c0_283, %c0_284] : memref<6x32x128xbf16, #tpu.memory_space<vmem>>, vector<1x32x128xbf16>
    %559 = vector.shape_cast %558 : vector<1x32x128xbf16> to vector<32x128xbf16>
    %cst_285 = arith.constant dense<0.000000e+00> : vector<32x128xf32>
    %560 = tpu.matmul %557, %559, %cst_285 {dimension_numbers = #tpu.dot_dimension_numbers<[1], [0], [0], [1], [0, 0, 1, 1], [], []>} : vector<32x32xbf16>, vector<32x128xbf16>, vector<32x128xf32> -> vector<32x128xf32>
    %c4_286 = arith.constant 4 : index
    %c0_287 = arith.constant 0 : index
    %c0_288 = arith.constant 0 : index
    %561 = vector.load %arg19[%c4_286, %c0_287, %c0_288] : memref<6x1x128xf32, #tpu.memory_space<vmem>>, vector<1x1x128xf32>
    %562 = vector.shape_cast %561 : vector<1x1x128xf32> to vector<1x128xf32>
    %563 = vector.broadcast %562 : vector<1x128xf32> to vector<32x128xf32>
    %564 = arith.addf %560, %563 : vector<32x128xf32>
    %565 = vector.extract_strided_slice %564 {offsets = [0, 0], sizes = [32, 32], strides = [1, 1]} : vector<32x128xf32> to vector<32x32xf32>
    %566 = vector.extract_strided_slice %564 {offsets = [0, 32], sizes = [32, 32], strides = [1, 1]} : vector<32x128xf32> to vector<32x32xf32>
    %567 = vector.extract_strided_slice %564 {offsets = [0, 64], sizes = [32, 32], strides = [1, 1]} : vector<32x128xf32> to vector<32x32xf32>
    %568 = arith.mulf %565, %566 : vector<32x32xf32>
    %c16_i32_289 = arith.constant 16 : i32
    %569 = tpu.dynamic_rotate %566 by %c16_i32_289 dim 0 : vector<32x32xf32>, i32 -> vector<32x32xf32>
    %570 = arith.mulf %565, %569 : vector<32x32xf32>
    %c16_i32_290 = arith.constant 16 : i32
    %571 = tpu.dynamic_rotate %567 by %c16_i32_290 dim 0 : vector<32x32xf32>, i32 -> vector<32x32xf32>
    %572 = tpu.concatenate %568, %570 in 1 : vector<32x32xf32>, vector<32x32xf32> -> vector<32x64xf32>
    %c0_291 = arith.constant 0 : index
    %c0_292 = arith.constant 0 : index
    %573 = vector.load %arg8[%c0_291, %c0_292] : memref<64x16xf32, #tpu.memory_space<vmem>>, vector<64x16xf32>
    %cst_293 = arith.constant dense<0.000000e+00> : vector<32x16xf32>
    %574 = tpu.matmul %572, %573, %cst_293 {dimension_numbers = #tpu.dot_dimension_numbers<[1], [0], [0], [1], [0, 0, 1, 1], [], []>} : vector<32x64xf32>, vector<64x16xf32>, vector<32x16xf32> -> vector<32x16xf32>
    %575 = vector.extract_strided_slice %574 {offsets = [0, 0], sizes = [32, 8], strides = [1, 1]} : vector<32x16xf32> to vector<32x8xf32>
    %576 = vector.extract_strided_slice %574 {offsets = [0, 8], sizes = [32, 8], strides = [1, 1]} : vector<32x16xf32> to vector<32x8xf32>
    %577 = arith.maximumf %575, %576 : vector<32x8xf32>
    %578 = arith.subf %575, %577 : vector<32x8xf32>
    %579 = math.exp %578 : vector<32x8xf32>
    %580 = arith.subf %576, %577 : vector<32x8xf32>
    %581 = math.exp %580 : vector<32x8xf32>
    %582 = arith.addf %579, %581 : vector<32x8xf32>
    %583 = tpu.reciprocal %582 {approx = true} : vector<32x8xf32> -> vector<32x8xf32>
    %584 = arith.mulf %579, %583 : vector<32x8xf32>
    %585 = arith.mulf %581, %583 : vector<32x8xf32>
    %586 = tpu.concatenate %584, %585 in 1 : vector<32x8xf32>, vector<32x8xf32> -> vector<32x16xf32>
    %c0_294 = arith.constant 0 : index
    %c0_295 = arith.constant 0 : index
    %587 = vector.load %arg9[%c0_294, %c0_295] : memref<16x64xf32, #tpu.memory_space<vmem>>, vector<16x64xf32>
    %cst_296 = arith.constant dense<0.000000e+00> : vector<32x64xf32>
    %588 = tpu.matmul %586, %587, %cst_296 {dimension_numbers = #tpu.dot_dimension_numbers<[1], [0], [0], [1], [0, 0, 1, 1], [], []>} : vector<32x16xf32>, vector<16x64xf32>, vector<32x64xf32> -> vector<32x64xf32>
    %589 = vector.extract_strided_slice %588 {offsets = [0, 0], sizes = [32, 32], strides = [1, 1]} : vector<32x64xf32> to vector<32x32xf32>
    %590 = arith.mulf %589, %567 : vector<32x32xf32>
    %591 = vector.extract_strided_slice %588 {offsets = [0, 32], sizes = [32, 32], strides = [1, 1]} : vector<32x64xf32> to vector<32x32xf32>
    %592 = arith.mulf %591, %571 : vector<32x32xf32>
    %593 = arith.addf %590, %592 : vector<32x32xf32>
    %594 = arith.truncf %593 : vector<32x32xf32> to vector<32x32xbf16>
    %c4_297 = arith.constant 4 : index
    %c0_298 = arith.constant 0 : index
    %c0_299 = arith.constant 0 : index
    %595 = vector.load %arg20[%c4_297, %c0_298, %c0_299] : memref<6x32x32xbf16, #tpu.memory_space<vmem>>, vector<1x32x32xbf16>
    %596 = vector.shape_cast %595 : vector<1x32x32xbf16> to vector<32x32xbf16>
    %cst_300 = arith.constant dense<0.000000e+00> : vector<32x32xf32>
    %597 = tpu.matmul %594, %596, %cst_300 {dimension_numbers = #tpu.dot_dimension_numbers<[1], [0], [0], [1], [0, 0, 1, 1], [], []>} : vector<32x32xbf16>, vector<32x32xbf16>, vector<32x32xf32> -> vector<32x32xf32>
    %c4_301 = arith.constant 4 : index
    %c0_302 = arith.constant 0 : index
    %c0_303 = arith.constant 0 : index
    %598 = vector.load %arg21[%c4_301, %c0_302, %c0_303] : memref<6x1x32xf32, #tpu.memory_space<vmem>>, vector<1x1x32xf32>
    %599 = vector.shape_cast %598 : vector<1x1x32xf32> to vector<1x32xf32>
    %600 = vector.broadcast %599 : vector<1x32xf32> to vector<32x32xf32>
    %601 = arith.addf %597, %600 : vector<32x32xf32>
    %602 = arith.addf %556, %601 : vector<32x32xf32>
    %c4_304 = arith.constant 4 : index
    %c0_305 = arith.constant 0 : index
    %c0_306 = arith.constant 0 : index
    %603 = vector.load %arg26[%c4_304, %c0_305, %c0_306] : memref<6x1x32xf32, #tpu.memory_space<vmem>>, vector<1x1x32xf32>
    %604 = vector.shape_cast %603 : vector<1x1x32xf32> to vector<1x32xf32>
    %c4_307 = arith.constant 4 : index
    %c0_308 = arith.constant 0 : index
    %c0_309 = arith.constant 0 : index
    %605 = vector.load %arg27[%c4_307, %c0_308, %c0_309] : memref<6x1x32xf32, #tpu.memory_space<vmem>>, vector<1x1x32xf32>
    %606 = vector.shape_cast %605 : vector<1x1x32xf32> to vector<1x32xf32>
    %cst_310 = arith.constant dense<0.000000e+00> : vector<32xf32>
    %607 = vector.multi_reduction <add>, %602, %cst_310 [1] : vector<32x32xf32> to vector<32xf32>
    %608 = vector.shape_cast %607 : vector<32xf32> to vector<32x1xf32>
    %cst_311 = arith.constant 3.200000e+01 : f32
    %609 = vector.broadcast %cst_311 : f32 to vector<32x1xf32>
    %610 = arith.divf %608, %609 : vector<32x1xf32>
    %611 = arith.mulf %602, %602 : vector<32x32xf32>
    %cst_312 = arith.constant dense<0.000000e+00> : vector<32xf32>
    %612 = vector.multi_reduction <add>, %611, %cst_312 [1] : vector<32x32xf32> to vector<32xf32>
    %613 = vector.shape_cast %612 : vector<32xf32> to vector<32x1xf32>
    %cst_313 = arith.constant 3.200000e+01 : f32
    %614 = vector.broadcast %cst_313 : f32 to vector<32x1xf32>
    %615 = arith.divf %613, %614 : vector<32x1xf32>
    %616 = arith.mulf %610, %610 : vector<32x1xf32>
    %617 = arith.subf %615, %616 : vector<32x1xf32>
    %618 = vector.broadcast %610 : vector<32x1xf32> to vector<32x32xf32>
    %619 = arith.subf %602, %618 : vector<32x32xf32>
    %cst_314 = arith.constant 9.99999974E-6 : f32
    %620 = vector.broadcast %cst_314 : f32 to vector<32x1xf32>
    %621 = arith.addf %617, %620 : vector<32x1xf32>
    %622 = math.rsqrt %621 : vector<32x1xf32>
    %623 = vector.broadcast %622 : vector<32x1xf32> to vector<32x32xf32>
    %624 = arith.mulf %619, %623 : vector<32x32xf32>
    %625 = vector.broadcast %604 : vector<1x32xf32> to vector<32x32xf32>
    %626 = arith.mulf %624, %625 : vector<32x32xf32>
    %627 = vector.broadcast %606 : vector<1x32xf32> to vector<32x32xf32>
    %628 = arith.addf %626, %627 : vector<32x32xf32>
    %629 = arith.truncf %628 : vector<32x32xf32> to vector<32x32xbf16>
    %c4_315 = arith.constant 4 : index
    %c0_316 = arith.constant 0 : index
    %c0_317 = arith.constant 0 : index
    %630 = vector.load %arg22[%c4_315, %c0_316, %c0_317] : memref<6x32x128xbf16, #tpu.memory_space<vmem>>, vector<1x32x128xbf16>
    %631 = vector.shape_cast %630 : vector<1x32x128xbf16> to vector<32x128xbf16>
    %cst_318 = arith.constant dense<0.000000e+00> : vector<32x128xf32>
    %632 = tpu.matmul %629, %631, %cst_318 {dimension_numbers = #tpu.dot_dimension_numbers<[1], [0], [0], [1], [0, 0, 1, 1], [], []>} : vector<32x32xbf16>, vector<32x128xbf16>, vector<32x128xf32> -> vector<32x128xf32>
    %c4_319 = arith.constant 4 : index
    %c0_320 = arith.constant 0 : index
    %c0_321 = arith.constant 0 : index
    %633 = vector.load %arg23[%c4_319, %c0_320, %c0_321] : memref<6x1x128xf32, #tpu.memory_space<vmem>>, vector<1x1x128xf32>
    %634 = vector.shape_cast %633 : vector<1x1x128xf32> to vector<1x128xf32>
    %635 = vector.broadcast %634 : vector<1x128xf32> to vector<32x128xf32>
    %636 = arith.addf %632, %635 : vector<32x128xf32>
    %cst_322 = arith.constant 5.000000e-01 : f32
    %637 = vector.broadcast %cst_322 : f32 to vector<32x128xf32>
    %638 = arith.mulf %637, %636 : vector<32x128xf32>
    %cst_323 = arith.constant 4.471500e-02 : f32
    %639 = vector.broadcast %cst_323 : f32 to vector<32x128xf32>
    %640 = arith.mulf %639, %636 : vector<32x128xf32>
    %641 = arith.mulf %640, %636 : vector<32x128xf32>
    %642 = arith.mulf %641, %636 : vector<32x128xf32>
    %643 = arith.addf %636, %642 : vector<32x128xf32>
    %cst_324 = arith.constant 0.797884583 : f32
    %644 = vector.broadcast %cst_324 : f32 to vector<32x128xf32>
    %645 = arith.mulf %644, %643 : vector<32x128xf32>
    %646 = math.tanh %645 : vector<32x128xf32>
    %cst_325 = arith.constant 1.000000e+00 : f32
    %647 = vector.broadcast %cst_325 : f32 to vector<32x128xf32>
    %648 = arith.addf %647, %646 : vector<32x128xf32>
    %649 = arith.mulf %638, %648 : vector<32x128xf32>
    %650 = arith.truncf %649 : vector<32x128xf32> to vector<32x128xbf16>
    %c4_326 = arith.constant 4 : index
    %c0_327 = arith.constant 0 : index
    %c0_328 = arith.constant 0 : index
    %651 = vector.load %arg24[%c4_326, %c0_327, %c0_328] : memref<6x128x32xbf16, #tpu.memory_space<vmem>>, vector<1x128x32xbf16>
    %652 = vector.shape_cast %651 : vector<1x128x32xbf16> to vector<128x32xbf16>
    %cst_329 = arith.constant dense<0.000000e+00> : vector<32x32xf32>
    %653 = tpu.matmul %650, %652, %cst_329 {dimension_numbers = #tpu.dot_dimension_numbers<[1], [0], [0], [1], [0, 0, 1, 1], [], []>} : vector<32x128xbf16>, vector<128x32xbf16>, vector<32x32xf32> -> vector<32x32xf32>
    %c4_330 = arith.constant 4 : index
    %c0_331 = arith.constant 0 : index
    %c0_332 = arith.constant 0 : index
    %654 = vector.load %arg25[%c4_330, %c0_331, %c0_332] : memref<6x1x32xf32, #tpu.memory_space<vmem>>, vector<1x1x32xf32>
    %655 = vector.shape_cast %654 : vector<1x1x32xf32> to vector<1x32xf32>
    %656 = vector.broadcast %655 : vector<1x32xf32> to vector<32x32xf32>
    %657 = arith.addf %653, %656 : vector<32x32xf32>
    %658 = arith.addf %628, %657 : vector<32x32xf32>
    %c4_333 = arith.constant 4 : index
    %c0_334 = arith.constant 0 : index
    %c0_335 = arith.constant 0 : index
    %659 = vector.load %arg28[%c4_333, %c0_334, %c0_335] : memref<6x1x32xf32, #tpu.memory_space<vmem>>, vector<1x1x32xf32>
    %660 = vector.shape_cast %659 : vector<1x1x32xf32> to vector<1x32xf32>
    %c4_336 = arith.constant 4 : index
    %c0_337 = arith.constant 0 : index
    %c0_338 = arith.constant 0 : index
    %661 = vector.load %arg29[%c4_336, %c0_337, %c0_338] : memref<6x1x32xf32, #tpu.memory_space<vmem>>, vector<1x1x32xf32>
    %662 = vector.shape_cast %661 : vector<1x1x32xf32> to vector<1x32xf32>
    %cst_339 = arith.constant dense<0.000000e+00> : vector<32xf32>
    %663 = vector.multi_reduction <add>, %658, %cst_339 [1] : vector<32x32xf32> to vector<32xf32>
    %664 = vector.shape_cast %663 : vector<32xf32> to vector<32x1xf32>
    %cst_340 = arith.constant 3.200000e+01 : f32
    %665 = vector.broadcast %cst_340 : f32 to vector<32x1xf32>
    %666 = arith.divf %664, %665 : vector<32x1xf32>
    %667 = arith.mulf %658, %658 : vector<32x32xf32>
    %cst_341 = arith.constant dense<0.000000e+00> : vector<32xf32>
    %668 = vector.multi_reduction <add>, %667, %cst_341 [1] : vector<32x32xf32> to vector<32xf32>
    %669 = vector.shape_cast %668 : vector<32xf32> to vector<32x1xf32>
    %cst_342 = arith.constant 3.200000e+01 : f32
    %670 = vector.broadcast %cst_342 : f32 to vector<32x1xf32>
    %671 = arith.divf %669, %670 : vector<32x1xf32>
    %672 = arith.mulf %666, %666 : vector<32x1xf32>
    %673 = arith.subf %671, %672 : vector<32x1xf32>
    %674 = vector.broadcast %666 : vector<32x1xf32> to vector<32x32xf32>
    %675 = arith.subf %658, %674 : vector<32x32xf32>
    %cst_343 = arith.constant 9.99999974E-6 : f32
    %676 = vector.broadcast %cst_343 : f32 to vector<32x1xf32>
    %677 = arith.addf %673, %676 : vector<32x1xf32>
    %678 = math.rsqrt %677 : vector<32x1xf32>
    %679 = vector.broadcast %678 : vector<32x1xf32> to vector<32x32xf32>
    %680 = arith.mulf %675, %679 : vector<32x32xf32>
    %681 = vector.broadcast %660 : vector<1x32xf32> to vector<32x32xf32>
    %682 = arith.mulf %680, %681 : vector<32x32xf32>
    %683 = vector.broadcast %662 : vector<1x32xf32> to vector<32x32xf32>
    %684 = arith.addf %682, %683 : vector<32x32xf32>
    %685 = arith.truncf %684 : vector<32x32xf32> to vector<32x32xbf16>
    %c5 = arith.constant 5 : index
    %c0_344 = arith.constant 0 : index
    %c0_345 = arith.constant 0 : index
    %686 = vector.load %arg18[%c5, %c0_344, %c0_345] : memref<6x32x128xbf16, #tpu.memory_space<vmem>>, vector<1x32x128xbf16>
    %687 = vector.shape_cast %686 : vector<1x32x128xbf16> to vector<32x128xbf16>
    %cst_346 = arith.constant dense<0.000000e+00> : vector<32x128xf32>
    %688 = tpu.matmul %685, %687, %cst_346 {dimension_numbers = #tpu.dot_dimension_numbers<[1], [0], [0], [1], [0, 0, 1, 1], [], []>} : vector<32x32xbf16>, vector<32x128xbf16>, vector<32x128xf32> -> vector<32x128xf32>
    %c5_347 = arith.constant 5 : index
    %c0_348 = arith.constant 0 : index
    %c0_349 = arith.constant 0 : index
    %689 = vector.load %arg19[%c5_347, %c0_348, %c0_349] : memref<6x1x128xf32, #tpu.memory_space<vmem>>, vector<1x1x128xf32>
    %690 = vector.shape_cast %689 : vector<1x1x128xf32> to vector<1x128xf32>
    %691 = vector.broadcast %690 : vector<1x128xf32> to vector<32x128xf32>
    %692 = arith.addf %688, %691 : vector<32x128xf32>
    %693 = vector.extract_strided_slice %692 {offsets = [0, 0], sizes = [32, 32], strides = [1, 1]} : vector<32x128xf32> to vector<32x32xf32>
    %694 = vector.extract_strided_slice %692 {offsets = [0, 32], sizes = [32, 32], strides = [1, 1]} : vector<32x128xf32> to vector<32x32xf32>
    %695 = vector.extract_strided_slice %692 {offsets = [0, 64], sizes = [32, 32], strides = [1, 1]} : vector<32x128xf32> to vector<32x32xf32>
    %696 = arith.mulf %693, %694 : vector<32x32xf32>
    %c16_i32_350 = arith.constant 16 : i32
    %697 = tpu.dynamic_rotate %694 by %c16_i32_350 dim 0 : vector<32x32xf32>, i32 -> vector<32x32xf32>
    %698 = arith.mulf %693, %697 : vector<32x32xf32>
    %c16_i32_351 = arith.constant 16 : i32
    %699 = tpu.dynamic_rotate %695 by %c16_i32_351 dim 0 : vector<32x32xf32>, i32 -> vector<32x32xf32>
    %700 = tpu.concatenate %696, %698 in 1 : vector<32x32xf32>, vector<32x32xf32> -> vector<32x64xf32>
    %c0_352 = arith.constant 0 : index
    %c0_353 = arith.constant 0 : index
    %701 = vector.load %arg8[%c0_352, %c0_353] : memref<64x16xf32, #tpu.memory_space<vmem>>, vector<64x16xf32>
    %cst_354 = arith.constant dense<0.000000e+00> : vector<32x16xf32>
    %702 = tpu.matmul %700, %701, %cst_354 {dimension_numbers = #tpu.dot_dimension_numbers<[1], [0], [0], [1], [0, 0, 1, 1], [], []>} : vector<32x64xf32>, vector<64x16xf32>, vector<32x16xf32> -> vector<32x16xf32>
    %703 = vector.extract_strided_slice %702 {offsets = [0, 0], sizes = [32, 8], strides = [1, 1]} : vector<32x16xf32> to vector<32x8xf32>
    %704 = vector.extract_strided_slice %702 {offsets = [0, 8], sizes = [32, 8], strides = [1, 1]} : vector<32x16xf32> to vector<32x8xf32>
    %705 = arith.maximumf %703, %704 : vector<32x8xf32>
    %706 = arith.subf %703, %705 : vector<32x8xf32>
    %707 = math.exp %706 : vector<32x8xf32>
    %708 = arith.subf %704, %705 : vector<32x8xf32>
    %709 = math.exp %708 : vector<32x8xf32>
    %710 = arith.addf %707, %709 : vector<32x8xf32>
    %711 = tpu.reciprocal %710 {approx = true} : vector<32x8xf32> -> vector<32x8xf32>
    %712 = arith.mulf %707, %711 : vector<32x8xf32>
    %713 = arith.mulf %709, %711 : vector<32x8xf32>
    %714 = tpu.concatenate %712, %713 in 1 : vector<32x8xf32>, vector<32x8xf32> -> vector<32x16xf32>
    %c0_355 = arith.constant 0 : index
    %c0_356 = arith.constant 0 : index
    %715 = vector.load %arg9[%c0_355, %c0_356] : memref<16x64xf32, #tpu.memory_space<vmem>>, vector<16x64xf32>
    %cst_357 = arith.constant dense<0.000000e+00> : vector<32x64xf32>
    %716 = tpu.matmul %714, %715, %cst_357 {dimension_numbers = #tpu.dot_dimension_numbers<[1], [0], [0], [1], [0, 0, 1, 1], [], []>} : vector<32x16xf32>, vector<16x64xf32>, vector<32x64xf32> -> vector<32x64xf32>
    %717 = vector.extract_strided_slice %716 {offsets = [0, 0], sizes = [32, 32], strides = [1, 1]} : vector<32x64xf32> to vector<32x32xf32>
    %718 = arith.mulf %717, %695 : vector<32x32xf32>
    %719 = vector.extract_strided_slice %716 {offsets = [0, 32], sizes = [32, 32], strides = [1, 1]} : vector<32x64xf32> to vector<32x32xf32>
    %720 = arith.mulf %719, %699 : vector<32x32xf32>
    %721 = arith.addf %718, %720 : vector<32x32xf32>
    %722 = arith.truncf %721 : vector<32x32xf32> to vector<32x32xbf16>
    %c5_358 = arith.constant 5 : index
    %c0_359 = arith.constant 0 : index
    %c0_360 = arith.constant 0 : index
    %723 = vector.load %arg20[%c5_358, %c0_359, %c0_360] : memref<6x32x32xbf16, #tpu.memory_space<vmem>>, vector<1x32x32xbf16>
    %724 = vector.shape_cast %723 : vector<1x32x32xbf16> to vector<32x32xbf16>
    %cst_361 = arith.constant dense<0.000000e+00> : vector<32x32xf32>
    %725 = tpu.matmul %722, %724, %cst_361 {dimension_numbers = #tpu.dot_dimension_numbers<[1], [0], [0], [1], [0, 0, 1, 1], [], []>} : vector<32x32xbf16>, vector<32x32xbf16>, vector<32x32xf32> -> vector<32x32xf32>
    %c5_362 = arith.constant 5 : index
    %c0_363 = arith.constant 0 : index
    %c0_364 = arith.constant 0 : index
    %726 = vector.load %arg21[%c5_362, %c0_363, %c0_364] : memref<6x1x32xf32, #tpu.memory_space<vmem>>, vector<1x1x32xf32>
    %727 = vector.shape_cast %726 : vector<1x1x32xf32> to vector<1x32xf32>
    %728 = vector.broadcast %727 : vector<1x32xf32> to vector<32x32xf32>
    %729 = arith.addf %725, %728 : vector<32x32xf32>
    %730 = arith.addf %684, %729 : vector<32x32xf32>
    %c5_365 = arith.constant 5 : index
    %c0_366 = arith.constant 0 : index
    %c0_367 = arith.constant 0 : index
    %731 = vector.load %arg26[%c5_365, %c0_366, %c0_367] : memref<6x1x32xf32, #tpu.memory_space<vmem>>, vector<1x1x32xf32>
    %732 = vector.shape_cast %731 : vector<1x1x32xf32> to vector<1x32xf32>
    %c5_368 = arith.constant 5 : index
    %c0_369 = arith.constant 0 : index
    %c0_370 = arith.constant 0 : index
    %733 = vector.load %arg27[%c5_368, %c0_369, %c0_370] : memref<6x1x32xf32, #tpu.memory_space<vmem>>, vector<1x1x32xf32>
    %734 = vector.shape_cast %733 : vector<1x1x32xf32> to vector<1x32xf32>
    %cst_371 = arith.constant dense<0.000000e+00> : vector<32xf32>
    %735 = vector.multi_reduction <add>, %730, %cst_371 [1] : vector<32x32xf32> to vector<32xf32>
    %736 = vector.shape_cast %735 : vector<32xf32> to vector<32x1xf32>
    %cst_372 = arith.constant 3.200000e+01 : f32
    %737 = vector.broadcast %cst_372 : f32 to vector<32x1xf32>
    %738 = arith.divf %736, %737 : vector<32x1xf32>
    %739 = arith.mulf %730, %730 : vector<32x32xf32>
    %cst_373 = arith.constant dense<0.000000e+00> : vector<32xf32>
    %740 = vector.multi_reduction <add>, %739, %cst_373 [1] : vector<32x32xf32> to vector<32xf32>
    %741 = vector.shape_cast %740 : vector<32xf32> to vector<32x1xf32>
    %cst_374 = arith.constant 3.200000e+01 : f32
    %742 = vector.broadcast %cst_374 : f32 to vector<32x1xf32>
    %743 = arith.divf %741, %742 : vector<32x1xf32>
    %744 = arith.mulf %738, %738 : vector<32x1xf32>
    %745 = arith.subf %743, %744 : vector<32x1xf32>
    %746 = vector.broadcast %738 : vector<32x1xf32> to vector<32x32xf32>
    %747 = arith.subf %730, %746 : vector<32x32xf32>
    %cst_375 = arith.constant 9.99999974E-6 : f32
    %748 = vector.broadcast %cst_375 : f32 to vector<32x1xf32>
    %749 = arith.addf %745, %748 : vector<32x1xf32>
    %750 = math.rsqrt %749 : vector<32x1xf32>
    %751 = vector.broadcast %750 : vector<32x1xf32> to vector<32x32xf32>
    %752 = arith.mulf %747, %751 : vector<32x32xf32>
    %753 = vector.broadcast %732 : vector<1x32xf32> to vector<32x32xf32>
    %754 = arith.mulf %752, %753 : vector<32x32xf32>
    %755 = vector.broadcast %734 : vector<1x32xf32> to vector<32x32xf32>
    %756 = arith.addf %754, %755 : vector<32x32xf32>
    %757 = arith.truncf %756 : vector<32x32xf32> to vector<32x32xbf16>
    %c5_376 = arith.constant 5 : index
    %c0_377 = arith.constant 0 : index
    %c0_378 = arith.constant 0 : index
    %758 = vector.load %arg22[%c5_376, %c0_377, %c0_378] : memref<6x32x128xbf16, #tpu.memory_space<vmem>>, vector<1x32x128xbf16>
    %759 = vector.shape_cast %758 : vector<1x32x128xbf16> to vector<32x128xbf16>
    %cst_379 = arith.constant dense<0.000000e+00> : vector<32x128xf32>
    %760 = tpu.matmul %757, %759, %cst_379 {dimension_numbers = #tpu.dot_dimension_numbers<[1], [0], [0], [1], [0, 0, 1, 1], [], []>} : vector<32x32xbf16>, vector<32x128xbf16>, vector<32x128xf32> -> vector<32x128xf32>
    %c5_380 = arith.constant 5 : index
    %c0_381 = arith.constant 0 : index
    %c0_382 = arith.constant 0 : index
    %761 = vector.load %arg23[%c5_380, %c0_381, %c0_382] : memref<6x1x128xf32, #tpu.memory_space<vmem>>, vector<1x1x128xf32>
    %762 = vector.shape_cast %761 : vector<1x1x128xf32> to vector<1x128xf32>
    %763 = vector.broadcast %762 : vector<1x128xf32> to vector<32x128xf32>
    %764 = arith.addf %760, %763 : vector<32x128xf32>
    %cst_383 = arith.constant 5.000000e-01 : f32
    %765 = vector.broadcast %cst_383 : f32 to vector<32x128xf32>
    %766 = arith.mulf %765, %764 : vector<32x128xf32>
    %cst_384 = arith.constant 4.471500e-02 : f32
    %767 = vector.broadcast %cst_384 : f32 to vector<32x128xf32>
    %768 = arith.mulf %767, %764 : vector<32x128xf32>
    %769 = arith.mulf %768, %764 : vector<32x128xf32>
    %770 = arith.mulf %769, %764 : vector<32x128xf32>
    %771 = arith.addf %764, %770 : vector<32x128xf32>
    %cst_385 = arith.constant 0.797884583 : f32
    %772 = vector.broadcast %cst_385 : f32 to vector<32x128xf32>
    %773 = arith.mulf %772, %771 : vector<32x128xf32>
    %774 = math.tanh %773 : vector<32x128xf32>
    %cst_386 = arith.constant 1.000000e+00 : f32
    %775 = vector.broadcast %cst_386 : f32 to vector<32x128xf32>
    %776 = arith.addf %775, %774 : vector<32x128xf32>
    %777 = arith.mulf %766, %776 : vector<32x128xf32>
    %778 = arith.truncf %777 : vector<32x128xf32> to vector<32x128xbf16>
    %c5_387 = arith.constant 5 : index
    %c0_388 = arith.constant 0 : index
    %c0_389 = arith.constant 0 : index
    %779 = vector.load %arg24[%c5_387, %c0_388, %c0_389] : memref<6x128x32xbf16, #tpu.memory_space<vmem>>, vector<1x128x32xbf16>
    %780 = vector.shape_cast %779 : vector<1x128x32xbf16> to vector<128x32xbf16>
    %cst_390 = arith.constant dense<0.000000e+00> : vector<32x32xf32>
    %781 = tpu.matmul %778, %780, %cst_390 {dimension_numbers = #tpu.dot_dimension_numbers<[1], [0], [0], [1], [0, 0, 1, 1], [], []>} : vector<32x128xbf16>, vector<128x32xbf16>, vector<32x32xf32> -> vector<32x32xf32>
    %c5_391 = arith.constant 5 : index
    %c0_392 = arith.constant 0 : index
    %c0_393 = arith.constant 0 : index
    %782 = vector.load %arg25[%c5_391, %c0_392, %c0_393] : memref<6x1x32xf32, #tpu.memory_space<vmem>>, vector<1x1x32xf32>
    %783 = vector.shape_cast %782 : vector<1x1x32xf32> to vector<1x32xf32>
    %784 = vector.broadcast %783 : vector<1x32xf32> to vector<32x32xf32>
    %785 = arith.addf %781, %784 : vector<32x32xf32>
    %786 = arith.addf %756, %785 : vector<32x32xf32>
    %c5_394 = arith.constant 5 : index
    %c0_395 = arith.constant 0 : index
    %c0_396 = arith.constant 0 : index
    %787 = vector.load %arg28[%c5_394, %c0_395, %c0_396] : memref<6x1x32xf32, #tpu.memory_space<vmem>>, vector<1x1x32xf32>
    %788 = vector.shape_cast %787 : vector<1x1x32xf32> to vector<1x32xf32>
    %c5_397 = arith.constant 5 : index
    %c0_398 = arith.constant 0 : index
    %c0_399 = arith.constant 0 : index
    %789 = vector.load %arg29[%c5_397, %c0_398, %c0_399] : memref<6x1x32xf32, #tpu.memory_space<vmem>>, vector<1x1x32xf32>
    %790 = vector.shape_cast %789 : vector<1x1x32xf32> to vector<1x32xf32>
    %cst_400 = arith.constant dense<0.000000e+00> : vector<32xf32>
    %791 = vector.multi_reduction <add>, %786, %cst_400 [1] : vector<32x32xf32> to vector<32xf32>
    %792 = vector.shape_cast %791 : vector<32xf32> to vector<32x1xf32>
    %cst_401 = arith.constant 3.200000e+01 : f32
    %793 = vector.broadcast %cst_401 : f32 to vector<32x1xf32>
    %794 = arith.divf %792, %793 : vector<32x1xf32>
    %795 = arith.mulf %786, %786 : vector<32x32xf32>
    %cst_402 = arith.constant dense<0.000000e+00> : vector<32xf32>
    %796 = vector.multi_reduction <add>, %795, %cst_402 [1] : vector<32x32xf32> to vector<32xf32>
    %797 = vector.shape_cast %796 : vector<32xf32> to vector<32x1xf32>
    %cst_403 = arith.constant 3.200000e+01 : f32
    %798 = vector.broadcast %cst_403 : f32 to vector<32x1xf32>
    %799 = arith.divf %797, %798 : vector<32x1xf32>
    %800 = arith.mulf %794, %794 : vector<32x1xf32>
    %801 = arith.subf %799, %800 : vector<32x1xf32>
    %802 = vector.broadcast %794 : vector<32x1xf32> to vector<32x32xf32>
    %803 = arith.subf %786, %802 : vector<32x32xf32>
    %cst_404 = arith.constant 9.99999974E-6 : f32
    %804 = vector.broadcast %cst_404 : f32 to vector<32x1xf32>
    %805 = arith.addf %801, %804 : vector<32x1xf32>
    %806 = math.rsqrt %805 : vector<32x1xf32>
    %807 = vector.broadcast %806 : vector<32x1xf32> to vector<32x32xf32>
    %808 = arith.mulf %803, %807 : vector<32x32xf32>
    %809 = vector.broadcast %788 : vector<1x32xf32> to vector<32x32xf32>
    %810 = arith.mulf %808, %809 : vector<32x32xf32>
    %811 = vector.broadcast %790 : vector<1x32xf32> to vector<32x32xf32>
    %812 = arith.addf %810, %811 : vector<32x32xf32>
    %813 = arith.truncf %812 : vector<32x32xf32> to vector<32x32xbf16>
    %c0_405 = arith.constant 0 : index
    %c0_406 = arith.constant 0 : index
    %814 = vector.load %arg30[%c0_405, %c0_406] : memref<32x8xbf16, #tpu.memory_space<vmem>>, vector<32x8xbf16>
    %cst_407 = arith.constant dense<0.000000e+00> : vector<32x8xf32>
    %815 = tpu.matmul %813, %814, %cst_407 {dimension_numbers = #tpu.dot_dimension_numbers<[1], [0], [0], [1], [0, 0, 1, 1], [], []>} : vector<32x32xbf16>, vector<32x8xbf16>, vector<32x8xf32> -> vector<32x8xf32>
    %c0_408 = arith.constant 0 : index
    %c0_409 = arith.constant 0 : index
    %816 = vector.load %arg31[%c0_408, %c0_409] : memref<1x8xf32, #tpu.memory_space<vmem>>, vector<1x8xf32>
    %817 = vector.broadcast %816 : vector<1x8xf32> to vector<32x8xf32>
    %818 = arith.addf %815, %817 : vector<32x8xf32>
    %c0_410 = arith.constant 0 : index
    %c0_411 = arith.constant 0 : index
    %819 = vector.load %arg32[%c0_410, %c0_411] : memref<32x8xf32, #tpu.memory_space<vmem>>, vector<32x8xf32>
    tpu.vector_store %arg32[%c0_410, %c0_411], %818 {strides = array<i32>} : memref<32x8xf32, #tpu.memory_space<vmem>>, vector<32x8xf32>,
    return
  }
}

</mosaic_0001>

<bundles_post_ra>
// kernel: transformer_encoder_forward.1
= control target key start
LH: loop header
LB: loop body
LE: loop exit
PB: predicated region body
PF: predicated region fallthrough
CT: control target
= control target key end

     0   :  { %v8637_v0 = vmov 0   ;;  %s8638_s3 = smov 1   ;;  %v8639_v1 = vmov 0.0|0.0   ;;  %s8640_s7 = smov 10   ;;  %vm8641_vm0 = vmmov 0   ;;  %v8642_v2 = vmov 0.0   ;;  %s10117_s0 = inlined_call_operand.smem [shape: u32[33], index: -1, kind: input, shape index: {}] }
   0x1   :  { %8260 = vset.pattern.permute.xlu0 %v8637_v0  ;;  %s6827_s6 = sld [smem:[%s10117_s0 + %s8638_s3]]   ;;  %8082 = vmatprep.subr.bf16.mxu0 %v8639_v1  ;;  %s8643_s11 = smov 2   ;;  %vm145_vm1 = vcmask 130048   ;;  %vm229_vm2 = vcmask 64512   ;;  %vm358_vm3 = vcmask 261120   ;;  %vm414_vm4 = vcmask 15360  }
   0x2   :  { %s6836_s10 = sld [smem:[%s10117_s0 + %s8640_s7]]   ;;  %7568 = vmatprep.mubr.msk.f32.mxu0 %vm8641_vm0, %v8642_v2  ;;  %s8644_s15 = smov 12   ;;  %vm427_vm5 = vcmask 1041408   ;;  %vm975_vm6 = vcmask 523264  }
   0x3   :  { %s6828_s14 = sld [smem:[%s10117_s0 + %s8643_s11]]   ;;  %s8645_s22 = smov 16  }
   0x4   :  { %s6838_s18 = sld [smem:[%s10117_s0 + %s8644_s15]]   ;;  %s8646_s26 = smov 14  }
   0x5   :  { %s1_s21 = sld [smem:[%s10117_s0]]   ;;  %s8647_s30 = smov 15  }
   0x6   :  { %s6842_s25 = sld [smem:[%s10117_s0 + %s8645_s22]]   ;;  %s8648_s4 = smov 5  }
   0x7   :  { %v311_v3 = vld [vmem:[%s6827_s6] sm:$0x3]  ;;  %s6840_s29 = sld [smem:[%s10117_s0 + %s8646_s26]]   ;;  %s8649_s8 = smov 11  }
   0x8   :  { %v136_v4 = vld [vmem:[%s6836_s10] sm:$0xff]  ;;  %v137_v5 = vld [vmem:[%s6836_s10 + $0x8] sm:$0xff]  ;;  %315 = vperm.xlu0 %8260, %v311_v3   ;;  %s6841_s3 = sld [smem:[%s10117_s0 + %s8647_s30]]   ;;  %s8650_s12 = smov 13  }
   0x9   :  { %v8083_v6 = vpack.c.bf16 %v137_v5, %v136_v4  ;;  %v135_v8 = vld [vmem:[%s6828_s14] sm:$0x3]  ;;  %s8714_s7 = sld [smem:[%s10117_s0 + %s8648_s4]]   ;;  %s8651_s16 = smov 96  }
   0xa   :  { %v221_v7 = vld [vmem:[%s6838_s18] sm:$0xff]  ;;  %s6837_s11 = sld [smem:[%s10117_s0 + %s8649_s8]]   ;;  %s8652_s17 = smov 4  }
   0xb   :  { %8084 = vmatpush3.bf16.msra.mxu0 %v8083_v6  ;;  %7571 = vmatprep.subr.mxu1 %v221_v7  ;;  %v219_v9 = vld [vmem:[%s1_s21] sm:$0xff]  ;;  %v220_v10 = vld [vmem:[%s1_s21 + $0x8] sm:$0xff]  ;;  %s6839_s15 = sld [smem:[%s10117_s0 + %s8650_s12]]   ;;  %s8653_s21 = smov 17  }
   0xc   :  { %7572 = vmatpush3.msra.mxu1 %v221_v7  ;;  %7573 = vmatprep.mubr.msk.f32.mxu1 %vm229_vm2, %v219_v9  ;;  %v8261_v11 = vld [vmem:[%s6842_s25] sm:$0xff]   ;;  %v8262_v12 = vld [vmem:[%s6842_s25 + $0x8] sm:$0xff]   ;;  %s6830_s20 = sld [smem:[%s10117_s0 + %s8652_s17]]   ;;  %s8654_s25 = smov 6  }
   0xd   :  { %7576 = vmatprep.subr.bf16.mxu1 %v8642_v2  ;;  %7574 = vmatmul.mubr.msk.f32.vlgmr.msra.gmra.mrb[0].mxu1 %vm229_vm2, %v220_v10  ;;  %v6864_v13 = vld [vmem:[%s6840_s29] ss:$0 sm:$0xff]  ;;  %s6843_s24 = sld [smem:[%s10117_s0 + %s8653_s21]]   ;;  %s8655_s29 = smov 7  }
   0xe   :  { %7569 = vmatmul.mubr.msk.f32.vlgmr.msra.gmra.mrb[0].mxu0 %vm145_vm1, %v135_v8  ;;  %7577 = vmatpush3.bf16.msra.mxu1 %v8261_v11  ;;  %v6865_v14 = vld [vmem:[%s6841_s3] ss:$0 sm:$0xff]  ;;  %s6832_s28 = sld [smem:[%s10117_s0 + %s8654_s25]]   ;;  %s8656_s3 = smov 18  }
   0xf   :  { %7580 = vmatprep.mubr.msk.bf16.mxu1 %vm8641_vm0, %v8642_v2  ;;  %7578 = vmatprep.subr.bf16.mxu1 %v8642_v2  ;;  %v407_v20 = vld [vmem:[%s8714_s7] sm:$0xff]  ;;  %v408_v32 = vld [vmem:[%s8714_s7 + $0x8] sm:$0xff]  ;;  %v409_v33 = vld [vmem:[%s8714_s7 + $0x10] sm:$0xff]  ;;  %s6833_s2 = sld [smem:[%s10117_s0 + %s8655_s29]]   ;;  %s8661_s21 = smov 120  }
  0x10   :  { %7586 = vmatprep.mubr.msk.f32.mxu0 %vm414_vm4, %v407_v20  ;;  %v6859_v21 = vld [vmem:[%s6837_s11] ss:$0 sm:$0xff]  ;;  %v410_v34 = vld [vmem:[%s8714_s7 + $0x18] sm:$0xff]  ;;  %s8764_s6 = sld [smem:[%s10117_s0 + %s8656_s3]]   ;;  %s8657_s7 = smov 3  }
  0x11   :  { %v6861_v22 = vld [vmem:[%s6839_s15] ss:$0 sm:$0xff]  ;;  %s6829_s10 = sld [smem:[%s10117_s0 + %s8657_s7]]   ;;  %s8658_s11 = smov 19  }
  0x12   :  { %7579 = vmatpush3.bf16.msra.mxu1 %v8262_v12  ;;  %v403_v35 = vld [vmem:[%s6830_s20] sm:$0xff]  ;;  %v404_v36 = vld [vmem:[%s6830_s20 + $0x8] sm:$0xff]  ;;  %v405_v37 = vld [vmem:[%s6830_s20 + $0x10] sm:$0xff]  ;;  %s8788_s14 = sld [smem:[%s10117_s0 + %s8658_s11]]   ;;  %s8659_s15 = smov 8  }
  0x13   :  { %v6866_v38 = vld [vmem:[%s6843_s24] ss:$0 sm:$0xff]  ;;  %v406_v39 = vld [vmem:[%s6830_s20 + $0x18] sm:$0xff]  ;;  %s6834_s19 = sld [smem:[%s10117_s0 + %s8659_s15]]   ;;  %s8660_s20 = smov 32  }
  0x14   :  { %v614_v40 = vld [vmem:[%s6832_s28] sm:$0xff]  ;;  %v615_v47 = vld [vmem:[%s6832_s28 + $0x8] sm:$0xff]  ;;  %v616_v48 = vld [vmem:[%s6832_s28 + $0x10] sm:$0xff]  ;;  %s8662_s22 = smov 9   ;;  %s8663_s26 = smov 64  }
  0x15   :  { %v617_v49 = vld [vmem:[%s6832_s28 + $0x18] sm:$0xff]  ;;  %v722_v50 = vld [vmem:[%s6833_s2] sm:$0xff]  ;;  %v723_v51 = vld [vmem:[%s6833_s2 + $0x8] sm:$0xff]  ;;  %s6835_s25 = sld [smem:[%s10117_s0 + %s8662_s22]]   ;;  %s8664_s27 = smov 20  }
  0x16   :  { %v724_v52 = vld [vmem:[%s6833_s2 + $0x10] sm:$0xff]  ;;  %v725_v53 = vld [vmem:[%s6833_s2 + $0x18] sm:$0xff]  ;;  %v8263_v54 = vld [vmem:[%s8764_s6] sm:$0xff]   ;;  %s8893_s30 = sld [smem:[%s10117_s0 + %s8664_s27]]   ;;  %s8665_s1 = smov 21  }
  0x17   :  { %v8264_v55 = vld [vmem:[%s8764_s6 + $0x8] sm:$0xff]   ;;  %v827_v57 = vld [vmem:[%s6829_s10] sm:$0xff]  ;;  %v830_v62 = vld [vmem:[%s6829_s10 + $0x18] sm:$0xff]  ;;  %s8906_s4 = sld [smem:[%s10117_s0 + %s8665_s1]]   ;;  %s8666_s5 = smov 22  }
  0x18   :  { %v828_v56 = vld [vmem:[%s6829_s10 + $0x8] sm:$0xff]  ;;  %v829_v63 = vld [vmem:[%s6829_s10 + $0x10] sm:$0xff]  ;;  %v6889_v6 = vld [vmem:[%s8788_s14] ss:$0 sm:$0xff]  ;;  %s8944_s9 = sld [smem:[%s10117_s0 + %s8666_s5]]   ;;  %s8667_s10 = smov 26  }
  0x19   :  { %s8951_s13 = sld [smem:[%s10117_s0 + %s8667_s10]]   ;;  %s8668_s17 = smov 27  }
  0x1a   :  { %s8956_s22 = sld [smem:[%s10117_s0 + %s8668_s17]]   ;;  %s8669_s23 = smov 24  }
  0x1b   :  { %s8981_s27 = sld [smem:[%s10117_s0 + %s8669_s23]]   ;;  %s8670_s28 = smov 23  }
  0x1c   :  { %s8994_s2 = sld [smem:[%s10117_s0 + %s8670_s28]]   ;;  %s8671_s3 = smov 25  }
  0x1d   :  { %s9000_s8 = sld [smem:[%s10117_s0 + %s8671_s3]]   ;;  %s8672_s10 = smov 28  }
  0x1e   :  { %s9041_s17 = sld [smem:[%s10117_s0 + %s8672_s10]]   ;;  %s8673_s18 = smov 29  }
  0x1f   :  { %s9046_s24 = sld [smem:[%s10117_s0 + %s8673_s18]]  }
  0x87   :  { %v316_v15 = vpop.permute.xlu0 %315 }
  0x88   :  { %v324_v16 = vmul.f32 %v6864_v13, %v316_v15  ;;  %v968_v15 = vld [vmem:[%s6834_s19 + $0x8] sm:$0xff] }
  0x8a   :  { %v332_v17 = vadd.f32 %v6865_v14, %v324_v16  ;;  %v967_v14 = vld [vmem:[%s6834_s19] sm:$0xff]  ;;  %v969_v16 = vld [vmem:[%s6834_s19 + $0x10] sm:$0xff] }
  0x8c   :  { %v333_v18 = vmax.f32 %v332_v17, 0.0  ;;  %v8807_v17 = vpack.c.bf16 %v968_v15, %v967_v14 }
  0x8e   :  { %v334_v19 = vpack.c.bf16 %v333_v18, %v333_v18  ;;  %v970_v18 = vld [vmem:[%s6834_s19 + $0x18] sm:$0xff]  ;;  %8090 = vmatprep.subr.bf16.mxu1 %v8807_v17 }
  0x8f   :  { %v8811_v20 = vpack.c.bf16 %v970_v18, %v969_v16 }
  0x90   :  { %7581 = vmatmul.mubr.msk.bf16.vlgmr.msra.gmra.mrb[4].mxu1 %vm358_vm3, %v334_v19 }
  0x91   :  { %8092 = vmatpush3.bf16.msra.mxu1 %v8807_v17 }
  0x92   :  { %8094 = vmatprep.subr.bf16.mxu1 %v8811_v20 }
  0x95   :  { %8096 = vmatpush3.bf16.msra.mxu1 %v8811_v20 }
  0xe0   :  { %v7575_v26 = vpop.f32.mrb[0].mxu1 }
  0xe1   :  { %v215_v23 = vpop.f32.mrb[0].mxu0  ;;  %v308_v27 = vadd.f32 %v7575_v26, %v6861_v22  ;;  %v302_v28 = vpop.f32.mrb[1].mxu1 }
  0xe2   :  { %v216_v24 = vadd.f32 %v6859_v21, %v215_v23  ;;  %v7570_v25 = vpop.f32.mrb[1].mxu0  ;;  %v303_v29 = vadd.f32 %v6861_v22, %v302_v28  ;;  %v971_v21 = vld [vmem:[%s6834_s19 + $0x20] sm:$0xff]  ;;  %v972_v22 = vld [vmem:[%s6834_s19 + $0x28] sm:$0xff] }
  0xe3   :  { %v8818_v23 = vpack.c.bf16 %v972_v22, %v971_v21  ;;  %v974_v25 = vld [vmem:[%s6834_s19 + $0x38] sm:$0xff] }
  0xe4   :  { %412 = vrot.lane.b32.xlu0 %v216_v24, %s8651_s16  ;;  %v8085_v30 = vpack.c.bf16 %v308_v27, %v303_v29 }
  0xe5   :  { %8098 = vmatprep.subr.bf16.mxu1 %v8818_v23 }
  0xe6   :  { %8100 = vmatpush3.bf16.msra.mxu1 %v8818_v23 }
 0x156   :  { %v413_v31 = vpop.permute.xlu0 %412 }
 0x157   :  { %7584 = vmatprep.subr.msk.mxu0 %vm427_vm5, %v413_v31 }
 0x158   :  { %7585 = vmatpush3.msk.msra.mxu0 %vm427_vm5, %v413_v31 }
 0x159   :  { %7592 = vmatprep.subr.msk.mxu0 %vm427_vm5, %v216_v24  ;;  %7587 = vmatmul.mubr.msk.f32.vlgmr.msra.gmra.mrb[2].mxu0 %vm414_vm4, %v408_v32 }
 0x15a   :  { %7593 = vmatpush3.msk.msra.mxu0 %vm427_vm5, %v216_v24  ;;  %7589 = vmatprep.mubr.msk.f32.mxu0 %vm414_vm4, %v409_v33  ;;  %v973_v24 = vld [vmem:[%s6834_s19 + $0x30] sm:$0xff] }
 0x15b   :  { %v8823_v26 = vpack.c.bf16 %v974_v25, %v973_v24 }
 0x15d   :  { %7590 = vmatmul.mubr.msk.f32.gmra.mrb[4].mxu0 %vm414_vm4, %v410_v34  ;;  %8102 = vmatprep.subr.bf16.mxu1 %v8823_v26 }
 0x15e   :  { %7594 = vmatprep.mubr.msk.f32.mxu0 %vm414_vm4, %v403_v35  ;;  %8104 = vmatpush3.bf16.msra.mxu1 %v8823_v26 }
 0x161   :  { %7595 = vmatmul.mubr.msk.f32.vlgmr.msra.gmra.mrb[2].mxu0 %vm414_vm4, %v404_v36 }
 0x162   :  { %7597 = vmatprep.mubr.msk.f32.mxu0 %vm414_vm4, %v405_v37 }
 0x163   :  { %v396_v41 = vpop.f32.mrb[4].mxu1 }
 0x164   :  { %v397_v42 = vadd.f32 %v6866_v38, %v396_v41  ;;  %v7582_v43 = vpop.f32.mrb[5].mxu1 }
 0x165   :  { %7598 = vmatmul.mubr.msk.f32.gmra.mrb[4].mxu0 %vm414_vm4, %v406_v39  ;;  %v399_v44 = vpop.f32.mrb[6].mxu1 }
 0x166   :  { %7602 = vmatprep.mubr.msk.f32.mxu0 %vm414_vm4, %v614_v40  ;;  %v402_v45 = vmax.f32 %v397_v42, 0.0  ;;  %v7583_v46 = vpop.f32.mrb[7].mxu1 }
 0x168   :  { %7600 = vmatprep.subr.msk.mxu0 %vm427_vm5, %v402_v45 }
 0x169   :  { %7601 = vmatpush3.msk.msra.mxu0 %vm427_vm5, %v402_v45 }
 0x16a   :  { %7603 = vmatmul.mubr.msk.f32.vlgmr.msra.gmra.mrb[2].mxu0 %vm414_vm4, %v615_v47  ;;  %8086 = vmatprep.subr.bf16.mxu0 %v8085_v30 }
 0x16b   :  { %8088 = vmatpush3.bf16.msra.mxu0 %v8085_v30  ;;  %7605 = vmatprep.mubr.msk.f32.mxu0 %vm414_vm4, %v616_v48 }
 0x16c   :  { %7618 = vmatprep.subr.bf16.mxu0 %v8263_v54 }
 0x16e   :  { %7606 = vmatmul.mubr.msk.f32.gmra.mrb[4].mxu0 %vm414_vm4, %v617_v49 }
 0x16f   :  { %7612 = vmatprep.mubr.msk.f32.mxu0 %vm145_vm1, %v722_v50 }
 0x172   :  { %7613 = vmatmul.mubr.msk.f32.vlgmr.msra.gmra.mrb[2].mxu0 %vm145_vm1, %v723_v51 }
 0x173   :  { %7615 = vmatprep.mubr.msk.f32.mxu0 %vm145_vm1, %v724_v52  ;;  %7619 = vmatpush3.bf16.msra.mxu0 %v8263_v54 }
 0x174   :  { %7620 = vmatprep.subr.bf16.mxu0 %v8264_v55 }
 0x176   :  { %7616 = vmatmul.mubr.msk.f32.gmra.mrb[4].mxu0 %vm145_vm1, %v725_v53 }
 0x177   :  { %7621 = vmatpush3.bf16.msra.mxu0 %v8264_v55 }
 0x245   :  { %v7614_v58 = vpop.f32.mrb[2].mxu0 }
 0x246   :  { %v8771_v59 = vadd.f32 %v7614_v58, %v828_v56  ;;  %v804_v60 = vpop.f32.mrb[3].mxu0 }
 0x247   :  { %v8773_v61 = vadd.f32 %v827_v57, %v804_v60 }
 0x249   :  { %v835_v0 = vpack.c.bf16 %v8771_v59, %v8773_v61  ;;  %v7617_v1 = vpop.f32.mrb[4].mxu0 }
 0x24a   :  { %v8777_v2 = vadd.f32 %v7617_v1, %v830_v62  ;;  %v814_v3 = vpop.f32.mrb[5].mxu0 }
 0x24b   :  { %v8779_v4 = vadd.f32 %v829_v63, %v814_v3  ;;  %7622 = vmatprep.mubr.msk.bf16.mxu0 %vm358_vm3, %v835_v0 }
 0x24d   :  { %v836_v5 = vpack.c.bf16 %v8777_v2, %v8779_v4 }
 0x24f   :  { %7623 = vmatmul.mubr.msk.bf16.vlgmr.msra.gmra.mrb[8].mxu0 %vm358_vm3, %v836_v5 }
 0x322   :  { %v7624_v7 = vpop.f32.mrb[8].mxu0 }
 0x323   :  { %v8791_v8 = vadd.f32 %v7624_v7, %v6889_v6  ;;  %v900_v9 = vpop.f32.mrb[9].mxu0 }
 0x324   :  { %v8797_v10 = vadd.f32 %v6889_v6, %v900_v9  ;;  %v7625_v11 = vpop.f32.mrb[10].mxu0 }
 0x325   :  { %923 = vrot.lane.b32.xlu1 %v8791_v8, %s8651_s16  ;;  %v903_v12 = vpop.f32.mrb[11].mxu0  ;;  %v8803_v13 = vadd.f32 %v7625_v11, %v6889_v6 }
 0x326   :  { %919 = vrot.lane.b32.xlu0 %v8797_v10, %s8651_s16  ;;  %v8809_v19 = vadd.f32 %v6889_v6, %v903_v12 }
 0x329   :  { %925 = vrot.lane.b32.xlu1 %v8803_v13, %s8651_s16 }
 0x32d   :  { %921 = vrot.lane.b32.xlu1 %v8809_v19, %s8651_s16 }
 0x397   :  { %v924_v27 = vpop.permute.xlu1 %923 }
 0x398   :  { %v935_v28 = vmul.f32 %v924_v27, %v8797_v10  ;;  %v920_v29 = vpop.permute.xlu0 %919  ;;  %v933_v38 = vmul.f32 %v924_v27, %v8791_v8 }
 0x399   :  { %v937_v31 = vmul.f32 %v920_v29, %v8791_v8  ;;  %v931_v35 = vmul.f32 %v920_v29, %v8797_v10 }
 0x39a   :  { %951 = vrot.lane.b32.xlu0 %v935_v28, %s8660_s20 }
 0x39b   :  { %v926_v30 = vpop.permute.xlu1 %925 }
 0x39c   :  { %v936_v32 = vmul.f32 %v926_v30, %v8809_v19  ;;  %v934_v44 = vmul.f32 %v926_v30, %v8803_v13 }
 0x39e   :  { %953 = vrot.lane.b32.xlu1 %v936_v32, %s8660_s20  ;;  %955 = vrot.lane.b32.xlu0 %v937_v31, %s8660_s20  ;;  %v1185_v31 = vld [vmem:[%s6835_s25] sm:$0xff]  ;;  %v1186_v32 = vld [vmem:[%s6835_s25 + $0x8] sm:$0xff] }
 0x39f   :  { %v922_v33 = vpop.permute.xlu1 %921 }
 0x3a0   :  { %v938_v34 = vmul.f32 %v922_v33, %v8803_v13  ;;  %v932_v39 = vmul.f32 %v922_v33, %v8809_v19 }
 0x3a2   :  { %957 = vrot.lane.b32.xlu1 %v938_v34, %s8660_s20 }
 0x40c   :  { %v952_v36 = vpop.permute.xlu0 %951 }
 0x40d   :  { %v963_v37 = vsel %vm358_vm3, %v931_v35, %v952_v36  ;;  %v8862_v35 = vpack.c.bf16 %v1186_v32, %v1185_v31 }
 0x40e   :  { %7642 = vmatprep.mubr.msk.f32.mxu1 %vm975_vm6, %v963_v37 }
 0x40f   :  { %8106 = vmatprep.subr.bf16.mxu0 %v8862_v35 }
 0x410   :  { %v954_v40 = vpop.permute.xlu1 %953  ;;  %v956_v41 = vpop.permute.xlu0 %955  ;;  %8108 = vmatpush3.bf16.msra.mxu0 %v8862_v35 }
 0x411   :  { %v964_v42 = vsel %vm358_vm3, %v932_v39, %v954_v40  ;;  %v965_v43 = vsel %vm358_vm3, %v933_v38, %v956_v41 }
 0x412   :  { %7643 = vmatmul.mubr.msk.f32.vlgmr.msra.gmra.mrb[2].mxu1 %vm975_vm6, %v964_v42 }
 0x413   :  { %7645 = vmatprep.mubr.msk.f32.mxu1 %vm975_vm6, %v965_v43 }
 0x414   :  { %v958_v45 = vpop.permute.xlu1 %957 }
 0x415   :  { %v966_v46 = vsel %vm358_vm3, %v934_v44, %v958_v45 }
 0x416   :  { %7646 = vmatmul.mubr.msk.f32.gmra.mrb[8].mxu1 %vm975_vm6, %v966_v46 }
 0x4e5   :  { %v7644_v47 = vpop.f32.mrb[2].mxu1 }
 0x4e6   :  { %1079 = vrot.lane.b32.xlu1 %v7644_v47, %s8661_s21  ;;  %v1054_v48 = vpop.f32.mrb[3].mxu1 }
 0x4e7   :  { %1077 = vrot.lane.b32.xlu0 %v1054_v48, %s8661_s21 }
 0x4e9   :  { %v7647_v49 = vpop.f32.mrb[8].mxu1 }
 0x4ea   :  { %1083 = vrot.lane.b32.xlu1 %v7647_v49, %s8661_s21  ;;  %v1064_v50 = vpop.f32.mrb[9].mxu1 }
 0x4eb   :  { %1081 = vrot.lane.b32.xlu0 %v1064_v50, %s8661_s21 }
 0x558   :  { %v1080_v51 = vpop.permute.xlu1 %1079 }
 0x559   :  { %v1090_v52 = vmax.f32 %v7644_v47, %v1080_v51  ;;  %v1078_v53 = vpop.permute.xlu0 %1077 }
 0x55a   :  { %v1089_v54 = vmax.f32 %v1054_v48, %v1078_v53 }
 0x55b   :  { %v1094_v55 = vsub.f32 %v7644_v47, %v1090_v52  ;;  %1111 = vrot.lane.b32.xlu1 %v1090_v52, %s8659_s15 }
 0x55c   :  { %v1093_v56 = vsub.f32 %v1054_v48, %v1089_v54  ;;  %v1084_v57 = vpop.permute.xlu1 %1083  ;;  %1109 = vrot.lane.b32.xlu0 %v1089_v54, %s8659_s15 }
 0x55d   :  { %v1092_v58 = vmax.f32 %v7647_v49, %v1084_v57  ;;  %v1082_v60 = vpop.permute.xlu0 %1081  ;;  %v1099_v27 = vmul.f32 1.442695, %v1094_v55 }
 0x55e   :  { %v1091_v62 = vmax.f32 %v1064_v50, %v1082_v60  ;;  %v1097_v28 = vmul.f32 1.442695, %v1093_v56 }
 0x55f   :  { %v1096_v63 = vsub.f32 %v7647_v49, %v1092_v58  ;;  %1115 = vrot.lane.b32.xlu1 %v1092_v58, %s8659_s15 }
 0x560   :  { %v1095_v0 = vsub.f32 %v1064_v50, %v1091_v62  ;;  %1113 = vrot.lane.b32.xlu0 %v1091_v62, %s8659_s15 }
 0x561   :  { %v1103_v29 = vmul.f32 1.442695, %v1096_v63 }
 0x562   :  { %v1101_v30 = vmul.f32 1.442695, %v1095_v0 }
 0x5cd   :  { %v1112_v1 = vpop.permute.xlu1 %1111 }
 0x5ce   :  { %v1122_v3 = vsub.f32 %v7644_v47, %v1112_v1  ;;  %v1110_v5 = vpop.permute.xlu0 %1109 }
 0x5cf   :  { %v1121_v6 = vsub.f32 %v1054_v48, %v1110_v5 }
 0x5d0   :  { %v1127_v7 = vmul.f32 1.442695, %v1122_v3 }
 0x5d1   :  { %v1125_v9 = vmul.f32 1.442695, %v1121_v6  ;;  %v1116_v11 = vpop.permute.xlu1 %1115  ;;  %v8265_v6 = vld [vmem:[%s8893_s30] sm:$0xff]  }
 0x5d2   :  { %8349 = vpow2.f32 %v1127_v7  ;;  %v1124_v12 = vsub.f32 %v7647_v49, %v1116_v11  ;;  %v1114_v14 = vpop.permute.xlu0 %1113  ;;  %7658 = vmatprep.subr.bf16.mxu1 %v8265_v6  ;;  %v8266_v7 = vld [vmem:[%s8893_s30 + $0x8] sm:$0xff]  }
 0x5d3   :  { %8351 = vpow2.f32 %v1125_v9  ;;  %v1123_v15 = vsub.f32 %v1064_v50, %v1114_v14  ;;  %7659 = vmatpush3.bf16.msra.mxu1 %v8265_v6 }
 0x5d4   :  { %v1131_v16 = vmul.f32 1.442695, %v1124_v12  ;;  %7660 = vmatprep.subr.bf16.mxu1 %v8266_v7 }
 0x5d5   :  { %v1129_v18 = vmul.f32 1.442695, %v1123_v15 }
 0x5d6   :  { %8353 = vpow2.f32 %v1131_v16 }
 0x5d7   :  { %8355 = vpow2.f32 %v1129_v18  ;;  %7661 = vmatpush3.bf16.msra.mxu1 %v8266_v7 }
 0x5d8   :  { %8357 = vpow2.f32 %v1099_v27 }
 0x5d9   :  { %8359 = vpow2.f32 %v1097_v28 }
 0x5da   :  { %8361 = vpow2.f32 %v1103_v29 }
 0x5db   :  { %8363 = vpow2.f32 %v1101_v30 }
 0x5dc   :  { %v8350_v21 = vpop.eup %8349 }
 0x5dd   :  { %v8352_v22 = vpop.eup %8351  ;;  %1139 = vrot.lane.b32.xlu1 %v8350_v21, %s8661_s21 }
 0x5de   :  { %1137 = vrot.lane.b32.xlu0 %v8352_v22, %s8661_s21 }
 0x5e0   :  { %v8354_v24 = vpop.eup %8353 }
 0x5e1   :  { %v8356_v25 = vpop.eup %8355  ;;  %1143 = vrot.lane.b32.xlu1 %v8354_v24, %s8661_s21 }
 0x5e2   :  { %1141 = vrot.lane.b32.xlu0 %v8356_v25, %s8661_s21  ;;  %v8358_v33 = vpop.eup %8357 }
 0x5e3   :  { %v8360_v36 = vpop.eup %8359 }
 0x5e4   :  { %v8362_v40 = vpop.eup %8361 }
 0x5e5   :  { %v8364_v42 = vpop.eup %8363 }
 0x64f   :  { %v1140_v34 = vpop.permute.xlu1 %1139 }
 0x650   :  { %v1150_v37 = vadd.f32 %v8358_v33, %v1140_v34  ;;  %v1138_v38 = vpop.permute.xlu0 %1137 }
 0x651   :  { %v1149_v39 = vadd.f32 %v8360_v36, %v1138_v38 }
 0x652   :  { %8365 = vrcp.f32 %v1150_v37 }
 0x653   :  { %8367 = vrcp.f32 %v1149_v39  ;;  %v1144_v41 = vpop.permute.xlu1 %1143 }
 0x654   :  { %v1152_v43 = vadd.f32 %v8362_v40, %v1144_v41  ;;  %v1142_v44 = vpop.permute.xlu0 %1141 }
 0x655   :  { %v1151_v45 = vadd.f32 %v8364_v42, %v1142_v44 }
 0x656   :  { %8369 = vrcp.f32 %v1152_v43  ;;  %v6902_v43 = vld [vmem:[%s8906_s4] ss:$0 sm:$0xff] }
 0x657   :  { %8371 = vrcp.f32 %v1151_v45 }
 0x65c   :  { %v8366_v46 = vpop.eup %8365 }
 0x65d   :  { %v8368_v47 = vpop.eup %8367  ;;  %1167 = vrot.lane.b32.xlu1 %v8366_v46, %s8659_s15  ;;  %v1158_v48 = vmul.f32 %v8366_v46, %v8358_v33 }
 0x65e   :  { %1165 = vrot.lane.b32.xlu0 %v8368_v47, %s8659_s15  ;;  %v1157_v49 = vmul.f32 %v8368_v47, %v8360_v36 }
 0x660   :  { %v8370_v50 = vpop.eup %8369 }
 0x661   :  { %v8372_v51 = vpop.eup %8371  ;;  %1171 = vrot.lane.b32.xlu1 %v8370_v50, %s8659_s15  ;;  %v1160_v52 = vmul.f32 %v8370_v50, %v8362_v40 }
 0x662   :  { %1169 = vrot.lane.b32.xlu0 %v8372_v51, %s8659_s15  ;;  %v1159_v53 = vmul.f32 %v8372_v51, %v8364_v42 }
 0x665   :  { %945 = vrot.lane.b32.xlu1 %v8803_v13, %s8663_s26 }
 0x666   :  { %943 = vrot.lane.b32.xlu0 %v8791_v8, %s8663_s26 }
 0x669   :  { %941 = vrot.lane.b32.xlu1 %v8809_v19, %s8663_s26 }
 0x66a   :  { %939 = vrot.lane.b32.xlu0 %v8797_v10, %s8663_s26 }
 0x6cf   :  { %v1168_v54 = vpop.permute.xlu1 %1167 }
 0x6d0   :  { %v1178_v55 = vmul.f32 %v8350_v21, %v1168_v54  ;;  %v1166_v56 = vpop.permute.xlu0 %1165 }
 0x6d1   :  { %v1177_v57 = vmul.f32 %v8352_v22, %v1166_v56 }
 0x6d2   :  { %v1182_v63 = vsel %vm229_vm2, %v1158_v48, %v1178_v55 }
 0x6d3   :  { %v1172_v58 = vpop.permute.xlu1 %1171  ;;  %v1181_v60 = vsel %vm229_vm2, %v1157_v49, %v1177_v57 }
 0x6d4   :  { %v1180_v62 = vmul.f32 %v8354_v24, %v1172_v58  ;;  %7652 = vmatprep.mubr.msk.f32.mxu0 %vm145_vm1, %v1181_v60  ;;  %v1170_v13 = vpop.permute.xlu0 %1169 }
 0x6d5   :  { %v1179_v8 = vmul.f32 %v8356_v25, %v1170_v13  ;;  %7653 = vmatmul.mubr.msk.f32.vlgmr.msra.gmra.mrb[6].mxu0 %vm145_vm1, %v1182_v63 }
 0x6d6   :  { %v1184_v1 = vsel %vm229_vm2, %v1160_v52, %v1180_v62 }
 0x6d7   :  { %v946_v19 = vpop.permute.xlu1 %945  ;;  %v1183_v0 = vsel %vm229_vm2, %v1159_v53, %v1179_v8 }
 0x6d8   :  { %1294 = vrot.lane.b32.xlu1 %v946_v19, %s8660_s20  ;;  %7655 = vmatprep.mubr.msk.f32.mxu0 %vm145_vm1, %v1183_v0  ;;  %v944_v10 = vpop.permute.xlu0 %943  ;;  %v8268_v0 = vld [vmem:[%s8944_s9 + $0x8] sm:$0xff]  }
 0x6d9   :  { %7656 = vmatmul.mubr.msk.f32.gmra.mrb[12].mxu0 %vm145_vm1, %v1184_v1  ;;  %1292 = vrot.lane.b32.xlu0 %v944_v10, %s8660_s20 }
 0x6db   :  { %v942_v3 = vpop.permute.xlu1 %941 }
 0x6dc   :  { %1298 = vrot.lane.b32.xlu1 %v942_v3, %s8660_s20  ;;  %v940_v5 = vpop.permute.xlu0 %939 }
 0x6dd   :  { %1296 = vrot.lane.b32.xlu0 %v940_v5, %s8660_s20 }
 0x74a   :  { %v1295_v9 = vpop.permute.xlu1 %1294 }
 0x74b   :  { %v1293_v11 = vpop.permute.xlu0 %1292 }
 0x74e   :  { %v1299_v18 = vpop.permute.xlu1 %1298 }
 0x74f   :  { %v1297_v22 = vpop.permute.xlu0 %1296 }
 0x7a8   :  { %v7654_v12 = vpop.f32.mrb[6].mxu0 }
 0x7a9   :  { %v1305_v14 = vmul.f32 %v7654_v12, %v1295_v9  ;;  %v1265_v15 = vpop.f32.mrb[7].mxu0  ;;  %v1289_v28 = vmul.f32 %v7654_v12, %v942_v3 }
 0x7aa   :  { %v1304_v16 = vmul.f32 %v1293_v11, %v1265_v15  ;;  %v1288_v29 = vmul.f32 %v1265_v15, %v940_v5 }
 0x7ab   :  { %1314 = vrot.lane.b32.xlu1 %v1305_v14, %s8651_s16 }
 0x7ac   :  { %v7657_v21 = vpop.f32.mrb[12].mxu0  ;;  %1312 = vrot.lane.b32.xlu0 %v1304_v16, %s8651_s16 }
 0x7ad   :  { %v1307_v24 = vmul.f32 %v7657_v21, %v1299_v18  ;;  %v1275_v25 = vpop.f32.mrb[13].mxu0  ;;  %v1291_v34 = vmul.f32 %v7657_v21, %v946_v19  ;;  %v8267_v19 = vld [vmem:[%s8944_s9] sm:$0xff]  }
 0x7ae   :  { %v1306_v27 = vmul.f32 %v1297_v22, %v1275_v25  ;;  %v1290_v36 = vmul.f32 %v1275_v25, %v944_v10  ;;  %7666 = vmatprep.subr.bf16.mxu0 %v8267_v19 }
 0x7af   :  { %1318 = vrot.lane.b32.xlu1 %v1307_v24, %s8651_s16  ;;  %7667 = vmatpush3.bf16.msra.mxu0 %v8267_v19  ;;  %v8274_v19 = vld [vmem:[%s8981_s27 + $0x28] sm:$0xff]  }
 0x7b0   :  { %1316 = vrot.lane.b32.xlu0 %v1306_v27, %s8651_s16  ;;  %7668 = vmatprep.subr.bf16.mxu0 %v8268_v0 }
 0x7b3   :  { %7669 = vmatpush3.bf16.msra.mxu0 %v8268_v0  ;;  %v8275_v0 = vld [vmem:[%s8981_s27 + $0x30] sm:$0xff]  }
 0x81d   :  { %v1315_v30 = vpop.permute.xlu1 %1314 }
 0x81e   :  { %v1325_v31 = vadd.f32 %v1315_v30, %v1289_v28  ;;  %v1313_v32 = vpop.permute.xlu0 %1312 }
 0x81f   :  { %v1324_v33 = vadd.f32 %v1313_v32, %v1288_v29 }
 0x821   :  { %v1328_v37 = vpack.c.bf16 %v1325_v31, %v1324_v33  ;;  %v1319_v38 = vpop.permute.xlu1 %1318 }
 0x822   :  { %v1327_v39 = vadd.f32 %v1319_v38, %v1291_v34  ;;  %v1317_v40 = vpop.permute.xlu0 %1316 }
 0x823   :  { %v1326_v41 = vadd.f32 %v1317_v40, %v1290_v36  ;;  %7662 = vmatprep.mubr.msk.bf16.mxu1 %vm358_vm3, %v1328_v37 }
 0x825   :  { %v1329_v42 = vpack.c.bf16 %v1327_v39, %v1326_v41 }
 0x827   :  { %7663 = vmatmul.mubr.msk.bf16.vlgmr.msra.gmra.mrb[12].mxu1 %vm358_vm3, %v1329_v42  ;;  %v6907_v42 = vld [vmem:[%s8951_s13] ss:$0 sm:$0xff] }
 0x8fa   :  { %v7664_v44 = vpop.f32.mrb[12].mxu1 }
 0x8fb   :  { %v1402_v45 = vadd.f32 %v7664_v44, %v6902_v43  ;;  %v1393_v46 = vpop.f32.mrb[13].mxu1 }
 0x8fc   :  { %v1394_v47 = vadd.f32 %v6902_v43, %v1393_v46  ;;  %v7665_v48 = vpop.f32.mrb[14].mxu1 }
 0x8fd   :  { %v8910_v49 = vadd.f32 %v1402_v45, %v8779_v4  ;;  %v1396_v50 = vpop.f32.mrb[15].mxu1  ;;  %v1405_v53 = vadd.f32 %v7665_v48, %v6902_v43 }
 0x8fe   :  { %v8913_v51 = vadd.f32 %v1394_v47, %v8773_v61  ;;  %v1397_v52 = vadd.f32 %v6902_v43, %v1396_v50 }
 0x8ff   :  { %v1420_v54 = vsel %vm358_vm3, %v8910_v49, 0.0  ;;  %v8925_v57 = vadd.f32 %v1405_v53, %v8777_v2 }
 0x900   :  { %v8918_v55 = vadd.f32 %v1397_v52, %v8771_v59  ;;  %1421 = vadd.xlane.f32.xlu0 %v1420_v54  ;;  %v1431_v4 = vmul.f32 %v8913_v51, %v8913_v51  ;;  %v1414_v61 = vsel %vm358_vm3, %v8913_v51, 0.0  ;;  %v1433_v59 = vmul.f32 %v8910_v49, %v8910_v49  ;;  %v6908_v52 = vld [vmem:[%s8956_s22] ss:$0 sm:$0xff] }
 0x901   :  { %v1423_v60 = vsel %vm358_vm3, %v8925_v57, 0.0  ;;  %v1434_v63 = vmul.f32 %v8925_v57, %v8925_v57 }
 0x902   :  { %v1417_v56 = vsel %vm358_vm3, %v8918_v55, 0.0  ;;  %v1435_v58 = vsel %vm358_vm3, %v1431_v4, 0.0  ;;  %v1432_v62 = vmul.f32 %v8918_v55, %v8918_v55  ;;  %v1441_v2 = vsel %vm358_vm3, %v1433_v59, 0.0 }
 0x903   :  { %1418 = vadd.xlane.f32.xlu1 %v1417_v56  ;;  %v1444_v8 = vsel %vm358_vm3, %v1434_v63, 0.0  ;;  %v8272_v63 = vld [vmem:[%s8981_s27 + $0x18] sm:$0xff]  }
 0x904   :  { %1415 = vadd.xlane.f32.xlu0 %v1414_v61  ;;  %v1438_v13 = vsel %vm358_vm3, %v1432_v62, 0.0  ;;  %v8269_v62 = vld [vmem:[%s8981_s27] sm:$0xff]  }
 0x905   :  { %7674 = vmatprep.subr.bf16.mxu1 %v8269_v62 }
 0x906   :  { %7675 = vmatpush3.bf16.msra.mxu1 %v8269_v62  ;;  %v6914_v62 = vld [vmem:[%s9000_s8] ss:$0 sm:$0xff] }
 0x907   :  { %1436 = vadd.xlane.f32.xlu1 %v1435_v58 }
 0x908   :  { %1424 = vadd.xlane.f32.xlu0 %v1423_v60 }
 0x90b   :  { %1442 = vadd.xlane.f32.xlu1 %v1441_v2  ;;  %v8270_v2 = vld [vmem:[%s8981_s27 + $0x8] sm:$0xff]  }
 0x90c   :  { %1439 = vadd.xlane.f32.xlu0 %v1438_v13  ;;  %7676 = vmatprep.subr.bf16.mxu1 %v8270_v2  ;;  %v8271_v13 = vld [vmem:[%s8981_s27 + $0x10] sm:$0xff]  }
 0x90d   :  { %7677 = vmatpush3.bf16.msra.mxu1 %v8270_v2 }
 0x90e   :  { %7678 = vmatprep.subr.bf16.mxu1 %v8271_v13 }
 0x910   :  { %1445 = vadd.xlane.f32.xlu0 %v1444_v8  ;;  %v8273_v8 = vld [vmem:[%s8981_s27 + $0x20] sm:$0xff]  }
 0x911   :  { %7679 = vmatpush3.bf16.msra.mxu1 %v8271_v13 }
 0x912   :  { %7680 = vmatprep.subr.bf16.mxu1 %v8272_v63 }
 0x915   :  { %7681 = vmatpush3.bf16.msra.mxu1 %v8272_v63 }
 0x916   :  { %7682 = vmatprep.subr.bf16.mxu1 %v8273_v8 }
 0x919   :  { %7683 = vmatpush3.bf16.msra.mxu1 %v8273_v8 }
 0x91a   :  { %7684 = vmatprep.subr.bf16.mxu1 %v8274_v19 }
 0x91d   :  { %7685 = vmatpush3.bf16.msra.mxu1 %v8274_v19 }
 0x91e   :  { %7686 = vmatprep.subr.bf16.mxu1 %v8275_v0 }
 0x921   :  { %7687 = vmatpush3.bf16.msra.mxu1 %v8275_v0 }
 0x98d   :  { %v1422_v10 = vpop.xlane.xlu0 %1421 }
 0x98e   :  { %v1429_v9 = vmul.f32 0.03125, %v1422_v10  ;;  %v8276_v10 = vld [vmem:[%s8981_s27 + $0x38] sm:$0xff]  }
 0x98f   :  { %7688 = vmatprep.subr.bf16.mxu1 %v8276_v10 }
 0x990   :  { %v1419_v1 = vpop.xlane.xlu1 %1418  ;;  %v1453_v18 = vmul.f32 %v1429_v9, %v1429_v9  ;;  %v1461_v44 = vsub.f32 %v8910_v49, %v1429_v9  ;;  %7689 = vmatpush3.bf16.msra.mxu1 %v8276_v10 }
 0x991   :  { %v1416_v3 = vpop.xlane.xlu0 %1415  ;;  %v1428_v14 = vmul.f32 0.03125, %v1419_v1  ;;  %v6909_v1 = vld [vmem:[%s8994_s2] ss:$0 sm:$0xff] }
 0x992   :  { %v1427_v5 = vmul.f32 0.03125, %v1416_v3 }
 0x993   :  { %v1452_v25 = vmul.f32 %v1428_v14, %v1428_v14  ;;  %v1460_v45 = vsub.f32 %v8918_v55, %v1428_v14 }
 0x994   :  { %v1451_v6 = vmul.f32 %v1427_v5, %v1427_v5  ;;  %v1437_v7 = vpop.xlane.xlu1 %1436  ;;  %v1459_v40 = vsub.f32 %v8913_v51, %v1427_v5 }
 0x995   :  { %v1447_v11 = vmul.f32 0.03125, %v1437_v7  ;;  %v1425_v12 = vpop.xlane.xlu0 %1424 }
 0x996   :  { %v1430_v27 = vmul.f32 0.03125, %v1425_v12 }
 0x997   :  { %v1455_v15 = vsub.f32 %v1447_v11, %v1451_v6 }
 0x998   :  { %v1443_v16 = vpop.xlane.xlu1 %1442  ;;  %v1454_v33 = vmul.f32 %v1430_v27, %v1430_v27  ;;  %v1462_v53 = vsub.f32 %v8925_v57, %v1430_v27 }
 0x999   :  { %v1463_v21 = vadd.f32 1e-05, %v1455_v15  ;;  %v1449_v22 = vmul.f32 0.03125, %v1443_v16  ;;  %v1440_v24 = vpop.xlane.xlu0 %1439 }
 0x99a   :  { %v1448_v28 = vmul.f32 0.03125, %v1440_v24 }
 0x99b   :  { %8373 = vrsqrt.f32 %v1463_v21  ;;  %v1457_v29 = vsub.f32 %v1449_v22, %v1453_v18 }
 0x99c   :  { %v1456_v30 = vsub.f32 %v1448_v28, %v1452_v25 }
 0x99d   :  { %v1465_v31 = vadd.f32 1e-05, %v1457_v29  ;;  %v1446_v32 = vpop.xlane.xlu0 %1445 }
 0x99e   :  { %v1464_v34 = vadd.f32 1e-05, %v1456_v30  ;;  %v1450_v36 = vmul.f32 0.03125, %v1446_v32 }
 0x99f   :  { %8375 = vrsqrt.f32 %v1465_v31 }
 0x9a0   :  { %8377 = vrsqrt.f32 %v1464_v34  ;;  %v1458_v37 = vsub.f32 %v1450_v36, %v1454_v33 }
 0x9a2   :  { %v1466_v38 = vadd.f32 1e-05, %v1458_v37 }
 0x9a4   :  { %8379 = vrsqrt.f32 %v1466_v38 }
 0x9a5   :  { %v8374_v39 = vpop.eup %8373 }
 0x9a6   :  { %v1471_v41 = vmul.f32 %v8374_v39, %v1459_v40 }
 0x9a8   :  { %v1481_v50 = vmul.f32 %v6907_v42, %v1471_v41 }
 0x9a9   :  { %v8376_v43 = vpop.eup %8375 }
 0x9aa   :  { %v8378_v46 = vpop.eup %8377  ;;  %v1473_v47 = vmul.f32 %v8376_v43, %v1461_v44  ;;  %v8964_v58 = vadd.f32 %v6908_v52, %v1481_v50 }
 0x9ab   :  { %v1472_v48 = vmul.f32 %v8378_v46, %v1460_v45 }
 0x9ac   :  { %v1483_v61 = vmul.f32 %v6907_v42, %v1473_v47 }
 0x9ad   :  { %v1482_v54 = vmul.f32 %v6907_v42, %v1472_v48 }
 0x9ae   :  { %v8380_v56 = vpop.eup %8379  ;;  %v8970_v55 = vadd.f32 %v6908_v52, %v1483_v61 }
 0x9af   :  { %v1474_v4 = vmul.f32 %v8380_v56, %v1462_v53  ;;  %v8966_v51 = vadd.f32 %v6908_v52, %v1482_v54 }
 0x9b1   :  { %v1484_v59 = vmul.f32 %v6907_v42, %v1474_v4  ;;  %v1495_v49 = vpack.c.bf16 %v8966_v51, %v8964_v58 }
 0x9b3   :  { %v8972_v60 = vadd.f32 %v6908_v52, %v1484_v59  ;;  %7670 = vmatprep.mubr.msk.bf16.mxu0 %vm358_vm3, %v1495_v49 }
 0x9b5   :  { %v1496_v57 = vpack.c.bf16 %v8972_v60, %v8970_v55 }
 0x9b7   :  { %7671 = vmatmul.mubr.msk.bf16.vlgmr.msra.gmra.mrb[16].mxu0 %vm358_vm3, %v1496_v57 }
 0xa8a   :  { %v7672_v3 = vpop.f32.mrb[16].mxu0 }
 0xa8b   :  { %v1569_v5 = vadd.f32 %v7672_v3, %v6909_v1  ;;  %v1560_v6 = vpop.f32.mrb[17].mxu0 }
 0xa8c   :  { %v1561_v7 = vadd.f32 %v6909_v1, %v1560_v6  ;;  %v7673_v9 = vpop.f32.mrb[18].mxu0 }
 0xa8d   :  { %v1581_v11 = vmul.f32 0.044715, %v1569_v5  ;;  %v1572_v12 = vadd.f32 %v7673_v9, %v6909_v1  ;;  %v1563_v14 = vpop.f32.mrb[19].mxu0  ;;  %v1577_v47 = vmul.f32 0.5, %v1569_v5 }
 0xa8e   :  { %v1579_v15 = vmul.f32 0.044715, %v1561_v7  ;;  %v1564_v16 = vadd.f32 %v6909_v1, %v1563_v14  ;;  %v1575_v52 = vmul.f32 0.5, %v1561_v7 }
 0xa8f   :  { %v1585_v18 = vmul.f32 %v1581_v11, %v1569_v5  ;;  %v1582_v21 = vmul.f32 0.044715, %v1572_v12  ;;  %v1578_v48 = vmul.f32 0.5, %v1572_v12 }
 0xa90   :  { %v1583_v22 = vmul.f32 %v1579_v15, %v1561_v7  ;;  %v1580_v24 = vmul.f32 0.044715, %v1564_v16  ;;  %v1576_v53 = vmul.f32 0.5, %v1564_v16 }
 0xa91   :  { %v1589_v25 = vmul.f32 %v1585_v18, %v1569_v5  ;;  %v1586_v27 = vmul.f32 %v1582_v21, %v1572_v12 }
 0xa92   :  { %v1587_v28 = vmul.f32 %v1583_v22, %v1561_v7  ;;  %v1584_v29 = vmul.f32 %v1580_v24, %v1564_v16  ;;  %v8277_v22 = vld [vmem:[%s8764_s6 + $0x10] sm:$0xff]   ;;  %v8278_v24 = vld [vmem:[%s8764_s6 + $0x18] sm:$0xff]  }
 0xa93   :  { %v1593_v30 = vadd.f32 %v1589_v25, %v1569_v5  ;;  %v1590_v31 = vmul.f32 %v1586_v27, %v1572_v12  ;;  %7694 = vmatprep.subr.bf16.mxu0 %v8277_v22 }
 0xa94   :  { %v1588_v32 = vmul.f32 %v1584_v29, %v1564_v16  ;;  %v1591_v33 = vadd.f32 %v1587_v28, %v1561_v7  ;;  %7695 = vmatpush3.bf16.msra.mxu0 %v8277_v22 }
 0xa95   :  { %v1597_v34 = vmul.f32 0.7978846, %v1593_v30  ;;  %v1594_v36 = vadd.f32 %v1590_v31, %v1572_v12  ;;  %7696 = vmatprep.subr.bf16.mxu0 %v8278_v24 }
 0xa96   :  { %v1592_v37 = vadd.f32 %v1588_v32, %v1564_v16  ;;  %v1595_v38 = vmul.f32 0.7978846, %v1591_v33 }
 0xa97   :  { %8381 = vtanh.f32 %v1597_v34  ;;  %v1598_v39 = vmul.f32 0.7978846, %v1594_v36 }
 0xa98   :  { %v1596_v40 = vmul.f32 0.7978846, %v1592_v37  ;;  %8383 = vtanh.f32 %v1595_v38  ;;  %7697 = vmatpush3.bf16.msra.mxu0 %v8278_v24 }
 0xa99   :  { %8385 = vtanh.f32 %v1598_v39  ;;  %8110 = vmatprep.subr.bf16.mxu0 %v8807_v17 }
 0xa9a   :  { %8387 = vtanh.f32 %v1596_v40 }
 0xaa1   :  { %v8382_v41 = vpop.eup %8381 }
 0xaa2   :  { %v8384_v42 = vpop.eup %8383  ;;  %v1605_v43 = vadd.f32 1.0, %v8382_v41 }
 0xaa3   :  { %v8386_v44 = vpop.eup %8385  ;;  %v1603_v45 = vadd.f32 1.0, %v8384_v42 }
 0xaa4   :  { %v8388_v46 = vpop.eup %8387  ;;  %v1606_v50 = vadd.f32 1.0, %v8386_v44  ;;  %v1609_v56 = vmul.f32 %v1605_v43, %v1577_v47 }
 0xaa5   :  { %v1604_v54 = vadd.f32 1.0, %v8388_v46  ;;  %v1607_v61 = vmul.f32 %v1603_v45, %v1575_v52 }
 0xaa6   :  { %v1610_v4 = vmul.f32 %v1606_v50, %v1578_v48 }
 0xaa7   :  { %v1608_v59 = vmul.f32 %v1604_v54, %v1576_v53 }
 0xaa8   :  { %v1612_v49 = vpack.c.bf16 %v1610_v4, %v1609_v56 }
 0xaa9   :  { %v1611_v57 = vpack.c.bf16 %v1608_v59, %v1607_v61 }
 0xaab   :  { %7690 = vmatprep.mubr.bf16.mxu1 %v1611_v57 }
 0xaac   :  { %7691 = vmatmul.mubr.bf16.vlgmr.msra.gmra.mrb[16].mxu1 %v1612_v49  ;;  %v6923_v49 = vld [vmem:[%s9041_s17] ss:$0 sm:$0xff] }
 0xb7f   :  { %v7692_v2 = vpop.f32.mrb[16].mxu1 }
 0xb80   :  { %v1727_v13 = vadd.f32 %v7692_v2, %v6914_v62  ;;  %v1718_v63 = vpop.f32.mrb[17].mxu1 }
 0xb81   :  { %v1719_v8 = vadd.f32 %v6914_v62, %v1718_v63  ;;  %v7693_v19 = vpop.f32.mrb[18].mxu1 }
 0xb82   :  { %v9004_v0 = vadd.f32 %v1727_v13, %v8970_v55  ;;  %v1730_v10 = vadd.f32 %v7693_v19, %v6914_v62  ;;  %v1721_v1 = vpop.f32.mrb[19].mxu1 }
 0xb83   :  { %v1722_v3 = vadd.f32 %v6914_v62, %v1721_v1  ;;  %v9007_v5 = vadd.f32 %v1719_v8, %v8964_v58 }
 0xb84   :  { %v9010_v6 = vadd.f32 %v1730_v10, %v8972_v60  ;;  %v1745_v7 = vsel %vm358_vm3, %v9004_v0, 0.0  ;;  %v1757_v14 = vmul.f32 %v9004_v0, %v9004_v0  ;;  %v6924_v10 = vld [vmem:[%s9046_s24] ss:$0 sm:$0xff] }
 0xb85   :  { %1746 = vadd.xlane.f32.xlu1 %v1745_v7  ;;  %v9015_v9 = vadd.f32 %v1722_v3, %v8966_v51  ;;  %v1739_v11 = vsel %vm358_vm3, %v9007_v5, 0.0  ;;  %v1755_v58 = vmul.f32 %v9007_v5, %v9007_v5 }
 0xb86   :  { %v1748_v55 = vsel %vm358_vm3, %v9010_v6, 0.0  ;;  %v1758_v16 = vmul.f32 %v9010_v6, %v9010_v6  ;;  %v1765_v18 = vsel %vm358_vm3, %v1757_v14, 0.0  ;;  %v6930_v14 = vld [vmem:[%s8788_s14 + $0x1] ss:$0 sm:$0xff] }
 0xb87   :  { %1749 = vadd.xlane.f32.xlu0 %v1748_v55  ;;  %v1742_v60 = vsel %vm358_vm3, %v9015_v9, 0.0  ;;  %v1756_v51 = vmul.f32 %v9015_v9, %v9015_v9  ;;  %v1759_v12 = vsel %vm358_vm3, %v1755_v58, 0.0 }
 0xb88   :  { %v1768_v21 = vsel %vm358_vm3, %v1758_v16, 0.0 }
 0xb89   :  { %1740 = vadd.xlane.f32.xlu1 %v1739_v11  ;;  %v1762_v15 = vsel %vm358_vm3, %v1756_v51, 0.0 }
 0xb8b   :  { %1743 = vadd.xlane.f32.xlu0 %v1742_v60 }
 0xb8d   :  { %1760 = vadd.xlane.f32.xlu1 %v1759_v12 }
 0xb8f   :  { %1763 = vadd.xlane.f32.xlu0 %v1762_v15 }
 0xb91   :  { %1766 = vadd.xlane.f32.xlu1 %v1765_v18 }
 0xb93   :  { %1769 = vadd.xlane.f32.xlu0 %v1768_v21 }
 0xc12   :  { %v1747_v25 = vpop.xlane.xlu1 %1746 }
 0xc13   :  { %v1753_v33 = vmul.f32 0.03125, %v1747_v25 }
 0xc14   :  { %v1750_v27 = vpop.xlane.xlu0 %1749 }
 0xc15   :  { %v1754_v37 = vmul.f32 0.03125, %v1750_v27  ;;  %v1777_v43 = vmul.f32 %v1753_v33, %v1753_v33  ;;  %v1785_v13 = vsub.f32 %v9004_v0, %v1753_v33 }
 0xc16   :  { %v1741_v28 = vpop.xlane.xlu1 %1740 }
 0xc17   :  { %v1751_v29 = vmul.f32 0.03125, %v1741_v28  ;;  %v1778_v47 = vmul.f32 %v1754_v37, %v1754_v37  ;;  %v1786_v1 = vsub.f32 %v9010_v6, %v1754_v37 }
 0xc18   :  { %v1744_v30 = vpop.xlane.xlu0 %1743 }
 0xc19   :  { %v1752_v31 = vmul.f32 0.03125, %v1744_v30  ;;  %v1775_v34 = vmul.f32 %v1751_v29, %v1751_v29  ;;  %v1783_v61 = vsub.f32 %v9007_v5, %v1751_v29 }
 0xc1a   :  { %v1761_v32 = vpop.xlane.xlu1 %1760 }
 0xc1b   :  { %v1771_v36 = vmul.f32 0.03125, %v1761_v32  ;;  %v1776_v39 = vmul.f32 %v1752_v31, %v1752_v31  ;;  %v1784_v57 = vsub.f32 %v9015_v9, %v1752_v31 }
 0xc1c   :  { %v1764_v38 = vpop.xlane.xlu0 %1763 }
 0xc1d   :  { %v1779_v40 = vsub.f32 %v1771_v36, %v1775_v34  ;;  %v1772_v41 = vmul.f32 0.03125, %v1764_v38 }
 0xc1e   :  { %v1767_v42 = vpop.xlane.xlu1 %1766 }
 0xc1f   :  { %v1787_v44 = vadd.f32 1e-05, %v1779_v40  ;;  %v1780_v45 = vsub.f32 %v1772_v41, %v1776_v39  ;;  %v1773_v46 = vmul.f32 0.03125, %v1767_v42 }
 0xc20   :  { %v1770_v48 = vpop.xlane.xlu0 %1769 }
 0xc21   :  { %8389 = vrsqrt.f32 %v1787_v44  ;;  %v1788_v50 = vadd.f32 1e-05, %v1780_v45  ;;  %v1781_v52 = vsub.f32 %v1773_v46, %v1777_v43  ;;  %v1774_v53 = vmul.f32 0.03125, %v1770_v48 }
 0xc23   :  { %8391 = vrsqrt.f32 %v1788_v50  ;;  %v1789_v54 = vadd.f32 1e-05, %v1781_v52  ;;  %v1782_v56 = vsub.f32 %v1774_v53, %v1778_v47 }
 0xc25   :  { %8393 = vrsqrt.f32 %v1789_v54  ;;  %v1790_v4 = vadd.f32 1e-05, %v1782_v56 }
 0xc27   :  { %8395 = vrsqrt.f32 %v1790_v4 }
 0xc2b   :  { %v8390_v59 = vpop.eup %8389 }
 0xc2c   :  { %v1795_v62 = vmul.f32 %v8390_v59, %v1783_v61 }
 0xc2d   :  { %v8392_v2 = vpop.eup %8391 }
 0xc2e   :  { %v1796_v63 = vmul.f32 %v8392_v2, %v1784_v57  ;;  %v1805_v8 = vmul.f32 %v6923_v49, %v1795_v62 }
 0xc2f   :  { %v8394_v19 = vpop.eup %8393 }
 0xc30   :  { %v1797_v3 = vmul.f32 %v8394_v19, %v1785_v13  ;;  %v1806_v7 = vmul.f32 %v6923_v49, %v1796_v63  ;;  %v9054_v58 = vadd.f32 %v6924_v10, %v1805_v8 }
 0xc31   :  { %v8396_v55 = vpop.eup %8395 }
 0xc32   :  { %v1798_v11 = vmul.f32 %v8396_v55, %v1786_v1  ;;  %v9056_v5 = vadd.f32 %v6924_v10, %v1806_v7  ;;  %v1807_v60 = vmul.f32 %v6923_v49, %v1797_v3 }
 0xc34   :  { %v1819_v9 = vpack.c.bf16 %v9056_v5, %v9054_v58  ;;  %v1808_v0 = vmul.f32 %v6923_v49, %v1798_v11  ;;  %v9061_v51 = vadd.f32 %v6924_v10, %v1807_v60 }
 0xc36   :  { %7698 = vmatprep.mubr.msk.bf16.mxu0 %vm358_vm3, %v1819_v9  ;;  %v9063_v12 = vadd.f32 %v6924_v10, %v1808_v0 }
 0xc38   :  { %v1820_v6 = vpack.c.bf16 %v9063_v12, %v9061_v51 }
 0xc3a   :  { %7699 = vmatmul.mubr.msk.bf16.vlgmr.msra.gmra.mrb[20].mxu0 %vm358_vm3, %v1820_v6 }
 0xc3b   :  { %8112 = vmatpush3.bf16.msra.mxu0 %v8807_v17 }
 0xc3c   :  { %8114 = vmatprep.subr.bf16.mxu0 %v8811_v20 }
 0xc3f   :  { %8116 = vmatpush3.bf16.msra.mxu0 %v8811_v20 }
 0xc40   :  { %8118 = vmatprep.subr.bf16.mxu0 %v8818_v23 }
 0xc43   :  { %8120 = vmatpush3.bf16.msra.mxu0 %v8818_v23 }
 0xc44   :  { %8122 = vmatprep.subr.bf16.mxu0 %v8823_v26 }
 0xc47   :  { %8124 = vmatpush3.bf16.msra.mxu0 %v8823_v26 }
 0xc48   :  { %8126 = vmatprep.subr.bf16.mxu0 %v8862_v35 }
 0xd0d   :  { %v7700_v15 = vpop.f32.mrb[20].mxu0 }
 0xd0e   :  { %v9077_v16 = vadd.f32 %v7700_v15, %v6930_v14  ;;  %v1886_v18 = vpop.f32.mrb[21].mxu0 }
 0xd0f   :  { %v7701_v21 = vpop.f32.mrb[22].mxu0  ;;  %v9083_v25 = vadd.f32 %v6930_v14, %v1886_v18 }
 0xd10   :  { %v9079_v22 = vadd.f32 %v7701_v21, %v6930_v14  ;;  %1909 = vrot.lane.b32.xlu1 %v9077_v16, %s8651_s16  ;;  %v1889_v24 = vpop.f32.mrb[23].mxu0 }
 0xd11   :  { %v9089_v27 = vadd.f32 %v6930_v14, %v1889_v24 }
 0xd12   :  { %1911 = vrot.lane.b32.xlu0 %v9079_v22, %s8651_s16 }
 0xd14   :  { %1905 = vrot.lane.b32.xlu1 %v9083_v25, %s8651_s16 }
 0xd18   :  { %1907 = vrot.lane.b32.xlu1 %v9089_v27, %s8651_s16 }
 0xd82   :  { %v1910_v28 = vpop.permute.xlu1 %1909 }
 0xd83   :  { %v1921_v29 = vmul.f32 %v1910_v28, %v9083_v25  ;;  %v1919_v42 = vmul.f32 %v1910_v28, %v9077_v16 }
 0xd84   :  { %v1912_v30 = vpop.permute.xlu0 %1911 }
 0xd85   :  { %v1922_v31 = vmul.f32 %v1912_v30, %v9089_v27  ;;  %1937 = vrot.lane.b32.xlu0 %v1921_v29, %s8660_s20  ;;  %v1920_v46 = vmul.f32 %v1912_v30, %v9079_v22 }
 0xd86   :  { %v1906_v32 = vpop.permute.xlu1 %1905 }
 0xd87   :  { %v1923_v33 = vmul.f32 %v1906_v32, %v9077_v16  ;;  %1939 = vrot.lane.b32.xlu1 %v1922_v31, %s8660_s20  ;;  %v1917_v37 = vmul.f32 %v1906_v32, %v9083_v25 }
 0xd89   :  { %1941 = vrot.lane.b32.xlu0 %v1923_v33, %s8660_s20 }
 0xd8a   :  { %v1908_v34 = vpop.permute.xlu1 %1907 }
 0xd8b   :  { %v1924_v36 = vmul.f32 %v1908_v34, %v9079_v22  ;;  %v1918_v39 = vmul.f32 %v1908_v34, %v9089_v27 }
 0xd8d   :  { %1943 = vrot.lane.b32.xlu1 %v1924_v36, %s8660_s20 }
 0xdf7   :  { %v1938_v38 = vpop.permute.xlu0 %1937 }
 0xdf8   :  { %v1949_v40 = vsel %vm358_vm3, %v1917_v37, %v1938_v38 }
 0xdf9   :  { %v1940_v41 = vpop.permute.xlu1 %1939  ;;  %7718 = vmatprep.mubr.msk.f32.mxu0 %vm975_vm6, %v1949_v40 }
 0xdfa   :  { %v1950_v43 = vsel %vm358_vm3, %v1918_v39, %v1940_v41 }
 0xdfb   :  { %7719 = vmatmul.mubr.msk.f32.vlgmr.msra.gmra.mrb[14].mxu0 %vm975_vm6, %v1950_v43  ;;  %v1942_v44 = vpop.permute.xlu0 %1941 }
 0xdfc   :  { %v1951_v45 = vsel %vm358_vm3, %v1919_v42, %v1942_v44  ;;  %8128 = vmatpush3.bf16.msra.mxu0 %v8862_v35 }
 0xdfd   :  { %7721 = vmatprep.mubr.msk.f32.mxu0 %vm975_vm6, %v1951_v45 }
 0xdff   :  { %v1944_v47 = vpop.permute.xlu1 %1943 }
 0xe00   :  { %v1952_v48 = vsel %vm358_vm3, %v1920_v46, %v1944_v47 }
 0xe01   :  { %7722 = vmatmul.mubr.msk.f32.gmra.mrb[24].mxu0 %vm975_vm6, %v1952_v48 }
 0xece   :  { %v7720_v50 = vpop.f32.mrb[14].mxu0 }
 0xecf   :  { %2056 = vrot.lane.b32.xlu1 %v7720_v50, %s8661_s21  ;;  %v2031_v52 = vpop.f32.mrb[15].mxu0 }
 0xed0   :  { %2054 = vrot.lane.b32.xlu0 %v2031_v52, %s8661_s21 }
 0xed4   :  { %v7723_v53 = vpop.f32.mrb[24].mxu0 }
 0xed5   :  { %2060 = vrot.lane.b32.xlu1 %v7723_v53, %s8661_s21  ;;  %v2041_v54 = vpop.f32.mrb[25].mxu0 }
 0xed6   :  { %2058 = vrot.lane.b32.xlu0 %v2041_v54, %s8661_s21 }
 0xf41   :  { %v2057_v56 = vpop.permute.xlu1 %2056 }
 0xf42   :  { %v2067_v4 = vmax.f32 %v7720_v50, %v2057_v56  ;;  %v2055_v61 = vpop.permute.xlu0 %2054 }
 0xf43   :  { %v2066_v59 = vmax.f32 %v2031_v52, %v2055_v61 }
 0xf44   :  { %v2071_v49 = vsub.f32 %v7720_v50, %v2067_v4  ;;  %2088 = vrot.lane.b32.xlu1 %v2067_v4, %s8659_s15 }
 0xf45   :  { %v2070_v57 = vsub.f32 %v2031_v52, %v2066_v59  ;;  %2086 = vrot.lane.b32.xlu0 %v2066_v59, %s8659_s15 }
 0xf46   :  { %v2076_v29 = vmul.f32 1.442695, %v2071_v49 }
 0xf47   :  { %v2061_v62 = vpop.permute.xlu1 %2060  ;;  %v2074_v30 = vmul.f32 1.442695, %v2070_v57 }
 0xf48   :  { %v2069_v2 = vmax.f32 %v7723_v53, %v2061_v62  ;;  %v2059_v13 = vpop.permute.xlu0 %2058 }
 0xf49   :  { %v2068_v63 = vmax.f32 %v2041_v54, %v2059_v13 }
 0xf4a   :  { %v2073_v8 = vsub.f32 %v7723_v53, %v2069_v2  ;;  %2092 = vrot.lane.b32.xlu1 %v2069_v2, %s8659_s15 }
 0xf4b   :  { %v2072_v19 = vsub.f32 %v2041_v54, %v2068_v63  ;;  %2090 = vrot.lane.b32.xlu0 %v2068_v63, %s8659_s15 }
 0xf4c   :  { %v2080_v31 = vmul.f32 1.442695, %v2073_v8 }
 0xf4d   :  { %v2078_v32 = vmul.f32 1.442695, %v2072_v19 }
 0xfb6   :  { %v2089_v10 = vpop.permute.xlu1 %2088 }
 0xfb7   :  { %v2099_v1 = vsub.f32 %v7720_v50, %v2089_v10  ;;  %v2087_v3 = vpop.permute.xlu0 %2086 }
 0xfb8   :  { %v2098_v7 = vsub.f32 %v2031_v52, %v2087_v3  ;;  %v8280_v3 = vld [vmem:[%s8893_s30 + $0x18] sm:$0xff]  }
 0xfb9   :  { %v2104_v55 = vmul.f32 1.442695, %v2099_v1  ;;  %v8279_v1 = vld [vmem:[%s8893_s30 + $0x10] sm:$0xff]  }
 0xfba   :  { %v2102_v11 = vmul.f32 1.442695, %v2098_v7  ;;  %7734 = vmatprep.subr.bf16.mxu1 %v8279_v1 }
 0xfbb   :  { %8397 = vpow2.f32 %v2104_v55  ;;  %7735 = vmatpush3.bf16.msra.mxu1 %v8279_v1 }
 0xfbc   :  { %8399 = vpow2.f32 %v2102_v11  ;;  %v2093_v60 = vpop.permute.xlu1 %2092  ;;  %7736 = vmatprep.subr.bf16.mxu1 %v8280_v3 }
 0xfbd   :  { %v2101_v9 = vsub.f32 %v7723_v53, %v2093_v60  ;;  %v2091_v0 = vpop.permute.xlu0 %2090 }
 0xfbe   :  { %v2100_v6 = vsub.f32 %v2041_v54, %v2091_v0 }
 0xfbf   :  { %v2108_v14 = vmul.f32 1.442695, %v2101_v9  ;;  %7737 = vmatpush3.bf16.msra.mxu1 %v8280_v3 }
 0xfc0   :  { %v2106_v15 = vmul.f32 1.442695, %v2100_v6 }
 0xfc1   :  { %8401 = vpow2.f32 %v2108_v14 }
 0xfc2   :  { %8403 = vpow2.f32 %v2106_v15 }
 0xfc3   :  { %8405 = vpow2.f32 %v2076_v29 }
 0xfc4   :  { %8407 = vpow2.f32 %v2074_v30 }
 0xfc5   :  { %v8398_v18 = vpop.eup %8397  ;;  %8409 = vpow2.f32 %v2080_v31 }
 0xfc6   :  { %v8400_v21 = vpop.eup %8399  ;;  %2116 = vrot.lane.b32.xlu1 %v8398_v18, %s8661_s21  ;;  %8411 = vpow2.f32 %v2078_v32 }
 0xfc7   :  { %2114 = vrot.lane.b32.xlu0 %v8400_v21, %s8661_s21 }
 0xfcb   :  { %v8402_v24 = vpop.eup %8401 }
 0xfcc   :  { %v8404_v28 = vpop.eup %8403  ;;  %2120 = vrot.lane.b32.xlu1 %v8402_v24, %s8661_s21 }
 0xfcd   :  { %2118 = vrot.lane.b32.xlu0 %v8404_v28, %s8661_s21  ;;  %v8406_v33 = vpop.eup %8405 }
 0xfce   :  { %v8408_v36 = vpop.eup %8407 }
 0xfcf   :  { %v8410_v40 = vpop.eup %8409 }
 0xfd0   :  { %v8412_v42 = vpop.eup %8411 }
0x1038   :  { %v2117_v34 = vpop.permute.xlu1 %2116 }
0x1039   :  { %v2127_v37 = vadd.f32 %v8406_v33, %v2117_v34  ;;  %v2115_v38 = vpop.permute.xlu0 %2114 }
0x103a   :  { %v2126_v39 = vadd.f32 %v8408_v36, %v2115_v38 }
0x103b   :  { %8413 = vrcp.f32 %v2127_v37 }
0x103c   :  { %8415 = vrcp.f32 %v2126_v39 }
0x103e   :  { %v2121_v41 = vpop.permute.xlu1 %2120 }
0x103f   :  { %v2129_v43 = vadd.f32 %v8410_v40, %v2121_v41  ;;  %v2119_v44 = vpop.permute.xlu0 %2118 }
0x1040   :  { %v2128_v45 = vadd.f32 %v8412_v42, %v2119_v44 }
0x1041   :  { %8417 = vrcp.f32 %v2129_v43  ;;  %v6948_v43 = vld [vmem:[%s8906_s4 + $0x1] ss:$0 sm:$0xff] }
0x1042   :  { %8419 = vrcp.f32 %v2128_v45 }
0x1045   :  { %v8414_v46 = vpop.eup %8413 }
0x1046   :  { %v8416_v47 = vpop.eup %8415  ;;  %2144 = vrot.lane.b32.xlu1 %v8414_v46, %s8659_s15  ;;  %v2135_v48 = vmul.f32 %v8414_v46, %v8406_v33 }
0x1047   :  { %2142 = vrot.lane.b32.xlu0 %v8416_v47, %s8659_s15  ;;  %v2134_v50 = vmul.f32 %v8416_v47, %v8408_v36 }
0x104b   :  { %v8418_v52 = vpop.eup %8417 }
0x104c   :  { %v8420_v53 = vpop.eup %8419  ;;  %2148 = vrot.lane.b32.xlu1 %v8418_v52, %s8659_s15  ;;  %v2137_v54 = vmul.f32 %v8418_v52, %v8410_v40 }
0x104d   :  { %2146 = vrot.lane.b32.xlu0 %v8420_v53, %s8659_s15  ;;  %v2136_v56 = vmul.f32 %v8420_v53, %v8412_v42 }
0x1050   :  { %1931 = vrot.lane.b32.xlu1 %v9079_v22, %s8663_s26 }
0x1051   :  { %1929 = vrot.lane.b32.xlu0 %v9077_v16, %s8663_s26 }
0x1054   :  { %1927 = vrot.lane.b32.xlu1 %v9089_v27, %s8663_s26 }
0x1055   :  { %1925 = vrot.lane.b32.xlu0 %v9083_v25, %s8663_s26 }
0x10b8   :  { %v2145_v4 = vpop.permute.xlu1 %2144 }
0x10b9   :  { %v2155_v61 = vmul.f32 %v8398_v18, %v2145_v4  ;;  %v2143_v59 = vpop.permute.xlu0 %2142 }
0x10ba   :  { %v2154_v49 = vmul.f32 %v8400_v21, %v2143_v59 }
0x10bb   :  { %v2159_v62 = vsel %vm229_vm2, %v2135_v48, %v2155_v61 }
0x10bc   :  { %v2158_v57 = vsel %vm229_vm2, %v2134_v50, %v2154_v49 }
0x10bd   :  { %7728 = vmatprep.mubr.msk.f32.mxu0 %vm145_vm1, %v2158_v57 }
0x10be   :  { %v2149_v22 = vpop.permute.xlu1 %2148  ;;  %7729 = vmatmul.mubr.msk.f32.vlgmr.msra.gmra.mrb[26].mxu0 %vm145_vm1, %v2159_v62 }
0x10bf   :  { %v2157_v16 = vmul.f32 %v8402_v24, %v2149_v22  ;;  %v2147_v2 = vpop.permute.xlu0 %2146 }
0x10c0   :  { %v2156_v27 = vmul.f32 %v8404_v28, %v2147_v2 }
0x10c1   :  { %v2161_v8 = vsel %vm229_vm2, %v2137_v54, %v2157_v16 }
0x10c2   :  { %v1932_v13 = vpop.permute.xlu1 %1931  ;;  %v2160_v25 = vsel %vm229_vm2, %v2136_v56, %v2156_v27 }
0x10c3   :  { %2269 = vrot.lane.b32.xlu1 %v1932_v13, %s8660_s20  ;;  %7731 = vmatprep.mubr.msk.f32.mxu0 %vm145_vm1, %v2160_v25  ;;  %v1930_v63 = vpop.permute.xlu0 %1929  ;;  %v8282_v25 = vld [vmem:[%s8944_s9 + $0x18] sm:$0xff]  }
0x10c4   :  { %7732 = vmatmul.mubr.msk.f32.gmra.mrb[28].mxu0 %vm145_vm1, %v2161_v8  ;;  %2267 = vrot.lane.b32.xlu0 %v1930_v63, %s8660_s20 }
0x10c6   :  { %v1928_v19 = vpop.permute.xlu1 %1927 }
0x10c7   :  { %2273 = vrot.lane.b32.xlu1 %v1928_v19, %s8660_s20  ;;  %v1926_v10 = vpop.permute.xlu0 %1925 }
0x10c8   :  { %2271 = vrot.lane.b32.xlu0 %v1926_v10, %s8660_s20 }
0x1135   :  { %v2270_v7 = vpop.permute.xlu1 %2269 }
0x1136   :  { %v2268_v11 = vpop.permute.xlu0 %2267 }
0x1139   :  { %v2274_v6 = vpop.permute.xlu1 %2273 }
0x113a   :  { %v2272_v15 = vpop.permute.xlu0 %2271 }
0x1191   :  { %v7730_v55 = vpop.f32.mrb[26].mxu0 }
0x1192   :  { %v2280_v60 = vmul.f32 %v7730_v55, %v2270_v7  ;;  %v2240_v9 = vpop.f32.mrb[27].mxu0  ;;  %v2264_v28 = vmul.f32 %v7730_v55, %v1928_v19 }
0x1193   :  { %v2279_v0 = vmul.f32 %v2268_v11, %v2240_v9  ;;  %v2263_v29 = vmul.f32 %v2240_v9, %v1926_v10 }
0x1194   :  { %2289 = vrot.lane.b32.xlu1 %v2280_v60, %s8651_s16 }
0x1195   :  { %2287 = vrot.lane.b32.xlu0 %v2279_v0, %s8651_s16 }
0x1197   :  { %v7733_v14 = vpop.f32.mrb[28].mxu0 }
0x1198   :  { %v2282_v18 = vmul.f32 %v7733_v14, %v2274_v6  ;;  %v2250_v21 = vpop.f32.mrb[29].mxu0  ;;  %v2266_v36 = vmul.f32 %v7733_v14, %v1932_v13  ;;  %v8281_v13 = vld [vmem:[%s8944_s9 + $0x10] sm:$0xff]  }
0x1199   :  { %v2281_v24 = vmul.f32 %v2272_v15, %v2250_v21  ;;  %v2265_v37 = vmul.f32 %v2250_v21, %v1930_v63  ;;  %7742 = vmatprep.subr.bf16.mxu0 %v8281_v13 }
0x119a   :  { %2293 = vrot.lane.b32.xlu1 %v2282_v18, %s8651_s16  ;;  %7743 = vmatpush3.bf16.msra.mxu0 %v8281_v13  ;;  %v8288_v13 = vld [vmem:[%s8981_s27 + $0x68] sm:$0xff]  }
0x119b   :  { %2291 = vrot.lane.b32.xlu0 %v2281_v24, %s8651_s16  ;;  %7744 = vmatprep.subr.bf16.mxu0 %v8282_v25 }
0x119e   :  { %7745 = vmatpush3.bf16.msra.mxu0 %v8282_v25  ;;  %v8289_v25 = vld [vmem:[%s8981_s27 + $0x70] sm:$0xff]  }
0x1206   :  { %v2290_v30 = vpop.permute.xlu1 %2289 }
0x1207   :  { %v2300_v31 = vadd.f32 %v2290_v30, %v2264_v28  ;;  %v2288_v32 = vpop.permute.xlu0 %2287 }
0x1208   :  { %v2299_v33 = vadd.f32 %v2288_v32, %v2263_v29 }
0x120a   :  { %v2303_v34 = vpack.c.bf16 %v2300_v31, %v2299_v33 }
0x120c   :  { %v2294_v38 = vpop.permute.xlu1 %2293  ;;  %7738 = vmatprep.mubr.msk.bf16.mxu1 %vm358_vm3, %v2303_v34 }
0x120d   :  { %v2302_v39 = vadd.f32 %v2294_v38, %v2266_v36  ;;  %v2292_v40 = vpop.permute.xlu0 %2291 }
0x120e   :  { %v2301_v41 = vadd.f32 %v2292_v40, %v2265_v37 }
0x1210   :  { %v2304_v42 = vpack.c.bf16 %v2302_v39, %v2301_v41 }
0x1212   :  { %7739 = vmatmul.mubr.msk.bf16.vlgmr.msra.gmra.mrb[20].mxu1 %vm358_vm3, %v2304_v42  ;;  %v6955_v42 = vld [vmem:[%s8951_s13 + $0x1] ss:$0 sm:$0xff] }
0x12e5   :  { %v7740_v44 = vpop.f32.mrb[20].mxu1 }
0x12e6   :  { %v2379_v45 = vadd.f32 %v7740_v44, %v6948_v43  ;;  %v2370_v46 = vpop.f32.mrb[21].mxu1 }
0x12e7   :  { %v2371_v47 = vadd.f32 %v6948_v43, %v2370_v46  ;;  %v7741_v48 = vpop.f32.mrb[22].mxu1 }
0x12e8   :  { %v9160_v50 = vadd.f32 %v2379_v45, %v9061_v51  ;;  %v2373_v52 = vpop.f32.mrb[23].mxu1  ;;  %v2382_v56 = vadd.f32 %v7741_v48, %v6948_v43 }
0x12e9   :  { %v9163_v53 = vadd.f32 %v2371_v47, %v9054_v58  ;;  %v2374_v54 = vadd.f32 %v6948_v43, %v2373_v52 }
0x12ea   :  { %v2399_v4 = vsel %vm358_vm3, %v9160_v50, 0.0  ;;  %v9175_v49 = vadd.f32 %v2382_v56, %v9063_v12  ;;  %v2411_v57 = vmul.f32 %v9160_v50, %v9160_v50 }
0x12eb   :  { %v9168_v61 = vadd.f32 %v2374_v54, %v9056_v5  ;;  %2400 = vadd.xlane.f32.xlu0 %v2399_v4  ;;  %v2409_v51 = vmul.f32 %v9163_v53, %v9163_v53  ;;  %v2393_v58 = vsel %vm358_vm3, %v9163_v53, 0.0  ;;  %v6956_v54 = vld [vmem:[%s8956_s22 + $0x1] ss:$0 sm:$0xff] }
0x12ec   :  { %v2402_v62 = vsel %vm358_vm3, %v9175_v49, 0.0  ;;  %v2419_v22 = vsel %vm358_vm3, %v2411_v57, 0.0  ;;  %v2412_v2 = vmul.f32 %v9175_v49, %v9175_v49 }
0x12ed   :  { %v2396_v59 = vsel %vm358_vm3, %v9168_v61, 0.0  ;;  %v2413_v5 = vsel %vm358_vm3, %v2409_v51, 0.0  ;;  %v2410_v12 = vmul.f32 %v9168_v61, %v9168_v61 }
0x12ee   :  { %2397 = vadd.xlane.f32.xlu1 %v2396_v59  ;;  %v2422_v27 = vsel %vm358_vm3, %v2412_v2, 0.0  ;;  %v8286_v2 = vld [vmem:[%s8981_s27 + $0x58] sm:$0xff]  }
0x12ef   :  { %2394 = vadd.xlane.f32.xlu0 %v2393_v58  ;;  %v2416_v16 = vsel %vm358_vm3, %v2410_v12, 0.0  ;;  %v8283_v12 = vld [vmem:[%s8981_s27 + $0x40] sm:$0xff]  }
0x12f0   :  { %7750 = vmatprep.subr.bf16.mxu1 %v8283_v12 }
0x12f1   :  { %7751 = vmatpush3.bf16.msra.mxu1 %v8283_v12  ;;  %v6984_v12 = vld [vmem:[%s9000_s8 + $0x1] ss:$0 sm:$0xff] }
0x12f2   :  { %2414 = vadd.xlane.f32.xlu1 %v2413_v5 }
0x12f3   :  { %2403 = vadd.xlane.f32.xlu0 %v2402_v62 }
0x12f6   :  { %2420 = vadd.xlane.f32.xlu1 %v2419_v22  ;;  %v8284_v22 = vld [vmem:[%s8981_s27 + $0x48] sm:$0xff]  }
0x12f7   :  { %2417 = vadd.xlane.f32.xlu0 %v2416_v16  ;;  %7752 = vmatprep.subr.bf16.mxu1 %v8284_v22  ;;  %v8285_v16 = vld [vmem:[%s8981_s27 + $0x50] sm:$0xff]  }
0x12f8   :  { %7753 = vmatpush3.bf16.msra.mxu1 %v8284_v22 }
0x12f9   :  { %7754 = vmatprep.subr.bf16.mxu1 %v8285_v16 }
0x12fb   :  { %2423 = vadd.xlane.f32.xlu0 %v2422_v27  ;;  %v8287_v27 = vld [vmem:[%s8981_s27 + $0x60] sm:$0xff]  }
0x12fc   :  { %7755 = vmatpush3.bf16.msra.mxu1 %v8285_v16 }
0x12fd   :  { %7756 = vmatprep.subr.bf16.mxu1 %v8286_v2 }
0x1300   :  { %7757 = vmatpush3.bf16.msra.mxu1 %v8286_v2 }
0x1301   :  { %7758 = vmatprep.subr.bf16.mxu1 %v8287_v27 }
0x1304   :  { %7759 = vmatpush3.bf16.msra.mxu1 %v8287_v27 }
0x1305   :  { %7760 = vmatprep.subr.bf16.mxu1 %v8288_v13 }
0x1308   :  { %7761 = vmatpush3.bf16.msra.mxu1 %v8288_v13 }
0x1309   :  { %7762 = vmatprep.subr.bf16.mxu1 %v8289_v25 }
0x130c   :  { %7763 = vmatpush3.bf16.msra.mxu1 %v8289_v25 }
0x1378   :  { %v2401_v63 = vpop.xlane.xlu0 %2400 }
0x1379   :  { %v2407_v7 = vmul.f32 0.03125, %v2401_v63  ;;  %v8290_v63 = vld [vmem:[%s8981_s27 + $0x78] sm:$0xff]  }
0x137a   :  { %7764 = vmatprep.subr.bf16.mxu1 %v8290_v63 }
0x137b   :  { %v2398_v8 = vpop.xlane.xlu1 %2397  ;;  %v2431_v6 = vmul.f32 %v2407_v7, %v2407_v7  ;;  %v2439_v44 = vsub.f32 %v9160_v50, %v2407_v7  ;;  %7765 = vmatpush3.bf16.msra.mxu1 %v8290_v63 }
0x137c   :  { %v2395_v19 = vpop.xlane.xlu0 %2394  ;;  %v2406_v60 = vmul.f32 0.03125, %v2398_v8  ;;  %v6962_v8 = vld [vmem:[%s8994_s2 + $0x1] ss:$0 sm:$0xff] }
0x137d   :  { %v2405_v10 = vmul.f32 0.03125, %v2395_v19 }
0x137e   :  { %v2430_v21 = vmul.f32 %v2406_v60, %v2406_v60  ;;  %v2438_v45 = vsub.f32 %v9168_v61, %v2406_v60 }
0x137f   :  { %v2429_v1 = vmul.f32 %v2405_v10, %v2405_v10  ;;  %v2415_v3 = vpop.xlane.xlu1 %2414  ;;  %v2437_v40 = vsub.f32 %v9163_v53, %v2405_v10 }
0x1380   :  { %v2425_v55 = vmul.f32 0.03125, %v2415_v3  ;;  %v2404_v11 = vpop.xlane.xlu0 %2403 }
0x1381   :  { %v2408_v24 = vmul.f32 0.03125, %v2404_v11 }
0x1382   :  { %v2433_v9 = vsub.f32 %v2425_v55, %v2429_v1 }
0x1383   :  { %v2421_v0 = vpop.xlane.xlu1 %2420  ;;  %v2432_v33 = vmul.f32 %v2408_v24, %v2408_v24  ;;  %v2440_v56 = vsub.f32 %v9175_v49, %v2408_v24 }
0x1384   :  { %v2441_v14 = vadd.f32 1e-05, %v2433_v9  ;;  %v2427_v15 = vmul.f32 0.03125, %v2421_v0  ;;  %v2418_v18 = vpop.xlane.xlu0 %2417 }
0x1385   :  { %v2426_v28 = vmul.f32 0.03125, %v2418_v18 }
0x1386   :  { %8421 = vrsqrt.f32 %v2441_v14  ;;  %v2435_v29 = vsub.f32 %v2427_v15, %v2431_v6 }
0x1387   :  { %v2434_v30 = vsub.f32 %v2426_v28, %v2430_v21 }
0x1388   :  { %v2443_v31 = vadd.f32 1e-05, %v2435_v29  ;;  %v2424_v32 = vpop.xlane.xlu0 %2423 }
0x1389   :  { %v2442_v34 = vadd.f32 1e-05, %v2434_v30  ;;  %v2428_v36 = vmul.f32 0.03125, %v2424_v32 }
0x138a   :  { %8423 = vrsqrt.f32 %v2443_v31 }
0x138b   :  { %8425 = vrsqrt.f32 %v2442_v34  ;;  %v2436_v37 = vsub.f32 %v2428_v36, %v2432_v33 }
0x138d   :  { %v2444_v38 = vadd.f32 1e-05, %v2436_v37 }
0x138f   :  { %8427 = vrsqrt.f32 %v2444_v38 }
0x1390   :  { %v8422_v39 = vpop.eup %8421 }
0x1391   :  { %v2449_v41 = vmul.f32 %v8422_v39, %v2437_v40 }
0x1393   :  { %v2459_v52 = vmul.f32 %v6955_v42, %v2449_v41 }
0x1394   :  { %v8424_v43 = vpop.eup %8423 }
0x1395   :  { %v8426_v46 = vpop.eup %8425  ;;  %v2451_v47 = vmul.f32 %v8424_v43, %v2439_v44  ;;  %v9199_v58 = vadd.f32 %v6956_v54, %v2459_v52 }
0x1396   :  { %v2450_v48 = vmul.f32 %v8426_v46, %v2438_v45 }
0x1397   :  { %v2461_v53 = vmul.f32 %v6955_v42, %v2451_v47 }
0x1398   :  { %v2460_v4 = vmul.f32 %v6955_v42, %v2450_v48 }
0x1399   :  { %v8428_v59 = vpop.eup %8427  ;;  %v9205_v57 = vadd.f32 %v6956_v54, %v2461_v53 }
0x139a   :  { %v2452_v51 = vmul.f32 %v8428_v59, %v2440_v56  ;;  %v9201_v5 = vadd.f32 %v6956_v54, %v2460_v4 }
0x139c   :  { %v2462_v50 = vmul.f32 %v6955_v42, %v2452_v51  ;;  %v2473_v61 = vpack.c.bf16 %v9201_v5, %v9199_v58 }
0x139e   :  { %v9207_v62 = vadd.f32 %v6956_v54, %v2462_v50  ;;  %7746 = vmatprep.mubr.msk.bf16.mxu0 %vm358_vm3, %v2473_v61 }
0x13a0   :  { %v2474_v49 = vpack.c.bf16 %v9207_v62, %v9205_v57 }
0x13a2   :  { %7747 = vmatmul.mubr.msk.bf16.vlgmr.msra.gmra.mrb[32].mxu0 %vm358_vm3, %v2474_v49 }
0x1475   :  { %v7748_v19 = vpop.f32.mrb[32].mxu0 }
0x1476   :  { %v2549_v10 = vadd.f32 %v7748_v19, %v6962_v8  ;;  %v2540_v1 = vpop.f32.mrb[33].mxu0 }
0x1477   :  { %v2541_v3 = vadd.f32 %v6962_v8, %v2540_v1  ;;  %v7749_v7 = vpop.f32.mrb[34].mxu0 }
0x1478   :  { %v2561_v55 = vmul.f32 0.044715, %v2549_v10  ;;  %v2552_v11 = vadd.f32 %v7749_v7, %v6962_v8  ;;  %v2543_v60 = vpop.f32.mrb[35].mxu0  ;;  %v2557_v47 = vmul.f32 0.5, %v2549_v10 }
0x1479   :  { %v2559_v9 = vmul.f32 0.044715, %v2541_v3  ;;  %v2544_v0 = vadd.f32 %v6962_v8, %v2543_v60  ;;  %v2555_v54 = vmul.f32 0.5, %v2541_v3 }
0x147a   :  { %v2565_v6 = vmul.f32 %v2561_v55, %v2549_v10  ;;  %v2562_v14 = vmul.f32 0.044715, %v2552_v11  ;;  %v2558_v48 = vmul.f32 0.5, %v2552_v11 }
0x147b   :  { %v2563_v15 = vmul.f32 %v2559_v9, %v2541_v3  ;;  %v2560_v18 = vmul.f32 0.044715, %v2544_v0  ;;  %v2556_v56 = vmul.f32 0.5, %v2544_v0 }
0x147c   :  { %v2569_v21 = vmul.f32 %v2565_v6, %v2549_v10  ;;  %v2566_v24 = vmul.f32 %v2562_v14, %v2552_v11 }
0x147d   :  { %v2567_v28 = vmul.f32 %v2563_v15, %v2541_v3  ;;  %v2564_v29 = vmul.f32 %v2560_v18, %v2544_v0  ;;  %v8291_v15 = vld [vmem:[%s8764_s6 + $0x20] sm:$0xff]   ;;  %v8292_v18 = vld [vmem:[%s8764_s6 + $0x28] sm:$0xff]  }
0x147e   :  { %v2573_v30 = vadd.f32 %v2569_v21, %v2549_v10  ;;  %v2570_v31 = vmul.f32 %v2566_v24, %v2552_v11  ;;  %7770 = vmatprep.subr.bf16.mxu0 %v8291_v15 }
0x147f   :  { %v2568_v32 = vmul.f32 %v2564_v29, %v2544_v0  ;;  %v2571_v33 = vadd.f32 %v2567_v28, %v2541_v3  ;;  %7771 = vmatpush3.bf16.msra.mxu0 %v8291_v15 }
0x1480   :  { %v2577_v34 = vmul.f32 0.7978846, %v2573_v30  ;;  %v2574_v36 = vadd.f32 %v2570_v31, %v2552_v11  ;;  %7772 = vmatprep.subr.bf16.mxu0 %v8292_v18 }
0x1481   :  { %v2572_v37 = vadd.f32 %v2568_v32, %v2544_v0  ;;  %v2575_v38 = vmul.f32 0.7978846, %v2571_v33 }
0x1482   :  { %8429 = vtanh.f32 %v2577_v34  ;;  %v2578_v39 = vmul.f32 0.7978846, %v2574_v36 }
0x1483   :  { %v2576_v40 = vmul.f32 0.7978846, %v2572_v37  ;;  %8431 = vtanh.f32 %v2575_v38  ;;  %7773 = vmatpush3.bf16.msra.mxu0 %v8292_v18 }
0x1484   :  { %8433 = vtanh.f32 %v2578_v39  ;;  %8130 = vmatprep.subr.bf16.mxu0 %v8807_v17 }
0x1485   :  { %8435 = vtanh.f32 %v2576_v40 }
0x148c   :  { %v8430_v41 = vpop.eup %8429 }
0x148d   :  { %v8432_v42 = vpop.eup %8431  ;;  %v2585_v43 = vadd.f32 1.0, %v8430_v41 }
0x148e   :  { %v8434_v44 = vpop.eup %8433  ;;  %v2583_v45 = vadd.f32 1.0, %v8432_v42 }
0x148f   :  { %v8436_v46 = vpop.eup %8435  ;;  %v2586_v52 = vadd.f32 1.0, %v8434_v44  ;;  %v2589_v59 = vmul.f32 %v2585_v43, %v2557_v47 }
0x1490   :  { %v2584_v4 = vadd.f32 1.0, %v8436_v46  ;;  %v2587_v53 = vmul.f32 %v2583_v45, %v2555_v54 }
0x1491   :  { %v2590_v51 = vmul.f32 %v2586_v52, %v2558_v48 }
0x1492   :  { %v2588_v50 = vmul.f32 %v2584_v4, %v2556_v56 }
0x1493   :  { %v2592_v61 = vpack.c.bf16 %v2590_v51, %v2589_v59 }
0x1494   :  { %v2591_v49 = vpack.c.bf16 %v2588_v50, %v2587_v53 }
0x1496   :  { %7766 = vmatprep.mubr.bf16.mxu1 %v2591_v49 }
0x1497   :  { %7767 = vmatmul.mubr.bf16.vlgmr.msra.gmra.mrb[24].mxu1 %v2592_v61  ;;  %v6995_v61 = vld [vmem:[%s9041_s17 + $0x1] ss:$0 sm:$0xff] }
0x156a   :  { %v7768_v22 = vpop.f32.mrb[24].mxu1 }
0x156b   :  { %v2709_v16 = vadd.f32 %v7768_v22, %v6984_v12  ;;  %v2700_v2 = vpop.f32.mrb[25].mxu1 }
0x156c   :  { %v2701_v27 = vadd.f32 %v6984_v12, %v2700_v2  ;;  %v7769_v13 = vpop.f32.mrb[26].mxu1 }
0x156d   :  { %v9224_v25 = vadd.f32 %v2709_v16, %v9205_v57  ;;  %v2712_v63 = vadd.f32 %v7769_v13, %v6984_v12  ;;  %v2703_v8 = vpop.f32.mrb[27].mxu1 }
0x156e   :  { %v2704_v19 = vadd.f32 %v6984_v12, %v2703_v8  ;;  %v9227_v10 = vadd.f32 %v2701_v27, %v9199_v58 }
0x156f   :  { %v9230_v1 = vadd.f32 %v2712_v63, %v9207_v62  ;;  %v2729_v3 = vsel %vm358_vm3, %v9224_v25, 0.0  ;;  %v2741_v60 = vmul.f32 %v9224_v25, %v9224_v25  ;;  %v6996_v63 = vld [vmem:[%s9046_s24 + $0x1] ss:$0 sm:$0xff] }
0x1570   :  { %2730 = vadd.xlane.f32.xlu1 %v2729_v3  ;;  %v9235_v7 = vadd.f32 %v2704_v19, %v9201_v5  ;;  %v2723_v55 = vsel %vm358_vm3, %v9227_v10, 0.0  ;;  %v2739_v58 = vmul.f32 %v9227_v10, %v9227_v10 }
0x1571   :  { %v2732_v57 = vsel %vm358_vm3, %v9230_v1, 0.0  ;;  %v2742_v0 = vmul.f32 %v9230_v1, %v9230_v1  ;;  %v2749_v6 = vsel %vm358_vm3, %v2741_v60, 0.0  ;;  %v7002_v60 = vld [vmem:[%s8788_s14 + $0x2] ss:$0 sm:$0xff] }
0x1572   :  { %2733 = vadd.xlane.f32.xlu0 %v2732_v57  ;;  %v2726_v62 = vsel %vm358_vm3, %v9235_v7, 0.0  ;;  %v2740_v5 = vmul.f32 %v9235_v7, %v9235_v7  ;;  %v2743_v11 = vsel %vm358_vm3, %v2739_v58, 0.0 }
0x1573   :  { %v2752_v14 = vsel %vm358_vm3, %v2742_v0, 0.0 }
0x1574   :  { %2724 = vadd.xlane.f32.xlu1 %v2723_v55  ;;  %v2746_v9 = vsel %vm358_vm3, %v2740_v5, 0.0 }
0x1576   :  { %2727 = vadd.xlane.f32.xlu0 %v2726_v62 }
0x1578   :  { %2744 = vadd.xlane.f32.xlu1 %v2743_v11 }
0x157a   :  { %2747 = vadd.xlane.f32.xlu0 %v2746_v9 }
0x157c   :  { %2750 = vadd.xlane.f32.xlu1 %v2749_v6 }
0x157e   :  { %2753 = vadd.xlane.f32.xlu0 %v2752_v14 }
0x15fd   :  { %v2731_v21 = vpop.xlane.xlu1 %2730 }
0x15fe   :  { %v2737_v33 = vmul.f32 0.03125, %v2731_v21 }
0x15ff   :  { %v2734_v24 = vpop.xlane.xlu0 %2733 }
0x1600   :  { %v2738_v37 = vmul.f32 0.03125, %v2734_v24  ;;  %v2761_v43 = vmul.f32 %v2737_v33, %v2737_v33  ;;  %v2769_v16 = vsub.f32 %v9224_v25, %v2737_v33 }
0x1601   :  { %v2725_v28 = vpop.xlane.xlu1 %2724 }
0x1602   :  { %v2735_v29 = vmul.f32 0.03125, %v2725_v28  ;;  %v2762_v47 = vmul.f32 %v2738_v37, %v2738_v37  ;;  %v2770_v8 = vsub.f32 %v9230_v1, %v2738_v37 }
0x1603   :  { %v2728_v30 = vpop.xlane.xlu0 %2727 }
0x1604   :  { %v2736_v31 = vmul.f32 0.03125, %v2728_v30  ;;  %v2759_v34 = vmul.f32 %v2735_v29, %v2735_v29  ;;  %v2767_v53 = vsub.f32 %v9227_v10, %v2735_v29 }
0x1605   :  { %v2745_v32 = vpop.xlane.xlu1 %2744 }
0x1606   :  { %v2755_v36 = vmul.f32 0.03125, %v2745_v32  ;;  %v2760_v39 = vmul.f32 %v2736_v31, %v2736_v31  ;;  %v2768_v49 = vsub.f32 %v9235_v7, %v2736_v31 }
0x1607   :  { %v2748_v38 = vpop.xlane.xlu0 %2747 }
0x1608   :  { %v2763_v40 = vsub.f32 %v2755_v36, %v2759_v34  ;;  %v2756_v41 = vmul.f32 0.03125, %v2748_v38 }
0x1609   :  { %v2751_v42 = vpop.xlane.xlu1 %2750 }
0x160a   :  { %v2771_v44 = vadd.f32 1e-05, %v2763_v40  ;;  %v2764_v45 = vsub.f32 %v2756_v41, %v2760_v39  ;;  %v2757_v46 = vmul.f32 0.03125, %v2751_v42 }
0x160b   :  { %v2754_v48 = vpop.xlane.xlu0 %2753 }
0x160c   :  { %8437 = vrsqrt.f32 %v2771_v44  ;;  %v2772_v52 = vadd.f32 1e-05, %v2764_v45  ;;  %v2765_v54 = vsub.f32 %v2757_v46, %v2761_v43  ;;  %v2758_v56 = vmul.f32 0.03125, %v2754_v48 }
0x160e   :  { %8439 = vrsqrt.f32 %v2772_v52  ;;  %v2773_v4 = vadd.f32 1e-05, %v2765_v54  ;;  %v2766_v59 = vsub.f32 %v2758_v56, %v2762_v47 }
0x1610   :  { %8441 = vrsqrt.f32 %v2773_v4  ;;  %v2774_v51 = vadd.f32 1e-05, %v2766_v59 }
0x1612   :  { %8443 = vrsqrt.f32 %v2774_v51 }
0x1616   :  { %v8438_v50 = vpop.eup %8437 }
0x1617   :  { %v2779_v12 = vmul.f32 %v8438_v50, %v2767_v53 }
0x1618   :  { %v8440_v22 = vpop.eup %8439 }
0x1619   :  { %v2780_v2 = vmul.f32 %v8440_v22, %v2768_v49  ;;  %v2789_v27 = vmul.f32 %v6995_v61, %v2779_v12 }
0x161a   :  { %v8442_v13 = vpop.eup %8441 }
0x161b   :  { %v2781_v19 = vmul.f32 %v8442_v13, %v2769_v16  ;;  %v2790_v3 = vmul.f32 %v6995_v61, %v2780_v2  ;;  %v9264_v58 = vadd.f32 %v6996_v63, %v2789_v27 }
0x161c   :  { %v8444_v57 = vpop.eup %8443 }
0x161d   :  { %v2782_v55 = vmul.f32 %v8444_v57, %v2770_v8  ;;  %v9266_v10 = vadd.f32 %v6996_v63, %v2790_v3  ;;  %v2791_v62 = vmul.f32 %v6995_v61, %v2781_v19 }
0x161f   :  { %v2803_v7 = vpack.c.bf16 %v9266_v10, %v9264_v58  ;;  %v2792_v25 = vmul.f32 %v6995_v61, %v2782_v55  ;;  %v9271_v5 = vadd.f32 %v6996_v63, %v2791_v62 }
0x1621   :  { %7774 = vmatprep.mubr.msk.bf16.mxu0 %vm358_vm3, %v2803_v7  ;;  %v9273_v11 = vadd.f32 %v6996_v63, %v2792_v25 }
0x1623   :  { %v2804_v1 = vpack.c.bf16 %v9273_v11, %v9271_v5 }
0x1625   :  { %7775 = vmatmul.mubr.msk.bf16.vlgmr.msra.gmra.mrb[36].mxu0 %vm358_vm3, %v2804_v1 }
0x1626   :  { %8132 = vmatpush3.bf16.msra.mxu0 %v8807_v17 }
0x1627   :  { %8134 = vmatprep.subr.bf16.mxu0 %v8811_v20 }
0x162a   :  { %8136 = vmatpush3.bf16.msra.mxu0 %v8811_v20 }
0x162b   :  { %8138 = vmatprep.subr.bf16.mxu0 %v8818_v23 }
0x162e   :  { %8140 = vmatpush3.bf16.msra.mxu0 %v8818_v23 }
0x162f   :  { %8142 = vmatprep.subr.bf16.mxu0 %v8823_v26 }
0x1632   :  { %8144 = vmatpush3.bf16.msra.mxu0 %v8823_v26 }
0x1633   :  { %8146 = vmatprep.subr.bf16.mxu0 %v8862_v35 }
0x16f8   :  { %v7776_v9 = vpop.f32.mrb[36].mxu0 }
0x16f9   :  { %v9287_v0 = vadd.f32 %v7776_v9, %v7002_v60  ;;  %v2870_v6 = vpop.f32.mrb[37].mxu0 }
0x16fa   :  { %v7777_v14 = vpop.f32.mrb[38].mxu0  ;;  %v9293_v21 = vadd.f32 %v7002_v60, %v2870_v6 }
0x16fb   :  { %v9289_v15 = vadd.f32 %v7777_v14, %v7002_v60  ;;  %2893 = vrot.lane.b32.xlu1 %v9287_v0, %s8651_s16  ;;  %v2873_v18 = vpop.f32.mrb[39].mxu0 }
0x16fc   :  { %v9299_v24 = vadd.f32 %v7002_v60, %v2873_v18 }
0x16fd   :  { %2895 = vrot.lane.b32.xlu0 %v9289_v15, %s8651_s16 }
0x16ff   :  { %2889 = vrot.lane.b32.xlu1 %v9293_v21, %s8651_s16 }
0x1703   :  { %2891 = vrot.lane.b32.xlu1 %v9299_v24, %s8651_s16 }
0x176d   :  { %v2894_v28 = vpop.permute.xlu1 %2893 }
0x176e   :  { %v2905_v29 = vmul.f32 %v2894_v28, %v9293_v21  ;;  %v2903_v42 = vmul.f32 %v2894_v28, %v9287_v0 }
0x176f   :  { %v2896_v30 = vpop.permute.xlu0 %2895 }
0x1770   :  { %v2906_v31 = vmul.f32 %v2896_v30, %v9299_v24  ;;  %2921 = vrot.lane.b32.xlu0 %v2905_v29, %s8660_s20  ;;  %v2904_v46 = vmul.f32 %v2896_v30, %v9289_v15 }
0x1771   :  { %v2890_v32 = vpop.permute.xlu1 %2889 }
0x1772   :  { %v2907_v33 = vmul.f32 %v2890_v32, %v9287_v0  ;;  %2923 = vrot.lane.b32.xlu1 %v2906_v31, %s8660_s20  ;;  %v2901_v37 = vmul.f32 %v2890_v32, %v9293_v21 }
0x1774   :  { %2925 = vrot.lane.b32.xlu0 %v2907_v33, %s8660_s20 }
0x1775   :  { %v2892_v34 = vpop.permute.xlu1 %2891 }
0x1776   :  { %v2908_v36 = vmul.f32 %v2892_v34, %v9289_v15  ;;  %v2902_v39 = vmul.f32 %v2892_v34, %v9299_v24 }
0x1778   :  { %2927 = vrot.lane.b32.xlu1 %v2908_v36, %s8660_s20 }
0x17e2   :  { %v2922_v38 = vpop.permute.xlu0 %2921 }
0x17e3   :  { %v2933_v40 = vsel %vm358_vm3, %v2901_v37, %v2922_v38 }
0x17e4   :  { %v2924_v41 = vpop.permute.xlu1 %2923  ;;  %7794 = vmatprep.mubr.msk.f32.mxu0 %vm975_vm6, %v2933_v40 }
0x17e5   :  { %v2934_v43 = vsel %vm358_vm3, %v2902_v39, %v2924_v41 }
0x17e6   :  { %7795 = vmatmul.mubr.msk.f32.vlgmr.msra.gmra.mrb[30].mxu0 %vm975_vm6, %v2934_v43  ;;  %v2926_v44 = vpop.permute.xlu0 %2925 }
0x17e7   :  { %v2935_v45 = vsel %vm358_vm3, %v2903_v42, %v2926_v44  ;;  %8148 = vmatpush3.bf16.msra.mxu0 %v8862_v35 }
0x17e8   :  { %7797 = vmatprep.mubr.msk.f32.mxu0 %vm975_vm6, %v2935_v45 }
0x17ea   :  { %v2928_v47 = vpop.permute.xlu1 %2927 }
0x17eb   :  { %v2936_v48 = vsel %vm358_vm3, %v2904_v46, %v2928_v47 }
0x17ec   :  { %7798 = vmatmul.mubr.msk.f32.gmra.mrb[40].mxu0 %vm975_vm6, %v2936_v48 }
0x18b9   :  { %v7796_v52 = vpop.f32.mrb[30].mxu0 }
0x18ba   :  { %3040 = vrot.lane.b32.xlu1 %v7796_v52, %s8661_s21  ;;  %v3015_v54 = vpop.f32.mrb[31].mxu0 }
0x18bb   :  { %3038 = vrot.lane.b32.xlu0 %v3015_v54, %s8661_s21 }
0x18bf   :  { %v7799_v56 = vpop.f32.mrb[40].mxu0 }
0x18c0   :  { %3044 = vrot.lane.b32.xlu1 %v7799_v56, %s8661_s21  ;;  %v3025_v4 = vpop.f32.mrb[41].mxu0 }
0x18c1   :  { %3042 = vrot.lane.b32.xlu0 %v3025_v4, %s8661_s21 }
0x192c   :  { %v3041_v59 = vpop.permute.xlu1 %3040 }
0x192d   :  { %v3051_v51 = vmax.f32 %v7796_v52, %v3041_v59  ;;  %v3039_v53 = vpop.permute.xlu0 %3038 }
0x192e   :  { %v3050_v50 = vmax.f32 %v3015_v54, %v3039_v53 }
0x192f   :  { %v3055_v61 = vsub.f32 %v7796_v52, %v3051_v51  ;;  %3072 = vrot.lane.b32.xlu1 %v3051_v51, %s8659_s15 }
0x1930   :  { %v3054_v49 = vsub.f32 %v3015_v54, %v3050_v50  ;;  %3070 = vrot.lane.b32.xlu0 %v3050_v50, %s8659_s15 }
0x1931   :  { %v3060_v29 = vmul.f32 1.442695, %v3055_v61 }
0x1932   :  { %v3045_v12 = vpop.permute.xlu1 %3044  ;;  %v3058_v30 = vmul.f32 1.442695, %v3054_v49 }
0x1933   :  { %v3053_v22 = vmax.f32 %v7799_v56, %v3045_v12  ;;  %v3043_v16 = vpop.permute.xlu0 %3042 }
0x1934   :  { %v3052_v2 = vmax.f32 %v3025_v4, %v3043_v16 }
0x1935   :  { %v3057_v27 = vsub.f32 %v7799_v56, %v3053_v22  ;;  %3076 = vrot.lane.b32.xlu1 %v3053_v22, %s8659_s15 }
0x1936   :  { %v3056_v13 = vsub.f32 %v3025_v4, %v3052_v2  ;;  %3074 = vrot.lane.b32.xlu0 %v3052_v2, %s8659_s15 }
0x1937   :  { %v3064_v31 = vmul.f32 1.442695, %v3057_v27 }
0x1938   :  { %v3062_v32 = vmul.f32 1.442695, %v3056_v13 }
0x19a1   :  { %v3073_v63 = vpop.permute.xlu1 %3072 }
0x19a2   :  { %v3083_v8 = vsub.f32 %v7796_v52, %v3073_v63  ;;  %v3071_v19 = vpop.permute.xlu0 %3070 }
0x19a3   :  { %v3082_v3 = vsub.f32 %v3015_v54, %v3071_v19  ;;  %v8294_v19 = vld [vmem:[%s8893_s30 + $0x28] sm:$0xff]  }
0x19a4   :  { %v3088_v57 = vmul.f32 1.442695, %v3083_v8  ;;  %v8293_v8 = vld [vmem:[%s8893_s30 + $0x20] sm:$0xff]  }
0x19a5   :  { %v3086_v55 = vmul.f32 1.442695, %v3082_v3  ;;  %7810 = vmatprep.subr.bf16.mxu1 %v8293_v8 }
0x19a6   :  { %8445 = vpow2.f32 %v3088_v57  ;;  %7811 = vmatpush3.bf16.msra.mxu1 %v8293_v8 }
0x19a7   :  { %8447 = vpow2.f32 %v3086_v55  ;;  %v3077_v62 = vpop.permute.xlu1 %3076  ;;  %7812 = vmatprep.subr.bf16.mxu1 %v8294_v19 }
0x19a8   :  { %v3085_v7 = vsub.f32 %v7799_v56, %v3077_v62  ;;  %v3075_v25 = vpop.permute.xlu0 %3074 }
0x19a9   :  { %v3084_v1 = vsub.f32 %v3025_v4, %v3075_v25 }
0x19aa   :  { %v3092_v60 = vmul.f32 1.442695, %v3085_v7  ;;  %7813 = vmatpush3.bf16.msra.mxu1 %v8294_v19 }
0x19ab   :  { %v3090_v9 = vmul.f32 1.442695, %v3084_v1 }
0x19ac   :  { %8449 = vpow2.f32 %v3092_v60 }
0x19ad   :  { %8451 = vpow2.f32 %v3090_v9 }
0x19ae   :  { %8453 = vpow2.f32 %v3060_v29 }
0x19af   :  { %8455 = vpow2.f32 %v3058_v30 }
0x19b0   :  { %v8446_v6 = vpop.eup %8445  ;;  %8457 = vpow2.f32 %v3064_v31 }
0x19b1   :  { %v8448_v14 = vpop.eup %8447  ;;  %3100 = vrot.lane.b32.xlu1 %v8446_v6, %s8661_s21  ;;  %8459 = vpow2.f32 %v3062_v32 }
0x19b2   :  { %3098 = vrot.lane.b32.xlu0 %v8448_v14, %s8661_s21 }
0x19b6   :  { %v8450_v18 = vpop.eup %8449 }
0x19b7   :  { %v8452_v28 = vpop.eup %8451  ;;  %3104 = vrot.lane.b32.xlu1 %v8450_v18, %s8661_s21 }
0x19b8   :  { %3102 = vrot.lane.b32.xlu0 %v8452_v28, %s8661_s21  ;;  %v8454_v33 = vpop.eup %8453 }
0x19b9   :  { %v8456_v36 = vpop.eup %8455 }
0x19ba   :  { %v8458_v40 = vpop.eup %8457 }
0x19bb   :  { %v8460_v42 = vpop.eup %8459 }
0x1a23   :  { %v3101_v34 = vpop.permute.xlu1 %3100 }
0x1a24   :  { %v3111_v37 = vadd.f32 %v8454_v33, %v3101_v34  ;;  %v3099_v38 = vpop.permute.xlu0 %3098 }
0x1a25   :  { %v3110_v39 = vadd.f32 %v8456_v36, %v3099_v38 }
0x1a26   :  { %8461 = vrcp.f32 %v3111_v37 }
0x1a27   :  { %8463 = vrcp.f32 %v3110_v39 }
0x1a29   :  { %v3105_v41 = vpop.permute.xlu1 %3104 }
0x1a2a   :  { %v3113_v43 = vadd.f32 %v8458_v40, %v3105_v41  ;;  %v3103_v44 = vpop.permute.xlu0 %3102 }
0x1a2b   :  { %v3112_v45 = vadd.f32 %v8460_v42, %v3103_v44 }
0x1a2c   :  { %8465 = vrcp.f32 %v3113_v43  ;;  %v7020_v43 = vld [vmem:[%s8906_s4 + $0x2] ss:$0 sm:$0xff] }
0x1a2d   :  { %8467 = vrcp.f32 %v3112_v45 }
0x1a30   :  { %v8462_v46 = vpop.eup %8461 }
0x1a31   :  { %v8464_v47 = vpop.eup %8463  ;;  %3128 = vrot.lane.b32.xlu1 %v8462_v46, %s8659_s15  ;;  %v3119_v48 = vmul.f32 %v8462_v46, %v8454_v33 }
0x1a32   :  { %3126 = vrot.lane.b32.xlu0 %v8464_v47, %s8659_s15  ;;  %v3118_v52 = vmul.f32 %v8464_v47, %v8456_v36 }
0x1a36   :  { %v8466_v54 = vpop.eup %8465 }
0x1a37   :  { %v8468_v56 = vpop.eup %8467  ;;  %3132 = vrot.lane.b32.xlu1 %v8466_v54, %s8659_s15  ;;  %v3121_v4 = vmul.f32 %v8466_v54, %v8458_v40 }
0x1a38   :  { %3130 = vrot.lane.b32.xlu0 %v8468_v56, %s8659_s15  ;;  %v3120_v59 = vmul.f32 %v8468_v56, %v8460_v42 }
0x1a3b   :  { %2915 = vrot.lane.b32.xlu1 %v9289_v15, %s8663_s26 }
0x1a3c   :  { %2913 = vrot.lane.b32.xlu0 %v9287_v0, %s8663_s26 }
0x1a3f   :  { %2911 = vrot.lane.b32.xlu1 %v9299_v24, %s8663_s26 }
0x1a40   :  { %2909 = vrot.lane.b32.xlu0 %v9293_v21, %s8663_s26 }
0x1aa3   :  { %v3129_v51 = vpop.permute.xlu1 %3128 }
0x1aa4   :  { %v3139_v53 = vmul.f32 %v8446_v6, %v3129_v51  ;;  %v3127_v50 = vpop.permute.xlu0 %3126 }
0x1aa5   :  { %v3138_v61 = vmul.f32 %v8448_v14, %v3127_v50 }
0x1aa6   :  { %v3143_v12 = vsel %vm229_vm2, %v3119_v48, %v3139_v53 }
0x1aa7   :  { %v3142_v49 = vsel %vm229_vm2, %v3118_v52, %v3138_v61 }
0x1aa8   :  { %7804 = vmatprep.mubr.msk.f32.mxu0 %vm145_vm1, %v3142_v49 }
0x1aa9   :  { %v3133_v15 = vpop.permute.xlu1 %3132  ;;  %7805 = vmatmul.mubr.msk.f32.vlgmr.msra.gmra.mrb[42].mxu0 %vm145_vm1, %v3143_v12 }
0x1aaa   :  { %v3141_v0 = vmul.f32 %v8450_v18, %v3133_v15  ;;  %v3131_v22 = vpop.permute.xlu0 %3130 }
0x1aab   :  { %v3140_v24 = vmul.f32 %v8452_v28, %v3131_v22 }
0x1aac   :  { %v3145_v27 = vsel %vm229_vm2, %v3121_v4, %v3141_v0 }
0x1aad   :  { %v2916_v16 = vpop.permute.xlu1 %2915  ;;  %v3144_v21 = vsel %vm229_vm2, %v3120_v59, %v3140_v24 }
0x1aae   :  { %3253 = vrot.lane.b32.xlu1 %v2916_v16, %s8660_s20  ;;  %7807 = vmatprep.mubr.msk.f32.mxu0 %vm145_vm1, %v3144_v21  ;;  %v2914_v2 = vpop.permute.xlu0 %2913  ;;  %v8296_v21 = vld [vmem:[%s8944_s9 + $0x28] sm:$0xff]  }
0x1aaf   :  { %7808 = vmatmul.mubr.msk.f32.gmra.mrb[44].mxu0 %vm145_vm1, %v3145_v27  ;;  %3251 = vrot.lane.b32.xlu0 %v2914_v2, %s8660_s20 }
0x1ab1   :  { %v2912_v13 = vpop.permute.xlu1 %2911 }
0x1ab2   :  { %3257 = vrot.lane.b32.xlu1 %v2912_v13, %s8660_s20  ;;  %v2910_v63 = vpop.permute.xlu0 %2909 }
0x1ab3   :  { %3255 = vrot.lane.b32.xlu0 %v2910_v63, %s8660_s20 }
0x1b20   :  { %v3254_v3 = vpop.permute.xlu1 %3253 }
0x1b21   :  { %v3252_v55 = vpop.permute.xlu0 %3251 }
0x1b24   :  { %v3258_v1 = vpop.permute.xlu1 %3257 }
0x1b25   :  { %v3256_v9 = vpop.permute.xlu0 %3255 }
0x1b7c   :  { %v7806_v57 = vpop.f32.mrb[42].mxu0 }
0x1b7d   :  { %v3264_v62 = vmul.f32 %v7806_v57, %v3254_v3  ;;  %v3224_v7 = vpop.f32.mrb[43].mxu0  ;;  %v3248_v28 = vmul.f32 %v7806_v57, %v2912_v13 }
0x1b7e   :  { %v3263_v25 = vmul.f32 %v3252_v55, %v3224_v7  ;;  %v3247_v29 = vmul.f32 %v3224_v7, %v2910_v63 }
0x1b7f   :  { %3273 = vrot.lane.b32.xlu1 %v3264_v62, %s8651_s16 }
0x1b80   :  { %3271 = vrot.lane.b32.xlu0 %v3263_v25, %s8651_s16 }
0x1b82   :  { %v7809_v60 = vpop.f32.mrb[44].mxu0 }
0x1b83   :  { %v3266_v6 = vmul.f32 %v7809_v60, %v3258_v1  ;;  %v3234_v14 = vpop.f32.mrb[45].mxu0  ;;  %v3250_v36 = vmul.f32 %v7809_v60, %v2916_v16  ;;  %v8295_v16 = vld [vmem:[%s8944_s9 + $0x20] sm:$0xff]  }
0x1b84   :  { %v3265_v18 = vmul.f32 %v3256_v9, %v3234_v14  ;;  %v3249_v37 = vmul.f32 %v3234_v14, %v2914_v2  ;;  %7818 = vmatprep.subr.bf16.mxu0 %v8295_v16 }
0x1b85   :  { %3277 = vrot.lane.b32.xlu1 %v3266_v6, %s8651_s16  ;;  %7819 = vmatpush3.bf16.msra.mxu0 %v8295_v16  ;;  %v8302_v16 = vld [vmem:[%s8981_s27 + $0xa8] sm:$0xff]  }
0x1b86   :  { %3275 = vrot.lane.b32.xlu0 %v3265_v18, %s8651_s16  ;;  %7820 = vmatprep.subr.bf16.mxu0 %v8296_v21 }
0x1b89   :  { %7821 = vmatpush3.bf16.msra.mxu0 %v8296_v21  ;;  %v8303_v21 = vld [vmem:[%s8981_s27 + $0xb0] sm:$0xff]  }
0x1bf1   :  { %v3274_v30 = vpop.permute.xlu1 %3273 }
0x1bf2   :  { %v3284_v31 = vadd.f32 %v3274_v30, %v3248_v28  ;;  %v3272_v32 = vpop.permute.xlu0 %3271 }
0x1bf3   :  { %v3283_v33 = vadd.f32 %v3272_v32, %v3247_v29 }
0x1bf5   :  { %v3287_v34 = vpack.c.bf16 %v3284_v31, %v3283_v33 }
0x1bf7   :  { %v3278_v38 = vpop.permute.xlu1 %3277  ;;  %7814 = vmatprep.mubr.msk.bf16.mxu1 %vm358_vm3, %v3287_v34 }
0x1bf8   :  { %v3286_v39 = vadd.f32 %v3278_v38, %v3250_v36  ;;  %v3276_v40 = vpop.permute.xlu0 %3275 }
0x1bf9   :  { %v3285_v41 = vadd.f32 %v3276_v40, %v3249_v37 }
0x1bfb   :  { %v3288_v42 = vpack.c.bf16 %v3286_v39, %v3285_v41 }
0x1bfd   :  { %7815 = vmatmul.mubr.msk.bf16.vlgmr.msra.gmra.mrb[28].mxu1 %vm358_vm3, %v3288_v42  ;;  %v7027_v42 = vld [vmem:[%s8951_s13 + $0x2] ss:$0 sm:$0xff] }
0x1cd0   :  { %v7816_v44 = vpop.f32.mrb[28].mxu1 }
0x1cd1   :  { %v3363_v45 = vadd.f32 %v7816_v44, %v7020_v43  ;;  %v3354_v46 = vpop.f32.mrb[29].mxu1 }
0x1cd2   :  { %v3355_v47 = vadd.f32 %v7020_v43, %v3354_v46  ;;  %v7817_v48 = vpop.f32.mrb[30].mxu1 }
0x1cd3   :  { %v9370_v52 = vadd.f32 %v3363_v45, %v9271_v5  ;;  %v3357_v54 = vpop.f32.mrb[31].mxu1  ;;  %v3366_v59 = vadd.f32 %v7817_v48, %v7020_v43 }
0x1cd4   :  { %v9373_v56 = vadd.f32 %v3355_v47, %v9264_v58  ;;  %v3358_v4 = vadd.f32 %v7020_v43, %v3357_v54 }
0x1cd5   :  { %v3383_v51 = vsel %vm358_vm3, %v9370_v52, 0.0  ;;  %v9385_v61 = vadd.f32 %v3366_v59, %v9273_v11  ;;  %v3395_v49 = vmul.f32 %v9370_v52, %v9370_v52 }
0x1cd6   :  { %v9378_v53 = vadd.f32 %v3358_v4, %v9266_v10  ;;  %3384 = vadd.xlane.f32.xlu0 %v3383_v51  ;;  %v3393_v5 = vmul.f32 %v9373_v56, %v9373_v56  ;;  %v3377_v58 = vsel %vm358_vm3, %v9373_v56, 0.0  ;;  %v7028_v4 = vld [vmem:[%s8956_s22 + $0x2] ss:$0 sm:$0xff] }
0x1cd7   :  { %v3386_v12 = vsel %vm358_vm3, %v9385_v61, 0.0  ;;  %v3403_v15 = vsel %vm358_vm3, %v3395_v49, 0.0  ;;  %v3396_v22 = vmul.f32 %v9385_v61, %v9385_v61 }
0x1cd8   :  { %v3380_v50 = vsel %vm358_vm3, %v9378_v53, 0.0  ;;  %v3397_v10 = vsel %vm358_vm3, %v3393_v5, 0.0  ;;  %v3394_v11 = vmul.f32 %v9378_v53, %v9378_v53 }
0x1cd9   :  { %3381 = vadd.xlane.f32.xlu1 %v3380_v50  ;;  %v3406_v24 = vsel %vm358_vm3, %v3396_v22, 0.0  ;;  %v8300_v22 = vld [vmem:[%s8981_s27 + $0x98] sm:$0xff]  }
0x1cda   :  { %3378 = vadd.xlane.f32.xlu0 %v3377_v58  ;;  %v3400_v0 = vsel %vm358_vm3, %v3394_v11, 0.0  ;;  %v8297_v11 = vld [vmem:[%s8981_s27 + $0x80] sm:$0xff]  }
0x1cdb   :  { %7826 = vmatprep.subr.bf16.mxu1 %v8297_v11 }
0x1cdc   :  { %7827 = vmatpush3.bf16.msra.mxu1 %v8297_v11  ;;  %v7056_v11 = vld [vmem:[%s9000_s8 + $0x2] ss:$0 sm:$0xff] }
0x1cdd   :  { %3398 = vadd.xlane.f32.xlu1 %v3397_v10 }
0x1cde   :  { %3387 = vadd.xlane.f32.xlu0 %v3386_v12 }
0x1ce1   :  { %3404 = vadd.xlane.f32.xlu1 %v3403_v15  ;;  %v8298_v15 = vld [vmem:[%s8981_s27 + $0x88] sm:$0xff]  }
0x1ce2   :  { %3401 = vadd.xlane.f32.xlu0 %v3400_v0  ;;  %7828 = vmatprep.subr.bf16.mxu1 %v8298_v15  ;;  %v8299_v0 = vld [vmem:[%s8981_s27 + $0x90] sm:$0xff]  }
0x1ce3   :  { %7829 = vmatpush3.bf16.msra.mxu1 %v8298_v15 }
0x1ce4   :  { %7830 = vmatprep.subr.bf16.mxu1 %v8299_v0 }
0x1ce6   :  { %3407 = vadd.xlane.f32.xlu0 %v3406_v24  ;;  %v8301_v24 = vld [vmem:[%s8981_s27 + $0xa0] sm:$0xff]  }
0x1ce7   :  { %7831 = vmatpush3.bf16.msra.mxu1 %v8299_v0 }
0x1ce8   :  { %7832 = vmatprep.subr.bf16.mxu1 %v8300_v22 }
0x1ceb   :  { %7833 = vmatpush3.bf16.msra.mxu1 %v8300_v22 }
0x1cec   :  { %7834 = vmatprep.subr.bf16.mxu1 %v8301_v24 }
0x1cef   :  { %7835 = vmatpush3.bf16.msra.mxu1 %v8301_v24 }
0x1cf0   :  { %7836 = vmatprep.subr.bf16.mxu1 %v8302_v16 }
0x1cf3   :  { %7837 = vmatpush3.bf16.msra.mxu1 %v8302_v16 }
0x1cf4   :  { %7838 = vmatprep.subr.bf16.mxu1 %v8303_v21 }
0x1cf7   :  { %7839 = vmatpush3.bf16.msra.mxu1 %v8303_v21 }
0x1d63   :  { %v3385_v2 = vpop.xlane.xlu0 %3384 }
0x1d64   :  { %v3391_v3 = vmul.f32 0.03125, %v3385_v2  ;;  %v8304_v2 = vld [vmem:[%s8981_s27 + $0xb8] sm:$0xff]  }
0x1d65   :  { %7840 = vmatprep.subr.bf16.mxu1 %v8304_v2 }
0x1d66   :  { %v3382_v27 = vpop.xlane.xlu1 %3381  ;;  %v3415_v1 = vmul.f32 %v3391_v3, %v3391_v3  ;;  %v3423_v44 = vsub.f32 %v9370_v52, %v3391_v3  ;;  %7841 = vmatpush3.bf16.msra.mxu1 %v8304_v2 }
0x1d67   :  { %v3379_v13 = vpop.xlane.xlu0 %3378  ;;  %v3390_v62 = vmul.f32 0.03125, %v3382_v27  ;;  %v7034_v27 = vld [vmem:[%s8994_s2 + $0x2] ss:$0 sm:$0xff] }
0x1d68   :  { %v3389_v63 = vmul.f32 0.03125, %v3379_v13 }
0x1d69   :  { %v3414_v14 = vmul.f32 %v3390_v62, %v3390_v62  ;;  %v3422_v45 = vsub.f32 %v9378_v53, %v3390_v62 }
0x1d6a   :  { %v3413_v8 = vmul.f32 %v3389_v63, %v3389_v63  ;;  %v3399_v19 = vpop.xlane.xlu1 %3398  ;;  %v3421_v40 = vsub.f32 %v9373_v56, %v3389_v63 }
0x1d6b   :  { %v3409_v57 = vmul.f32 0.03125, %v3399_v19  ;;  %v3388_v55 = vpop.xlane.xlu0 %3387 }
0x1d6c   :  { %v3392_v18 = vmul.f32 0.03125, %v3388_v55 }
0x1d6d   :  { %v3417_v7 = vsub.f32 %v3409_v57, %v3413_v8 }
0x1d6e   :  { %v3405_v25 = vpop.xlane.xlu1 %3404  ;;  %v3416_v33 = vmul.f32 %v3392_v18, %v3392_v18  ;;  %v3424_v59 = vsub.f32 %v9385_v61, %v3392_v18 }
0x1d6f   :  { %v3425_v60 = vadd.f32 1e-05, %v3417_v7  ;;  %v3411_v9 = vmul.f32 0.03125, %v3405_v25  ;;  %v3402_v6 = vpop.xlane.xlu0 %3401 }
0x1d70   :  { %v3410_v28 = vmul.f32 0.03125, %v3402_v6 }
0x1d71   :  { %8469 = vrsqrt.f32 %v3425_v60  ;;  %v3419_v29 = vsub.f32 %v3411_v9, %v3415_v1 }
0x1d72   :  { %v3418_v30 = vsub.f32 %v3410_v28, %v3414_v14 }
0x1d73   :  { %v3427_v31 = vadd.f32 1e-05, %v3419_v29  ;;  %v3408_v32 = vpop.xlane.xlu0 %3407 }
0x1d74   :  { %v3426_v34 = vadd.f32 1e-05, %v3418_v30  ;;  %v3412_v36 = vmul.f32 0.03125, %v3408_v32 }
0x1d75   :  { %8471 = vrsqrt.f32 %v3427_v31 }
0x1d76   :  { %8473 = vrsqrt.f32 %v3426_v34  ;;  %v3420_v37 = vsub.f32 %v3412_v36, %v3416_v33 }
0x1d78   :  { %v3428_v38 = vadd.f32 1e-05, %v3420_v37 }
0x1d7a   :  { %8475 = vrsqrt.f32 %v3428_v38 }
0x1d7b   :  { %v8470_v39 = vpop.eup %8469 }
0x1d7c   :  { %v3433_v41 = vmul.f32 %v8470_v39, %v3421_v40 }
0x1d7e   :  { %v3443_v54 = vmul.f32 %v7027_v42, %v3433_v41 }
0x1d7f   :  { %v8472_v43 = vpop.eup %8471 }
0x1d80   :  { %v8474_v46 = vpop.eup %8473  ;;  %v3435_v47 = vmul.f32 %v8472_v43, %v3423_v44  ;;  %v9409_v58 = vadd.f32 %v7028_v4, %v3443_v54 }
0x1d81   :  { %v3434_v48 = vmul.f32 %v8474_v46, %v3422_v45 }
0x1d82   :  { %v3445_v56 = vmul.f32 %v7027_v42, %v3435_v47 }
0x1d83   :  { %v3444_v51 = vmul.f32 %v7027_v42, %v3434_v48 }
0x1d84   :  { %v8476_v50 = vpop.eup %8475  ;;  %v9415_v49 = vadd.f32 %v7028_v4, %v3445_v56 }
0x1d85   :  { %v3436_v5 = vmul.f32 %v8476_v50, %v3424_v59  ;;  %v9411_v10 = vadd.f32 %v7028_v4, %v3444_v51 }
0x1d87   :  { %v3446_v52 = vmul.f32 %v7027_v42, %v3436_v5  ;;  %v3457_v53 = vpack.c.bf16 %v9411_v10, %v9409_v58 }
0x1d89   :  { %v9417_v12 = vadd.f32 %v7028_v4, %v3446_v52  ;;  %7822 = vmatprep.mubr.msk.bf16.mxu0 %vm358_vm3, %v3457_v53 }
0x1d8b   :  { %v3458_v61 = vpack.c.bf16 %v9417_v12, %v9415_v49 }
0x1d8d   :  { %7823 = vmatmul.mubr.msk.bf16.vlgmr.msra.gmra.mrb[48].mxu0 %vm358_vm3, %v3458_v61 }
0x1e60   :  { %v7824_v13 = vpop.f32.mrb[48].mxu0 }
0x1e61   :  { %v3533_v63 = vadd.f32 %v7824_v13, %v7034_v27  ;;  %v3524_v8 = vpop.f32.mrb[49].mxu0 }
0x1e62   :  { %v3525_v19 = vadd.f32 %v7034_v27, %v3524_v8  ;;  %v7825_v3 = vpop.f32.mrb[50].mxu0 }
0x1e63   :  { %v3545_v57 = vmul.f32 0.044715, %v3533_v63  ;;  %v3536_v55 = vadd.f32 %v7825_v3, %v7034_v27  ;;  %v3527_v62 = vpop.f32.mrb[51].mxu0  ;;  %v3541_v47 = vmul.f32 0.5, %v3533_v63 }
0x1e64   :  { %v3543_v7 = vmul.f32 0.044715, %v3525_v19  ;;  %v3528_v25 = vadd.f32 %v7034_v27, %v3527_v62  ;;  %v3539_v4 = vmul.f32 0.5, %v3525_v19 }
0x1e65   :  { %v3549_v1 = vmul.f32 %v3545_v57, %v3533_v63  ;;  %v3546_v60 = vmul.f32 0.044715, %v3536_v55  ;;  %v3542_v48 = vmul.f32 0.5, %v3536_v55 }
0x1e66   :  { %v3547_v9 = vmul.f32 %v3543_v7, %v3525_v19  ;;  %v3544_v6 = vmul.f32 0.044715, %v3528_v25  ;;  %v3540_v59 = vmul.f32 0.5, %v3528_v25 }
0x1e67   :  { %v3553_v14 = vmul.f32 %v3549_v1, %v3533_v63  ;;  %v3550_v18 = vmul.f32 %v3546_v60, %v3536_v55 }
0x1e68   :  { %v3551_v28 = vmul.f32 %v3547_v9, %v3525_v19  ;;  %v3548_v29 = vmul.f32 %v3544_v6, %v3528_v25  ;;  %v8305_v9 = vld [vmem:[%s8764_s6 + $0x30] sm:$0xff]   ;;  %v8306_v6 = vld [vmem:[%s8764_s6 + $0x38] sm:$0xff]  }
0x1e69   :  { %v3557_v30 = vadd.f32 %v3553_v14, %v3533_v63  ;;  %v3554_v31 = vmul.f32 %v3550_v18, %v3536_v55  ;;  %7846 = vmatprep.subr.bf16.mxu0 %v8305_v9 }
0x1e6a   :  { %v3552_v32 = vmul.f32 %v3548_v29, %v3528_v25  ;;  %v3555_v33 = vadd.f32 %v3551_v28, %v3525_v19  ;;  %7847 = vmatpush3.bf16.msra.mxu0 %v8305_v9 }
0x1e6b   :  { %v3561_v34 = vmul.f32 0.7978846, %v3557_v30  ;;  %v3558_v36 = vadd.f32 %v3554_v31, %v3536_v55  ;;  %7848 = vmatprep.subr.bf16.mxu0 %v8306_v6 }
0x1e6c   :  { %v3556_v37 = vadd.f32 %v3552_v32, %v3528_v25  ;;  %v3559_v38 = vmul.f32 0.7978846, %v3555_v33 }
0x1e6d   :  { %8477 = vtanh.f32 %v3561_v34  ;;  %v3562_v39 = vmul.f32 0.7978846, %v3558_v36 }
0x1e6e   :  { %v3560_v40 = vmul.f32 0.7978846, %v3556_v37  ;;  %8479 = vtanh.f32 %v3559_v38  ;;  %7849 = vmatpush3.bf16.msra.mxu0 %v8306_v6 }
0x1e6f   :  { %8481 = vtanh.f32 %v3562_v39  ;;  %8150 = vmatprep.subr.bf16.mxu0 %v8807_v17 }
0x1e70   :  { %8483 = vtanh.f32 %v3560_v40 }
0x1e77   :  { %v8478_v41 = vpop.eup %8477 }
0x1e78   :  { %v8480_v42 = vpop.eup %8479  ;;  %v3569_v43 = vadd.f32 1.0, %v8478_v41 }
0x1e79   :  { %v8482_v44 = vpop.eup %8481  ;;  %v3567_v45 = vadd.f32 1.0, %v8480_v42 }
0x1e7a   :  { %v8484_v46 = vpop.eup %8483  ;;  %v3570_v54 = vadd.f32 1.0, %v8482_v44  ;;  %v3573_v50 = vmul.f32 %v3569_v43, %v3541_v47 }
0x1e7b   :  { %v3568_v51 = vadd.f32 1.0, %v8484_v46  ;;  %v3571_v56 = vmul.f32 %v3567_v45, %v3539_v4 }
0x1e7c   :  { %v3574_v5 = vmul.f32 %v3570_v54, %v3542_v48 }
0x1e7d   :  { %v3572_v52 = vmul.f32 %v3568_v51, %v3540_v59 }
0x1e7e   :  { %v3576_v53 = vpack.c.bf16 %v3574_v5, %v3573_v50 }
0x1e7f   :  { %v3575_v61 = vpack.c.bf16 %v3572_v52, %v3571_v56 }
0x1e81   :  { %7842 = vmatprep.mubr.bf16.mxu1 %v3575_v61 }
0x1e82   :  { %7843 = vmatmul.mubr.bf16.vlgmr.msra.gmra.mrb[32].mxu1 %v3576_v53  ;;  %v7067_v53 = vld [vmem:[%s9041_s17 + $0x2] ss:$0 sm:$0xff] }
0x1f55   :  { %v7844_v15 = vpop.f32.mrb[32].mxu1 }
0x1f56   :  { %v3693_v0 = vadd.f32 %v7844_v15, %v7056_v11  ;;  %v3684_v22 = vpop.f32.mrb[33].mxu1 }
0x1f57   :  { %v3685_v24 = vadd.f32 %v7056_v11, %v3684_v22  ;;  %v7845_v16 = vpop.f32.mrb[34].mxu1 }
0x1f58   :  { %v9434_v21 = vadd.f32 %v3693_v0, %v9415_v49  ;;  %v3696_v2 = vadd.f32 %v7845_v16, %v7056_v11  ;;  %v3687_v27 = vpop.f32.mrb[35].mxu1 }
0x1f59   :  { %v3688_v13 = vadd.f32 %v7056_v11, %v3687_v27  ;;  %v9437_v63 = vadd.f32 %v3685_v24, %v9409_v58 }
0x1f5a   :  { %v9440_v8 = vadd.f32 %v3696_v2, %v9417_v12  ;;  %v3713_v19 = vsel %vm358_vm3, %v9434_v21, 0.0  ;;  %v3725_v62 = vmul.f32 %v9434_v21, %v9434_v21  ;;  %v7068_v2 = vld [vmem:[%s9046_s24 + $0x2] ss:$0 sm:$0xff] }
0x1f5b   :  { %3714 = vadd.xlane.f32.xlu1 %v3713_v19  ;;  %v9445_v3 = vadd.f32 %v3688_v13, %v9411_v10  ;;  %v3707_v57 = vsel %vm358_vm3, %v9437_v63, 0.0  ;;  %v3723_v58 = vmul.f32 %v9437_v63, %v9437_v63 }
0x1f5c   :  { %v3716_v49 = vsel %vm358_vm3, %v9440_v8, 0.0  ;;  %v3726_v25 = vmul.f32 %v9440_v8, %v9440_v8  ;;  %v3733_v1 = vsel %vm358_vm3, %v3725_v62, 0.0  ;;  %v7074_v62 = vld [vmem:[%s8788_s14 + $0x3] ss:$0 sm:$0xff] }
0x1f5d   :  { %3717 = vadd.xlane.f32.xlu0 %v3716_v49  ;;  %v3710_v12 = vsel %vm358_vm3, %v9445_v3, 0.0  ;;  %v3724_v10 = vmul.f32 %v9445_v3, %v9445_v3  ;;  %v3727_v55 = vsel %vm358_vm3, %v3723_v58, 0.0 }
0x1f5e   :  { %v3736_v60 = vsel %vm358_vm3, %v3726_v25, 0.0 }
0x1f5f   :  { %3708 = vadd.xlane.f32.xlu1 %v3707_v57  ;;  %v3730_v7 = vsel %vm358_vm3, %v3724_v10, 0.0 }
0x1f61   :  { %3711 = vadd.xlane.f32.xlu0 %v3710_v12 }
0x1f63   :  { %3728 = vadd.xlane.f32.xlu1 %v3727_v55 }
0x1f65   :  { %3731 = vadd.xlane.f32.xlu0 %v3730_v7 }
0x1f67   :  { %3734 = vadd.xlane.f32.xlu1 %v3733_v1 }
0x1f69   :  { %3737 = vadd.xlane.f32.xlu0 %v3736_v60 }
0x1fe8   :  { %v3715_v14 = vpop.xlane.xlu1 %3714 }
0x1fe9   :  { %v3721_v33 = vmul.f32 0.03125, %v3715_v14 }
0x1fea   :  { %v3718_v18 = vpop.xlane.xlu0 %3717 }
0x1feb   :  { %v3722_v37 = vmul.f32 0.03125, %v3718_v18  ;;  %v3745_v43 = vmul.f32 %v3721_v33, %v3721_v33  ;;  %v3753_v0 = vsub.f32 %v9434_v21, %v3721_v33 }
0x1fec   :  { %v3709_v28 = vpop.xlane.xlu1 %3708 }
0x1fed   :  { %v3719_v29 = vmul.f32 0.03125, %v3709_v28  ;;  %v3746_v47 = vmul.f32 %v3722_v37, %v3722_v37  ;;  %v3754_v27 = vsub.f32 %v9440_v8, %v3722_v37 }
0x1fee   :  { %v3712_v30 = vpop.xlane.xlu0 %3711 }
0x1fef   :  { %v3720_v31 = vmul.f32 0.03125, %v3712_v30  ;;  %v3743_v34 = vmul.f32 %v3719_v29, %v3719_v29  ;;  %v3751_v56 = vsub.f32 %v9437_v63, %v3719_v29 }
0x1ff0   :  { %v3729_v32 = vpop.xlane.xlu1 %3728 }
0x1ff1   :  { %v3739_v36 = vmul.f32 0.03125, %v3729_v32  ;;  %v3744_v39 = vmul.f32 %v3720_v31, %v3720_v31  ;;  %v3752_v61 = vsub.f32 %v9445_v3, %v3720_v31 }
0x1ff2   :  { %v3732_v38 = vpop.xlane.xlu0 %3731 }
0x1ff3   :  { %v3747_v40 = vsub.f32 %v3739_v36, %v3743_v34  ;;  %v3740_v41 = vmul.f32 0.03125, %v3732_v38 }
0x1ff4   :  { %v3735_v42 = vpop.xlane.xlu1 %3734 }
0x1ff5   :  { %v3755_v44 = vadd.f32 1e-05, %v3747_v40  ;;  %v3748_v45 = vsub.f32 %v3740_v41, %v3744_v39  ;;  %v3741_v46 = vmul.f32 0.03125, %v3735_v42 }
0x1ff6   :  { %v3738_v48 = vpop.xlane.xlu0 %3737 }
0x1ff7   :  { %8485 = vrsqrt.f32 %v3755_v44  ;;  %v3756_v54 = vadd.f32 1e-05, %v3748_v45  ;;  %v3749_v4 = vsub.f32 %v3741_v46, %v3745_v43  ;;  %v3742_v59 = vmul.f32 0.03125, %v3738_v48 }
0x1ff9   :  { %8487 = vrsqrt.f32 %v3756_v54  ;;  %v3757_v51 = vadd.f32 1e-05, %v3749_v4  ;;  %v3750_v50 = vsub.f32 %v3742_v59, %v3746_v47 }
0x1ffb   :  { %8489 = vrsqrt.f32 %v3757_v51  ;;  %v3758_v5 = vadd.f32 1e-05, %v3750_v50 }
0x1ffd   :  { %8491 = vrsqrt.f32 %v3758_v5 }
0x2001   :  { %v8486_v52 = vpop.eup %8485 }
0x2002   :  { %v3763_v11 = vmul.f32 %v8486_v52, %v3751_v56 }
0x2003   :  { %v8488_v15 = vpop.eup %8487 }
0x2004   :  { %v3764_v22 = vmul.f32 %v8488_v15, %v3752_v61  ;;  %v3773_v24 = vmul.f32 %v7067_v53, %v3763_v11 }
0x2005   :  { %v8490_v16 = vpop.eup %8489 }
0x2006   :  { %v3765_v13 = vmul.f32 %v8490_v16, %v3753_v0  ;;  %v3774_v19 = vmul.f32 %v7067_v53, %v3764_v22  ;;  %v9474_v58 = vadd.f32 %v7068_v2, %v3773_v24 }
0x2007   :  { %v8492_v49 = vpop.eup %8491 }
0x2008   :  { %v3766_v57 = vmul.f32 %v8492_v49, %v3754_v27  ;;  %v9476_v63 = vadd.f32 %v7068_v2, %v3774_v19  ;;  %v3775_v12 = vmul.f32 %v7067_v53, %v3765_v13 }
0x200a   :  { %v3787_v3 = vpack.c.bf16 %v9476_v63, %v9474_v58  ;;  %v3776_v21 = vmul.f32 %v7067_v53, %v3766_v57  ;;  %v9481_v10 = vadd.f32 %v7068_v2, %v3775_v12 }
0x200c   :  { %7850 = vmatprep.mubr.msk.bf16.mxu0 %vm358_vm3, %v3787_v3  ;;  %v9483_v55 = vadd.f32 %v7068_v2, %v3776_v21 }
0x200e   :  { %v3788_v8 = vpack.c.bf16 %v9483_v55, %v9481_v10 }
0x2010   :  { %7851 = vmatmul.mubr.msk.bf16.vlgmr.msra.gmra.mrb[52].mxu0 %vm358_vm3, %v3788_v8 }
0x2011   :  { %8152 = vmatpush3.bf16.msra.mxu0 %v8807_v17 }
0x2012   :  { %8154 = vmatprep.subr.bf16.mxu0 %v8811_v20 }
0x2015   :  { %8156 = vmatpush3.bf16.msra.mxu0 %v8811_v20 }
0x2016   :  { %8158 = vmatprep.subr.bf16.mxu0 %v8818_v23 }
0x2019   :  { %8160 = vmatpush3.bf16.msra.mxu0 %v8818_v23 }
0x201a   :  { %8162 = vmatprep.subr.bf16.mxu0 %v8823_v26 }
0x201d   :  { %8164 = vmatpush3.bf16.msra.mxu0 %v8823_v26 }
0x201e   :  { %8166 = vmatprep.subr.bf16.mxu0 %v8862_v35 }
0x20e3   :  { %v7852_v7 = vpop.f32.mrb[52].mxu0 }
0x20e4   :  { %v9497_v25 = vadd.f32 %v7852_v7, %v7074_v62  ;;  %v3854_v1 = vpop.f32.mrb[53].mxu0 }
0x20e5   :  { %v7853_v60 = vpop.f32.mrb[54].mxu0  ;;  %v9503_v14 = vadd.f32 %v7074_v62, %v3854_v1 }
0x20e6   :  { %v9499_v9 = vadd.f32 %v7853_v60, %v7074_v62  ;;  %3877 = vrot.lane.b32.xlu1 %v9497_v25, %s8651_s16  ;;  %v3857_v6 = vpop.f32.mrb[55].mxu0 }
0x20e7   :  { %v9509_v18 = vadd.f32 %v7074_v62, %v3857_v6 }
0x20e8   :  { %3879 = vrot.lane.b32.xlu0 %v9499_v9, %s8651_s16 }
0x20ea   :  { %3873 = vrot.lane.b32.xlu1 %v9503_v14, %s8651_s16 }
0x20ee   :  { %3875 = vrot.lane.b32.xlu1 %v9509_v18, %s8651_s16 }
0x2158   :  { %v3878_v28 = vpop.permute.xlu1 %3877 }
0x2159   :  { %v3889_v29 = vmul.f32 %v3878_v28, %v9503_v14  ;;  %v3887_v42 = vmul.f32 %v3878_v28, %v9497_v25 }
0x215a   :  { %v3880_v30 = vpop.permute.xlu0 %3879 }
0x215b   :  { %v3890_v31 = vmul.f32 %v3880_v30, %v9509_v18  ;;  %3905 = vrot.lane.b32.xlu0 %v3889_v29, %s8660_s20  ;;  %v3888_v46 = vmul.f32 %v3880_v30, %v9499_v9 }
0x215c   :  { %v3874_v32 = vpop.permute.xlu1 %3873 }
0x215d   :  { %v3891_v33 = vmul.f32 %v3874_v32, %v9497_v25  ;;  %3907 = vrot.lane.b32.xlu1 %v3890_v31, %s8660_s20  ;;  %v3885_v37 = vmul.f32 %v3874_v32, %v9503_v14 }
0x215f   :  { %3909 = vrot.lane.b32.xlu0 %v3891_v33, %s8660_s20 }
0x2160   :  { %v3876_v34 = vpop.permute.xlu1 %3875 }
0x2161   :  { %v3892_v36 = vmul.f32 %v3876_v34, %v9499_v9  ;;  %v3886_v39 = vmul.f32 %v3876_v34, %v9509_v18 }
0x2163   :  { %3911 = vrot.lane.b32.xlu1 %v3892_v36, %s8660_s20 }
0x21cd   :  { %v3906_v38 = vpop.permute.xlu0 %3905 }
0x21ce   :  { %v3917_v40 = vsel %vm358_vm3, %v3885_v37, %v3906_v38 }
0x21cf   :  { %v3908_v41 = vpop.permute.xlu1 %3907  ;;  %7870 = vmatprep.mubr.msk.f32.mxu0 %vm975_vm6, %v3917_v40 }
0x21d0   :  { %v3918_v43 = vsel %vm358_vm3, %v3886_v39, %v3908_v41 }
0x21d1   :  { %7871 = vmatmul.mubr.msk.f32.vlgmr.msra.gmra.mrb[46].mxu0 %vm975_vm6, %v3918_v43  ;;  %v3910_v44 = vpop.permute.xlu0 %3909 }
0x21d2   :  { %v3919_v45 = vsel %vm358_vm3, %v3887_v42, %v3910_v44  ;;  %8168 = vmatpush3.bf16.msra.mxu0 %v8862_v35 }
0x21d3   :  { %7873 = vmatprep.mubr.msk.f32.mxu0 %vm975_vm6, %v3919_v45 }
0x21d5   :  { %v3912_v47 = vpop.permute.xlu1 %3911 }
0x21d6   :  { %v3920_v48 = vsel %vm358_vm3, %v3888_v46, %v3912_v47 }
0x21d7   :  { %7874 = vmatmul.mubr.msk.f32.gmra.mrb[56].mxu0 %vm975_vm6, %v3920_v48 }
0x22a4   :  { %v7872_v54 = vpop.f32.mrb[46].mxu0 }
0x22a5   :  { %4024 = vrot.lane.b32.xlu1 %v7872_v54, %s8661_s21  ;;  %v3999_v4 = vpop.f32.mrb[47].mxu0 }
0x22a6   :  { %4022 = vrot.lane.b32.xlu0 %v3999_v4, %s8661_s21 }
0x22aa   :  { %v7875_v59 = vpop.f32.mrb[56].mxu0 }
0x22ab   :  { %4028 = vrot.lane.b32.xlu1 %v7875_v59, %s8661_s21  ;;  %v4009_v51 = vpop.f32.mrb[57].mxu0 }
0x22ac   :  { %4026 = vrot.lane.b32.xlu0 %v4009_v51, %s8661_s21 }
0x2317   :  { %v4025_v50 = vpop.permute.xlu1 %4024 }
0x2318   :  { %v4035_v5 = vmax.f32 %v7872_v54, %v4025_v50  ;;  %v4023_v56 = vpop.permute.xlu0 %4022 }
0x2319   :  { %v4034_v52 = vmax.f32 %v3999_v4, %v4023_v56 }
0x231a   :  { %v4039_v53 = vsub.f32 %v7872_v54, %v4035_v5  ;;  %4056 = vrot.lane.b32.xlu1 %v4035_v5, %s8659_s15 }
0x231b   :  { %v4038_v61 = vsub.f32 %v3999_v4, %v4034_v52  ;;  %4054 = vrot.lane.b32.xlu0 %v4034_v52, %s8659_s15 }
0x231c   :  { %v4044_v29 = vmul.f32 1.442695, %v4039_v53 }
0x231d   :  { %v4029_v11 = vpop.permute.xlu1 %4028  ;;  %v4042_v30 = vmul.f32 1.442695, %v4038_v61 }
0x231e   :  { %v4037_v15 = vmax.f32 %v7875_v59, %v4029_v11  ;;  %v4027_v0 = vpop.permute.xlu0 %4026 }
0x231f   :  { %v4036_v22 = vmax.f32 %v4009_v51, %v4027_v0 }
0x2320   :  { %v4041_v24 = vsub.f32 %v7875_v59, %v4037_v15  ;;  %4060 = vrot.lane.b32.xlu1 %v4037_v15, %s8659_s15 }
0x2321   :  { %v4040_v16 = vsub.f32 %v4009_v51, %v4036_v22  ;;  %4058 = vrot.lane.b32.xlu0 %v4036_v22, %s8659_s15 }
0x2322   :  { %v4048_v31 = vmul.f32 1.442695, %v4041_v24 }
0x2323   :  { %v4046_v32 = vmul.f32 1.442695, %v4040_v16 }
0x238c   :  { %v4057_v2 = vpop.permute.xlu1 %4056 }
0x238d   :  { %v4067_v27 = vsub.f32 %v7872_v54, %v4057_v2  ;;  %v4055_v13 = vpop.permute.xlu0 %4054 }
0x238e   :  { %v4066_v19 = vsub.f32 %v3999_v4, %v4055_v13  ;;  %v8308_v13 = vld [vmem:[%s8893_s30 + $0x38] sm:$0xff]  }
0x238f   :  { %v4072_v49 = vmul.f32 1.442695, %v4067_v27  ;;  %v8307_v27 = vld [vmem:[%s8893_s30 + $0x30] sm:$0xff]  }
0x2390   :  { %v4070_v57 = vmul.f32 1.442695, %v4066_v19  ;;  %7886 = vmatprep.subr.bf16.mxu1 %v8307_v27 }
0x2391   :  { %8493 = vpow2.f32 %v4072_v49  ;;  %7887 = vmatpush3.bf16.msra.mxu1 %v8307_v27 }
0x2392   :  { %8495 = vpow2.f32 %v4070_v57  ;;  %v4061_v12 = vpop.permute.xlu1 %4060  ;;  %7888 = vmatprep.subr.bf16.mxu1 %v8308_v13 }
0x2393   :  { %v4069_v3 = vsub.f32 %v7875_v59, %v4061_v12  ;;  %v4059_v21 = vpop.permute.xlu0 %4058 }
0x2394   :  { %v4068_v8 = vsub.f32 %v4009_v51, %v4059_v21 }
0x2395   :  { %v4076_v62 = vmul.f32 1.442695, %v4069_v3  ;;  %7889 = vmatpush3.bf16.msra.mxu1 %v8308_v13 }
0x2396   :  { %v4074_v7 = vmul.f32 1.442695, %v4068_v8 }
0x2397   :  { %8497 = vpow2.f32 %v4076_v62 }
0x2398   :  { %8499 = vpow2.f32 %v4074_v7 }
0x2399   :  { %8501 = vpow2.f32 %v4044_v29 }
0x239a   :  { %8503 = vpow2.f32 %v4042_v30 }
0x239b   :  { %v8494_v1 = vpop.eup %8493  ;;  %8505 = vpow2.f32 %v4048_v31 }
0x239c   :  { %v8496_v60 = vpop.eup %8495  ;;  %4084 = vrot.lane.b32.xlu1 %v8494_v1, %s8661_s21  ;;  %8507 = vpow2.f32 %v4046_v32 }
0x239d   :  { %4082 = vrot.lane.b32.xlu0 %v8496_v60, %s8661_s21 }
0x23a1   :  { %v8498_v6 = vpop.eup %8497 }
0x23a2   :  { %v8500_v28 = vpop.eup %8499  ;;  %4088 = vrot.lane.b32.xlu1 %v8498_v6, %s8661_s21 }
0x23a3   :  { %4086 = vrot.lane.b32.xlu0 %v8500_v28, %s8661_s21  ;;  %v8502_v33 = vpop.eup %8501 }
0x23a4   :  { %v8504_v36 = vpop.eup %8503 }
0x23a5   :  { %v8506_v40 = vpop.eup %8505 }
0x23a6   :  { %v8508_v42 = vpop.eup %8507 }
0x240e   :  { %v4085_v34 = vpop.permute.xlu1 %4084 }
0x240f   :  { %v4095_v37 = vadd.f32 %v8502_v33, %v4085_v34  ;;  %v4083_v38 = vpop.permute.xlu0 %4082 }
0x2410   :  { %v4094_v39 = vadd.f32 %v8504_v36, %v4083_v38 }
0x2411   :  { %8509 = vrcp.f32 %v4095_v37 }
0x2412   :  { %8511 = vrcp.f32 %v4094_v39 }
0x2414   :  { %v4089_v41 = vpop.permute.xlu1 %4088 }
0x2415   :  { %v4097_v43 = vadd.f32 %v8506_v40, %v4089_v41  ;;  %v4087_v44 = vpop.permute.xlu0 %4086 }
0x2416   :  { %v4096_v45 = vadd.f32 %v8508_v42, %v4087_v44 }
0x2417   :  { %8513 = vrcp.f32 %v4097_v43  ;;  %v7092_v43 = vld [vmem:[%s8906_s4 + $0x3] ss:$0 sm:$0xff] }
0x2418   :  { %8515 = vrcp.f32 %v4096_v45 }
0x241b   :  { %v8510_v46 = vpop.eup %8509 }
0x241c   :  { %v8512_v47 = vpop.eup %8511  ;;  %4112 = vrot.lane.b32.xlu1 %v8510_v46, %s8659_s15  ;;  %v4103_v48 = vmul.f32 %v8510_v46, %v8502_v33 }
0x241d   :  { %4110 = vrot.lane.b32.xlu0 %v8512_v47, %s8659_s15  ;;  %v4102_v54 = vmul.f32 %v8512_v47, %v8504_v36 }
0x2421   :  { %v8514_v4 = vpop.eup %8513 }
0x2422   :  { %v8516_v59 = vpop.eup %8515  ;;  %4116 = vrot.lane.b32.xlu1 %v8514_v4, %s8659_s15  ;;  %v4105_v51 = vmul.f32 %v8514_v4, %v8506_v40 }
0x2423   :  { %4114 = vrot.lane.b32.xlu0 %v8516_v59, %s8659_s15  ;;  %v4104_v50 = vmul.f32 %v8516_v59, %v8508_v42 }
0x2426   :  { %3899 = vrot.lane.b32.xlu1 %v9499_v9, %s8663_s26 }
0x2427   :  { %3897 = vrot.lane.b32.xlu0 %v9497_v25, %s8663_s26 }
0x242a   :  { %3895 = vrot.lane.b32.xlu1 %v9509_v18, %s8663_s26 }
0x242b   :  { %3893 = vrot.lane.b32.xlu0 %v9503_v14, %s8663_s26 }
0x248e   :  { %v4113_v5 = vpop.permute.xlu1 %4112 }
0x248f   :  { %v4123_v56 = vmul.f32 %v8494_v1, %v4113_v5  ;;  %v4111_v52 = vpop.permute.xlu0 %4110 }
0x2490   :  { %v4122_v53 = vmul.f32 %v8496_v60, %v4111_v52 }
0x2491   :  { %v4127_v11 = vsel %vm229_vm2, %v4103_v48, %v4123_v56 }
0x2492   :  { %v4126_v61 = vsel %vm229_vm2, %v4102_v54, %v4122_v53 }
0x2493   :  { %7880 = vmatprep.mubr.msk.f32.mxu0 %vm145_vm1, %v4126_v61 }
0x2494   :  { %v4117_v9 = vpop.permute.xlu1 %4116  ;;  %7881 = vmatmul.mubr.msk.f32.vlgmr.msra.gmra.mrb[58].mxu0 %vm145_vm1, %v4127_v11 }
0x2495   :  { %v4125_v25 = vmul.f32 %v8498_v6, %v4117_v9  ;;  %v4115_v15 = vpop.permute.xlu0 %4114 }
0x2496   :  { %v4124_v18 = vmul.f32 %v8500_v28, %v4115_v15 }
0x2497   :  { %v4129_v24 = vsel %vm229_vm2, %v4105_v51, %v4125_v25 }
0x2498   :  { %v3900_v0 = vpop.permute.xlu1 %3899  ;;  %v4128_v14 = vsel %vm229_vm2, %v4104_v50, %v4124_v18 }
0x2499   :  { %4237 = vrot.lane.b32.xlu1 %v3900_v0, %s8660_s20  ;;  %7883 = vmatprep.mubr.msk.f32.mxu0 %vm145_vm1, %v4128_v14  ;;  %v3898_v22 = vpop.permute.xlu0 %3897  ;;  %v8310_v14 = vld [vmem:[%s8944_s9 + $0x38] sm:$0xff]  }
0x249a   :  { %7884 = vmatmul.mubr.msk.f32.gmra.mrb[60].mxu0 %vm145_vm1, %v4129_v24  ;;  %4235 = vrot.lane.b32.xlu0 %v3898_v22, %s8660_s20 }
0x249c   :  { %v3896_v16 = vpop.permute.xlu1 %3895 }
0x249d   :  { %4241 = vrot.lane.b32.xlu1 %v3896_v16, %s8660_s20  ;;  %v3894_v2 = vpop.permute.xlu0 %3893 }
0x249e   :  { %4239 = vrot.lane.b32.xlu0 %v3894_v2, %s8660_s20 }
0x250b   :  { %v4238_v19 = vpop.permute.xlu1 %4237 }
0x250c   :  { %v4236_v57 = vpop.permute.xlu0 %4235 }
0x250f   :  { %v4242_v8 = vpop.permute.xlu1 %4241 }
0x2510   :  { %v4240_v7 = vpop.permute.xlu0 %4239 }
0x2567   :  { %v7882_v49 = vpop.f32.mrb[58].mxu0 }
0x2568   :  { %v4248_v12 = vmul.f32 %v7882_v49, %v4238_v19  ;;  %v4208_v3 = vpop.f32.mrb[59].mxu0  ;;  %v4232_v28 = vmul.f32 %v7882_v49, %v3896_v16 }
0x2569   :  { %v4247_v21 = vmul.f32 %v4236_v57, %v4208_v3  ;;  %v4231_v29 = vmul.f32 %v4208_v3, %v3894_v2 }
0x256a   :  { %4257 = vrot.lane.b32.xlu1 %v4248_v12, %s8651_s16 }
0x256b   :  { %4255 = vrot.lane.b32.xlu0 %v4247_v21, %s8651_s16 }
0x256d   :  { %v7885_v62 = vpop.f32.mrb[60].mxu0 }
0x256e   :  { %v4250_v1 = vmul.f32 %v7885_v62, %v4242_v8  ;;  %v4218_v60 = vpop.f32.mrb[61].mxu0  ;;  %v4234_v36 = vmul.f32 %v7885_v62, %v3900_v0  ;;  %v8309_v0 = vld [vmem:[%s8944_s9 + $0x30] sm:$0xff]  }
0x256f   :  { %v4249_v6 = vmul.f32 %v4240_v7, %v4218_v60  ;;  %v4233_v37 = vmul.f32 %v4218_v60, %v3898_v22  ;;  %7894 = vmatprep.subr.bf16.mxu0 %v8309_v0 }
0x2570   :  { %4261 = vrot.lane.b32.xlu1 %v4250_v1, %s8651_s16  ;;  %7895 = vmatpush3.bf16.msra.mxu0 %v8309_v0  ;;  %v8316_v0 = vld [vmem:[%s8981_s27 + $0xe8] sm:$0xff]  }
0x2571   :  { %4259 = vrot.lane.b32.xlu0 %v4249_v6, %s8651_s16  ;;  %7896 = vmatprep.subr.bf16.mxu0 %v8310_v14 }
0x2574   :  { %7897 = vmatpush3.bf16.msra.mxu0 %v8310_v14  ;;  %v8317_v14 = vld [vmem:[%s8981_s27 + $0xf0] sm:$0xff]  }
0x25dc   :  { %v4258_v30 = vpop.permute.xlu1 %4257 }
0x25dd   :  { %v4268_v31 = vadd.f32 %v4258_v30, %v4232_v28  ;;  %v4256_v32 = vpop.permute.xlu0 %4255 }
0x25de   :  { %v4267_v33 = vadd.f32 %v4256_v32, %v4231_v29 }
0x25e0   :  { %v4271_v34 = vpack.c.bf16 %v4268_v31, %v4267_v33 }
0x25e2   :  { %v4262_v38 = vpop.permute.xlu1 %4261  ;;  %7890 = vmatprep.mubr.msk.bf16.mxu1 %vm358_vm3, %v4271_v34 }
0x25e3   :  { %v4270_v39 = vadd.f32 %v4262_v38, %v4234_v36  ;;  %v4260_v40 = vpop.permute.xlu0 %4259 }
0x25e4   :  { %v4269_v41 = vadd.f32 %v4260_v40, %v4233_v37 }
0x25e6   :  { %v4272_v42 = vpack.c.bf16 %v4270_v39, %v4269_v41 }
0x25e8   :  { %7891 = vmatmul.mubr.msk.bf16.vlgmr.msra.gmra.mrb[36].mxu1 %vm358_vm3, %v4272_v42  ;;  %v7099_v42 = vld [vmem:[%s8951_s13 + $0x3] ss:$0 sm:$0xff] }
0x26bb   :  { %v7892_v44 = vpop.f32.mrb[36].mxu1 }
0x26bc   :  { %v4347_v45 = vadd.f32 %v7892_v44, %v7092_v43  ;;  %v4338_v46 = vpop.f32.mrb[37].mxu1 }
0x26bd   :  { %v4339_v47 = vadd.f32 %v7092_v43, %v4338_v46  ;;  %v7893_v48 = vpop.f32.mrb[38].mxu1 }
0x26be   :  { %v9580_v54 = vadd.f32 %v4347_v45, %v9481_v10  ;;  %v4341_v4 = vpop.f32.mrb[39].mxu1  ;;  %v4350_v50 = vadd.f32 %v7893_v48, %v7092_v43 }
0x26bf   :  { %v9583_v59 = vadd.f32 %v4339_v47, %v9474_v58  ;;  %v4342_v51 = vadd.f32 %v7092_v43, %v4341_v4 }
0x26c0   :  { %v4367_v5 = vsel %vm358_vm3, %v9580_v54, 0.0  ;;  %v9595_v53 = vadd.f32 %v4350_v50, %v9483_v55  ;;  %v4379_v61 = vmul.f32 %v9580_v54, %v9580_v54 }
0x26c1   :  { %v9588_v56 = vadd.f32 %v4342_v51, %v9476_v63  ;;  %4368 = vadd.xlane.f32.xlu0 %v4367_v5  ;;  %v4377_v10 = vmul.f32 %v9583_v59, %v9583_v59  ;;  %v4361_v58 = vsel %vm358_vm3, %v9583_v59, 0.0  ;;  %v7100_v51 = vld [vmem:[%s8956_s22 + $0x3] ss:$0 sm:$0xff] }
0x26c2   :  { %v4370_v11 = vsel %vm358_vm3, %v9595_v53, 0.0  ;;  %v4387_v9 = vsel %vm358_vm3, %v4379_v61, 0.0  ;;  %v4380_v15 = vmul.f32 %v9595_v53, %v9595_v53 }
0x26c3   :  { %v4364_v52 = vsel %vm358_vm3, %v9588_v56, 0.0  ;;  %v4381_v63 = vsel %vm358_vm3, %v4377_v10, 0.0  ;;  %v4378_v55 = vmul.f32 %v9588_v56, %v9588_v56 }
0x26c4   :  { %4365 = vadd.xlane.f32.xlu1 %v4364_v52  ;;  %v4390_v18 = vsel %vm358_vm3, %v4380_v15, 0.0  ;;  %v8314_v15 = vld [vmem:[%s8981_s27 + $0xd8] sm:$0xff]  }
0x26c5   :  { %4362 = vadd.xlane.f32.xlu0 %v4361_v58  ;;  %v4384_v25 = vsel %vm358_vm3, %v4378_v55, 0.0  ;;  %v8311_v55 = vld [vmem:[%s8981_s27 + $0xc0] sm:$0xff]  }
0x26c6   :  { %7902 = vmatprep.subr.bf16.mxu1 %v8311_v55 }
0x26c7   :  { %7903 = vmatpush3.bf16.msra.mxu1 %v8311_v55  ;;  %v7128_v55 = vld [vmem:[%s9000_s8 + $0x3] ss:$0 sm:$0xff] }
0x26c8   :  { %4382 = vadd.xlane.f32.xlu1 %v4381_v63 }
0x26c9   :  { %4371 = vadd.xlane.f32.xlu0 %v4370_v11 }
0x26cc   :  { %4388 = vadd.xlane.f32.xlu1 %v4387_v9  ;;  %v8312_v9 = vld [vmem:[%s8981_s27 + $0xc8] sm:$0xff]  }
0x26cd   :  { %4385 = vadd.xlane.f32.xlu0 %v4384_v25  ;;  %7904 = vmatprep.subr.bf16.mxu1 %v8312_v9  ;;  %v8313_v25 = vld [vmem:[%s8981_s27 + $0xd0] sm:$0xff]  }
0x26ce   :  { %7905 = vmatpush3.bf16.msra.mxu1 %v8312_v9 }
0x26cf   :  { %7906 = vmatprep.subr.bf16.mxu1 %v8313_v25 }
0x26d1   :  { %4391 = vadd.xlane.f32.xlu0 %v4390_v18  ;;  %v8315_v18 = vld [vmem:[%s8981_s27 + $0xe0] sm:$0xff]  }
0x26d2   :  { %7907 = vmatpush3.bf16.msra.mxu1 %v8313_v25 }
0x26d3   :  { %7908 = vmatprep.subr.bf16.mxu1 %v8314_v15 }
0x26d6   :  { %7909 = vmatpush3.bf16.msra.mxu1 %v8314_v15 }
0x26d7   :  { %7910 = vmatprep.subr.bf16.mxu1 %v8315_v18 }
0x26da   :  { %7911 = vmatpush3.bf16.msra.mxu1 %v8315_v18 }
0x26db   :  { %7912 = vmatprep.subr.bf16.mxu1 %v8316_v0 }
0x26de   :  { %7913 = vmatpush3.bf16.msra.mxu1 %v8316_v0 }
0x26df   :  { %7914 = vmatprep.subr.bf16.mxu1 %v8317_v14 }
0x26e2   :  { %7915 = vmatpush3.bf16.msra.mxu1 %v8317_v14 }
0x274e   :  { %v4369_v22 = vpop.xlane.xlu0 %4368 }
0x274f   :  { %v4375_v19 = vmul.f32 0.03125, %v4369_v22  ;;  %v8318_v22 = vld [vmem:[%s8981_s27 + $0xf8] sm:$0xff]  }
0x2750   :  { %7916 = vmatprep.subr.bf16.mxu1 %v8318_v22 }
0x2751   :  { %v4366_v24 = vpop.xlane.xlu1 %4365  ;;  %v4399_v8 = vmul.f32 %v4375_v19, %v4375_v19  ;;  %v4407_v44 = vsub.f32 %v9580_v54, %v4375_v19  ;;  %7917 = vmatpush3.bf16.msra.mxu1 %v8318_v22 }
0x2752   :  { %v4363_v16 = vpop.xlane.xlu0 %4362  ;;  %v4374_v12 = vmul.f32 0.03125, %v4366_v24  ;;  %v7106_v24 = vld [vmem:[%s8994_s2 + $0x3] ss:$0 sm:$0xff] }
0x2753   :  { %v4373_v2 = vmul.f32 0.03125, %v4363_v16 }
0x2754   :  { %v4398_v60 = vmul.f32 %v4374_v12, %v4374_v12  ;;  %v4406_v45 = vsub.f32 %v9588_v56, %v4374_v12 }
0x2755   :  { %v4397_v27 = vmul.f32 %v4373_v2, %v4373_v2  ;;  %v4383_v13 = vpop.xlane.xlu1 %4382  ;;  %v4405_v40 = vsub.f32 %v9583_v59, %v4373_v2 }
0x2756   :  { %v4393_v49 = vmul.f32 0.03125, %v4383_v13  ;;  %v4372_v57 = vpop.xlane.xlu0 %4371 }
0x2757   :  { %v4376_v6 = vmul.f32 0.03125, %v4372_v57 }
0x2758   :  { %v4401_v3 = vsub.f32 %v4393_v49, %v4397_v27 }
0x2759   :  { %v4389_v21 = vpop.xlane.xlu1 %4388  ;;  %v4400_v33 = vmul.f32 %v4376_v6, %v4376_v6  ;;  %v4408_v50 = vsub.f32 %v9595_v53, %v4376_v6 }
0x275a   :  { %v4409_v62 = vadd.f32 1e-05, %v4401_v3  ;;  %v4395_v7 = vmul.f32 0.03125, %v4389_v21  ;;  %v4386_v1 = vpop.xlane.xlu0 %4385 }
0x275b   :  { %v4394_v28 = vmul.f32 0.03125, %v4386_v1 }
0x275c   :  { %8517 = vrsqrt.f32 %v4409_v62  ;;  %v4403_v29 = vsub.f32 %v4395_v7, %v4399_v8 }
0x275d   :  { %v4402_v30 = vsub.f32 %v4394_v28, %v4398_v60 }
0x275e   :  { %v4411_v31 = vadd.f32 1e-05, %v4403_v29  ;;  %v4392_v32 = vpop.xlane.xlu0 %4391 }
0x275f   :  { %v4410_v34 = vadd.f32 1e-05, %v4402_v30  ;;  %v4396_v36 = vmul.f32 0.03125, %v4392_v32 }
0x2760   :  { %8519 = vrsqrt.f32 %v4411_v31 }
0x2761   :  { %8521 = vrsqrt.f32 %v4410_v34  ;;  %v4404_v37 = vsub.f32 %v4396_v36, %v4400_v33 }
0x2763   :  { %v4412_v38 = vadd.f32 1e-05, %v4404_v37 }
0x2765   :  { %8523 = vrsqrt.f32 %v4412_v38 }
0x2766   :  { %v8518_v39 = vpop.eup %8517 }
0x2767   :  { %v4417_v41 = vmul.f32 %v8518_v39, %v4405_v40 }
0x2769   :  { %v4427_v4 = vmul.f32 %v7099_v42, %v4417_v41 }
0x276a   :  { %v8520_v43 = vpop.eup %8519 }
0x276b   :  { %v8522_v46 = vpop.eup %8521  ;;  %v4419_v47 = vmul.f32 %v8520_v43, %v4407_v44  ;;  %v9619_v58 = vadd.f32 %v7100_v51, %v4427_v4 }
0x276c   :  { %v4418_v48 = vmul.f32 %v8522_v46, %v4406_v45 }
0x276d   :  { %v4429_v59 = vmul.f32 %v7099_v42, %v4419_v47 }
0x276e   :  { %v4428_v5 = vmul.f32 %v7099_v42, %v4418_v48 }
0x276f   :  { %v8524_v52 = vpop.eup %8523  ;;  %v9625_v61 = vadd.f32 %v7100_v51, %v4429_v59 }
0x2770   :  { %v4420_v10 = vmul.f32 %v8524_v52, %v4408_v50  ;;  %v9621_v63 = vadd.f32 %v7100_v51, %v4428_v5 }
0x2772   :  { %v4430_v54 = vmul.f32 %v7099_v42, %v4420_v10  ;;  %v4441_v56 = vpack.c.bf16 %v9621_v63, %v9619_v58 }
0x2774   :  { %v9627_v11 = vadd.f32 %v7100_v51, %v4430_v54  ;;  %7898 = vmatprep.mubr.msk.bf16.mxu0 %vm358_vm3, %v4441_v56 }
0x2776   :  { %v4442_v53 = vpack.c.bf16 %v9627_v11, %v9625_v61 }
0x2778   :  { %7899 = vmatmul.mubr.msk.bf16.vlgmr.msra.gmra.mrb[64].mxu0 %vm358_vm3, %v4442_v53 }
0x284b   :  { %v7900_v16 = vpop.f32.mrb[64].mxu0 }
0x284c   :  { %v4517_v2 = vadd.f32 %v7900_v16, %v7106_v24  ;;  %v4508_v27 = vpop.f32.mrb[65].mxu0 }
0x284d   :  { %v4509_v13 = vadd.f32 %v7106_v24, %v4508_v27  ;;  %v7901_v19 = vpop.f32.mrb[66].mxu0 }
0x284e   :  { %v4529_v49 = vmul.f32 0.044715, %v4517_v2  ;;  %v4520_v57 = vadd.f32 %v7901_v19, %v7106_v24  ;;  %v4511_v12 = vpop.f32.mrb[67].mxu0  ;;  %v4525_v47 = vmul.f32 0.5, %v4517_v2 }
0x284f   :  { %v4527_v3 = vmul.f32 0.044715, %v4509_v13  ;;  %v4512_v21 = vadd.f32 %v7106_v24, %v4511_v12  ;;  %v4523_v51 = vmul.f32 0.5, %v4509_v13 }
0x2850   :  { %v4533_v8 = vmul.f32 %v4529_v49, %v4517_v2  ;;  %v4530_v62 = vmul.f32 0.044715, %v4520_v57  ;;  %v4526_v48 = vmul.f32 0.5, %v4520_v57 }
0x2851   :  { %v4531_v7 = vmul.f32 %v4527_v3, %v4509_v13  ;;  %v4528_v1 = vmul.f32 0.044715, %v4512_v21  ;;  %v4524_v50 = vmul.f32 0.5, %v4512_v21 }
0x2852   :  { %v4537_v60 = vmul.f32 %v4533_v8, %v4517_v2  ;;  %v4534_v6 = vmul.f32 %v4530_v62, %v4520_v57 }
0x2853   :  { %v4535_v28 = vmul.f32 %v4531_v7, %v4509_v13  ;;  %v4532_v29 = vmul.f32 %v4528_v1, %v4512_v21  ;;  %v8319_v7 = vld [vmem:[%s8764_s6 + $0x40] sm:$0xff]   ;;  %v8320_v1 = vld [vmem:[%s8764_s6 + $0x48] sm:$0xff]  }
0x2854   :  { %v4541_v30 = vadd.f32 %v4537_v60, %v4517_v2  ;;  %v4538_v31 = vmul.f32 %v4534_v6, %v4520_v57  ;;  %7922 = vmatprep.subr.bf16.mxu0 %v8319_v7 }
0x2855   :  { %v4536_v32 = vmul.f32 %v4532_v29, %v4512_v21  ;;  %v4539_v33 = vadd.f32 %v4535_v28, %v4509_v13  ;;  %7923 = vmatpush3.bf16.msra.mxu0 %v8319_v7 }
0x2856   :  { %v4545_v34 = vmul.f32 0.7978846, %v4541_v30  ;;  %v4542_v36 = vadd.f32 %v4538_v31, %v4520_v57  ;;  %7924 = vmatprep.subr.bf16.mxu0 %v8320_v1 }
0x2857   :  { %v4540_v37 = vadd.f32 %v4536_v32, %v4512_v21  ;;  %v4543_v38 = vmul.f32 0.7978846, %v4539_v33 }
0x2858   :  { %8525 = vtanh.f32 %v4545_v34  ;;  %v4546_v39 = vmul.f32 0.7978846, %v4542_v36 }
0x2859   :  { %v4544_v40 = vmul.f32 0.7978846, %v4540_v37  ;;  %8527 = vtanh.f32 %v4543_v38  ;;  %7925 = vmatpush3.bf16.msra.mxu0 %v8320_v1 }
0x285a   :  { %8529 = vtanh.f32 %v4546_v39  ;;  %8170 = vmatprep.subr.bf16.mxu0 %v8807_v17 }
0x285b   :  { %8531 = vtanh.f32 %v4544_v40 }
0x2862   :  { %v8526_v41 = vpop.eup %8525 }
0x2863   :  { %v8528_v42 = vpop.eup %8527  ;;  %v4553_v43 = vadd.f32 1.0, %v8526_v41 }
0x2864   :  { %v8530_v44 = vpop.eup %8529  ;;  %v4551_v45 = vadd.f32 1.0, %v8528_v42 }
0x2865   :  { %v8532_v46 = vpop.eup %8531  ;;  %v4554_v4 = vadd.f32 1.0, %v8530_v44  ;;  %v4557_v52 = vmul.f32 %v4553_v43, %v4525_v47 }
0x2866   :  { %v4552_v5 = vadd.f32 1.0, %v8532_v46  ;;  %v4555_v59 = vmul.f32 %v4551_v45, %v4523_v51 }
0x2867   :  { %v4558_v10 = vmul.f32 %v4554_v4, %v4526_v48 }
0x2868   :  { %v4556_v54 = vmul.f32 %v4552_v5, %v4524_v50 }
0x2869   :  { %v4560_v56 = vpack.c.bf16 %v4558_v10, %v4557_v52 }
0x286a   :  { %v4559_v53 = vpack.c.bf16 %v4556_v54, %v4555_v59 }
0x286c   :  { %7918 = vmatprep.mubr.bf16.mxu1 %v4559_v53 }
0x286d   :  { %7919 = vmatmul.mubr.bf16.vlgmr.msra.gmra.mrb[40].mxu1 %v4560_v56  ;;  %v7139_v56 = vld [vmem:[%s9041_s17 + $0x3] ss:$0 sm:$0xff] }
0x2940   :  { %v7920_v9 = vpop.f32.mrb[40].mxu1 }
0x2941   :  { %v4677_v25 = vadd.f32 %v7920_v9, %v7128_v55  ;;  %v4668_v15 = vpop.f32.mrb[41].mxu1 }
0x2942   :  { %v4669_v18 = vadd.f32 %v7128_v55, %v4668_v15  ;;  %v7921_v0 = vpop.f32.mrb[42].mxu1 }
0x2943   :  { %v9644_v14 = vadd.f32 %v4677_v25, %v9625_v61  ;;  %v4680_v22 = vadd.f32 %v7921_v0, %v7128_v55  ;;  %v4671_v24 = vpop.f32.mrb[43].mxu1 }
0x2944   :  { %v4672_v16 = vadd.f32 %v7128_v55, %v4671_v24  ;;  %v9647_v2 = vadd.f32 %v4669_v18, %v9619_v58 }
0x2945   :  { %v9650_v27 = vadd.f32 %v4680_v22, %v9627_v11  ;;  %v4697_v13 = vsel %vm358_vm3, %v9644_v14, 0.0  ;;  %v4709_v12 = vmul.f32 %v9644_v14, %v9644_v14  ;;  %v7140_v22 = vld [vmem:[%s9046_s24 + $0x3] ss:$0 sm:$0xff] }
0x2946   :  { %4698 = vadd.xlane.f32.xlu1 %v4697_v13  ;;  %v9655_v19 = vadd.f32 %v4672_v16, %v9621_v63  ;;  %v4691_v49 = vsel %vm358_vm3, %v9647_v2, 0.0  ;;  %v4707_v58 = vmul.f32 %v9647_v2, %v9647_v2 }
0x2947   :  { %v4700_v61 = vsel %vm358_vm3, %v9650_v27, 0.0  ;;  %v4710_v21 = vmul.f32 %v9650_v27, %v9650_v27  ;;  %v4717_v8 = vsel %vm358_vm3, %v4709_v12, 0.0  ;;  %v7146_v12 = vld [vmem:[%s8788_s14 + $0x4] ss:$0 sm:$0xff] }
0x2948   :  { %4701 = vadd.xlane.f32.xlu0 %v4700_v61  ;;  %v4694_v11 = vsel %vm358_vm3, %v9655_v19, 0.0  ;;  %v4708_v63 = vmul.f32 %v9655_v19, %v9655_v19  ;;  %v4711_v57 = vsel %vm358_vm3, %v4707_v58, 0.0 }
0x2949   :  { %v4720_v62 = vsel %vm358_vm3, %v4710_v21, 0.0 }
0x294a   :  { %4692 = vadd.xlane.f32.xlu1 %v4691_v49  ;;  %v4714_v3 = vsel %vm358_vm3, %v4708_v63, 0.0 }
0x294c   :  { %4695 = vadd.xlane.f32.xlu0 %v4694_v11 }
0x294e   :  { %4712 = vadd.xlane.f32.xlu1 %v4711_v57 }
0x2950   :  { %4715 = vadd.xlane.f32.xlu0 %v4714_v3 }
0x2952   :  { %4718 = vadd.xlane.f32.xlu1 %v4717_v8 }
0x2954   :  { %4721 = vadd.xlane.f32.xlu0 %v4720_v62 }
0x29d3   :  { %v4699_v60 = vpop.xlane.xlu1 %4698 }
0x29d4   :  { %v4705_v33 = vmul.f32 0.03125, %v4699_v60 }
0x29d5   :  { %v4702_v6 = vpop.xlane.xlu0 %4701 }
0x29d6   :  { %v4706_v37 = vmul.f32 0.03125, %v4702_v6  ;;  %v4729_v43 = vmul.f32 %v4705_v33, %v4705_v33  ;;  %v4737_v25 = vsub.f32 %v9644_v14, %v4705_v33 }
0x29d7   :  { %v4693_v28 = vpop.xlane.xlu1 %4692 }
0x29d8   :  { %v4703_v29 = vmul.f32 0.03125, %v4693_v28  ;;  %v4730_v47 = vmul.f32 %v4706_v37, %v4706_v37  ;;  %v4738_v24 = vsub.f32 %v9650_v27, %v4706_v37 }
0x29d9   :  { %v4696_v30 = vpop.xlane.xlu0 %4695 }
0x29da   :  { %v4704_v31 = vmul.f32 0.03125, %v4696_v30  ;;  %v4727_v34 = vmul.f32 %v4703_v29, %v4703_v29  ;;  %v4735_v59 = vsub.f32 %v9647_v2, %v4703_v29 }
0x29db   :  { %v4713_v32 = vpop.xlane.xlu1 %4712 }
0x29dc   :  { %v4723_v36 = vmul.f32 0.03125, %v4713_v32  ;;  %v4728_v39 = vmul.f32 %v4704_v31, %v4704_v31  ;;  %v4736_v53 = vsub.f32 %v9655_v19, %v4704_v31 }
0x29dd   :  { %v4716_v38 = vpop.xlane.xlu0 %4715 }
0x29de   :  { %v4731_v40 = vsub.f32 %v4723_v36, %v4727_v34  ;;  %v4724_v41 = vmul.f32 0.03125, %v4716_v38 }
0x29df   :  { %v4719_v42 = vpop.xlane.xlu1 %4718 }
0x29e0   :  { %v4739_v44 = vadd.f32 1e-05, %v4731_v40  ;;  %v4732_v45 = vsub.f32 %v4724_v41, %v4728_v39  ;;  %v4725_v46 = vmul.f32 0.03125, %v4719_v42 }
0x29e1   :  { %v4722_v48 = vpop.xlane.xlu0 %4721 }
0x29e2   :  { %8533 = vrsqrt.f32 %v4739_v44  ;;  %v4740_v4 = vadd.f32 1e-05, %v4732_v45  ;;  %v4733_v51 = vsub.f32 %v4725_v46, %v4729_v43  ;;  %v4726_v50 = vmul.f32 0.03125, %v4722_v48 }
0x29e4   :  { %8535 = vrsqrt.f32 %v4740_v4  ;;  %v4741_v5 = vadd.f32 1e-05, %v4733_v51  ;;  %v4734_v52 = vsub.f32 %v4726_v50, %v4730_v47 }
0x29e6   :  { %8537 = vrsqrt.f32 %v4741_v5  ;;  %v4742_v10 = vadd.f32 1e-05, %v4734_v52 }
0x29e8   :  { %8539 = vrsqrt.f32 %v4742_v10 }
0x29ec   :  { %v8534_v54 = vpop.eup %8533 }
0x29ed   :  { %v4747_v55 = vmul.f32 %v8534_v54, %v4735_v59 }
0x29ee   :  { %v8536_v9 = vpop.eup %8535 }
0x29ef   :  { %v4748_v15 = vmul.f32 %v8536_v9, %v4736_v53  ;;  %v4757_v18 = vmul.f32 %v7139_v56, %v4747_v55 }
0x29f0   :  { %v8538_v0 = vpop.eup %8537 }
0x29f1   :  { %v4749_v16 = vmul.f32 %v8538_v0, %v4737_v25  ;;  %v4758_v13 = vmul.f32 %v7139_v56, %v4748_v15  ;;  %v9684_v58 = vadd.f32 %v7140_v22, %v4757_v18 }
0x29f2   :  { %v8540_v61 = vpop.eup %8539 }
0x29f3   :  { %v4750_v49 = vmul.f32 %v8540_v61, %v4738_v24  ;;  %v9686_v2 = vadd.f32 %v7140_v22, %v4758_v13  ;;  %v4759_v11 = vmul.f32 %v7139_v56, %v4749_v16 }
0x29f5   :  { %v4771_v19 = vpack.c.bf16 %v9686_v2, %v9684_v58  ;;  %v4760_v14 = vmul.f32 %v7139_v56, %v4750_v49  ;;  %v9691_v63 = vadd.f32 %v7140_v22, %v4759_v11 }
0x29f7   :  { %7926 = vmatprep.mubr.msk.bf16.mxu0 %vm358_vm3, %v4771_v19  ;;  %v9693_v57 = vadd.f32 %v7140_v22, %v4760_v14 }
0x29f9   :  { %v4772_v27 = vpack.c.bf16 %v9693_v57, %v9691_v63 }
0x29fb   :  { %7927 = vmatmul.mubr.msk.bf16.vlgmr.msra.gmra.mrb[68].mxu0 %vm358_vm3, %v4772_v27 }
0x29fc   :  { %8172 = vmatpush3.bf16.msra.mxu0 %v8807_v17 }
0x29fd   :  { %8174 = vmatprep.subr.bf16.mxu0 %v8811_v20 }
0x2a00   :  { %8176 = vmatpush3.bf16.msra.mxu0 %v8811_v20 }
0x2a01   :  { %8178 = vmatprep.subr.bf16.mxu0 %v8818_v23 }
0x2a04   :  { %8180 = vmatpush3.bf16.msra.mxu0 %v8818_v23 }
0x2a05   :  { %8182 = vmatprep.subr.bf16.mxu0 %v8823_v26 }
0x2a08   :  { %8184 = vmatpush3.bf16.msra.mxu0 %v8823_v26 }
0x2a09   :  { %8186 = vmatprep.subr.bf16.mxu0 %v8862_v35 }
0x2ace   :  { %v7928_v3 = vpop.f32.mrb[68].mxu0 }
0x2acf   :  { %v9707_v21 = vadd.f32 %v7928_v3, %v7146_v12  ;;  %v4838_v8 = vpop.f32.mrb[69].mxu0 }
0x2ad0   :  { %v7929_v62 = vpop.f32.mrb[70].mxu0  ;;  %v9713_v60 = vadd.f32 %v7146_v12, %v4838_v8 }
0x2ad1   :  { %v9709_v7 = vadd.f32 %v7929_v62, %v7146_v12  ;;  %4861 = vrot.lane.b32.xlu1 %v9707_v21, %s8651_s16  ;;  %v4841_v1 = vpop.f32.mrb[71].mxu0 }
0x2ad2   :  { %v9719_v6 = vadd.f32 %v7146_v12, %v4841_v1 }
0x2ad3   :  { %4863 = vrot.lane.b32.xlu0 %v9709_v7, %s8651_s16 }
0x2ad5   :  { %4857 = vrot.lane.b32.xlu1 %v9713_v60, %s8651_s16 }
0x2ad9   :  { %4859 = vrot.lane.b32.xlu1 %v9719_v6, %s8651_s16 }
0x2b43   :  { %v4862_v28 = vpop.permute.xlu1 %4861 }
0x2b44   :  { %v4873_v29 = vmul.f32 %v4862_v28, %v9713_v60  ;;  %v4871_v42 = vmul.f32 %v4862_v28, %v9707_v21 }
0x2b45   :  { %v4864_v30 = vpop.permute.xlu0 %4863 }
0x2b46   :  { %v4874_v31 = vmul.f32 %v4864_v30, %v9719_v6  ;;  %4889 = vrot.lane.b32.xlu0 %v4873_v29, %s8660_s20  ;;  %v4872_v46 = vmul.f32 %v4864_v30, %v9709_v7 }
0x2b47   :  { %v4858_v32 = vpop.permute.xlu1 %4857 }
0x2b48   :  { %v4875_v33 = vmul.f32 %v4858_v32, %v9707_v21  ;;  %4891 = vrot.lane.b32.xlu1 %v4874_v31, %s8660_s20  ;;  %v4869_v37 = vmul.f32 %v4858_v32, %v9713_v60 }
0x2b4a   :  { %4893 = vrot.lane.b32.xlu0 %v4875_v33, %s8660_s20 }
0x2b4b   :  { %v4860_v34 = vpop.permute.xlu1 %4859 }
0x2b4c   :  { %v4876_v36 = vmul.f32 %v4860_v34, %v9709_v7  ;;  %v4870_v39 = vmul.f32 %v4860_v34, %v9719_v6 }
0x2b4e   :  { %4895 = vrot.lane.b32.xlu1 %v4876_v36, %s8660_s20 }
0x2bb8   :  { %v4890_v38 = vpop.permute.xlu0 %4889 }
0x2bb9   :  { %v4901_v40 = vsel %vm358_vm3, %v4869_v37, %v4890_v38 }
0x2bba   :  { %v4892_v41 = vpop.permute.xlu1 %4891  ;;  %7946 = vmatprep.mubr.msk.f32.mxu0 %vm975_vm6, %v4901_v40 }
0x2bbb   :  { %v4902_v43 = vsel %vm358_vm3, %v4870_v39, %v4892_v41 }
0x2bbc   :  { %7947 = vmatmul.mubr.msk.f32.vlgmr.msra.gmra.mrb[62].mxu0 %vm975_vm6, %v4902_v43  ;;  %v4894_v44 = vpop.permute.xlu0 %4893 }
0x2bbd   :  { %v4903_v45 = vsel %vm358_vm3, %v4871_v42, %v4894_v44  ;;  %8188 = vmatpush3.bf16.msra.mxu0 %v8862_v35 }
0x2bbe   :  { %7949 = vmatprep.mubr.msk.f32.mxu0 %vm975_vm6, %v4903_v45 }
0x2bc0   :  { %v4896_v47 = vpop.permute.xlu1 %4895 }
0x2bc1   :  { %v4904_v48 = vsel %vm358_vm3, %v4872_v46, %v4896_v47 }
0x2bc2   :  { %7950 = vmatmul.mubr.msk.f32.gmra.mrb[72].mxu0 %vm975_vm6, %v4904_v48 }
0x2c8f   :  { %v7948_v4 = vpop.f32.mrb[62].mxu0 }
0x2c90   :  { %5008 = vrot.lane.b32.xlu1 %v7948_v4, %s8661_s21  ;;  %v4983_v51 = vpop.f32.mrb[63].mxu0 }
0x2c91   :  { %5006 = vrot.lane.b32.xlu0 %v4983_v51, %s8661_s21 }
0x2c95   :  { %v7951_v50 = vpop.f32.mrb[72].mxu0 }
0x2c96   :  { %5012 = vrot.lane.b32.xlu1 %v7951_v50, %s8661_s21  ;;  %v4993_v5 = vpop.f32.mrb[73].mxu0 }
0x2c97   :  { %5010 = vrot.lane.b32.xlu0 %v4993_v5, %s8661_s21 }
0x2d02   :  { %v5009_v52 = vpop.permute.xlu1 %5008 }
0x2d03   :  { %v5019_v10 = vmax.f32 %v7948_v4, %v5009_v52  ;;  %v5007_v59 = vpop.permute.xlu0 %5006 }
0x2d04   :  { %v5018_v54 = vmax.f32 %v4983_v51, %v5007_v59 }
0x2d05   :  { %v5023_v56 = vsub.f32 %v7948_v4, %v5019_v10  ;;  %5040 = vrot.lane.b32.xlu1 %v5019_v10, %s8659_s15 }
0x2d06   :  { %v5022_v53 = vsub.f32 %v4983_v51, %v5018_v54  ;;  %5038 = vrot.lane.b32.xlu0 %v5018_v54, %s8659_s15 }
0x2d07   :  { %v5028_v29 = vmul.f32 1.442695, %v5023_v56 }
0x2d08   :  { %v5013_v55 = vpop.permute.xlu1 %5012  ;;  %v5026_v30 = vmul.f32 1.442695, %v5022_v53 }
0x2d09   :  { %v5021_v9 = vmax.f32 %v7951_v50, %v5013_v55  ;;  %v5011_v25 = vpop.permute.xlu0 %5010 }
0x2d0a   :  { %v5020_v15 = vmax.f32 %v4993_v5, %v5011_v25 }
0x2d0b   :  { %v5025_v18 = vsub.f32 %v7951_v50, %v5021_v9  ;;  %5044 = vrot.lane.b32.xlu1 %v5021_v9, %s8659_s15 }
0x2d0c   :  { %v5024_v0 = vsub.f32 %v4993_v5, %v5020_v15  ;;  %5042 = vrot.lane.b32.xlu0 %v5020_v15, %s8659_s15 }
0x2d0d   :  { %v5032_v31 = vmul.f32 1.442695, %v5025_v18 }
0x2d0e   :  { %v5030_v32 = vmul.f32 1.442695, %v5024_v0 }
0x2d77   :  { %v5041_v22 = vpop.permute.xlu1 %5040 }
0x2d78   :  { %v5051_v24 = vsub.f32 %v7948_v4, %v5041_v22  ;;  %v5039_v16 = vpop.permute.xlu0 %5038 }
0x2d79   :  { %v5050_v13 = vsub.f32 %v4983_v51, %v5039_v16  ;;  %v8322_v16 = vld [vmem:[%s8893_s30 + $0x48] sm:$0xff]  }
0x2d7a   :  { %v5056_v61 = vmul.f32 1.442695, %v5051_v24  ;;  %v8321_v24 = vld [vmem:[%s8893_s30 + $0x40] sm:$0xff]  }
0x2d7b   :  { %v5054_v49 = vmul.f32 1.442695, %v5050_v13  ;;  %7962 = vmatprep.subr.bf16.mxu1 %v8321_v24 }
0x2d7c   :  { %8541 = vpow2.f32 %v5056_v61  ;;  %7963 = vmatpush3.bf16.msra.mxu1 %v8321_v24 }
0x2d7d   :  { %8543 = vpow2.f32 %v5054_v49  ;;  %v5045_v11 = vpop.permute.xlu1 %5044  ;;  %7964 = vmatprep.subr.bf16.mxu1 %v8322_v16 }
0x2d7e   :  { %v5053_v19 = vsub.f32 %v7951_v50, %v5045_v11  ;;  %v5043_v14 = vpop.permute.xlu0 %5042 }
0x2d7f   :  { %v5052_v27 = vsub.f32 %v4993_v5, %v5043_v14 }
0x2d80   :  { %v5060_v12 = vmul.f32 1.442695, %v5053_v19  ;;  %7965 = vmatpush3.bf16.msra.mxu1 %v8322_v16 }
0x2d81   :  { %v5058_v3 = vmul.f32 1.442695, %v5052_v27 }
0x2d82   :  { %8545 = vpow2.f32 %v5060_v12 }
0x2d83   :  { %8547 = vpow2.f32 %v5058_v3 }
0x2d84   :  { %8549 = vpow2.f32 %v5028_v29 }
0x2d85   :  { %8551 = vpow2.f32 %v5026_v30 }
0x2d86   :  { %v8542_v8 = vpop.eup %8541  ;;  %8553 = vpow2.f32 %v5032_v31 }
0x2d87   :  { %v8544_v62 = vpop.eup %8543  ;;  %5068 = vrot.lane.b32.xlu1 %v8542_v8, %s8661_s21  ;;  %8555 = vpow2.f32 %v5030_v32 }
0x2d88   :  { %5066 = vrot.lane.b32.xlu0 %v8544_v62, %s8661_s21 }
0x2d8c   :  { %v8546_v1 = vpop.eup %8545 }
0x2d8d   :  { %v8548_v28 = vpop.eup %8547  ;;  %5072 = vrot.lane.b32.xlu1 %v8546_v1, %s8661_s21 }
0x2d8e   :  { %5070 = vrot.lane.b32.xlu0 %v8548_v28, %s8661_s21  ;;  %v8550_v33 = vpop.eup %8549 }
0x2d8f   :  { %v8552_v36 = vpop.eup %8551 }
0x2d90   :  { %v8554_v40 = vpop.eup %8553 }
0x2d91   :  { %v8556_v42 = vpop.eup %8555 }
0x2df9   :  { %v5069_v34 = vpop.permute.xlu1 %5068 }
0x2dfa   :  { %v5079_v37 = vadd.f32 %v8550_v33, %v5069_v34  ;;  %v5067_v38 = vpop.permute.xlu0 %5066 }
0x2dfb   :  { %v5078_v39 = vadd.f32 %v8552_v36, %v5067_v38 }
0x2dfc   :  { %8557 = vrcp.f32 %v5079_v37 }
0x2dfd   :  { %8559 = vrcp.f32 %v5078_v39 }
0x2dff   :  { %v5073_v41 = vpop.permute.xlu1 %5072 }
0x2e00   :  { %v5081_v43 = vadd.f32 %v8554_v40, %v5073_v41  ;;  %v5071_v44 = vpop.permute.xlu0 %5070 }
0x2e01   :  { %v5080_v45 = vadd.f32 %v8556_v42, %v5071_v44 }
0x2e02   :  { %8561 = vrcp.f32 %v5081_v43  ;;  %v7164_v43 = vld [vmem:[%s8906_s4 + $0x4] ss:$0 sm:$0xff] }
0x2e03   :  { %8563 = vrcp.f32 %v5080_v45 }
0x2e06   :  { %v8558_v46 = vpop.eup %8557 }
0x2e07   :  { %v8560_v47 = vpop.eup %8559  ;;  %5096 = vrot.lane.b32.xlu1 %v8558_v46, %s8659_s15  ;;  %v5087_v48 = vmul.f32 %v8558_v46, %v8550_v33 }
0x2e08   :  { %5094 = vrot.lane.b32.xlu0 %v8560_v47, %s8659_s15  ;;  %v5086_v4 = vmul.f32 %v8560_v47, %v8552_v36 }
0x2e0c   :  { %v8562_v51 = vpop.eup %8561 }
0x2e0d   :  { %v8564_v50 = vpop.eup %8563  ;;  %5100 = vrot.lane.b32.xlu1 %v8562_v51, %s8659_s15  ;;  %v5089_v5 = vmul.f32 %v8562_v51, %v8554_v40 }
0x2e0e   :  { %5098 = vrot.lane.b32.xlu0 %v8564_v50, %s8659_s15  ;;  %v5088_v52 = vmul.f32 %v8564_v50, %v8556_v42 }
0x2e11   :  { %4883 = vrot.lane.b32.xlu1 %v9709_v7, %s8663_s26 }
0x2e12   :  { %4881 = vrot.lane.b32.xlu0 %v9707_v21, %s8663_s26 }
0x2e15   :  { %4879 = vrot.lane.b32.xlu1 %v9719_v6, %s8663_s26 }
0x2e16   :  { %4877 = vrot.lane.b32.xlu0 %v9713_v60, %s8663_s26 }
0x2e79   :  { %v5097_v10 = vpop.permute.xlu1 %5096 }
0x2e7a   :  { %v5107_v59 = vmul.f32 %v8542_v8, %v5097_v10  ;;  %v5095_v54 = vpop.permute.xlu0 %5094 }
0x2e7b   :  { %v5106_v56 = vmul.f32 %v8544_v62, %v5095_v54 }
0x2e7c   :  { %v5111_v55 = vsel %vm229_vm2, %v5087_v48, %v5107_v59 }
0x2e7d   :  { %v5110_v53 = vsel %vm229_vm2, %v5086_v4, %v5106_v56 }
0x2e7e   :  { %7956 = vmatprep.mubr.msk.f32.mxu0 %vm145_vm1, %v5110_v53 }
0x2e7f   :  { %v5101_v7 = vpop.permute.xlu1 %5100  ;;  %7957 = vmatmul.mubr.msk.f32.vlgmr.msra.gmra.mrb[74].mxu0 %vm145_vm1, %v5111_v55 }
0x2e80   :  { %v5109_v21 = vmul.f32 %v8546_v1, %v5101_v7  ;;  %v5099_v9 = vpop.permute.xlu0 %5098 }
0x2e81   :  { %v5108_v6 = vmul.f32 %v8548_v28, %v5099_v9 }
0x2e82   :  { %v5113_v18 = vsel %vm229_vm2, %v5089_v5, %v5109_v21 }
0x2e83   :  { %v4884_v25 = vpop.permute.xlu1 %4883  ;;  %v5112_v60 = vsel %vm229_vm2, %v5088_v52, %v5108_v6 }
0x2e84   :  { %5221 = vrot.lane.b32.xlu1 %v4884_v25, %s8660_s20  ;;  %7959 = vmatprep.mubr.msk.f32.mxu0 %vm145_vm1, %v5112_v60  ;;  %v4882_v15 = vpop.permute.xlu0 %4881  ;;  %v8324_v60 = vld [vmem:[%s8944_s9 + $0x48] sm:$0xff]  }
0x2e85   :  { %7960 = vmatmul.mubr.msk.f32.gmra.mrb[76].mxu0 %vm145_vm1, %v5113_v18  ;;  %5219 = vrot.lane.b32.xlu0 %v4882_v15, %s8660_s20 }
0x2e87   :  { %v4880_v0 = vpop.permute.xlu1 %4879 }
0x2e88   :  { %5225 = vrot.lane.b32.xlu1 %v4880_v0, %s8660_s20  ;;  %v4878_v22 = vpop.permute.xlu0 %4877 }
0x2e89   :  { %5223 = vrot.lane.b32.xlu0 %v4878_v22, %s8660_s20 }
0x2ef6   :  { %v5222_v13 = vpop.permute.xlu1 %5221 }
0x2ef7   :  { %v5220_v49 = vpop.permute.xlu0 %5219 }
0x2efa   :  { %v5226_v27 = vpop.permute.xlu1 %5225 }
0x2efb   :  { %v5224_v3 = vpop.permute.xlu0 %5223 }
0x2f52   :  { %v7958_v61 = vpop.f32.mrb[74].mxu0 }
0x2f53   :  { %v5232_v11 = vmul.f32 %v7958_v61, %v5222_v13  ;;  %v5192_v19 = vpop.f32.mrb[75].mxu0  ;;  %v5216_v28 = vmul.f32 %v7958_v61, %v4880_v0 }
0x2f54   :  { %v5231_v14 = vmul.f32 %v5220_v49, %v5192_v19  ;;  %v5215_v29 = vmul.f32 %v5192_v19, %v4878_v22 }
0x2f55   :  { %5241 = vrot.lane.b32.xlu1 %v5232_v11, %s8651_s16 }
0x2f56   :  { %5239 = vrot.lane.b32.xlu0 %v5231_v14, %s8651_s16 }
0x2f58   :  { %v7961_v12 = vpop.f32.mrb[76].mxu0 }
0x2f59   :  { %v5234_v8 = vmul.f32 %v7961_v12, %v5226_v27  ;;  %v5202_v62 = vpop.f32.mrb[77].mxu0  ;;  %v5218_v36 = vmul.f32 %v7961_v12, %v4884_v25  ;;  %v8323_v25 = vld [vmem:[%s8944_s9 + $0x40] sm:$0xff]  }
0x2f5a   :  { %v5233_v1 = vmul.f32 %v5224_v3, %v5202_v62  ;;  %v5217_v37 = vmul.f32 %v5202_v62, %v4882_v15  ;;  %7970 = vmatprep.subr.bf16.mxu0 %v8323_v25 }
0x2f5b   :  { %5245 = vrot.lane.b32.xlu1 %v5234_v8, %s8651_s16  ;;  %7971 = vmatpush3.bf16.msra.mxu0 %v8323_v25  ;;  %v8330_v25 = vld [vmem:[%s8981_s27 + $0x128] sm:$0xff]  }
0x2f5c   :  { %5243 = vrot.lane.b32.xlu0 %v5233_v1, %s8651_s16  ;;  %7972 = vmatprep.subr.bf16.mxu0 %v8324_v60 }
0x2f5f   :  { %7973 = vmatpush3.bf16.msra.mxu0 %v8324_v60  ;;  %v8331_v60 = vld [vmem:[%s8981_s27 + $0x130] sm:$0xff]  }
0x2fc7   :  { %v5242_v30 = vpop.permute.xlu1 %5241 }
0x2fc8   :  { %v5252_v31 = vadd.f32 %v5242_v30, %v5216_v28  ;;  %v5240_v32 = vpop.permute.xlu0 %5239 }
0x2fc9   :  { %v5251_v33 = vadd.f32 %v5240_v32, %v5215_v29 }
0x2fcb   :  { %v5255_v34 = vpack.c.bf16 %v5252_v31, %v5251_v33 }
0x2fcd   :  { %v5246_v38 = vpop.permute.xlu1 %5245  ;;  %7966 = vmatprep.mubr.msk.bf16.mxu1 %vm358_vm3, %v5255_v34 }
0x2fce   :  { %v5254_v39 = vadd.f32 %v5246_v38, %v5218_v36  ;;  %v5244_v40 = vpop.permute.xlu0 %5243 }
0x2fcf   :  { %v5253_v41 = vadd.f32 %v5244_v40, %v5217_v37 }
0x2fd1   :  { %v5256_v42 = vpack.c.bf16 %v5254_v39, %v5253_v41 }
0x2fd3   :  { %7967 = vmatmul.mubr.msk.bf16.vlgmr.msra.gmra.mrb[44].mxu1 %vm358_vm3, %v5256_v42  ;;  %v7171_v42 = vld [vmem:[%s8951_s13 + $0x4] ss:$0 sm:$0xff] }
0x30a6   :  { %v7968_v44 = vpop.f32.mrb[44].mxu1 }
0x30a7   :  { %v5331_v45 = vadd.f32 %v7968_v44, %v7164_v43  ;;  %v5322_v46 = vpop.f32.mrb[45].mxu1 }
0x30a8   :  { %v5323_v47 = vadd.f32 %v7164_v43, %v5322_v46  ;;  %v7969_v48 = vpop.f32.mrb[46].mxu1 }
0x30a9   :  { %v9790_v4 = vadd.f32 %v5331_v45, %v9691_v63  ;;  %v5325_v51 = vpop.f32.mrb[47].mxu1  ;;  %v5334_v52 = vadd.f32 %v7969_v48, %v7164_v43 }
0x30aa   :  { %v9793_v50 = vadd.f32 %v5323_v47, %v9684_v58  ;;  %v5326_v5 = vadd.f32 %v7164_v43, %v5325_v51 }
0x30ab   :  { %v5351_v10 = vsel %vm358_vm3, %v9790_v4, 0.0  ;;  %v9805_v56 = vadd.f32 %v5334_v52, %v9693_v57  ;;  %v5363_v53 = vmul.f32 %v9790_v4, %v9790_v4 }
0x30ac   :  { %v9798_v59 = vadd.f32 %v5326_v5, %v9686_v2  ;;  %5352 = vadd.xlane.f32.xlu0 %v5351_v10  ;;  %v5361_v63 = vmul.f32 %v9793_v50, %v9793_v50  ;;  %v5345_v58 = vsel %vm358_vm3, %v9793_v50, 0.0  ;;  %v7172_v5 = vld [vmem:[%s8956_s22 + $0x4] ss:$0 sm:$0xff] }
0x30ad   :  { %v5354_v55 = vsel %vm358_vm3, %v9805_v56, 0.0  ;;  %v5371_v7 = vsel %vm358_vm3, %v5363_v53, 0.0  ;;  %v5364_v9 = vmul.f32 %v9805_v56, %v9805_v56 }
0x30ae   :  { %v5348_v54 = vsel %vm358_vm3, %v9798_v59, 0.0  ;;  %v5365_v2 = vsel %vm358_vm3, %v5361_v63, 0.0  ;;  %v5362_v57 = vmul.f32 %v9798_v59, %v9798_v59 }
0x30af   :  { %5349 = vadd.xlane.f32.xlu1 %v5348_v54  ;;  %v5374_v6 = vsel %vm358_vm3, %v5364_v9, 0.0  ;;  %v8328_v9 = vld [vmem:[%s8981_s27 + $0x118] sm:$0xff]  }
0x30b0   :  { %5346 = vadd.xlane.f32.xlu0 %v5345_v58  ;;  %v5368_v21 = vsel %vm358_vm3, %v5362_v57, 0.0  ;;  %v8325_v57 = vld [vmem:[%s8981_s27 + $0x100] sm:$0xff]  }
0x30b1   :  { %7978 = vmatprep.subr.bf16.mxu1 %v8325_v57 }
0x30b2   :  { %7979 = vmatpush3.bf16.msra.mxu1 %v8325_v57  ;;  %v7200_v57 = vld [vmem:[%s9000_s8 + $0x4] ss:$0 sm:$0xff] }
0x30b3   :  { %5366 = vadd.xlane.f32.xlu1 %v5365_v2 }
0x30b4   :  { %5355 = vadd.xlane.f32.xlu0 %v5354_v55 }
0x30b7   :  { %5372 = vadd.xlane.f32.xlu1 %v5371_v7  ;;  %v8326_v7 = vld [vmem:[%s8981_s27 + $0x108] sm:$0xff]  }
0x30b8   :  { %5369 = vadd.xlane.f32.xlu0 %v5368_v21  ;;  %7980 = vmatprep.subr.bf16.mxu1 %v8326_v7  ;;  %v8327_v21 = vld [vmem:[%s8981_s27 + $0x110] sm:$0xff]  }
0x30b9   :  { %7981 = vmatpush3.bf16.msra.mxu1 %v8326_v7 }
0x30ba   :  { %7982 = vmatprep.subr.bf16.mxu1 %v8327_v21 }
0x30bc   :  { %5375 = vadd.xlane.f32.xlu0 %v5374_v6  ;;  %v8329_v6 = vld [vmem:[%s8981_s27 + $0x120] sm:$0xff]  }
0x30bd   :  { %7983 = vmatpush3.bf16.msra.mxu1 %v8327_v21 }
0x30be   :  { %7984 = vmatprep.subr.bf16.mxu1 %v8328_v9 }
0x30c1   :  { %7985 = vmatpush3.bf16.msra.mxu1 %v8328_v9 }
0x30c2   :  { %7986 = vmatprep.subr.bf16.mxu1 %v8329_v6 }
0x30c5   :  { %7987 = vmatpush3.bf16.msra.mxu1 %v8329_v6 }
0x30c6   :  { %7988 = vmatprep.subr.bf16.mxu1 %v8330_v25 }
0x30c9   :  { %7989 = vmatpush3.bf16.msra.mxu1 %v8330_v25 }
0x30ca   :  { %7990 = vmatprep.subr.bf16.mxu1 %v8331_v60 }
0x30cd   :  { %7991 = vmatpush3.bf16.msra.mxu1 %v8331_v60 }
0x3139   :  { %v5353_v15 = vpop.xlane.xlu0 %5352 }
0x313a   :  { %v5359_v13 = vmul.f32 0.03125, %v5353_v15  ;;  %v8332_v15 = vld [vmem:[%s8981_s27 + $0x138] sm:$0xff]  }
0x313b   :  { %7992 = vmatprep.subr.bf16.mxu1 %v8332_v15 }
0x313c   :  { %v5350_v18 = vpop.xlane.xlu1 %5349  ;;  %v5383_v27 = vmul.f32 %v5359_v13, %v5359_v13  ;;  %v5391_v44 = vsub.f32 %v9790_v4, %v5359_v13  ;;  %7993 = vmatpush3.bf16.msra.mxu1 %v8332_v15 }
0x313d   :  { %v5347_v0 = vpop.xlane.xlu0 %5346  ;;  %v5358_v11 = vmul.f32 0.03125, %v5350_v18  ;;  %v7178_v18 = vld [vmem:[%s8994_s2 + $0x4] ss:$0 sm:$0xff] }
0x313e   :  { %v5357_v22 = vmul.f32 0.03125, %v5347_v0 }
0x313f   :  { %v5382_v62 = vmul.f32 %v5358_v11, %v5358_v11  ;;  %v5390_v45 = vsub.f32 %v9798_v59, %v5358_v11 }
0x3140   :  { %v5381_v24 = vmul.f32 %v5357_v22, %v5357_v22  ;;  %v5367_v16 = vpop.xlane.xlu1 %5366  ;;  %v5389_v40 = vsub.f32 %v9793_v50, %v5357_v22 }
0x3141   :  { %v5377_v61 = vmul.f32 0.03125, %v5367_v16  ;;  %v5356_v49 = vpop.xlane.xlu0 %5355 }
0x3142   :  { %v5360_v1 = vmul.f32 0.03125, %v5356_v49 }
0x3143   :  { %v5385_v19 = vsub.f32 %v5377_v61, %v5381_v24 }
0x3144   :  { %v5373_v14 = vpop.xlane.xlu1 %5372  ;;  %v5384_v33 = vmul.f32 %v5360_v1, %v5360_v1  ;;  %v5392_v52 = vsub.f32 %v9805_v56, %v5360_v1 }
0x3145   :  { %v5393_v12 = vadd.f32 1e-05, %v5385_v19  ;;  %v5379_v3 = vmul.f32 0.03125, %v5373_v14  ;;  %v5370_v8 = vpop.xlane.xlu0 %5369 }
0x3146   :  { %v5378_v28 = vmul.f32 0.03125, %v5370_v8 }
0x3147   :  { %8565 = vrsqrt.f32 %v5393_v12  ;;  %v5387_v29 = vsub.f32 %v5379_v3, %v5383_v27 }
0x3148   :  { %v5386_v30 = vsub.f32 %v5378_v28, %v5382_v62 }
0x3149   :  { %v5395_v31 = vadd.f32 1e-05, %v5387_v29  ;;  %v5376_v32 = vpop.xlane.xlu0 %5375 }
0x314a   :  { %v5394_v34 = vadd.f32 1e-05, %v5386_v30  ;;  %v5380_v36 = vmul.f32 0.03125, %v5376_v32 }
0x314b   :  { %8567 = vrsqrt.f32 %v5395_v31 }
0x314c   :  { %8569 = vrsqrt.f32 %v5394_v34  ;;  %v5388_v37 = vsub.f32 %v5380_v36, %v5384_v33 }
0x314e   :  { %v5396_v38 = vadd.f32 1e-05, %v5388_v37 }
0x3150   :  { %8571 = vrsqrt.f32 %v5396_v38 }
0x3151   :  { %v8566_v39 = vpop.eup %8565 }
0x3152   :  { %v5401_v41 = vmul.f32 %v8566_v39, %v5389_v40 }
0x3154   :  { %v5411_v51 = vmul.f32 %v7171_v42, %v5401_v41 }
0x3155   :  { %v8568_v43 = vpop.eup %8567 }
0x3156   :  { %v8570_v46 = vpop.eup %8569  ;;  %v5403_v47 = vmul.f32 %v8568_v43, %v5391_v44  ;;  %v9829_v58 = vadd.f32 %v7172_v5, %v5411_v51 }
0x3157   :  { %v5402_v48 = vmul.f32 %v8570_v46, %v5390_v45 }
0x3158   :  { %v5413_v50 = vmul.f32 %v7171_v42, %v5403_v47 }
0x3159   :  { %v5412_v10 = vmul.f32 %v7171_v42, %v5402_v48 }
0x315a   :  { %v8572_v54 = vpop.eup %8571  ;;  %v9835_v53 = vadd.f32 %v7172_v5, %v5413_v50 }
0x315b   :  { %v5404_v63 = vmul.f32 %v8572_v54, %v5392_v52  ;;  %v9831_v2 = vadd.f32 %v7172_v5, %v5412_v10 }
0x315d   :  { %v5414_v4 = vmul.f32 %v7171_v42, %v5404_v63  ;;  %v5425_v59 = vpack.c.bf16 %v9831_v2, %v9829_v58 }
0x315f   :  { %v9837_v55 = vadd.f32 %v7172_v5, %v5414_v4  ;;  %7974 = vmatprep.mubr.msk.bf16.mxu0 %vm358_vm3, %v5425_v59 }
0x3161   :  { %v5426_v56 = vpack.c.bf16 %v9837_v55, %v9835_v53 }
0x3163   :  { %7975 = vmatmul.mubr.msk.bf16.vlgmr.msra.gmra.mrb[80].mxu0 %vm358_vm3, %v5426_v56 }
0x3236   :  { %v7976_v0 = vpop.f32.mrb[80].mxu0 }
0x3237   :  { %v5501_v22 = vadd.f32 %v7976_v0, %v7178_v18  ;;  %v5492_v24 = vpop.f32.mrb[81].mxu0 }
0x3238   :  { %v5493_v16 = vadd.f32 %v7178_v18, %v5492_v24  ;;  %v7977_v13 = vpop.f32.mrb[82].mxu0 }
0x3239   :  { %v5513_v61 = vmul.f32 0.044715, %v5501_v22  ;;  %v5504_v49 = vadd.f32 %v7977_v13, %v7178_v18  ;;  %v5495_v11 = vpop.f32.mrb[83].mxu0  ;;  %v5509_v47 = vmul.f32 0.5, %v5501_v22 }
0x323a   :  { %v5511_v19 = vmul.f32 0.044715, %v5493_v16  ;;  %v5496_v14 = vadd.f32 %v7178_v18, %v5495_v11  ;;  %v5507_v5 = vmul.f32 0.5, %v5493_v16 }
0x323b   :  { %v5517_v27 = vmul.f32 %v5513_v61, %v5501_v22  ;;  %v5514_v12 = vmul.f32 0.044715, %v5504_v49  ;;  %v5510_v48 = vmul.f32 0.5, %v5504_v49 }
0x323c   :  { %v5515_v3 = vmul.f32 %v5511_v19, %v5493_v16  ;;  %v5512_v8 = vmul.f32 0.044715, %v5496_v14  ;;  %v5508_v52 = vmul.f32 0.5, %v5496_v14 }
0x323d   :  { %v5521_v62 = vmul.f32 %v5517_v27, %v5501_v22  ;;  %v5518_v1 = vmul.f32 %v5514_v12, %v5504_v49 }
0x323e   :  { %v5519_v28 = vmul.f32 %v5515_v3, %v5493_v16  ;;  %v5516_v29 = vmul.f32 %v5512_v8, %v5496_v14  ;;  %v8333_v3 = vld [vmem:[%s8764_s6 + $0x50] sm:$0xff]   ;;  %v8334_v8 = vld [vmem:[%s8764_s6 + $0x58] sm:$0xff]  }
0x323f   :  { %v5525_v30 = vadd.f32 %v5521_v62, %v5501_v22  ;;  %v5522_v31 = vmul.f32 %v5518_v1, %v5504_v49  ;;  %7998 = vmatprep.subr.bf16.mxu0 %v8333_v3 }
0x3240   :  { %v5520_v32 = vmul.f32 %v5516_v29, %v5496_v14  ;;  %v5523_v33 = vadd.f32 %v5519_v28, %v5493_v16  ;;  %7999 = vmatpush3.bf16.msra.mxu0 %v8333_v3 }
0x3241   :  { %v5529_v34 = vmul.f32 0.7978846, %v5525_v30  ;;  %v5526_v36 = vadd.f32 %v5522_v31, %v5504_v49  ;;  %8000 = vmatprep.subr.bf16.mxu0 %v8334_v8 }
0x3242   :  { %v5524_v37 = vadd.f32 %v5520_v32, %v5496_v14  ;;  %v5527_v38 = vmul.f32 0.7978846, %v5523_v33 }
0x3243   :  { %8573 = vtanh.f32 %v5529_v34  ;;  %v5530_v39 = vmul.f32 0.7978846, %v5526_v36 }
0x3244   :  { %v5528_v40 = vmul.f32 0.7978846, %v5524_v37  ;;  %8575 = vtanh.f32 %v5527_v38  ;;  %8001 = vmatpush3.bf16.msra.mxu0 %v8334_v8 }
0x3245   :  { %8577 = vtanh.f32 %v5530_v39  ;;  %8190 = vmatprep.subr.bf16.mxu0 %v8807_v17 }
0x3246   :  { %8579 = vtanh.f32 %v5528_v40 }
0x324d   :  { %v8574_v41 = vpop.eup %8573 }
0x324e   :  { %v8576_v42 = vpop.eup %8575  ;;  %v5537_v43 = vadd.f32 1.0, %v8574_v41 }
0x324f   :  { %v8578_v44 = vpop.eup %8577  ;;  %v5535_v45 = vadd.f32 1.0, %v8576_v42 }
0x3250   :  { %v8580_v46 = vpop.eup %8579  ;;  %v5538_v51 = vadd.f32 1.0, %v8578_v44  ;;  %v5541_v54 = vmul.f32 %v5537_v43, %v5509_v47 }
0x3251   :  { %v5536_v10 = vadd.f32 1.0, %v8580_v46  ;;  %v5539_v50 = vmul.f32 %v5535_v45, %v5507_v5 }
0x3252   :  { %v5542_v63 = vmul.f32 %v5538_v51, %v5510_v48 }
0x3253   :  { %v5540_v4 = vmul.f32 %v5536_v10, %v5508_v52 }
0x3254   :  { %v5544_v59 = vpack.c.bf16 %v5542_v63, %v5541_v54 }
0x3255   :  { %v5543_v56 = vpack.c.bf16 %v5540_v4, %v5539_v50 }
0x3257   :  { %7994 = vmatprep.mubr.bf16.mxu1 %v5543_v56 }
0x3258   :  { %7995 = vmatmul.mubr.bf16.vlgmr.msra.gmra.mrb[48].mxu1 %v5544_v59  ;;  %v7211_v59 = vld [vmem:[%s9041_s17 + $0x4] ss:$0 sm:$0xff] }
0x332b   :  { %v7996_v7 = vpop.f32.mrb[48].mxu1 }
0x332c   :  { %v5661_v21 = vadd.f32 %v7996_v7, %v7200_v57  ;;  %v5652_v9 = vpop.f32.mrb[49].mxu1 }
0x332d   :  { %v5653_v6 = vadd.f32 %v7200_v57, %v5652_v9  ;;  %v7997_v25 = vpop.f32.mrb[50].mxu1 }
0x332e   :  { %v9854_v60 = vadd.f32 %v5661_v21, %v9835_v53  ;;  %v5664_v15 = vadd.f32 %v7997_v25, %v7200_v57  ;;  %v5655_v18 = vpop.f32.mrb[51].mxu1 }
0x332f   :  { %v5656_v0 = vadd.f32 %v7200_v57, %v5655_v18  ;;  %v9857_v22 = vadd.f32 %v5653_v6, %v9829_v58 }
0x3330   :  { %v9860_v24 = vadd.f32 %v5664_v15, %v9837_v55  ;;  %v5681_v16 = vsel %vm358_vm3, %v9854_v60, 0.0  ;;  %v5693_v11 = vmul.f32 %v9854_v60, %v9854_v60  ;;  %v7212_v15 = vld [vmem:[%s9046_s24 + $0x4] ss:$0 sm:$0xff] }
0x3331   :  { %5682 = vadd.xlane.f32.xlu1 %v5681_v16  ;;  %v9865_v13 = vadd.f32 %v5656_v0, %v9831_v2  ;;  %v5675_v61 = vsel %vm358_vm3, %v9857_v22, 0.0  ;;  %v5691_v58 = vmul.f32 %v9857_v22, %v9857_v22 }
0x3332   :  { %v5684_v53 = vsel %vm358_vm3, %v9860_v24, 0.0  ;;  %v5694_v14 = vmul.f32 %v9860_v24, %v9860_v24  ;;  %v5701_v27 = vsel %vm358_vm3, %v5693_v11, 0.0  ;;  %v7218_v11 = vld [vmem:[%s8788_s14 + $0x5] ss:$0 sm:$0xff] }
0x3333   :  { %5685 = vadd.xlane.f32.xlu0 %v5684_v53  ;;  %v5678_v55 = vsel %vm358_vm3, %v9865_v13, 0.0  ;;  %v5692_v2 = vmul.f32 %v9865_v13, %v9865_v13  ;;  %v5695_v49 = vsel %vm358_vm3, %v5691_v58, 0.0 }
0x3334   :  { %v5704_v12 = vsel %vm358_vm3, %v5694_v14, 0.0 }
0x3335   :  { %5676 = vadd.xlane.f32.xlu1 %v5675_v61  ;;  %v5698_v19 = vsel %vm358_vm3, %v5692_v2, 0.0 }
0x3337   :  { %5679 = vadd.xlane.f32.xlu0 %v5678_v55 }
0x3339   :  { %5696 = vadd.xlane.f32.xlu1 %v5695_v49 }
0x333b   :  { %5699 = vadd.xlane.f32.xlu0 %v5698_v19 }
0x333d   :  { %5702 = vadd.xlane.f32.xlu1 %v5701_v27 }
0x333f   :  { %5705 = vadd.xlane.f32.xlu0 %v5704_v12 }
0x33be   :  { %v5683_v62 = vpop.xlane.xlu1 %5682 }
0x33bf   :  { %v5689_v33 = vmul.f32 0.03125, %v5683_v62 }
0x33c0   :  { %v5686_v1 = vpop.xlane.xlu0 %5685 }
0x33c1   :  { %v5690_v37 = vmul.f32 0.03125, %v5686_v1  ;;  %v5713_v43 = vmul.f32 %v5689_v33, %v5689_v33  ;;  %v5721_v21 = vsub.f32 %v9854_v60, %v5689_v33 }
0x33c2   :  { %v5677_v28 = vpop.xlane.xlu1 %5676 }
0x33c3   :  { %v5687_v29 = vmul.f32 0.03125, %v5677_v28  ;;  %v5714_v47 = vmul.f32 %v5690_v37, %v5690_v37  ;;  %v5722_v18 = vsub.f32 %v9860_v24, %v5690_v37 }
0x33c4   :  { %v5680_v30 = vpop.xlane.xlu0 %5679 }
0x33c5   :  { %v5688_v31 = vmul.f32 0.03125, %v5680_v30  ;;  %v5711_v34 = vmul.f32 %v5687_v29, %v5687_v29  ;;  %v5719_v50 = vsub.f32 %v9857_v22, %v5687_v29 }
0x33c6   :  { %v5697_v32 = vpop.xlane.xlu1 %5696 }
0x33c7   :  { %v5707_v36 = vmul.f32 0.03125, %v5697_v32  ;;  %v5712_v39 = vmul.f32 %v5688_v31, %v5688_v31  ;;  %v5720_v56 = vsub.f32 %v9865_v13, %v5688_v31 }
0x33c8   :  { %v5700_v38 = vpop.xlane.xlu0 %5699 }
0x33c9   :  { %v5715_v40 = vsub.f32 %v5707_v36, %v5711_v34  ;;  %v5708_v41 = vmul.f32 0.03125, %v5700_v38 }
0x33ca   :  { %v5703_v42 = vpop.xlane.xlu1 %5702 }
0x33cb   :  { %v5723_v44 = vadd.f32 1e-05, %v5715_v40  ;;  %v5716_v45 = vsub.f32 %v5708_v41, %v5712_v39  ;;  %v5709_v46 = vmul.f32 0.03125, %v5703_v42 }
0x33cc   :  { %v5706_v48 = vpop.xlane.xlu0 %5705 }
0x33cd   :  { %8581 = vrsqrt.f32 %v5723_v44  ;;  %v5724_v51 = vadd.f32 1e-05, %v5716_v45  ;;  %v5717_v5 = vsub.f32 %v5709_v46, %v5713_v43  ;;  %v5710_v52 = vmul.f32 0.03125, %v5706_v48 }
0x33cf   :  { %8583 = vrsqrt.f32 %v5724_v51  ;;  %v5725_v10 = vadd.f32 1e-05, %v5717_v5  ;;  %v5718_v54 = vsub.f32 %v5710_v52, %v5714_v47 }
0x33d1   :  { %8585 = vrsqrt.f32 %v5725_v10  ;;  %v5726_v63 = vadd.f32 1e-05, %v5718_v54 }
0x33d3   :  { %8587 = vrsqrt.f32 %v5726_v63 }
0x33d7   :  { %v8582_v4 = vpop.eup %8581 }
0x33d8   :  { %v5731_v57 = vmul.f32 %v8582_v4, %v5719_v50 }
0x33d9   :  { %v8584_v7 = vpop.eup %8583 }
0x33da   :  { %v5732_v9 = vmul.f32 %v8584_v7, %v5720_v56  ;;  %v5741_v6 = vmul.f32 %v7211_v59, %v5731_v57 }
0x33db   :  { %v8586_v25 = vpop.eup %8585 }
0x33dc   :  { %v5733_v0 = vmul.f32 %v8586_v25, %v5721_v21  ;;  %v5742_v16 = vmul.f32 %v7211_v59, %v5732_v9  ;;  %v9894_v58 = vadd.f32 %v7212_v15, %v5741_v6 }
0x33dd   :  { %v8588_v53 = vpop.eup %8587 }
0x33de   :  { %v5734_v61 = vmul.f32 %v8588_v53, %v5722_v18  ;;  %v9896_v22 = vadd.f32 %v7212_v15, %v5742_v16  ;;  %v5743_v55 = vmul.f32 %v7211_v59, %v5733_v0 }
0x33e0   :  { %v5755_v13 = vpack.c.bf16 %v9896_v22, %v9894_v58  ;;  %v5744_v60 = vmul.f32 %v7211_v59, %v5734_v61  ;;  %v9901_v2 = vadd.f32 %v7212_v15, %v5743_v55 }
0x33e2   :  { %8002 = vmatprep.mubr.msk.bf16.mxu0 %vm358_vm3, %v5755_v13  ;;  %v9903_v49 = vadd.f32 %v7212_v15, %v5744_v60 }
0x33e4   :  { %v5756_v24 = vpack.c.bf16 %v9903_v49, %v9901_v2 }
0x33e6   :  { %8003 = vmatmul.mubr.msk.bf16.vlgmr.msra.gmra.mrb[84].mxu0 %vm358_vm3, %v5756_v24 }
0x33e7   :  { %8192 = vmatpush3.bf16.msra.mxu0 %v8807_v17 }
0x33e8   :  { %8194 = vmatprep.subr.bf16.mxu0 %v8811_v20 }
0x33eb   :  { %8196 = vmatpush3.bf16.msra.mxu0 %v8811_v20 }
0x33ec   :  { %8198 = vmatprep.subr.bf16.mxu0 %v8818_v23 }
0x33ef   :  { %8200 = vmatpush3.bf16.msra.mxu0 %v8818_v23 }
0x33f0   :  { %8202 = vmatprep.subr.bf16.mxu0 %v8823_v26 }
0x33f3   :  { %8204 = vmatpush3.bf16.msra.mxu0 %v8823_v26 }
0x33f4   :  { %8206 = vmatprep.subr.bf16.mxu0 %v8862_v35 }
0x34b9   :  { %v8004_v19 = vpop.f32.mrb[84].mxu0 }
0x34ba   :  { %v9917_v14 = vadd.f32 %v8004_v19, %v7218_v11  ;;  %v5822_v27 = vpop.f32.mrb[85].mxu0 }
0x34bb   :  { %v8005_v17 = vpop.f32.mrb[86].mxu0  ;;  %v9923_v3 = vadd.f32 %v7218_v11, %v5822_v27 }
0x34bc   :  { %v9919_v12 = vadd.f32 %v8005_v17, %v7218_v11  ;;  %5845 = vrot.lane.b32.xlu1 %v9917_v14, %s8651_s16  ;;  %v5825_v20 = vpop.f32.mrb[87].mxu0 }
0x34bd   :  { %v9929_v23 = vadd.f32 %v7218_v11, %v5825_v20 }
0x34be   :  { %5847 = vrot.lane.b32.xlu0 %v9919_v12, %s8651_s16 }
0x34c0   :  { %5841 = vrot.lane.b32.xlu1 %v9923_v3, %s8651_s16 }
0x34c4   :  { %5843 = vrot.lane.b32.xlu1 %v9929_v23, %s8651_s16 }
0x352e   :  { %v5846_v26 = vpop.permute.xlu1 %5845 }
0x352f   :  { %v5857_v8 = vmul.f32 %v5846_v26, %v9923_v3  ;;  %v5855_v38 = vmul.f32 %v5846_v26, %v9917_v14 }
0x3530   :  { %v5848_v62 = vpop.permute.xlu0 %5847 }
0x3531   :  { %v5858_v1 = vmul.f32 %v5848_v62, %v9929_v23  ;;  %5873 = vrot.lane.b32.xlu0 %v5857_v8, %s8660_s20  ;;  %v5856_v42 = vmul.f32 %v5848_v62, %v9919_v12 }
0x3532   :  { %v5842_v28 = vpop.permute.xlu1 %5841 }
0x3533   :  { %v5859_v29 = vmul.f32 %v5842_v28, %v9917_v14  ;;  %5875 = vrot.lane.b32.xlu1 %v5858_v1, %s8660_s20  ;;  %v5853_v32 = vmul.f32 %v5842_v28, %v9923_v3 }
0x3535   :  { %5877 = vrot.lane.b32.xlu0 %v5859_v29, %s8660_s20 }
0x3536   :  { %v5844_v30 = vpop.permute.xlu1 %5843 }
0x3537   :  { %v5860_v31 = vmul.f32 %v5844_v30, %v9919_v12  ;;  %v5854_v34 = vmul.f32 %v5844_v30, %v9929_v23 }
0x3539   :  { %5879 = vrot.lane.b32.xlu1 %v5860_v31, %s8660_s20 }
0x35a3   :  { %v5874_v33 = vpop.permute.xlu0 %5873 }
0x35a4   :  { %v5885_v36 = vsel %vm358_vm3, %v5853_v32, %v5874_v33 }
0x35a5   :  { %v5876_v37 = vpop.permute.xlu1 %5875  ;;  %8022 = vmatprep.mubr.msk.f32.mxu0 %vm975_vm6, %v5885_v36 }
0x35a6   :  { %v5886_v39 = vsel %vm358_vm3, %v5854_v34, %v5876_v37 }
0x35a7   :  { %8023 = vmatmul.mubr.msk.f32.vlgmr.msra.gmra.mrb[78].mxu0 %vm975_vm6, %v5886_v39  ;;  %v5878_v40 = vpop.permute.xlu0 %5877 }
0x35a8   :  { %v5887_v41 = vsel %vm358_vm3, %v5855_v38, %v5878_v40  ;;  %8208 = vmatpush3.bf16.msra.mxu0 %v8862_v35 }
0x35a9   :  { %8025 = vmatprep.mubr.msk.f32.mxu0 %vm975_vm6, %v5887_v41 }
0x35ab   :  { %v5880_v43 = vpop.permute.xlu1 %5879 }
0x35ac   :  { %v5888_v44 = vsel %vm358_vm3, %v5856_v42, %v5880_v43 }
0x35ad   :  { %8026 = vmatmul.mubr.msk.f32.gmra.mrb[88].mxu0 %vm975_vm6, %v5888_v44 }
0x367a   :  { %v8024_v45 = vpop.f32.mrb[78].mxu0 }
0x367b   :  { %5992 = vrot.lane.b32.xlu1 %v8024_v45, %s8661_s21  ;;  %v5967_v46 = vpop.f32.mrb[79].mxu0 }
0x367c   :  { %5990 = vrot.lane.b32.xlu0 %v5967_v46, %s8661_s21 }
0x3680   :  { %v8027_v47 = vpop.f32.mrb[88].mxu0 }
0x3681   :  { %5996 = vrot.lane.b32.xlu1 %v8027_v47, %s8661_s21  ;;  %v5977_v48 = vpop.f32.mrb[89].mxu0 }
0x3682   :  { %5994 = vrot.lane.b32.xlu0 %v5977_v48, %s8661_s21 }
0x36ed   :  { %v5993_v35 = vpop.permute.xlu1 %5992 }
0x36ee   :  { %v6003_v51 = vmax.f32 %v8024_v45, %v5993_v35  ;;  %v5991_v5 = vpop.permute.xlu0 %5990 }
0x36ef   :  { %v6002_v52 = vmax.f32 %v5967_v46, %v5991_v5 }
0x36f0   :  { %v6007_v10 = vsub.f32 %v8024_v45, %v6003_v51  ;;  %6024 = vrot.lane.b32.xlu1 %v6003_v51, %s8659_s15 }
0x36f1   :  { %v6006_v54 = vsub.f32 %v5967_v46, %v6002_v52  ;;  %6022 = vrot.lane.b32.xlu0 %v6002_v52, %s8659_s15 }
0x36f2   :  { %v6012_v19 = vmul.f32 1.442695, %v6007_v10 }
0x36f3   :  { %v5997_v63 = vpop.permute.xlu1 %5996  ;;  %v6010_v27 = vmul.f32 1.442695, %v6006_v54 }
0x36f4   :  { %v6005_v50 = vmax.f32 %v8027_v47, %v5997_v63  ;;  %v5995_v4 = vpop.permute.xlu0 %5994 }
0x36f5   :  { %v6004_v59 = vmax.f32 %v5977_v48, %v5995_v4  ;;  %v8335_v4 = vld [vmem:[%s8893_s30 + $0x50] sm:$0xff]  }
0x36f6   :  { %v6009_v56 = vsub.f32 %v8027_v47, %v6005_v50  ;;  %6028 = vrot.lane.b32.xlu1 %v6005_v50, %s8659_s15  ;;  %8038 = vmatprep.subr.bf16.mxu1 %v8335_v4 }
0x36f7   :  { %v6008_v57 = vsub.f32 %v5977_v48, %v6004_v59  ;;  %6026 = vrot.lane.b32.xlu0 %v6004_v59, %s8659_s15  ;;  %8039 = vmatpush3.bf16.msra.mxu1 %v8335_v4  ;;  %v8336_v59 = vld [vmem:[%s8893_s30 + $0x58] sm:$0xff]  }
0x36f8   :  { %v6016_v17 = vmul.f32 1.442695, %v6009_v56  ;;  %8040 = vmatprep.subr.bf16.mxu1 %v8336_v59 }
0x36f9   :  { %v6014_v20 = vmul.f32 1.442695, %v6008_v57 }
0x36fb   :  { %8041 = vmatpush3.bf16.msra.mxu1 %v8336_v59 }
0x3762   :  { %v6025_v7 = vpop.permute.xlu1 %6024 }
0x3763   :  { %v6035_v21 = vsub.f32 %v8024_v45, %v6025_v7  ;;  %v6023_v9 = vpop.permute.xlu0 %6022 }
0x3764   :  { %v6034_v6 = vsub.f32 %v5967_v46, %v6023_v9 }
0x3765   :  { %v6040_v25 = vmul.f32 1.442695, %v6035_v21 }
0x3766   :  { %v6038_v15 = vmul.f32 1.442695, %v6034_v6 }
0x3767   :  { %8589 = vpow2.f32 %v6040_v25 }
0x3768   :  { %8591 = vpow2.f32 %v6038_v15  ;;  %v6029_v18 = vpop.permute.xlu1 %6028 }
0x3769   :  { %v6037_v0 = vsub.f32 %v8027_v47, %v6029_v18  ;;  %v6027_v16 = vpop.permute.xlu0 %6026 }
0x376a   :  { %v6036_v53 = vsub.f32 %v5977_v48, %v6027_v16 }
0x376b   :  { %v6044_v61 = vmul.f32 1.442695, %v6037_v0 }
0x376c   :  { %v6042_v55 = vmul.f32 1.442695, %v6036_v53 }
0x376d   :  { %8593 = vpow2.f32 %v6044_v61 }
0x376e   :  { %8595 = vpow2.f32 %v6042_v55 }
0x376f   :  { %8597 = vpow2.f32 %v6012_v19 }
0x3770   :  { %8599 = vpow2.f32 %v6010_v27 }
0x3771   :  { %v8590_v13 = vpop.eup %8589  ;;  %8601 = vpow2.f32 %v6016_v17 }
0x3772   :  { %v8592_v60 = vpop.eup %8591  ;;  %6052 = vrot.lane.b32.xlu1 %v8590_v13, %s8661_s21  ;;  %8603 = vpow2.f32 %v6014_v20 }
0x3773   :  { %6050 = vrot.lane.b32.xlu0 %v8592_v60, %s8661_s21 }
0x3777   :  { %v8594_v24 = vpop.eup %8593 }
0x3778   :  { %v8596_v11 = vpop.eup %8595  ;;  %6056 = vrot.lane.b32.xlu1 %v8594_v24, %s8661_s21 }
0x3779   :  { %6054 = vrot.lane.b32.xlu0 %v8596_v11, %s8661_s21  ;;  %v8598_v26 = vpop.eup %8597  ;;  %s8675_s21 = smov 31  }
0x377a   :  { %v8600_v62 = vpop.eup %8599 }
0x377b   :  { %v8602_v30 = vpop.eup %8601 }
0x377c   :  { %v8604_v32 = vpop.eup %8603 }
0x37e4   :  { %v6053_v8 = vpop.permute.xlu1 %6052 }
0x37e5   :  { %v6063_v1 = vadd.f32 %v8598_v26, %v6053_v8  ;;  %v6051_v28 = vpop.permute.xlu0 %6050 }
0x37e6   :  { %v6062_v29 = vadd.f32 %v8600_v62, %v6051_v28  ;;  %v7236_v28 = vld [vmem:[%s8906_s4 + $0x5] ss:$0 sm:$0xff]  ;;  %s6857_s4 = sld [smem:[%s10117_s0 + %s8675_s21]]  }
0x37e7   :  { %8605 = vrcp.f32 %v6063_v1 }
0x37e8   :  { %8607 = vrcp.f32 %v6062_v29 }
0x37ea   :  { %v6057_v31 = vpop.permute.xlu1 %6056 }
0x37eb   :  { %v6065_v33 = vadd.f32 %v8602_v30, %v6057_v31  ;;  %v6055_v34 = vpop.permute.xlu0 %6054 }
0x37ec   :  { %v6064_v36 = vadd.f32 %v8604_v32, %v6055_v34 }
0x37ed   :  { %8609 = vrcp.f32 %v6065_v33 }
0x37ee   :  { %8611 = vrcp.f32 %v6064_v36 }
0x37f1   :  { %v8606_v37 = vpop.eup %8605 }
0x37f2   :  { %v8608_v38 = vpop.eup %8607  ;;  %6080 = vrot.lane.b32.xlu1 %v8606_v37, %s8659_s15  ;;  %v6071_v39 = vmul.f32 %v8606_v37, %v8598_v26 }
0x37f3   :  { %6078 = vrot.lane.b32.xlu0 %v8608_v38, %s8659_s15  ;;  %v6070_v40 = vmul.f32 %v8608_v38, %v8600_v62 }
0x37f7   :  { %v8610_v41 = vpop.eup %8609 }
0x37f8   :  { %v8612_v42 = vpop.eup %8611  ;;  %6084 = vrot.lane.b32.xlu1 %v8610_v41, %s8659_s15  ;;  %v6073_v43 = vmul.f32 %v8610_v41, %v8602_v30 }
0x37f9   :  { %6082 = vrot.lane.b32.xlu0 %v8612_v42, %s8659_s15  ;;  %v6072_v44 = vmul.f32 %v8612_v42, %v8604_v32 }
0x37fc   :  { %5867 = vrot.lane.b32.xlu1 %v9919_v12, %s8663_s26 }
0x37fd   :  { %5865 = vrot.lane.b32.xlu0 %v9917_v14, %s8663_s26 }
0x3800   :  { %5863 = vrot.lane.b32.xlu1 %v9929_v23, %s8663_s26 }
0x3801   :  { %5861 = vrot.lane.b32.xlu0 %v9923_v3, %s8663_s26 }
0x3864   :  { %v6081_v45 = vpop.permute.xlu1 %6080 }
0x3865   :  { %v6091_v46 = vmul.f32 %v8590_v13, %v6081_v45  ;;  %v6079_v47 = vpop.permute.xlu0 %6078 }
0x3866   :  { %v6090_v48 = vmul.f32 %v8592_v60, %v6079_v47 }
0x3867   :  { %v6095_v51 = vsel %vm229_vm2, %v6071_v39, %v6091_v46 }
0x3868   :  { %v6094_v35 = vsel %vm229_vm2, %v6070_v40, %v6090_v48 }
0x3869   :  { %8032 = vmatprep.mubr.msk.f32.mxu0 %vm145_vm1, %v6094_v35 }
0x386a   :  { %v6085_v12 = vpop.permute.xlu1 %6084  ;;  %8033 = vmatmul.mubr.msk.f32.vlgmr.msra.gmra.mrb[90].mxu0 %vm145_vm1, %v6095_v51  ;;  %v8337_v51 = vld [vmem:[%s8944_s9 + $0x50] sm:$0xff]  }
0x386b   :  { %v6093_v14 = vmul.f32 %v8594_v24, %v6085_v12  ;;  %v6083_v5 = vpop.permute.xlu0 %6082  ;;  %8046 = vmatprep.subr.bf16.mxu0 %v8337_v51  ;;  %v8338_v12 = vld [vmem:[%s8944_s9 + $0x58] sm:$0xff]  }
0x386c   :  { %v6092_v23 = vmul.f32 %v8596_v11, %v6083_v5  ;;  %8047 = vmatpush3.bf16.msra.mxu0 %v8337_v51 }
0x386d   :  { %v6097_v54 = vsel %vm229_vm2, %v6073_v43, %v6093_v14  ;;  %8048 = vmatprep.subr.bf16.mxu0 %v8338_v12 }
0x386e   :  { %v5868_v52 = vpop.permute.xlu1 %5867  ;;  %v6096_v3 = vsel %vm229_vm2, %v6072_v44, %v6092_v23 }
0x386f   :  { %6205 = vrot.lane.b32.xlu1 %v5868_v52, %s8660_s20  ;;  %8035 = vmatprep.mubr.msk.f32.mxu0 %vm145_vm1, %v6096_v3  ;;  %v5866_v10 = vpop.permute.xlu0 %5865 }
0x3870   :  { %8036 = vmatmul.mubr.msk.f32.gmra.mrb[92].mxu0 %vm145_vm1, %v6097_v54  ;;  %6203 = vrot.lane.b32.xlu0 %v5866_v10, %s8660_s20 }
0x3871   :  { %8049 = vmatpush3.bf16.msra.mxu0 %v8338_v12 }
0x3872   :  { %v5864_v63 = vpop.permute.xlu1 %5863 }
0x3873   :  { %6209 = vrot.lane.b32.xlu1 %v5864_v63, %s8660_s20  ;;  %v5862_v50 = vpop.permute.xlu0 %5861 }
0x3874   :  { %6207 = vrot.lane.b32.xlu0 %v5862_v50, %s8660_s20 }
0x38e1   :  { %v6206_v56 = vpop.permute.xlu1 %6205 }
0x38e2   :  { %v6204_v7 = vpop.permute.xlu0 %6203 }
0x38e5   :  { %v6210_v25 = vpop.permute.xlu1 %6209 }
0x38e6   :  { %v6208_v18 = vpop.permute.xlu0 %6207 }
0x393d   :  { %v8034_v57 = vpop.f32.mrb[90].mxu0 }
0x393e   :  { %v6216_v21 = vmul.f32 %v8034_v57, %v6206_v56  ;;  %v6176_v9 = vpop.f32.mrb[91].mxu0  ;;  %v6200_v61 = vmul.f32 %v8034_v57, %v5864_v63 }
0x393f   :  { %v6215_v6 = vmul.f32 %v6204_v7, %v6176_v9  ;;  %v6199_v55 = vmul.f32 %v6176_v9, %v5862_v50 }
0x3940   :  { %6225 = vrot.lane.b32.xlu1 %v6216_v21, %s8651_s16 }
0x3941   :  { %6223 = vrot.lane.b32.xlu0 %v6215_v6, %s8651_s16 }
0x3943   :  { %v8037_v15 = vpop.f32.mrb[92].mxu0 }
0x3944   :  { %v6218_v0 = vmul.f32 %v8037_v15, %v6210_v25  ;;  %v6186_v16 = vpop.f32.mrb[93].mxu0  ;;  %v6202_v27 = vmul.f32 %v8037_v15, %v5868_v52 }
0x3945   :  { %v6217_v53 = vmul.f32 %v6208_v18, %v6186_v16  ;;  %v6201_v17 = vmul.f32 %v6186_v16, %v5866_v10 }
0x3946   :  { %6229 = vrot.lane.b32.xlu1 %v6218_v0, %s8651_s16 }
0x3947   :  { %6227 = vrot.lane.b32.xlu0 %v6217_v53, %s8651_s16  ;;  %s8674_s16 = smov 30  }
0x3948   :  { %s6856_s15 = sld [smem:[%s10117_s0 + %s8674_s16]]  }
0x39b2   :  { %v6226_v13 = vpop.permute.xlu1 %6225 }
0x39b3   :  { %v6236_v60 = vadd.f32 %v6226_v13, %v6200_v61  ;;  %v6224_v24 = vpop.permute.xlu0 %6223 }
0x39b4   :  { %v6235_v11 = vadd.f32 %v6224_v24, %v6199_v55 }
0x39b6   :  { %v6239_v19 = vpack.c.bf16 %v6236_v60, %v6235_v11 }
0x39b8   :  { %v6230_v20 = vpop.permute.xlu1 %6229  ;;  %8042 = vmatprep.mubr.msk.bf16.mxu1 %vm358_vm3, %v6239_v19 }
0x39b9   :  { %v6238_v26 = vadd.f32 %v6230_v20, %v6202_v27  ;;  %v6228_v8 = vpop.permute.xlu0 %6227 }
0x39ba   :  { %v6237_v62 = vadd.f32 %v6228_v8, %v6201_v17  ;;  %v7243_v17 = vld [vmem:[%s8951_s13 + $0x5] ss:$0 sm:$0xff] }
0x39bc   :  { %v6240_v1 = vpack.c.bf16 %v6238_v26, %v6237_v62 }
0x39be   :  { %8043 = vmatmul.mubr.msk.bf16.vlgmr.msra.gmra.mrb[52].mxu1 %vm358_vm3, %v6240_v1 }
0x3a91   :  { %v8044_v29 = vpop.f32.mrb[52].mxu1 }
0x3a92   :  { %v6315_v30 = vadd.f32 %v8044_v29, %v7236_v28  ;;  %v6306_v31 = vpop.f32.mrb[53].mxu1 }
0x3a93   :  { %v6307_v32 = vadd.f32 %v7236_v28, %v6306_v31  ;;  %v8045_v33 = vpop.f32.mrb[54].mxu1 }
0x3a94   :  { %v10000_v34 = vadd.f32 %v6315_v30, %v9901_v2  ;;  %v6309_v36 = vpop.f32.mrb[55].mxu1  ;;  %v6318_v39 = vadd.f32 %v8045_v33, %v7236_v28  ;;  %v7244_v30 = vld [vmem:[%s8956_s22 + $0x5] ss:$0 sm:$0xff]  ;;  %s6858_s22 = sld [smem:[%s10117_s0 + %s8660_s20]]  }
0x3a95   :  { %v10003_v37 = vadd.f32 %v6307_v32, %v9894_v58  ;;  %v6310_v38 = vadd.f32 %v7236_v28, %v6309_v36 }
0x3a96   :  { %v6335_v40 = vsel %vm358_vm3, %v10000_v34, 0.0  ;;  %v10015_v43 = vadd.f32 %v6318_v39, %v9903_v49  ;;  %v6347_v44 = vmul.f32 %v10000_v34, %v10000_v34 }
0x3a97   :  { %v10008_v41 = vadd.f32 %v6310_v38, %v9896_v22  ;;  %6336 = vadd.xlane.f32.xlu0 %v6335_v40  ;;  %v6345_v2 = vmul.f32 %v10003_v37, %v10003_v37  ;;  %v6329_v58 = vsel %vm358_vm3, %v10003_v37, 0.0 }
0x3a98   :  { %v6338_v45 = vsel %vm358_vm3, %v10015_v43, 0.0  ;;  %v6355_v46 = vsel %vm358_vm3, %v6347_v44, 0.0  ;;  %v6348_v48 = vmul.f32 %v10015_v43, %v10015_v43  ;;  %v8342_v44 = vld [vmem:[%s8981_s27 + $0x158] sm:$0xff]  }
0x3a99   :  { %v6332_v42 = vsel %vm358_vm3, %v10008_v41, 0.0  ;;  %v6349_v22 = vsel %vm358_vm3, %v6345_v2, 0.0  ;;  %v6346_v49 = vmul.f32 %v10008_v41, %v10008_v41 }
0x3a9a   :  { %6333 = vadd.xlane.f32.xlu1 %v6332_v42  ;;  %v6358_v35 = vsel %vm358_vm3, %v6348_v48, 0.0  ;;  %v7250_v48 = vld [vmem:[%s8994_s2 + $0x5] ss:$0 sm:$0xff] }
0x3a9b   :  { %6330 = vadd.xlane.f32.xlu0 %v6329_v58  ;;  %v6352_v47 = vsel %vm358_vm3, %v6346_v49, 0.0  ;;  %v8340_v58 = vld [vmem:[%s8981_s27 + $0x148] sm:$0xff]  }
0x3a9c   :  { %v8344_v49 = vld [vmem:[%s8981_s27 + $0x168] sm:$0xff]  }
0x3a9e   :  { %6350 = vadd.xlane.f32.xlu1 %v6349_v22  ;;  %v8341_v22 = vld [vmem:[%s8981_s27 + $0x150] sm:$0xff]  }
0x3a9f   :  { %6339 = vadd.xlane.f32.xlu0 %v6338_v45  ;;  %v8343_v45 = vld [vmem:[%s8981_s27 + $0x160] sm:$0xff]  }
0x3aa2   :  { %6356 = vadd.xlane.f32.xlu1 %v6355_v46  ;;  %v8345_v46 = vld [vmem:[%s8981_s27 + $0x170] sm:$0xff]  }
0x3aa3   :  { %6353 = vadd.xlane.f32.xlu0 %v6352_v47  ;;  %v8346_v47 = vld [vmem:[%s8981_s27 + $0x178] sm:$0xff]  }
0x3aa7   :  { %6359 = vadd.xlane.f32.xlu0 %v6358_v35 }
0x3b24   :  { %v6337_v14 = vpop.xlane.xlu0 %6336 }
0x3b25   :  { %v6343_v54 = vmul.f32 0.03125, %v6337_v14 }
0x3b27   :  { %v6334_v5 = vpop.xlane.xlu1 %6333  ;;  %v6367_v57 = vmul.f32 %v6343_v54, %v6343_v54  ;;  %v6375_v26 = vsub.f32 %v10000_v34, %v6343_v54 }
0x3b28   :  { %v6331_v23 = vpop.xlane.xlu0 %6330  ;;  %v6342_v4 = vmul.f32 0.03125, %v6334_v5 }
0x3b29   :  { %v6341_v52 = vmul.f32 0.03125, %v6331_v23 }
0x3b2a   :  { %v6366_v6 = vmul.f32 %v6342_v4, %v6342_v4  ;;  %v6374_v8 = vsub.f32 %v10008_v41, %v6342_v4 }
0x3b2b   :  { %v6365_v3 = vmul.f32 %v6341_v52, %v6341_v52  ;;  %v6351_v10 = vpop.xlane.xlu1 %6350  ;;  %v6373_v19 = vsub.f32 %v10003_v37, %v6341_v52 }
0x3b2c   :  { %v6361_v63 = vmul.f32 0.03125, %v6351_v10  ;;  %v6340_v50 = vpop.xlane.xlu0 %6339 }
0x3b2d   :  { %v6344_v25 = vmul.f32 0.03125, %v6340_v50 }
0x3b2e   :  { %v6369_v59 = vsub.f32 %v6361_v63, %v6365_v3 }
0x3b2f   :  { %v6357_v56 = vpop.xlane.xlu1 %6356  ;;  %v6368_v61 = vmul.f32 %v6344_v25, %v6344_v25  ;;  %v6376_v31 = vsub.f32 %v10015_v43, %v6344_v25  ;;  %v8339_v43 = vld [vmem:[%s8981_s27 + $0x140] sm:$0xff]  }
0x3b30   :  { %v6377_v7 = vadd.f32 1e-05, %v6369_v59  ;;  %v6363_v21 = vmul.f32 0.03125, %v6357_v56  ;;  %v6354_v9 = vpop.xlane.xlu0 %6353  ;;  %8054 = vmatprep.subr.bf16.mxu1 %v8339_v43 }
0x3b31   :  { %v6362_v15 = vmul.f32 0.03125, %v6354_v9  ;;  %8055 = vmatpush3.bf16.msra.mxu1 %v8339_v43 }
0x3b32   :  { %8613 = vrsqrt.f32 %v6377_v7  ;;  %v6371_v18 = vsub.f32 %v6363_v21, %v6367_v57  ;;  %8056 = vmatprep.subr.bf16.mxu1 %v8340_v58 }
0x3b33   :  { %v6370_v0 = vsub.f32 %v6362_v15, %v6366_v6 }
0x3b34   :  { %v6379_v16 = vadd.f32 1e-05, %v6371_v18  ;;  %v6360_v53 = vpop.xlane.xlu0 %6359 }
0x3b35   :  { %v6378_v55 = vadd.f32 1e-05, %v6370_v0  ;;  %v6364_v13 = vmul.f32 0.03125, %v6360_v53  ;;  %8057 = vmatpush3.bf16.msra.mxu1 %v8340_v58 }
0x3b36   :  { %8615 = vrsqrt.f32 %v6379_v16  ;;  %8058 = vmatprep.subr.bf16.mxu1 %v8341_v22 }
0x3b37   :  { %8617 = vrsqrt.f32 %v6378_v55  ;;  %v6372_v60 = vsub.f32 %v6364_v13, %v6368_v61 }
0x3b39   :  { %v6380_v24 = vadd.f32 1e-05, %v6372_v60  ;;  %8059 = vmatpush3.bf16.msra.mxu1 %v8341_v22 }
0x3b3a   :  { %8060 = vmatprep.subr.bf16.mxu1 %v8342_v44 }
0x3b3b   :  { %8619 = vrsqrt.f32 %v6380_v24 }
0x3b3c   :  { %v8614_v11 = vpop.eup %8613 }
0x3b3d   :  { %v6385_v27 = vmul.f32 %v8614_v11, %v6373_v19  ;;  %8061 = vmatpush3.bf16.msra.mxu1 %v8342_v44 }
0x3b3e   :  { %8062 = vmatprep.subr.bf16.mxu1 %v8343_v45 }
0x3b3f   :  { %v6395_v29 = vmul.f32 %v7243_v17, %v6385_v27 }
0x3b40   :  { %v8616_v20 = vpop.eup %8615 }
0x3b41   :  { %v8618_v62 = vpop.eup %8617  ;;  %v6387_v1 = vmul.f32 %v8616_v20, %v6375_v26  ;;  %v10039_v38 = vadd.f32 %v7244_v30, %v6395_v29  ;;  %8063 = vmatpush3.bf16.msra.mxu1 %v8343_v45 }
0x3b42   :  { %v6386_v28 = vmul.f32 %v8618_v62, %v6374_v8  ;;  %8064 = vmatprep.subr.bf16.mxu1 %v8344_v49 }
0x3b43   :  { %v6397_v37 = vmul.f32 %v7243_v17, %v6387_v1 }
0x3b44   :  { %v6396_v32 = vmul.f32 %v7243_v17, %v6386_v28 }
0x3b45   :  { %v8620_v33 = vpop.eup %8619  ;;  %v10045_v41 = vadd.f32 %v7244_v30, %v6397_v37  ;;  %8065 = vmatpush3.bf16.msra.mxu1 %v8344_v49 }
0x3b46   :  { %v6388_v36 = vmul.f32 %v8620_v33, %v6376_v31  ;;  %v10041_v39 = vadd.f32 %v7244_v30, %v6396_v32  ;;  %8066 = vmatprep.subr.bf16.mxu1 %v8345_v46 }
0x3b48   :  { %v6398_v34 = vmul.f32 %v7243_v17, %v6388_v36  ;;  %v6409_v40 = vpack.c.bf16 %v10041_v39, %v10039_v38  ;;  %v7272_v36 = vld [vmem:[%s9000_s8 + $0x5] ss:$0 sm:$0xff] }
0x3b49   :  { %8067 = vmatpush3.bf16.msra.mxu1 %v8345_v46 }
0x3b4a   :  { %v10047_v42 = vadd.f32 %v7244_v30, %v6398_v34  ;;  %8050 = vmatprep.mubr.msk.bf16.mxu0 %vm358_vm3, %v6409_v40  ;;  %8068 = vmatprep.subr.bf16.mxu1 %v8346_v47 }
0x3b4c   :  { %v6410_v2 = vpack.c.bf16 %v10047_v42, %v10045_v41 }
0x3b4d   :  { %8069 = vmatpush3.bf16.msra.mxu1 %v8346_v47 }
0x3b4e   :  { %8051 = vmatmul.mubr.msk.bf16.vlgmr.msra.gmra.mrb[96].mxu0 %vm358_vm3, %v6410_v2 }
0x3c21   :  { %v8052_v35 = vpop.f32.mrb[96].mxu0 }
0x3c22   :  { %v6485_v51 = vadd.f32 %v8052_v35, %v7250_v48  ;;  %v6476_v12 = vpop.f32.mrb[97].mxu0 }
0x3c23   :  { %v6477_v14 = vadd.f32 %v7250_v48, %v6476_v12  ;;  %v8053_v5 = vpop.f32.mrb[98].mxu0 }
0x3c24   :  { %v6497_v23 = vmul.f32 0.044715, %v6485_v51  ;;  %v6488_v52 = vadd.f32 %v8053_v5, %v7250_v48  ;;  %v6479_v3 = vpop.f32.mrb[99].mxu0  ;;  %v6493_v17 = vmul.f32 0.5, %v6485_v51 }
0x3c25   :  { %v6495_v10 = vmul.f32 0.044715, %v6477_v14  ;;  %v6480_v54 = vadd.f32 %v7250_v48, %v6479_v3  ;;  %v6491_v8 = vmul.f32 0.5, %v6477_v14  ;;  %v8347_v3 = vld [vmem:[%s6856_s15] sm:$0xff]  }
0x3c26   :  { %v6501_v63 = vmul.f32 %v6497_v23, %v6485_v51  ;;  %v6498_v50 = vmul.f32 0.044715, %v6488_v52  ;;  %v6494_v20 = vmul.f32 0.5, %v6488_v52  ;;  %8074 = vmatprep.subr.bf16.mxu0 %v8347_v3 }
0x3c27   :  { %v6499_v4 = vmul.f32 %v6495_v10, %v6477_v14  ;;  %v6496_v59 = vmul.f32 0.044715, %v6480_v54  ;;  %v6492_v62 = vmul.f32 0.5, %v6480_v54  ;;  %v8348_v10 = vld [vmem:[%s6856_s15 + $0x8] sm:$0xff]   ;;  %8075 = vmatpush3.bf16.msra.mxu0 %v8347_v3 }
0x3c28   :  { %v6505_v56 = vmul.f32 %v6501_v63, %v6485_v51  ;;  %v6502_v57 = vmul.f32 %v6498_v50, %v6488_v52  ;;  %8076 = vmatprep.subr.bf16.mxu0 %v8348_v10 }
0x3c29   :  { %v6503_v7 = vmul.f32 %v6499_v4, %v6477_v14  ;;  %v6500_v21 = vmul.f32 %v6496_v59, %v6480_v54 }
0x3c2a   :  { %v6509_v9 = vadd.f32 %v6505_v56, %v6485_v51  ;;  %v6506_v6 = vmul.f32 %v6502_v57, %v6488_v52 }
0x3c2b   :  { %v6504_v25 = vmul.f32 %v6500_v21, %v6480_v54  ;;  %v6507_v15 = vadd.f32 %v6503_v7, %v6477_v14  ;;  %8077 = vmatpush3.bf16.msra.mxu0 %v8348_v10 }
0x3c2c   :  { %v6513_v18 = vmul.f32 0.7978846, %v6509_v9  ;;  %v6510_v0 = vadd.f32 %v6506_v6, %v6488_v52 }
0x3c2d   :  { %v6508_v16 = vadd.f32 %v6504_v25, %v6480_v54  ;;  %v6511_v53 = vmul.f32 0.7978846, %v6507_v15 }
0x3c2e   :  { %8621 = vtanh.f32 %v6513_v18  ;;  %v6514_v61 = vmul.f32 0.7978846, %v6510_v0 }
0x3c2f   :  { %v6512_v55 = vmul.f32 0.7978846, %v6508_v16  ;;  %8623 = vtanh.f32 %v6511_v53 }
0x3c30   :  { %8625 = vtanh.f32 %v6514_v61 }
0x3c31   :  { %8627 = vtanh.f32 %v6512_v55 }
0x3c38   :  { %v8622_v13 = vpop.eup %8621 }
0x3c39   :  { %v8624_v60 = vpop.eup %8623  ;;  %v6521_v24 = vadd.f32 1.0, %v8622_v13 }
0x3c3a   :  { %v8626_v11 = vpop.eup %8625  ;;  %v6519_v19 = vadd.f32 1.0, %v8624_v60 }
0x3c3b   :  { %v8628_v27 = vpop.eup %8627  ;;  %v6522_v26 = vadd.f32 1.0, %v8626_v11  ;;  %v6525_v28 = vmul.f32 %v6521_v24, %v6493_v17 }
0x3c3c   :  { %v6520_v1 = vadd.f32 1.0, %v8628_v27  ;;  %v6523_v30 = vmul.f32 %v6519_v19, %v6491_v8 }
0x3c3d   :  { %v6526_v29 = vmul.f32 %v6522_v26, %v6494_v20 }
0x3c3e   :  { %v6524_v31 = vmul.f32 %v6520_v1, %v6492_v62  ;;  %v7283_v1 = vld [vmem:[%s9041_s17 + $0x5] ss:$0 sm:$0xff] }
0x3c3f   :  { %v6528_v32 = vpack.c.bf16 %v6526_v29, %v6525_v28 }
0x3c40   :  { %v6527_v33 = vpack.c.bf16 %v6524_v31, %v6523_v30 }
0x3c42   :  { %8070 = vmatprep.mubr.bf16.mxu1 %v6527_v33 }
0x3c43   :  { %8071 = vmatmul.mubr.bf16.vlgmr.msra.gmra.mrb[56].mxu1 %v6528_v32 }
0x3d16   :  { %v8072_v37 = vpop.f32.mrb[56].mxu1 }
0x3d17   :  { %v6645_v34 = vadd.f32 %v8072_v37, %v7272_v36  ;;  %v6636_v40 = vpop.f32.mrb[57].mxu1  ;;  %v7284_v37 = vld [vmem:[%s9046_s24 + $0x5] ss:$0 sm:$0xff] }
0x3d18   :  { %v6637_v2 = vadd.f32 %v7272_v36, %v6636_v40  ;;  %v8073_v43 = vpop.f32.mrb[58].mxu1 }
0x3d19   :  { %v10064_v58 = vadd.f32 %v6645_v34, %v10045_v41  ;;  %v6648_v22 = vadd.f32 %v8073_v43, %v7272_v36  ;;  %v6639_v44 = vpop.f32.mrb[59].mxu1 }
0x3d1a   :  { %v6640_v45 = vadd.f32 %v7272_v36, %v6639_v44  ;;  %v10067_v49 = vadd.f32 %v6637_v2, %v10039_v38 }
0x3d1b   :  { %v10070_v46 = vadd.f32 %v6648_v22, %v10047_v42  ;;  %v6665_v47 = vsel %vm358_vm3, %v10064_v58, 0.0  ;;  %v6677_v12 = vmul.f32 %v10064_v58, %v10064_v58 }
0x3d1c   :  { %6666 = vadd.xlane.f32.xlu1 %v6665_v47  ;;  %v10075_v48 = vadd.f32 %v6640_v45, %v10041_v39  ;;  %v6659_v35 = vsel %vm358_vm3, %v10067_v49, 0.0  ;;  %v6675_v38 = vmul.f32 %v10067_v49, %v10067_v49 }
0x3d1d   :  { %v6668_v41 = vsel %vm358_vm3, %v10070_v46, 0.0  ;;  %v6678_v5 = vmul.f32 %v10070_v46, %v10070_v46  ;;  %v6685_v23 = vsel %vm358_vm3, %v6677_v12, 0.0 }
0x3d1e   :  { %6669 = vadd.xlane.f32.xlu0 %v6668_v41  ;;  %v6662_v42 = vsel %vm358_vm3, %v10075_v48, 0.0  ;;  %v6676_v51 = vmul.f32 %v10075_v48, %v10075_v48  ;;  %v6679_v39 = vsel %vm358_vm3, %v6675_v38, 0.0 }
0x3d1f   :  { %v6688_v52 = vsel %vm358_vm3, %v6678_v5, 0.0 }
0x3d20   :  { %6660 = vadd.xlane.f32.xlu1 %v6659_v35  ;;  %v6682_v14 = vsel %vm358_vm3, %v6676_v51, 0.0 }
0x3d22   :  { %6663 = vadd.xlane.f32.xlu0 %v6662_v42 }
0x3d24   :  { %6680 = vadd.xlane.f32.xlu1 %v6679_v39 }
0x3d26   :  { %6683 = vadd.xlane.f32.xlu0 %v6682_v14 }
0x3d28   :  { %6686 = vadd.xlane.f32.xlu1 %v6685_v23 }
0x3d2a   :  { %6689 = vadd.xlane.f32.xlu0 %v6688_v52 }
0x3da9   :  { %v6667_v54 = vpop.xlane.xlu1 %6666 }
0x3daa   :  { %v6673_v7 = vmul.f32 0.03125, %v6667_v54 }
0x3dab   :  { %v6670_v63 = vpop.xlane.xlu0 %6669 }
0x3dac   :  { %v6674_v6 = vmul.f32 0.03125, %v6670_v63  ;;  %v6697_v53 = vmul.f32 %v6673_v7, %v6673_v7  ;;  %v6705_v31 = vsub.f32 %v10064_v58, %v6673_v7 }
0x3dad   :  { %v6661_v50 = vpop.xlane.xlu1 %6660 }
0x3dae   :  { %v6671_v4 = vmul.f32 0.03125, %v6661_v50  ;;  %v6698_v60 = vmul.f32 %v6674_v6, %v6674_v6  ;;  %v6706_v34 = vsub.f32 %v10070_v46, %v6674_v6  ;;  %v7285_v46 = vld [vmem:[%s6857_s4] ss:$0 sm:$0xff] }
0x3daf   :  { %v6664_v59 = vpop.xlane.xlu0 %6663 }
0x3db0   :  { %v6672_v56 = vmul.f32 0.03125, %v6664_v59  ;;  %v6695_v21 = vmul.f32 %v6671_v4, %v6671_v4  ;;  %v6703_v8 = vsub.f32 %v10067_v49, %v6671_v4 }
0x3db1   :  { %v6681_v57 = vpop.xlane.xlu1 %6680 }
0x3db2   :  { %v6691_v9 = vmul.f32 0.03125, %v6681_v57  ;;  %v6696_v15 = vmul.f32 %v6672_v56, %v6672_v56  ;;  %v6704_v28 = vsub.f32 %v10075_v48, %v6672_v56 }
0x3db3   :  { %v6684_v25 = vpop.xlane.xlu0 %6683 }
0x3db4   :  { %v6699_v18 = vsub.f32 %v6691_v9, %v6695_v21  ;;  %v6692_v0 = vmul.f32 0.03125, %v6684_v25 }
0x3db5   :  { %v6687_v16 = vpop.xlane.xlu1 %6686 }
0x3db6   :  { %v6707_v61 = vadd.f32 1e-05, %v6699_v18  ;;  %v6700_v55 = vsub.f32 %v6692_v0, %v6696_v15  ;;  %v6693_v13 = vmul.f32 0.03125, %v6687_v16 }
0x3db7   :  { %v6690_v24 = vpop.xlane.xlu0 %6689 }
0x3db8   :  { %8629 = vrsqrt.f32 %v6707_v61  ;;  %v6708_v11 = vadd.f32 1e-05, %v6700_v55  ;;  %v6701_v19 = vsub.f32 %v6693_v13, %v6697_v53  ;;  %v6694_v27 = vmul.f32 0.03125, %v6690_v24 }
0x3dba   :  { %8631 = vrsqrt.f32 %v6708_v11  ;;  %v6709_v17 = vadd.f32 1e-05, %v6701_v19  ;;  %v6702_v20 = vsub.f32 %v6694_v27, %v6698_v60 }
0x3dbc   :  { %8633 = vrsqrt.f32 %v6709_v17  ;;  %v6710_v26 = vadd.f32 1e-05, %v6702_v20 }
0x3dbe   :  { %8635 = vrsqrt.f32 %v6710_v26 }
0x3dc2   :  { %v8630_v62 = vpop.eup %8629 }
0x3dc3   :  { %v6715_v29 = vmul.f32 %v8630_v62, %v6703_v8 }
0x3dc4   :  { %v8632_v30 = vpop.eup %8631 }
0x3dc5   :  { %v6716_v32 = vmul.f32 %v8632_v30, %v6704_v28  ;;  %v6725_v33 = vmul.f32 %v7283_v1, %v6715_v29 }
0x3dc6   :  { %v8634_v36 = vpop.eup %8633 }
0x3dc7   :  { %v6717_v40 = vmul.f32 %v8634_v36, %v6705_v31  ;;  %v6726_v2 = vmul.f32 %v7283_v1, %v6716_v32  ;;  %v6735_v44 = vadd.f32 %v7284_v37, %v6725_v33 }
0x3dc8   :  { %v8636_v43 = vpop.eup %8635 }
0x3dc9   :  { %v6718_v22 = vmul.f32 %v8636_v43, %v6706_v34  ;;  %v6736_v45 = vadd.f32 %v7284_v37, %v6726_v2  ;;  %v6727_v49 = vmul.f32 %v7283_v1, %v6717_v40 }
0x3dcb   :  { %v6739_v47 = vpack.c.bf16 %v6736_v45, %v6735_v44  ;;  %v6728_v41 = vmul.f32 %v7283_v1, %v6718_v22  ;;  %v6737_v48 = vadd.f32 %v7284_v37, %v6727_v49 }
0x3dcd   :  { %8078 = vmatprep.mubr.msk.bf16.mxu0 %vm358_vm3, %v6739_v47  ;;  %v6738_v35 = vadd.f32 %v7284_v37, %v6728_v41 }
0x3dcf   :  { %v6740_v58 = vpack.c.bf16 %v6738_v35, %v6737_v48 }
0x3dd1   :  { %8079 = vmatmul.mubr.msk.bf16.vlgmr.msra.gmra.mrb[100].mxu0 %vm358_vm3, %v6740_v58 }
0x3ea4   :  { %v8080_v38 = vpop.f32.mrb[100].mxu0 }
0x3ea5   :  { %v6813_v42 = vadd.f32 %v8080_v38, %v7285_v46  ;;  %v6804_v51 = vpop.f32.mrb[101].mxu0 }
0x3ea6   :  { %v6805_v39 = vadd.f32 %v7285_v46, %v6804_v51  ;;  %v8081_v12 = vpop.f32.mrb[102].mxu0 }
0x3ea7   :  { %6821 = vst.msk [vmem:[%s6858_s22 + $0x10] sm:$0xff] %vm229_vm2, %v6813_v42  ;;  %v6816_v14 = vadd.f32 %v8081_v12, %v7285_v46  ;;  %v6807_v5 = vpop.f32.mrb[103].mxu0 }
0x3ea8   :  { %6819 = vst.msk [vmem:[%s6858_s22] sm:$0xff] %vm229_vm2, %v6805_v39  ;;  %v6808_v23 = vadd.f32 %v7285_v46, %v6807_v5 }
0x3ea9   :  { %6822 = vst.msk [vmem:[%s6858_s22 + $0x18] sm:$0xff] %vm229_vm2, %v6816_v14 }
0x3eaa   :  { %6820 = vst.msk [vmem:[%s6858_s22 + $0x8] sm:$0xff] %vm229_vm2, %v6808_v23 }

</bundles_post_ra>
